<compile_context>
chip_gen: v7x
topology: tpu7x:2x2x1
jax: 0.10.0
libtpu: 0.0.40
codegen_flags: <defaults>
</compile_context>

<pallas_src>
import functools

import jax
import jax.numpy as jnp
import numpy as np
from jax.experimental import pallas as pl
from jax.experimental.pallas import tpu as pltpu

IMG_CHANNELS = 3
LATENT = 32


def _round_up(x, m):
    return ((x + m - 1) // m) * m


def _pick_tm(M):
    """Rows-per-tile: whole (padded) M if small, else 2 tiles for megacore."""
    Mp = _round_up(M, 8)
    if Mp <= 256:
        return Mp
    return _round_up(-(-M // 2), 8)


# ----------------------------- Pallas kernel ------------------------------ #
def _matmul_kernel(*refs, activation, has_bias):
    if has_bias:
        a_ref, b_ref, bias_ref, o_ref = refs
    else:
        a_ref, b_ref, o_ref = refs
    y = jnp.dot(a_ref[...], b_ref[...], preferred_element_type=jnp.float32)
    if has_bias:
        y = y + bias_ref[...]              # (1, tn) broadcasts over rows
    if activation == "relu":
        y = jnp.maximum(y, 0.0)
    elif activation == "sigmoid":
        y = jax.nn.sigmoid(y)
    o_ref[...] = y.astype(o_ref.dtype)


def matmul_bias_act(a, b, bias=None, activation="none", *, tm, tn):
    """Fused (a @ b [+ bias]) with activation.

    Whole-K tiles (no reduction grid axis, no accumulator scratch).
    `a` rows are zero-padded to a multiple of tm; result is sliced back to M.
    """
    M, K = a.shape
    K2, N = b.shape
    assert K == K2
    assert tm % 8 == 0
    assert N % tn == 0 and (tn == N or tn % 128 == 0)

    Mp = _round_up(M, tm)
    if Mp != M:
        a = jnp.pad(a, ((0, Mp - M), (0, 0)))

    grid = (Mp // tm, N // tn)
    in_specs = [
        pl.BlockSpec((tm, K), lambda i, j: (i, 0)),   # LHS: whole K resident
        pl.BlockSpec((K, tn), lambda i, j: (0, j)),   # RHS: whole K resident
    ]
    args = [a, b]
    has_bias = bias is not None
    if has_bias:
        in_specs.append(pl.BlockSpec((1, tn), lambda i, j: (0, j)))
        args.append(bias.reshape(1, N))

    out = pl.pallas_call(
        functools.partial(_matmul_kernel, activation=activation,
                          has_bias=has_bias),
        out_shape=jax.ShapeDtypeStruct((Mp, N), jnp.float32),
        grid_spec=pltpu.PrefetchScalarGridSpec(
            num_scalar_prefetch=0,
            grid=grid,
            in_specs=in_specs,
            out_specs=pl.BlockSpec((tm, tn), lambda i, j: (i, j)),
        ),
        compiler_params=pltpu.CompilerParams(
            dimension_semantics=("parallel", "parallel"),
            vmem_limit_bytes=32 * 1024 * 1024,
        ),
    )(*args)
    return out[:M] if Mp != M else out


# ------------------------- transposed conv layer --------------------------- #
def deconv_layer(x_nhwc, w_mat, bias, *, K, Co, stride, activation, tn):
    """ConvTranspose2d (no padding), NHWC.

    Pallas matmul over channels produces per-tap contributions
    (B*H*W, K*K*Co); the strided col2im scatter-add + bias + activation is
    tiny element-wise work done in plain JAX (matches PyTorch semantics).
    """
    B, H, W, Ci = x_nhwc.shape
    s = stride
    OH, OW = (H - 1) * s + K, (W - 1) * s + K
    M = B * H * W

    contrib = matmul_bias_act(x_nhwc.reshape(M, Ci), w_mat, None, "none",
                              tm=_pick_tm(M), tn=tn)
    contrib = contrib[:, :K * K * Co].reshape(B, H, W, K, K, Co)

    Hd, Wd = (H - 1) * s + 1, (W - 1) * s + 1
    y = jnp.zeros((B, OH, OW, Co), jnp.float32)
    for kh in range(K):
        for kw in range(K):
            y = y.at[:, kh:kh + Hd:s, kw:kw + Wd:s, :].add(
                contrib[:, :, :, kh, kw, :])
    y = y + bias[None, None, None, :]
    if activation == "relu":
        y = jnp.maximum(y, 0.0)
    elif activation == "sigmoid":
        y = jax.nn.sigmoid(y)
    return y


# --------------------------- weight preparation ----------------------------- #
def prepare_params(params):
    """One-time reformat: PyTorch layouts -> (pre-padded) matmul matrices."""
    def convt_mat(w, pad_n_to=None):
        ci, co, k, _ = w.shape
        m = w.transpose(0, 2, 3, 1).reshape(ci, k * k * co)   # cols: (kh,kw,co)
        if pad_n_to is not None and pad_n_to != m.shape[1]:
            m = jnp.pad(m, ((0, 0), (0, pad_n_to - m.shape[1])))
        return m

    return {
        "fc1_w": params["fc1_w"].T,                              # (latent, 1024)
        "fc1_b": params["fc1_b"],
        "dc1_w": convt_mat(params["dc1_w"]),                     # (1024, 3200)
        "dc1_b": jnp.tile(params["dc1_b"], 5 * 5),               # (3200,)
        "dc2_w": convt_mat(params["dc2_w"],
                           _round_up(5 * 5 * 64, 128)),          # (128, 1664)
        "dc2_b": params["dc2_b"],
        "dc3_w": convt_mat(params["dc3_w"]),                     # (64, 1152)
        "dc3_b": params["dc3_b"],
        "dc4_w": convt_mat(params["dc4_w"],
                           _round_up(6 * 6 * IMG_CHANNELS, 128)),  # (32, 128)
        "dc4_b": params["dc4_b"],
    }


# ------------------------------ decoder fwd -------------------------------- #
def decoder_forward(prep, z):
    B = z.shape[0]
    # fc1 + relu  (PyTorch Linear: x @ W.T + b; W.T pre-computed)
    h = matmul_bias_act(z, prep["fc1_w"], prep["fc1_b"], "relu",
                        tm=_pick_tm(B), tn=512)                  # (B, 1024)

    # deconv1: 1x1 spatial input -> pure matmul, bias+relu fused, NHWC output
    x = matmul_bias_act(h, prep["dc1_w"], prep["dc1_b"], "relu",
                        tm=_pick_tm(B), tn=640)                  # (B, 3200)
    x = x.reshape(B, 5, 5, 128)                                  # NHWC

    x = deconv_layer(x, prep["dc2_w"], prep["dc2_b"], K=5, Co=64,
                     stride=2, activation="relu", tn=1664)       # (B,13,13,64)
    x = deconv_layer(x, prep["dc3_w"], prep["dc3_b"], K=6, Co=32,
                     stride=2, activation="relu", tn=1152)       # (B,30,30,32)
    x = deconv_layer(x, prep["dc4_w"], prep["dc4_b"], K=6, Co=IMG_CHANNELS,
                     stride=2, activation="sigmoid", tn=128)     # (B,64,64,3)
    return x.transpose(0, 3, 1, 2)    # single NHWC -> NCHW at the very end


# --------------------------- pure-JAX reference ---------------------------- #
def _ref_deconv(x, w, b, s):
    B, Ci, H, W = x.shape
    _, Co, K, _ = w.shape
    OH, OW = (H - 1) * s + K, (W - 1) * s + K
    contrib = jnp.einsum("bchw,cokl->bohwkl", x, w)
    y = jnp.zeros((B, Co, OH, OW), x.dtype)
    for kh in range(K):
        for kw in range(K):
            y = y.at[:, :, kh:kh + (H - 1) * s + 1:s,
                     kw:kw + (W - 1) * s + 1:s].add(contrib[..., kh, kw])
    return y + b[None, :, None, None]


def ref_forward(params, z):
    h = jnp.maximum(z @ params["fc1_w"].T + params["fc1_b"], 0.0)
    x = h[:, :, None, None]
    x = jnp.maximum(_ref_deconv(x, params["dc1_w"], params["dc1_b"], 2), 0.0)
    x = jnp.maximum(_ref_deconv(x, params["dc2_w"], params["dc2_b"], 2), 0.0)
    x = jnp.maximum(_ref_deconv(x, params["dc3_w"], params["dc3_b"], 2), 0.0)
    x = jax.nn.sigmoid(_ref_deconv(x, params["dc4_w"], params["dc4_b"], 2))
    return x


# ----------------------------------- main ---------------------------------- #
if __name__ == "__main__":
    batch = 2

    key = jax.random.PRNGKey(0)
    keys = jax.random.split(key, 11)

    def init(k, shape, scale=0.05):
        return scale * jax.random.normal(k, shape, jnp.float32)

    params = {
        "fc1_w": init(keys[0], (1024, LATENT)),                 # Linear(out,in)
        "fc1_b": init(keys[1], (1024,)),
        "dc1_w": init(keys[2], (1024, 128, 5, 5)),              # ConvT(in,out,K,K)
        "dc1_b": init(keys[3], (128,)),
        "dc2_w": init(keys[4], (128, 64, 5, 5)),
        "dc2_b": init(keys[5], (64,)),
        "dc3_w": init(keys[6], (64, 32, 6, 6)),
        "dc3_b": init(keys[7], (32,)),
        "dc4_w": init(keys[8], (32, IMG_CHANNELS, 6, 6)),
        "dc4_b": init(keys[9], (IMG_CHANNELS,)),
    }
    z = jax.random.normal(keys[10], (batch, LATENT), jnp.float32)

    # One-time weight reformat (outside the jitted forward).
    prep = jax.tree_util.tree_map(jax.block_until_ready, prepare_params(params))

    out = jax.jit(decoder_forward)(prep, z)
    out = jax.block_until_ready(out)
    assert out.shape == (batch, IMG_CHANNELS, 64, 64), out.shape

    ref = jax.block_until_ready(ref_forward(params, z))
    np.testing.assert_allclose(np.asarray(out), np.asarray(ref),
                               rtol=1e-3, atol=5e-3)

    print("KERNEL_OK")
</pallas_src>

<mosaic_0001>
module attributes {stable_mosaic.version = 11 : i64} {
  func.func @_matmul_kernel(%arg0: i32, %arg1: i32, %arg2: memref<8x32xf32, #tpu.memory_space<vmem>>, %arg3: memref<32x512xf32, #tpu.memory_space<vmem>>, %arg4: memref<1x512xf32, #tpu.memory_space<vmem>>, %arg5: memref<8x512xf32, #tpu.memory_space<vmem>>) attributes {dimension_semantics = [#tpu.dimension_semantics<parallel>, #tpu.dimension_semantics<parallel>], iteration_bounds = array<i64: 1, 2>, scalar_prefetch = 0 : i64, scratch_operands = 0 : i64, tpu.core_type = #tpu.core_type<tc>, window_params = [{transform_indices = @transform_0, window_bounds = array<i64: 8, 32>}, {transform_indices = @transform_1, window_bounds = array<i64: 32, 512>}, {transform_indices = @transform_2, window_bounds = array<i64: 1, 512>}, {transform_indices = @transform_3, window_bounds = array<i64: 8, 512>}]} {
    %c0 = arith.constant 0 : index
    %c0_0 = arith.constant 0 : index
    %0 = vector.load %arg2[%c0, %c0_0] : memref<8x32xf32, #tpu.memory_space<vmem>>, vector<8x32xf32>
    %c0_1 = arith.constant 0 : index
    %c0_2 = arith.constant 0 : index
    %1 = vector.load %arg3[%c0_1, %c0_2] : memref<32x512xf32, #tpu.memory_space<vmem>>, vector<32x512xf32>
    %cst = arith.constant dense<0.000000e+00> : vector<8x512xf32>
    %2 = tpu.matmul %0, %1, %cst {dimension_numbers = #tpu.dot_dimension_numbers<[1], [0], [0], [1], [0, 0, 1, 1], [], []>} : vector<8x32xf32>, vector<32x512xf32>, vector<8x512xf32> -> vector<8x512xf32>
    %c0_3 = arith.constant 0 : index
    %c0_4 = arith.constant 0 : index
    %3 = vector.load %arg4[%c0_3, %c0_4] : memref<1x512xf32, #tpu.memory_space<vmem>>, vector<1x512xf32>
    %4 = vector.broadcast %3 : vector<1x512xf32> to vector<8x512xf32>
    %5 = arith.addf %2, %4 : vector<8x512xf32>
    %cst_5 = arith.constant 0.000000e+00 : f32
    %6 = vector.broadcast %cst_5 : f32 to vector<8x512xf32>
    %7 = arith.maximumf %5, %6 : vector<8x512xf32>
    %c0_6 = arith.constant 0 : index
    %c0_7 = arith.constant 0 : index
    %8 = vector.load %arg5[%c0_6, %c0_7] : memref<8x512xf32, #tpu.memory_space<vmem>>, vector<8x512xf32>
    tpu.vector_store %arg5[%c0_6, %c0_7], %7 {strides = array<i32>} : memref<8x512xf32, #tpu.memory_space<vmem>>, vector<8x512xf32>,
    return
  }
  func.func @transform_0(%arg0: i32, %arg1: i32) -> (i32, i32) {
    %c0_i32 = arith.constant 0 : i32
    %c0_i32_0 = arith.constant 0 : i32
    return %arg0, %c0_i32 : i32, i32
  }
  func.func @transform_1(%arg0: i32, %arg1: i32) -> (i32, i32) {
    %c0_i32 = arith.constant 0 : i32
    %c0_i32_0 = arith.constant 0 : i32
    return %c0_i32, %arg1 : i32, i32
  }
  func.func @transform_2(%arg0: i32, %arg1: i32) -> (i32, i32) {
    %c0_i32 = arith.constant 0 : i32
    %c0_i32_0 = arith.constant 0 : i32
    return %c0_i32, %arg1 : i32, i32
  }
  func.func @transform_3(%arg0: i32, %arg1: i32) -> (i32, i32) {
    %c0_i32 = arith.constant 0 : i32
    return %arg0, %arg1 : i32, i32
  }
}

module attributes {stable_mosaic.version = 11 : i64} {
  func.func @_matmul_kernel(%arg0: i32, %arg1: i32, %arg2: memref<8x1024xf32, #tpu.memory_space<vmem>>, %arg3: memref<1024x640xf32, #tpu.memory_space<vmem>>, %arg4: memref<1x640xf32, #tpu.memory_space<vmem>>, %arg5: memref<8x640xf32, #tpu.memory_space<vmem>>) attributes {dimension_semantics = [#tpu.dimension_semantics<parallel>, #tpu.dimension_semantics<parallel>], iteration_bounds = array<i64: 1, 5>, scalar_prefetch = 0 : i64, scratch_operands = 0 : i64, tpu.core_type = #tpu.core_type<tc>, window_params = [{transform_indices = @transform_0, window_bounds = array<i64: 8, 1024>}, {transform_indices = @transform_1, window_bounds = array<i64: 1024, 640>}, {transform_indices = @transform_2, window_bounds = array<i64: 1, 640>}, {transform_indices = @transform_3, window_bounds = array<i64: 8, 640>}]} {
    %c0 = arith.constant 0 : index
    %c0_0 = arith.constant 0 : index
    %0 = vector.load %arg2[%c0, %c0_0] : memref<8x1024xf32, #tpu.memory_space<vmem>>, vector<8x1024xf32>
    %c0_1 = arith.constant 0 : index
    %c0_2 = arith.constant 0 : index
    %1 = vector.load %arg3[%c0_1, %c0_2] : memref<1024x640xf32, #tpu.memory_space<vmem>>, vector<1024x640xf32>
    %cst = arith.constant dense<0.000000e+00> : vector<8x640xf32>
    %2 = tpu.matmul %0, %1, %cst {dimension_numbers = #tpu.dot_dimension_numbers<[1], [0], [0], [1], [0, 0, 1, 1], [], []>} : vector<8x1024xf32>, vector<1024x640xf32>, vector<8x640xf32> -> vector<8x640xf32>
    %c0_3 = arith.constant 0 : index
    %c0_4 = arith.constant 0 : index
    %3 = vector.load %arg4[%c0_3, %c0_4] : memref<1x640xf32, #tpu.memory_space<vmem>>, vector<1x640xf32>
    %4 = vector.broadcast %3 : vector<1x640xf32> to vector<8x640xf32>
    %5 = arith.addf %2, %4 : vector<8x640xf32>
    %cst_5 = arith.constant 0.000000e+00 : f32
    %6 = vector.broadcast %cst_5 : f32 to vector<8x640xf32>
    %7 = arith.maximumf %5, %6 : vector<8x640xf32>
    %c0_6 = arith.constant 0 : index
    %c0_7 = arith.constant 0 : index
    %8 = vector.load %arg5[%c0_6, %c0_7] : memref<8x640xf32, #tpu.memory_space<vmem>>, vector<8x640xf32>
    tpu.vector_store %arg5[%c0_6, %c0_7], %7 {strides = array<i32>} : memref<8x640xf32, #tpu.memory_space<vmem>>, vector<8x640xf32>,
    return
  }
  func.func @transform_0(%arg0: i32, %arg1: i32) -> (i32, i32) {
    %c0_i32 = arith.constant 0 : i32
    %c0_i32_0 = arith.constant 0 : i32
    return %arg0, %c0_i32 : i32, i32
  }
  func.func @transform_1(%arg0: i32, %arg1: i32) -> (i32, i32) {
    %c0_i32 = arith.constant 0 : i32
    %c0_i32_0 = arith.constant 0 : i32
    return %c0_i32, %arg1 : i32, i32
  }
  func.func @transform_2(%arg0: i32, %arg1: i32) -> (i32, i32) {
    %c0_i32 = arith.constant 0 : i32
    %c0_i32_0 = arith.constant 0 : i32
    return %c0_i32, %arg1 : i32, i32
  }
  func.func @transform_3(%arg0: i32, %arg1: i32) -> (i32, i32) {
    %c0_i32 = arith.constant 0 : i32
    return %arg0, %arg1 : i32, i32
  }
}

module attributes {stable_mosaic.version = 11 : i64} {
  func.func @_matmul_kernel(%arg0: i32, %arg1: i32, %arg2: memref<56x128xf32, #tpu.memory_space<vmem>>, %arg3: memref<128x1664xf32, #tpu.memory_space<vmem>>, %arg4: memref<56x1664xf32, #tpu.memory_space<vmem>>) attributes {dimension_semantics = [#tpu.dimension_semantics<parallel>, #tpu.dimension_semantics<parallel>], iteration_bounds = array<i64: 1, 1>, scalar_prefetch = 0 : i64, scratch_operands = 0 : i64, tpu.core_type = #tpu.core_type<tc>, window_params = [{transform_indices = @transform_0, window_bounds = array<i64: 56, 128>}, {transform_indices = @transform_1, window_bounds = array<i64: 128, 1664>}, {transform_indices = @transform_2, window_bounds = array<i64: 56, 1664>}]} {
    %c0 = arith.constant 0 : index
    %c0_0 = arith.constant 0 : index
    %0 = vector.load %arg2[%c0, %c0_0] : memref<56x128xf32, #tpu.memory_space<vmem>>, vector<56x128xf32>
    %c0_1 = arith.constant 0 : index
    %c0_2 = arith.constant 0 : index
    %1 = vector.load %arg3[%c0_1, %c0_2] : memref<128x1664xf32, #tpu.memory_space<vmem>>, vector<128x1664xf32>
    %cst = arith.constant dense<0.000000e+00> : vector<56x1664xf32>
    %2 = tpu.matmul %0, %1, %cst {dimension_numbers = #tpu.dot_dimension_numbers<[1], [0], [0], [1], [0, 0, 1, 1], [], []>} : vector<56x128xf32>, vector<128x1664xf32>, vector<56x1664xf32> -> vector<56x1664xf32>
    %c0_3 = arith.constant 0 : index
    %c0_4 = arith.constant 0 : index
    %3 = vector.load %arg4[%c0_3, %c0_4] : memref<56x1664xf32, #tpu.memory_space<vmem>>, vector<56x1664xf32>
    tpu.vector_store %arg4[%c0_3, %c0_4], %2 {strides = array<i32>} : memref<56x1664xf32, #tpu.memory_space<vmem>>, vector<56x1664xf32>,
    return
  }
  func.func @transform_0(%arg0: i32, %arg1: i32) -> (i32, i32) {
    %c0_i32 = arith.constant 0 : i32
    %c0_i32_0 = arith.constant 0 : i32
    return %arg0, %c0_i32 : i32, i32
  }
  func.func @transform_1(%arg0: i32, %arg1: i32) -> (i32, i32) {
    %c0_i32 = arith.constant 0 : i32
    %c0_i32_0 = arith.constant 0 : i32
    return %c0_i32, %arg1 : i32, i32
  }
  func.func @transform_2(%arg0: i32, %arg1: i32) -> (i32, i32) {
    %c0_i32 = arith.constant 0 : i32
    return %arg0, %arg1 : i32, i32
  }
}

module attributes {stable_mosaic.version = 11 : i64} {
  func.func @_matmul_kernel(%arg0: i32, %arg1: i32, %arg2: memref<176x64xf32, #tpu.memory_space<vmem>>, %arg3: memref<64x1152xf32, #tpu.memory_space<vmem>>, %arg4: memref<176x1152xf32, #tpu.memory_space<vmem>>) attributes {dimension_semantics = [#tpu.dimension_semantics<parallel>, #tpu.dimension_semantics<parallel>], iteration_bounds = array<i64: 2, 1>, scalar_prefetch = 0 : i64, scratch_operands = 0 : i64, tpu.core_type = #tpu.core_type<tc>, window_params = [{transform_indices = @transform_0, window_bounds = array<i64: 176, 64>}, {transform_indices = @transform_1, window_bounds = array<i64: 64, 1152>}, {transform_indices = @transform_2, window_bounds = array<i64: 176, 1152>}]} {
    %c0 = arith.constant 0 : index
    %c0_0 = arith.constant 0 : index
    %0 = vector.load %arg2[%c0, %c0_0] : memref<176x64xf32, #tpu.memory_space<vmem>>, vector<176x64xf32>
    %c0_1 = arith.constant 0 : index
    %c0_2 = arith.constant 0 : index
    %1 = vector.load %arg3[%c0_1, %c0_2] : memref<64x1152xf32, #tpu.memory_space<vmem>>, vector<64x1152xf32>
    %cst = arith.constant dense<0.000000e+00> : vector<176x1152xf32>
    %2 = tpu.matmul %0, %1, %cst {dimension_numbers = #tpu.dot_dimension_numbers<[1], [0], [0], [1], [0, 0, 1, 1], [], []>} : vector<176x64xf32>, vector<64x1152xf32>, vector<176x1152xf32> -> vector<176x1152xf32>
    %c0_3 = arith.constant 0 : index
    %c0_4 = arith.constant 0 : index
    %3 = vector.load %arg4[%c0_3, %c0_4] : memref<176x1152xf32, #tpu.memory_space<vmem>>, vector<176x1152xf32>
    tpu.vector_store %arg4[%c0_3, %c0_4], %2 {strides = array<i32>} : memref<176x1152xf32, #tpu.memory_space<vmem>>, vector<176x1152xf32>,
    return
  }
  func.func @transform_0(%arg0: i32, %arg1: i32) -> (i32, i32) {
    %c0_i32 = arith.constant 0 : i32
    %c0_i32_0 = arith.constant 0 : i32
    return %arg0, %c0_i32 : i32, i32
  }
  func.func @transform_1(%arg0: i32, %arg1: i32) -> (i32, i32) {
    %c0_i32 = arith.constant 0 : i32
    %c0_i32_0 = arith.constant 0 : i32
    return %c0_i32, %arg1 : i32, i32
  }
  func.func @transform_2(%arg0: i32, %arg1: i32) -> (i32, i32) {
    %c0_i32 = arith.constant 0 : i32
    return %arg0, %arg1 : i32, i32
  }
}

module attributes {stable_mosaic.version = 11 : i64} {
  func.func @_matmul_kernel(%arg0: i32, %arg1: i32, %arg2: memref<904x32xf32, #tpu.memory_space<vmem>>, %arg3: memref<32x128xf32, #tpu.memory_space<vmem>>, %arg4: memref<904x128xf32, #tpu.memory_space<vmem>>) attributes {dimension_semantics = [#tpu.dimension_semantics<parallel>, #tpu.dimension_semantics<parallel>], iteration_bounds = array<i64: 2, 1>, scalar_prefetch = 0 : i64, scratch_operands = 0 : i64, tpu.core_type = #tpu.core_type<tc>, window_params = [{transform_indices = @transform_0, window_bounds = array<i64: 904, 32>}, {transform_indices = @transform_1, window_bounds = array<i64: 32, 128>}, {transform_indices = @transform_2, window_bounds = array<i64: 904, 128>}]} {
    %c0 = arith.constant 0 : index
    %c0_0 = arith.constant 0 : index
    %0 = vector.load %arg2[%c0, %c0_0] : memref<904x32xf32, #tpu.memory_space<vmem>>, vector<904x32xf32>
    %c0_1 = arith.constant 0 : index
    %c0_2 = arith.constant 0 : index
    %1 = vector.load %arg3[%c0_1, %c0_2] : memref<32x128xf32, #tpu.memory_space<vmem>>, vector<32x128xf32>
    %cst = arith.constant dense<0.000000e+00> : vector<904x128xf32>
    %2 = tpu.matmul %0, %1, %cst {dimension_numbers = #tpu.dot_dimension_numbers<[1], [0], [0], [1], [0, 0, 1, 1], [], []>} : vector<904x32xf32>, vector<32x128xf32>, vector<904x128xf32> -> vector<904x128xf32>
    %c0_3 = arith.constant 0 : index
    %c0_4 = arith.constant 0 : index
    %3 = vector.load %arg4[%c0_3, %c0_4] : memref<904x128xf32, #tpu.memory_space<vmem>>, vector<904x128xf32>
    tpu.vector_store %arg4[%c0_3, %c0_4], %2 {strides = array<i32>} : memref<904x128xf32, #tpu.memory_space<vmem>>, vector<904x128xf32>,
    return
  }
  func.func @transform_0(%arg0: i32, %arg1: i32) -> (i32, i32) {
    %c0_i32 = arith.constant 0 : i32
    %c0_i32_0 = arith.constant 0 : i32
    return %arg0, %c0_i32 : i32, i32
  }
  func.func @transform_1(%arg0: i32, %arg1: i32) -> (i32, i32) {
    %c0_i32 = arith.constant 0 : i32
    %c0_i32_0 = arith.constant 0 : i32
    return %c0_i32, %arg1 : i32, i32
  }
  func.func @transform_2(%arg0: i32, %arg1: i32) -> (i32, i32) {
    %c0_i32 = arith.constant 0 : i32
    return %arg0, %arg1 : i32, i32
  }
}

</mosaic_0001>

<bundles_post_ra>
// kernel: decoder_forward.5
= control target key start
LH: loop header
LB: loop body
LE: loop exit
PB: predicated region body
PF: predicated region fallthrough
CT: control target
= control target key end

     0   :  { %8 = vsyncpa [#allocation3], 0  ;;  %s1027_s0 = inlined_call_operand.vmem [shape: f32[8,32], index: 0, kind: input, shape index: {}]   ;;  %s1028_s1 = inlined_call_operand.hbm [shape: f32[32,1024], index: 1, kind: input, shape index: {}]   ;;  %s1029_s2 = inlined_call_operand.hbm [shape: f32[1,1024], index: 2, kind: input, shape index: {}]   ;;  %s1030_s3 = inlined_call_operand.vmem [shape: f32[8,1024], index: 3, kind: output, shape index: {}]  }
   0x1   :  { %10 = vsyncpa [#allocation3 + $0x1], 0 }
   0x2   :  { %11 = vsyncpa [#allocation5], 0 }
   0x3   :  { %13 = vsyncpa [#allocation5 + $0x1], 0  ;;  %s838_s12 = smov 0   ;;  %s840_s13 = smov 0  }
   0x4   :  { %s842_s14 = smov 0   ;;  %s844_s15 = smov 0  }
   0x5   :  { %s846_s16 = smov 0   ;;  %s848_s17 = smov 0  }
   0x6 LB: > { %s594_s18 = sadd.s32 4294967295, %s810_s17   ;;  %s28_s19 = sadd.s32 1, %s806_s16  ;;  %s810_s17 = sphi %s848_s17, %s19_s17   ;;  %s806_s16 = sphi %s846_s16, %s1043_s16   ;;  %s802_s15 = sphi %s844_s15, %s1042_s15   ;;  %s798_s14 = sphi %s842_s14, %s1041_s14   ;;  %s794_s13 = sphi %s840_s13, %s1040_s13   ;;  %s790_s12 = sphi %s838_s12, %s1039_s12  }
   0x7   : > { %p29_p0 = scmp.ge.s32.totalorder %s28_s19, 2  ;;  %s64_s20 = sadd.s32 1, %s798_s14 }
   0x8   : > { %p71_p1 = scmp.ne.s32.totalorder %s798_s14, %s794_s13  ;;  %p72_p2 = scmp.eq.s32.totalorder %s810_s17, 0 }
   0x9   : > { %s1045_s19 = smov (%p29_p0, %s28_s19), 0  ;;  %p77_p4 = scmp.ne.s32.totalorder %s794_s13, %s790_s12 }
   0xa   : > { %p874_p3 = por %p72_p2, %p71_p1  ;;  %s61_s22 = ssub.s32 %s806_s16, %s1045_s19 }
   0xb   : > { %p78_p5 = scmp.eq.s32.totalorder %s594_s18, 0  ;;  %p62_p6 = scmp.eq.s32.totalorder %s61_s22, 0 }
   0xc   : > { %p643_p8 = scmp.lt.s32.totalorder %s810_s17, 2  ;;  %s890_s25 = sand.u32 1, %s798_s14  }
   0xd   : > { %p881_p7 = por %p78_p5, %p77_p4  ;;  %s614_s26 = sshll.u32 %s806_s16, 9 }
   0xe   : > { %s887_s24 = scalar_select %p62_p6, %s798_s14, %s64_s20  }
   0xf   : > { %s1033_s23 = scalar_select %p881_p7, 1, 0 }
  0x10   : > { %s599_s27 = sshll.u32 %s890_s25, 7  ;;  %s897_s30 = scalar_lea.hbm %s1028_s1, %s614_s26 }
  0x11   : > { %s166_s4 = scalar_lea.vmem [#allocation2], %s599_s27  ;;  %p901_p9 = pnand %p643_p8, %p874_p3 }
  0x12   : > { %s173_s5 = sshll.u32 %s166_s4, 4  ;;  %s163_s7 = scalar_lea.sflag [#allocation3], %s890_s25  ;;  %s905_s5 = int_to_ptr.vmem [resolvable:$true] %s173_s5 }
  0x13   : > { %s696_s8 = scalar_lea.hbm %s897_s30, 2048  ;;  %p698_p12 = pneg %p901_p9 }
  0x14   : > { %p697_p11 = scmp.ne.s32.totalorder %s897_s30, %s696_s8  ;;  %s701_s11 = scalar_lea.hbm %s1028_s1, 4096 }
  0x15   : > { %p702_p1 = scmp.lt.u32.totalorder %s897_s30, %s1028_s1  ;;  %p703_p2 = scmp.lt.u32.totalorder %s701_s11, %s696_s8 }
  0x16   : > { %p699_p13 = pnand %p698_p12, %p697_p11  ;;  %p705_p4 = scmp.lt.u32.totalorder %s696_s8, %s897_s30 }
  0x17   : > { %p704_p3 = por %p703_p2, %p702_p1 }
  0x18   : > { %p700_p0 = pneg %p699_p13 }
  0x19   : > { %p706_p5 = por %p705_p4, %p704_p3 }
  0x1b   : > { %p707_p6 = pnand %p706_p5, %p700_p0 }
  0x1d   : > { %710 = shalt.err (!%p707_p6)
}
  0x1e   : > { %s711_s20 = scalar_lea.vmem %s905_s5, 2048  ;;  %s812_s21 = smov [#allocation2]  }
  0x1f   : > { %p712_p8 = scmp.ne.s32.totalorder %s905_s5, %s711_s20  ;;  %s716_s22 = sshll.u32 %s812_s21, 4  ;;  %s717_s22 = int_to_ptr.vmem [resolvable:$false] %s716_s22 }
  0x20   : > { %s718_s26 = scalar_lea.vmem %s717_s22, 4096  ;;  %p719_p10 = scmp.lt.s32.totalorder %s905_s5, %s717_s22 }
  0x21   : > { %p714_p11 = pnand %p712_p8, %p698_p12  ;;  %p720_p1 = scmp.lt.s32.totalorder %s718_s26, %s711_s20 }
  0x23   : > { %p715_p13 = pneg %p714_p11  ;;  %p721_p2 = por %p720_p1, %p719_p10 }
  0x25   : > { %p722_p3 = pnand %p721_p2, %p715_p13 }
  0x27   : > { %725 = shalt.err (!%p722_p3)
}
  0x28   : > { %s813_s27 = smov 1024   ;;  %s814_s28 = smov 512  }
  0x29   : > { %s815_s29 = smov 32   ;;  %p200_p0 = scmp.lt.s32.totalorder %s810_s17, 3 }
  0x2a   : > { %639 = dma.hbm_to_vmem [thread:$0]  (!%p901_p9), %s897_s30, 2048, %s905_s5, %s163_s7, %s813_s27, %s814_s28, %s815_s29  }
  0x2b   : > { %s602_s4 = sshll.u32 %s890_s25, 2  ;;  %s615_s8 = sshll.u32 %s806_s16, 6 }
  0x2c   : > { %p1035_p10 = scmp.ge.s32.totalorder %s810_s17, 1  ;;  %s948_s12 = scalar_lea.hbm %s1029_s2, %s615_s8 }
  0x2d   : > { %s187_s18 = scalar_lea.vmem [#allocation4], %s602_s4  ;;  %s184_s30 = scalar_lea.sflag [#allocation5], %s890_s25 }
  0x2e   : > { %p941_p4 = pnand %p1035_p10, %p200_p0  ;;  %s195_s20 = sshll.u32 %s187_s18, 4  ;;  %s196_s20 = int_to_ptr.vmem [resolvable:$true] %s195_s20 }
  0x2f   : > { %s726_s5 = scalar_lea.hbm %s948_s12, 64  ;;  %s731_s22 = scalar_lea.hbm %s1029_s2, 128 }
  0x30   : > { %s1036_s9 = scalar_select %p941_p4, 1, 0 }
  0x31   : > { %p727_p5 = scmp.ne.s32.totalorder %s948_s12, %s726_s5  ;;  %p732_p11 = scmp.lt.u32.totalorder %s948_s12, %s1029_s2 }
  0x32   : > { %p733_p13 = scmp.lt.u32.totalorder %s731_s22, %s726_s5  ;;  %p735_p2 = scmp.lt.u32.totalorder %s726_s5, %s948_s12 }
  0x33   : > { %p729_p6 = pnand %p727_p5, %p698_p12 }
  0x34   : > { %p734_p1 = por %p733_p13, %p732_p11 }
  0x35   : > { %p730_p8 = pneg %p729_p6 }
  0x36   : > { %p736_p3 = por %p735_p2, %p734_p1 }
  0x38   : > { %p737_p0 = pnand %p736_p3, %p730_p8 }
  0x3a   : > { %740 = shalt.err (!%p737_p0)
}
  0x3b   : > { %s741_s25 = scalar_lea.vmem %s196_s20, 64  ;;  %s816_s28 = smov [#allocation4]  }
  0x3c   : > { %p742_p10 = scmp.ne.s32.totalorder %s196_s20, %s741_s25  ;;  %s746_s29 = sshll.u32 %s816_s28, 4  ;;  %s747_s29 = int_to_ptr.vmem [resolvable:$false] %s746_s29 }
  0x3d   : > { %s748_s4 = scalar_lea.vmem %s747_s29, 128  ;;  %p749_p7 = scmp.lt.s32.totalorder %s196_s20, %s747_s29 }
  0x3e   : > { %p744_p5 = pnand %p742_p10, %p698_p12  ;;  %p750_p4 = scmp.lt.s32.totalorder %s748_s4, %s741_s25 }
  0x40   : > { %p745_p6 = pneg %p744_p5  ;;  %p751_p11 = por %p750_p4, %p749_p7 }
  0x42   : > { %p752_p13 = pnand %p751_p11, %p745_p6 }
  0x44   : > { %755 = shalt.err (!%p752_p13)
}
  0x45   : > { %642 = dma.hbm_to_vmem [thread:$0]  (!%p901_p9), %s948_s12, 64, %s196_s20, %s184_s30  }
  0x46   : > { %p1037_p8 = scmp.ne.s32.totalorder %s1036_s9, 0 }
  0x47   : > { %s206_s8 = sand.u32 (!%p1037_p8), 1, %s794_s13   ;;  %p1038_p12 = scmp.ne.s32.totalorder (!%p1037_p8), %s1033_s23, 0 }
  0x48   : > { %204 = sbr.rel (%p1037_p8) target bundleno = 314 (0x13a), region = 32  ;;  %s606_s10 = sshll.u32 (!%p1037_p8), %s206_s8, 7 }
  0x49   : > { %s207_s11 = scalar_lea.sflag (!%p1037_p8), [#allocation3], %s206_s8  ;;  %s973_s18 = scalar_lea.vmem (!%p1037_p8), [#allocation2], %s606_s10 }
  0x4f   : > { %781 = dma.done.wait (%p1038_p12), %s207_s11, 2048  }
  0x50   : > { %783 = vsyncadd (%p1038_p12), %s207_s11, 4294965248  ;;  %s607_s5 = sshll.u32 %s206_s8, 2  ;;  %s216_s6 = scalar_lea.sflag [#allocation5], %s206_s8 }
  0x51   : > { %s979_s7 = scalar_lea.vmem [#allocation4], %s607_s5 }
  0x52   : > { %785 = dma.done.wait (%p1038_p12), %s216_s6, 64  }
  0x53   : > { %787 = vsyncadd (%p1038_p12), %s216_s6, 4294967232  ;;  %v817_v0 = vmov 0.0   ;;  %v273_v1 = vld [vmem:[%s973_s18 + $0x8] sm:$0xff]  ;;  %v272_v3 = vld [vmem:[%s973_s18] sm:$0xff]  ;;  %vm310_vm0 = vcmask 261120   ;;  %v290_v26 = vlaneseq  ;;  %s608_s12 = sshll.u32 %s802_s15, 2 }
  0x54   : > { %378 = vmatprep.mubr.f32.mxu0 %v817_v0  ;;  %449 = vmatprep.mubr.f32.mxu1 %v817_v0  ;;  %v277_v2 = vld [vmem:[%s973_s18 + $0x28] sm:$0xff]  ;;  %v276_v5 = vld [vmem:[%s973_s18 + $0x20] sm:$0xff]  ;;  %v275_v6 = vld [vmem:[%s973_s18 + $0x18] sm:$0xff]  ;;  %p264_p7 = scmp.lt.s32.totalorder %s608_s12, 7 }
  0x55   : > { %v616_v4 = vpack.c.bf16 %v277_v2, %v273_v1  ;;  %v279_v7 = vld [vmem:[%s973_s18 + $0x38] sm:$0xff]  ;;  %v618_v8 = vpack.c.bf16 %v276_v5, %v272_v3  ;;  %v274_v10 = vld [vmem:[%s973_s18 + $0x10] sm:$0xff]  ;;  %v281_v12 = vld [vmem:[%s973_s18 + $0x48] sm:$0xff]  ;;  %v291_v27 = vshrl.u32 %v290_v26, 7 }
  0x56   : > { %v624_v9 = vpack.c.bf16 %v279_v7, %v275_v6  ;;  %v278_v11 = vld [vmem:[%s973_s18 + $0x30] sm:$0xff]  ;;  %v285_v14 = vld [vmem:[%s973_s18 + $0x68] sm:$0xff]  ;;  %v280_v15 = vld [vmem:[%s973_s18 + $0x40] sm:$0xff]  ;;  %s1047_s12 = smov (!%p264_p7, %s608_s12), 7 }
  0x57   : > { %617 = vmatprep.subr.bf16.mxu0 %v616_v4  ;;  %v626_v13 = vpack.c.bf16 %v278_v11, %v274_v10  ;;  %v284_v16 = vld [vmem:[%s973_s18 + $0x60] sm:$0xff]  ;;  %v620_v17 = vpack.c.bf16 %v285_v14, %v281_v12  ;;  %v283_v19 = vld [vmem:[%s973_s18 + $0x58] sm:$0xff]  ;;  %v282_v21 = vld [vmem:[%s973_s18 + $0x50] sm:$0xff]  ;;  %v292_v28 = vsub.s32 0, %v291_v27  ;;  %v296_v30 = vsub.s32 1, %v291_v27  ;;  %s609_s20 = sshll.u32 %s1047_s12, 3 }
  0x58   : > { %619 = vmatpush1.bf16.msra.mxu0 %v618_v8  ;;  %625 = vmatprep.subr.bf16.mxu1 %v624_v9  ;;  %v622_v18 = vpack.c.bf16 %v284_v16, %v280_v15  ;;  %v287_v20 = vld [vmem:[%s973_s18 + $0x78] sm:$0xff]  ;;  %v286_v23 = vld [vmem:[%s973_s18 + $0x70] sm:$0xff]  ;;  %v271_v25 = vld [vmem:[%s1027_s0] sm:$0xff]  ;;  %v300_v31 = vsub.s32 2, %v291_v27  ;;  %v304_v32 = vsub.s32 3, %v291_v27  ;;  %s269_s15 = scalar_lea.vmem %s1030_s3, %s609_s20 }
  0x59   : > { %627 = vmatpush1.bf16.msra.mxu1 %v626_v13  ;;  %v628_v22 = vpack.c.bf16 %v287_v20, %v283_v19  ;;  %621 = vmatprep.subr.bf16.mxu0 %v620_v17  ;;  %v630_v24 = vpack.c.bf16 %v286_v23, %v282_v21  ;;  %v288_v29 = vld [vmem:[%s979_s7] sm:$0xf] }
  0x5a   : > { %v293_v33 = vrot.slane %v288_v29, %v292_v28  ;;  %v297_v34 = vrot.slane %v288_v29, %v296_v30  ;;  %v301_v35 = vrot.slane %v288_v29, %v300_v31  ;;  %v305_v36 = vrot.slane %v288_v29, %v304_v32 }
  0x5b   : > { %629 = vmatprep.subr.bf16.mxu1 %v628_v22 }
  0x5c   : > { %623 = vmatpush1.bf16.msra.mxu0 %v622_v18 }
  0x5d   : > { %631 = vmatpush1.bf16.msra.mxu1 %v630_v24 }
  0x5f   : > { %610 = vmatmul.mubr.msk.f32.vlgmr.msra.gmra.mrb[0].mxu0 %vm310_vm0, %v271_v25 }
  0x60   : > { %611 = vmatmul.mubr.msk.f32.vlgmr.msra.gmra.mrb[0].mxu1 %vm310_vm0, %v271_v25 }
 0x132   : > { %v380_v37 = vpop.f32.mrb[0].mxu0 }
 0x133   : > { %v381_v38 = vadd.f32 %v380_v37, %v293_v33  ;;  %v382_v39 = vpop.f32.mrb[1].mxu0  ;;  %v451_v40 = vpop.f32.mrb[0].mxu1 }
 0x134   : > { %v383_v41 = vadd.f32 %v382_v39, %v297_v34  ;;  %v452_v42 = vadd.f32 %v451_v40, %v301_v35  ;;  %v453_v43 = vpop.f32.mrb[1].mxu1 }
 0x135   : > { %v456_v44 = vmax.f32 %v381_v38, 0.0  ;;  %v454_v45 = vadd.f32 %v453_v43, %v305_v36 }
 0x136   : > { %v457_v46 = vmax.f32 %v383_v41, 0.0  ;;  %v458_v47 = vmax.f32 %v452_v42, 0.0 }
 0x137   : > { %460 = vst [vmem:[%s269_s15] sm:$0xff] %v456_v44  ;;  %v459_v48 = vmax.f32 %v454_v45, 0.0 }
 0x138   : > { %461 = vst [vmem:[%s269_s15 + $0x8] sm:$0xff] %v457_v46  ;;  %462 = vst [vmem:[%s269_s15 + $0x10] sm:$0xff] %v458_v47 }
 0x139   : > { %463 = vst [vmem:[%s269_s15 + $0x18] sm:$0xff] %v459_v48 }
 0x13a PF: > { %s19_s17 = sadd.s32 1, %s810_s17   ;;  %s1039_s12 = smov %s794_s13 }
 0x13b   : > { %p16_p9 = scmp.ge.s32.totalorder %s19_s17, 4   ;;  %s1040_s13 = smov %s798_s14 }
 0x13c   : > { %s1041_s14 = smov %s887_s24  ;;  %s1042_s15 = smov %s806_s16 }
 0x13d   : > { %s1043_s16 = smov %s1045_s19  ;;  %18 = sbr.rel (!%p16_p9) target bundleno = 6 (0x6), region = 88 }
 0x144   :  { %494 = vsyncpa [#allocation3], 1 }
 0x145   :  { %496 = vsyncpa [#allocation3 + $0x1], 1 }
 0x146   :  { %497 = vsyncpa [#allocation5], 1 }
 0x147   :  { %499 = vsyncpa [#allocation5 + $0x1], 1 }

// kernel: decoder_forward.7
= control target key start
LH: loop header
LB: loop body
LE: loop exit
PB: predicated region body
PF: predicated region fallthrough
CT: control target
= control target key end

     0   :  { %v1374_v3 = vmov 0.0   ;;  %vm1376_vm0 = vmmov 0   ;;  %s2445_s1 = inlined_call_operand.vmem [shape: f32[128,1664], index: 1, kind: input, shape index: {}]   ;;  %s2446_s0 = inlined_call_operand.vmem [shape: f32[56,128], index: 0, kind: input, shape index: {}]   ;;  %s2447_s2 = inlined_call_operand.vmem [shape: f32[56,1664], index: 2, kind: output, shape index: {}]  }
   0x1   :  { %v19_v0 = vld [vmem:[%s2445_s1 + $0x8] sm:$0xff]  ;;  %v32_v1 = vld [vmem:[%s2445_s1 + $0x70] sm:$0xff]  ;;  %v18_v2 = vld [vmem:[%s2445_s1] sm:$0xff]  ;;  %290 = vmatprep.mubr.f32.mxu0 %v1374_v3  ;;  %397 = vmatprep.mubr.f32.mxu1 %v1374_v3 }
   0x2   :  { %v1139_v4 = vpack.c.bf16 %v32_v1, %v19_v0  ;;  %v31_v5 = vld [vmem:[%s2445_s1 + $0x68] sm:$0xff]  ;;  %v21_v6 = vld [vmem:[%s2445_s1 + $0x18] sm:$0xff]  ;;  %v34_v7 = vld [vmem:[%s2445_s1 + $0x80] sm:$0xff] }
   0x3   :  { %v1141_v8 = vpack.c.bf16 %v31_v5, %v18_v2  ;;  %v1171_v9 = vpack.c.bf16 %v34_v7, %v21_v6  ;;  %v45_v10 = vld [vmem:[%s2445_s1 + $0xd8] sm:$0xff]  ;;  %v58_v11 = vld [vmem:[%s2445_s1 + $0x140] sm:$0xff]  ;;  %v20_v12 = vld [vmem:[%s2445_s1 + $0x10] sm:$0xff] }
   0x4   :  { %1140 = vmatprep.subr.bf16.mxu0 %v1139_v4  ;;  %v1143_v13 = vpack.c.bf16 %v58_v11, %v45_v10  ;;  %v33_v14 = vld [vmem:[%s2445_s1 + $0x78] sm:$0xff]  ;;  %v44_v15 = vld [vmem:[%s2445_s1 + $0xd0] sm:$0xff]  ;;  %v47_v19 = vld [vmem:[%s2445_s1 + $0xe8] sm:$0xff] }
   0x5   :  { %v57_v16 = vld [vmem:[%s2445_s1 + $0x138] sm:$0xff]  ;;  %1142 = vmatpush1.bf16.msra.mxu0 %v1141_v8  ;;  %1172 = vmatprep.subr.bf16.mxu1 %v1171_v9  ;;  %v1173_v17 = vpack.c.bf16 %v33_v14, %v20_v12  ;;  %v60_v20 = vld [vmem:[%s2445_s1 + $0x150] sm:$0xff]  ;;  %v71_v21 = vld [vmem:[%s2445_s1 + $0x1a8] sm:$0xff] }
   0x6   :  { %v1145_v18 = vpack.c.bf16 %v57_v16, %v44_v15  ;;  %1144 = vmatprep.subr.bf16.mxu0 %v1143_v13  ;;  %v1175_v22 = vpack.c.bf16 %v60_v20, %v47_v19  ;;  %v84_v23 = vld [vmem:[%s2445_s1 + $0x210] sm:$0xff]  ;;  %v46_v24 = vld [vmem:[%s2445_s1 + $0xe0] sm:$0xff]  ;;  %v59_v25 = vld [vmem:[%s2445_s1 + $0x148] sm:$0xff] }
   0x7   :  { %1174 = vmatpush1.bf16.msra.mxu1 %v1173_v17  ;;  %v1147_v26 = vpack.c.bf16 %v84_v23, %v71_v21  ;;  %v1177_v27 = vpack.c.bf16 %v59_v25, %v46_v24  ;;  %v70_v28 = vld [vmem:[%s2445_s1 + $0x1a0] sm:$0xff]  ;;  %v83_v29 = vld [vmem:[%s2445_s1 + $0x208] sm:$0xff]  ;;  %v73_v30 = vld [vmem:[%s2445_s1 + $0x1b8] sm:$0xff] }
   0x8   :  { %1176 = vmatprep.subr.bf16.mxu1 %v1175_v22  ;;  %v86_v31 = vld [vmem:[%s2445_s1 + $0x220] sm:$0xff]  ;;  %v97_v32 = vld [vmem:[%s2445_s1 + $0x278] sm:$0xff]  ;;  %v1149_v34 = vpack.c.bf16 %v83_v29, %v70_v28  ;;  %v72_v36 = vld [vmem:[%s2445_s1 + $0x1b0] sm:$0xff] }
   0x9   :  { %v110_v33 = vld [vmem:[%s2445_s1 + $0x2e0] sm:$0xff]  ;;  %1146 = vmatpush1.bf16.msra.mxu0 %v1145_v18  ;;  %v1179_v35 = vpack.c.bf16 %v86_v31, %v73_v30  ;;  %v85_v37 = vld [vmem:[%s2445_s1 + $0x218] sm:$0xff]  ;;  %v96_v38 = vld [vmem:[%s2445_s1 + $0x270] sm:$0xff] }
   0xa   :  { %1148 = vmatprep.subr.bf16.mxu0 %v1147_v26  ;;  %v1151_v39 = vpack.c.bf16 %v110_v33, %v97_v32  ;;  %v109_v40 = vld [vmem:[%s2445_s1 + $0x2d8] sm:$0xff]  ;;  %v99_v41 = vld [vmem:[%s2445_s1 + $0x288] sm:$0xff]  ;;  %v112_v42 = vld [vmem:[%s2445_s1 + $0x2f0] sm:$0xff]  ;;  %v1181_v43 = vpack.c.bf16 %v85_v37, %v72_v36 }
   0xb   :  { %1178 = vmatpush1.bf16.msra.mxu1 %v1177_v27  ;;  %v123_v44 = vld [vmem:[%s2445_s1 + $0x348] sm:$0xff]  ;;  %v136_v45 = vld [vmem:[%s2445_s1 + $0x3b0] sm:$0xff]  ;;  %v1183_v46 = vpack.c.bf16 %v112_v42, %v99_v41  ;;  %v98_v47 = vld [vmem:[%s2445_s1 + $0x280] sm:$0xff]  ;;  %v1153_v49 = vpack.c.bf16 %v109_v40, %v96_v38 }
   0xc   :  { %1180 = vmatprep.subr.bf16.mxu1 %v1179_v35  ;;  %v111_v48 = vld [vmem:[%s2445_s1 + $0x2e8] sm:$0xff]  ;;  %v125_v50 = vld [vmem:[%s2445_s1 + $0x358] sm:$0xff]  ;;  %v138_v51 = vld [vmem:[%s2445_s1 + $0x3c0] sm:$0xff]  ;;  %v1155_v52 = vpack.c.bf16 %v136_v45, %v123_v44 }
   0xd   :  { %1150 = vmatpush1.bf16.msra.mxu0 %v1149_v34  ;;  %v122_v53 = vld [vmem:[%s2445_s1 + $0x340] sm:$0xff]  ;;  %v135_v54 = vld [vmem:[%s2445_s1 + $0x3a8] sm:$0xff]  ;;  %v1185_v55 = vpack.c.bf16 %v111_v48, %v98_v47  ;;  %v149_v56 = vld [vmem:[%s2445_s1 + $0x418] sm:$0xff]  ;;  %v1187_v58 = vpack.c.bf16 %v138_v51, %v125_v50 }
   0xe   :  { %1152 = vmatprep.subr.bf16.mxu0 %v1151_v39  ;;  %v162_v57 = vld [vmem:[%s2445_s1 + $0x480] sm:$0xff]  ;;  %v124_v59 = vld [vmem:[%s2445_s1 + $0x350] sm:$0xff]  ;;  %v137_v60 = vld [vmem:[%s2445_s1 + $0x3b8] sm:$0xff]  ;;  %v1157_v61 = vpack.c.bf16 %v135_v54, %v122_v53 }
   0xf   :  { %1182 = vmatpush1.bf16.msra.mxu1 %v1181_v43  ;;  %v151_v62 = vld [vmem:[%s2445_s1 + $0x428] sm:$0xff]  ;;  %v164_v63 = vld [vmem:[%s2445_s1 + $0x490] sm:$0xff]  ;;  %v1159_v0 = vpack.c.bf16 %v162_v57, %v149_v56  ;;  %v161_v2 = vld [vmem:[%s2445_s1 + $0x478] sm:$0xff]  ;;  %v1189_v4 = vpack.c.bf16 %v137_v60, %v124_v59 }
  0x10   :  { %1184 = vmatprep.subr.bf16.mxu1 %v1183_v46  ;;  %v148_v1 = vld [vmem:[%s2445_s1 + $0x410] sm:$0xff]  ;;  %v175_v5 = vld [vmem:[%s2445_s1 + $0x4e8] sm:$0xff]  ;;  %v1191_v7 = vpack.c.bf16 %v164_v63, %v151_v62  ;;  %v150_v8 = vld [vmem:[%s2445_s1 + $0x420] sm:$0xff] }
  0x11   :  { %1154 = vmatpush1.bf16.msra.mxu0 %v1153_v49  ;;  %v188_v6 = vld [vmem:[%s2445_s1 + $0x550] sm:$0xff]  ;;  %v163_v9 = vld [vmem:[%s2445_s1 + $0x488] sm:$0xff]  ;;  %v1161_v10 = vpack.c.bf16 %v161_v2, %v148_v1  ;;  %v177_v11 = vld [vmem:[%s2445_s1 + $0x4f8] sm:$0xff] }
  0x12   :  { %1156 = vmatprep.subr.bf16.mxu0 %v1155_v52  ;;  %v190_v12 = vld [vmem:[%s2445_s1 + $0x560] sm:$0xff]  ;;  %v1163_v13 = vpack.c.bf16 %v188_v6, %v175_v5  ;;  %v187_v15 = vld [vmem:[%s2445_s1 + $0x548] sm:$0xff]  ;;  %v1193_v16 = vpack.c.bf16 %v163_v9, %v150_v8  ;;  %v201_v17 = vld [vmem:[%s2445_s1 + $0x5b8] sm:$0xff] }
  0x13   :  { %1186 = vmatpush1.bf16.msra.mxu1 %v1185_v55  ;;  %v174_v14 = vld [vmem:[%s2445_s1 + $0x4e0] sm:$0xff]  ;;  %v1195_v19 = vpack.c.bf16 %v190_v12, %v177_v11  ;;  %v176_v20 = vld [vmem:[%s2445_s1 + $0x4f0] sm:$0xff]  ;;  %v189_v21 = vld [vmem:[%s2445_s1 + $0x558] sm:$0xff] }
  0x14   :  { %1188 = vmatprep.subr.bf16.mxu1 %v1187_v58  ;;  %v214_v18 = vld [vmem:[%s2445_s1 + $0x620] sm:$0xff]  ;;  %v1165_v22 = vpack.c.bf16 %v187_v15, %v174_v14  ;;  %v203_v23 = vld [vmem:[%s2445_s1 + $0x5c8] sm:$0xff]  ;;  %v216_v24 = vld [vmem:[%s2445_s1 + $0x630] sm:$0xff]  ;;  %v1197_v28 = vpack.c.bf16 %v189_v21, %v176_v20 }
  0x15   :  { %1158 = vmatpush1.bf16.msra.mxu0 %v1157_v61  ;;  %v1167_v25 = vpack.c.bf16 %v214_v18, %v201_v17  ;;  %v200_v26 = vld [vmem:[%s2445_s1 + $0x5b0] sm:$0xff]  ;;  %v213_v27 = vld [vmem:[%s2445_s1 + $0x618] sm:$0xff]  ;;  %v23_v29 = vld [vmem:[%s2445_s1 + $0x28] sm:$0xff]  ;;  %v1199_v31 = vpack.c.bf16 %v216_v24, %v203_v23 }
  0x16   :  { %1160 = vmatprep.subr.bf16.mxu0 %v1159_v0  ;;  %v36_v30 = vld [vmem:[%s2445_s1 + $0x90] sm:$0xff]  ;;  %v202_v32 = vld [vmem:[%s2445_s1 + $0x5c0] sm:$0xff]  ;;  %v215_v33 = vld [vmem:[%s2445_s1 + $0x628] sm:$0xff]  ;;  %v1169_v34 = vpack.c.bf16 %v213_v27, %v200_v26 }
  0x17   :  { %1190 = vmatpush1.bf16.msra.mxu1 %v1189_v4  ;;  %v25_v35 = vld [vmem:[%s2445_s1 + $0x38] sm:$0xff]  ;;  %v38_v36 = vld [vmem:[%s2445_s1 + $0xa0] sm:$0xff]  ;;  %v1203_v37 = vpack.c.bf16 %v36_v30, %v23_v29  ;;  %v35_v39 = vld [vmem:[%s2445_s1 + $0x88] sm:$0xff]  ;;  %v1201_v40 = vpack.c.bf16 %v215_v33, %v202_v32 }
  0x18   :  { %1192 = vmatprep.subr.bf16.mxu1 %v1191_v7  ;;  %v22_v38 = vld [vmem:[%s2445_s1 + $0x20] sm:$0xff]  ;;  %v49_v41 = vld [vmem:[%s2445_s1 + $0xf8] sm:$0xff]  ;;  %v1235_v43 = vpack.c.bf16 %v38_v36, %v25_v35  ;;  %v24_v44 = vld [vmem:[%s2445_s1 + $0x30] sm:$0xff] }
  0x19   :  { %1162 = vmatpush1.bf16.msra.mxu0 %v1161_v10  ;;  %v62_v42 = vld [vmem:[%s2445_s1 + $0x160] sm:$0xff]  ;;  %v37_v45 = vld [vmem:[%s2445_s1 + $0x98] sm:$0xff]  ;;  %v1205_v47 = vpack.c.bf16 %v35_v39, %v22_v38  ;;  %v51_v48 = vld [vmem:[%s2445_s1 + $0x108] sm:$0xff] }
  0x1a   :  { %1164 = vmatprep.subr.bf16.mxu0 %v1163_v13  ;;  %v1619_v46 = vld [vmem:[%s2446_s0] sm:$0xff]  ;;  %v64_v49 = vld [vmem:[%s2445_s1 + $0x170] sm:$0xff]  ;;  %v1207_v50 = vpack.c.bf16 %v62_v42, %v49_v41  ;;  %v61_v52 = vld [vmem:[%s2445_s1 + $0x158] sm:$0xff]  ;;  %v1237_v53 = vpack.c.bf16 %v37_v45, %v24_v44 }
  0x1b   :  { %1194 = vmatpush1.bf16.msra.mxu1 %v1193_v16  ;;  %v48_v51 = vld [vmem:[%s2445_s1 + $0xf0] sm:$0xff]  ;;  %v75_v54 = vld [vmem:[%s2445_s1 + $0x1c8] sm:$0xff]  ;;  %v1239_v56 = vpack.c.bf16 %v64_v49, %v51_v48  ;;  %v50_v57 = vld [vmem:[%s2445_s1 + $0x100] sm:$0xff] }
  0x1c   :  { %1196 = vmatprep.subr.bf16.mxu1 %v1195_v19  ;;  %v88_v55 = vld [vmem:[%s2445_s1 + $0x230] sm:$0xff]  ;;  %v63_v58 = vld [vmem:[%s2445_s1 + $0x168] sm:$0xff]  ;;  %v1209_v59 = vpack.c.bf16 %v61_v52, %v48_v51  ;;  %v77_v61 = vld [vmem:[%s2445_s1 + $0x1d8] sm:$0xff] }
  0x1d   :  { %1166 = vmatpush1.bf16.msra.mxu0 %v1165_v22  ;;  %v1650_v60 = vld [vmem:[%s2446_s0 + $0x8] sm:$0xff]  ;;  %v90_v62 = vld [vmem:[%s2445_s1 + $0x240] sm:$0xff]  ;;  %v1211_v63 = vpack.c.bf16 %v88_v55, %v75_v54  ;;  %v1241_v2 = vpack.c.bf16 %v63_v58, %v50_v57  ;;  %v101_v4 = vld [vmem:[%s2445_s1 + $0x298] sm:$0xff] }
  0x1e   :  { %1168 = vmatprep.subr.bf16.mxu0 %v1167_v25  ;;  %v74_v0 = vld [vmem:[%s2445_s1 + $0x1c0] sm:$0xff]  ;;  %v87_v1 = vld [vmem:[%s2445_s1 + $0x228] sm:$0xff]  ;;  %v1243_v6 = vpack.c.bf16 %v90_v62, %v77_v61  ;;  %v76_v7 = vld [vmem:[%s2445_s1 + $0x1d0] sm:$0xff] }
  0x1f   :  { %1198 = vmatpush1.bf16.msra.mxu1 %v1197_v28  ;;  %v114_v5 = vld [vmem:[%s2445_s1 + $0x300] sm:$0xff]  ;;  %v89_v8 = vld [vmem:[%s2445_s1 + $0x238] sm:$0xff]  ;;  %v1213_v9 = vpack.c.bf16 %v87_v1, %v74_v0  ;;  %v1683_v10 = vld [vmem:[%s2446_s0 + $0x10] sm:$0xff] }
  0x20   :  { %1200 = vmatprep.subr.bf16.mxu1 %v1199_v31  ;;  %v103_v11 = vld [vmem:[%s2445_s1 + $0x2a8] sm:$0xff]  ;;  %v116_v12 = vld [vmem:[%s2445_s1 + $0x310] sm:$0xff]  ;;  %v1215_v13 = vpack.c.bf16 %v114_v5, %v101_v4  ;;  %v113_v15 = vld [vmem:[%s2445_s1 + $0x2f8] sm:$0xff]  ;;  %v1245_v16 = vpack.c.bf16 %v89_v8, %v76_v7 }
  0x21   :  { %1170 = vmatpush1.bf16.msra.mxu0 %v1169_v34  ;;  %v100_v14 = vld [vmem:[%s2445_s1 + $0x290] sm:$0xff]  ;;  %v127_v17 = vld [vmem:[%s2445_s1 + $0x368] sm:$0xff]  ;;  %v1247_v19 = vpack.c.bf16 %v116_v12, %v103_v11  ;;  %v102_v20 = vld [vmem:[%s2445_s1 + $0x2a0] sm:$0xff] }
  0x22   :  { %1204 = vmatprep.subr.bf16.mxu0 %v1203_v37  ;;  %v140_v18 = vld [vmem:[%s2445_s1 + $0x3d0] sm:$0xff]  ;;  %v115_v21 = vld [vmem:[%s2445_s1 + $0x308] sm:$0xff]  ;;  %v1217_v22 = vpack.c.bf16 %v113_v15, %v100_v14  ;;  %v1716_v23 = vld [vmem:[%s2446_s0 + $0x18] sm:$0xff] }
  0x23   :  { %1202 = vmatpush1.bf16.msra.mxu1 %v1201_v40  ;;  %v129_v24 = vld [vmem:[%s2445_s1 + $0x378] sm:$0xff]  ;;  %v142_v25 = vld [vmem:[%s2445_s1 + $0x3e0] sm:$0xff]  ;;  %v1219_v26 = vpack.c.bf16 %v140_v18, %v127_v17  ;;  %v139_v28 = vld [vmem:[%s2445_s1 + $0x3c8] sm:$0xff]  ;;  %v1249_v29 = vpack.c.bf16 %v115_v21, %v102_v20 }
  0x24   :  { %291 = vmatmul.mubr.f32.vlgmr.msra.gmra.mrb[0].mxu0 %v1619_v46  ;;  %1236 = vmatprep.subr.bf16.mxu1 %v1235_v43  ;;  %v126_v27 = vld [vmem:[%s2445_s1 + $0x360] sm:$0xff]  ;;  %v153_v30 = vld [vmem:[%s2445_s1 + $0x438] sm:$0xff]  ;;  %v1251_v32 = vpack.c.bf16 %v142_v25, %v129_v24  ;;  %v128_v33 = vld [vmem:[%s2445_s1 + $0x370] sm:$0xff] }
  0x25   :  { %1206 = vmatpush1.bf16.msra.mxu0 %v1205_v47  ;;  %296 = vmatprep.mubr.f32.mxu0 %v1374_v3  ;;  %v166_v31 = vld [vmem:[%s2445_s1 + $0x4a0] sm:$0xff]  ;;  %v141_v34 = vld [vmem:[%s2445_s1 + $0x3d8] sm:$0xff]  ;;  %v1221_v35 = vpack.c.bf16 %v139_v28, %v126_v27  ;;  %v155_v37 = vld [vmem:[%s2445_s1 + $0x448] sm:$0xff] }
  0x26   :  { %398 = vmatmul.mubr.f32.vlgmr.msra.gmra.mrb[0].mxu1 %v1619_v46  ;;  %1208 = vmatprep.subr.bf16.mxu0 %v1207_v50  ;;  %v1749_v36 = vld [vmem:[%s2446_s0 + $0x20] sm:$0xff]  ;;  %v168_v38 = vld [vmem:[%s2445_s1 + $0x4b0] sm:$0xff]  ;;  %v1223_v39 = vpack.c.bf16 %v166_v31, %v153_v30  ;;  %v165_v41 = vld [vmem:[%s2445_s1 + $0x498] sm:$0xff]  ;;  %v1253_v42 = vpack.c.bf16 %v141_v34, %v128_v33 }
  0x27   :  { %1238 = vmatpush1.bf16.msra.mxu1 %v1237_v53  ;;  %403 = vmatprep.mubr.f32.mxu1 %v1374_v3  ;;  %v152_v40 = vld [vmem:[%s2445_s1 + $0x430] sm:$0xff]  ;;  %v179_v43 = vld [vmem:[%s2445_s1 + $0x508] sm:$0xff]  ;;  %v1255_v45 = vpack.c.bf16 %v168_v38, %v155_v37  ;;  %v154_v47 = vld [vmem:[%s2445_s1 + $0x440] sm:$0xff] }
  0x28   :  { %1240 = vmatprep.subr.bf16.mxu1 %v1239_v56  ;;  %297 = vmatmul.mubr.f32.gmra.mrb[2].mxu0 %v1650_v60  ;;  %v192_v44 = vld [vmem:[%s2445_s1 + $0x570] sm:$0xff]  ;;  %v167_v48 = vld [vmem:[%s2445_s1 + $0x4a8] sm:$0xff]  ;;  %v1225_v49 = vpack.c.bf16 %v165_v41, %v152_v40  ;;  %v181_v51 = vld [vmem:[%s2445_s1 + $0x518] sm:$0xff] }
  0x29   :  { %1210 = vmatpush1.bf16.msra.mxu0 %v1209_v59  ;;  %302 = vmatprep.mubr.f32.mxu0 %v1374_v3  ;;  %v1782_v50 = vld [vmem:[%s2446_s0 + $0x28] sm:$0xff]  ;;  %v194_v52 = vld [vmem:[%s2445_s1 + $0x580] sm:$0xff]  ;;  %v1227_v53 = vpack.c.bf16 %v192_v44, %v179_v43  ;;  %v1257_v56 = vpack.c.bf16 %v167_v48, %v154_v47  ;;  %v205_v57 = vld [vmem:[%s2445_s1 + $0x5d8] sm:$0xff] }
  0x2a   :  { %1212 = vmatprep.subr.bf16.mxu0 %v1211_v63  ;;  %404 = vmatmul.mubr.f32.gmra.mrb[2].mxu1 %v1650_v60  ;;  %v178_v54 = vld [vmem:[%s2445_s1 + $0x500] sm:$0xff]  ;;  %v191_v55 = vld [vmem:[%s2445_s1 + $0x568] sm:$0xff]  ;;  %v1259_v59 = vpack.c.bf16 %v194_v52, %v181_v51  ;;  %v180_v61 = vld [vmem:[%s2445_s1 + $0x510] sm:$0xff] }
  0x2b   :  { %1242 = vmatpush1.bf16.msra.mxu1 %v1241_v2  ;;  %409 = vmatprep.mubr.f32.mxu1 %v1374_v3  ;;  %v218_v58 = vld [vmem:[%s2445_s1 + $0x640] sm:$0xff]  ;;  %v193_v62 = vld [vmem:[%s2445_s1 + $0x578] sm:$0xff]  ;;  %v1229_v63 = vpack.c.bf16 %v191_v55, %v178_v54  ;;  %v1815_v0 = vld [vmem:[%s2446_s0 + $0x30] sm:$0xff] }
  0x2c   :  { %1244 = vmatprep.subr.bf16.mxu1 %v1243_v6  ;;  %303 = vmatmul.mubr.f32.gmra.mrb[4].mxu0 %v1683_v10  ;;  %v207_v1 = vld [vmem:[%s2445_s1 + $0x5e8] sm:$0xff]  ;;  %v220_v2 = vld [vmem:[%s2445_s1 + $0x650] sm:$0xff]  ;;  %v1231_v4 = vpack.c.bf16 %v218_v58, %v205_v57  ;;  %v217_v6 = vld [vmem:[%s2445_s1 + $0x638] sm:$0xff]  ;;  %v1261_v7 = vpack.c.bf16 %v193_v62, %v180_v61 }
  0x2d   :  { %1214 = vmatpush1.bf16.msra.mxu0 %v1213_v9  ;;  %308 = vmatprep.mubr.f32.mxu0 %v1374_v3  ;;  %v204_v5 = vld [vmem:[%s2445_s1 + $0x5d0] sm:$0xff]  ;;  %v27_v8 = vld [vmem:[%s2445_s1 + $0x48] sm:$0xff]  ;;  %v1263_v11 = vpack.c.bf16 %v220_v2, %v207_v1  ;;  %v206_v12 = vld [vmem:[%s2445_s1 + $0x5e0] sm:$0xff] }
  0x2e   :  { %1216 = vmatprep.subr.bf16.mxu0 %v1215_v13  ;;  %410 = vmatmul.mubr.f32.gmra.mrb[4].mxu1 %v1683_v10  ;;  %v40_v9 = vld [vmem:[%s2445_s1 + $0xb0] sm:$0xff]  ;;  %v219_v13 = vld [vmem:[%s2445_s1 + $0x648] sm:$0xff]  ;;  %v1233_v14 = vpack.c.bf16 %v217_v6, %v204_v5  ;;  %v29_v15 = vld [vmem:[%s2445_s1 + $0x58] sm:$0xff] }
  0x2f   :  { %1246 = vmatpush1.bf16.msra.mxu1 %v1245_v16  ;;  %415 = vmatprep.mubr.f32.mxu1 %v1374_v3  ;;  %v42_v16 = vld [vmem:[%s2445_s1 + $0xc0] sm:$0xff]  ;;  %v1267_v17 = vpack.c.bf16 %v40_v9, %v27_v8  ;;  %v1265_v20 = vpack.c.bf16 %v219_v13, %v206_v12  ;;  %v53_v21 = vld [vmem:[%s2445_s1 + $0x118] sm:$0xff]  ;;  %v28_v25 = vld [vmem:[%s2445_s1 + $0x50] sm:$0xff] }
  0x30   :  { %1248 = vmatprep.subr.bf16.mxu1 %v1247_v19  ;;  %309 = vmatmul.mubr.f32.gmra.mrb[6].mxu0 %v1716_v23  ;;  %v26_v18 = vld [vmem:[%s2445_s1 + $0x40] sm:$0xff]  ;;  %v39_v19 = vld [vmem:[%s2445_s1 + $0xa8] sm:$0xff]  ;;  %v1299_v24 = vpack.c.bf16 %v42_v16, %v29_v15  ;;  %v52_v31 = vld [vmem:[%s2445_s1 + $0x110] sm:$0xff] }
  0x31   :  { %1218 = vmatpush1.bf16.msra.mxu0 %v1217_v22  ;;  %314 = vmatprep.mubr.f32.mxu0 %v1374_v3  ;;  %v66_v22 = vld [vmem:[%s2445_s1 + $0x180] sm:$0xff]  ;;  %v1269_v27 = vpack.c.bf16 %v39_v19, %v26_v18  ;;  %v55_v28 = vld [vmem:[%s2445_s1 + $0x128] sm:$0xff]  ;;  %v81_v41 = vld [vmem:[%s2445_s1 + $0x1f8] sm:$0xff] }
  0x32   :  { %1220 = vmatprep.subr.bf16.mxu0 %v1219_v26  ;;  %416 = vmatmul.mubr.f32.gmra.mrb[6].mxu1 %v1716_v23  ;;  %v41_v26 = vld [vmem:[%s2445_s1 + $0xb8] sm:$0xff]  ;;  %v1271_v30 = vpack.c.bf16 %v66_v22, %v53_v21  ;;  %v79_v34 = vld [vmem:[%s2445_s1 + $0x1e8] sm:$0xff]  ;;  %v54_v38 = vld [vmem:[%s2445_s1 + $0x120] sm:$0xff] }
  0x33   :  { %1250 = vmatpush1.bf16.msra.mxu1 %v1249_v29  ;;  %421 = vmatprep.mubr.f32.mxu1 %v1374_v3  ;;  %v68_v29 = vld [vmem:[%s2445_s1 + $0x190] sm:$0xff]  ;;  %v1301_v33 = vpack.c.bf16 %v41_v26, %v28_v25  ;;  %v78_v44 = vld [vmem:[%s2445_s1 + $0x1e0] sm:$0xff]  ;;  %v105_v48 = vld [vmem:[%s2445_s1 + $0x2b8] sm:$0xff] }
  0x34   :  { %1252 = vmatprep.subr.bf16.mxu1 %v1251_v32  ;;  %315 = vmatmul.mubr.f32.gmra.mrb[8].mxu0 %v1749_v36  ;;  %v65_v32 = vld [vmem:[%s2445_s1 + $0x178] sm:$0xff]  ;;  %v1303_v37 = vpack.c.bf16 %v68_v29, %v55_v28  ;;  %v80_v52 = vld [vmem:[%s2445_s1 + $0x1f0] sm:$0xff]  ;;  %v107_v55 = vld [vmem:[%s2445_s1 + $0x2c8] sm:$0xff] }
  0x35   :  { %1222 = vmatpush1.bf16.msra.mxu0 %v1221_v35  ;;  %320 = vmatprep.mubr.f32.mxu0 %v1374_v3  ;;  %v92_v35 = vld [vmem:[%s2445_s1 + $0x250] sm:$0xff]  ;;  %v1273_v40 = vpack.c.bf16 %v65_v32, %v52_v31  ;;  %v131_v62 = vld [vmem:[%s2445_s1 + $0x388] sm:$0xff]  ;;  %v106_v2 = vld [vmem:[%s2445_s1 + $0x2c0] sm:$0xff] }
  0x36   :  { %1224 = vmatprep.subr.bf16.mxu0 %v1223_v39  ;;  %422 = vmatmul.mubr.f32.gmra.mrb[8].mxu1 %v1749_v36  ;;  %v67_v39 = vld [vmem:[%s2445_s1 + $0x188] sm:$0xff]  ;;  %v1275_v43 = vpack.c.bf16 %v92_v35, %v79_v34  ;;  %v104_v58 = vld [vmem:[%s2445_s1 + $0x2b0] sm:$0xff]  ;;  %v133_v6 = vld [vmem:[%s2445_s1 + $0x398] sm:$0xff] }
  0x37   :  { %1254 = vmatpush1.bf16.msra.mxu1 %v1253_v42  ;;  %427 = vmatprep.mubr.f32.mxu1 %v1374_v3  ;;  %v94_v42 = vld [vmem:[%s2445_s1 + $0x260] sm:$0xff]  ;;  %v1305_v47 = vpack.c.bf16 %v67_v39, %v54_v38  ;;  %v157_v13 = vld [vmem:[%s2445_s1 + $0x458] sm:$0xff]  ;;  %v132_v16 = vld [vmem:[%s2445_s1 + $0x390] sm:$0xff] }
  0x38   :  { %1256 = vmatprep.subr.bf16.mxu1 %v1255_v45  ;;  %321 = vmatmul.mubr.f32.gmra.mrb[10].mxu0 %v1782_v50  ;;  %v91_v45 = vld [vmem:[%s2445_s1 + $0x248] sm:$0xff]  ;;  %v1307_v51 = vpack.c.bf16 %v94_v42, %v81_v41  ;;  %v130_v9 = vld [vmem:[%s2445_s1 + $0x380] sm:$0xff]  ;;  %v156_v22 = vld [vmem:[%s2445_s1 + $0x450] sm:$0xff] }
  0x39   :  { %1226 = vmatpush1.bf16.msra.mxu0 %v1225_v49  ;;  %326 = vmatprep.mubr.f32.mxu0 %v1374_v3  ;;  %v118_v49 = vld [vmem:[%s2445_s1 + $0x320] sm:$0xff]  ;;  %v1277_v54 = vpack.c.bf16 %v91_v45, %v78_v44  ;;  %v159_v19 = vld [vmem:[%s2445_s1 + $0x468] sm:$0xff]  ;;  %v185_v32 = vld [vmem:[%s2445_s1 + $0x538] sm:$0xff] }
  0x3a   :  { %1228 = vmatprep.subr.bf16.mxu0 %v1227_v53  ;;  %428 = vmatmul.mubr.f32.gmra.mrb[10].mxu1 %v1782_v50  ;;  %v93_v53 = vld [vmem:[%s2445_s1 + $0x258] sm:$0xff]  ;;  %v1279_v57 = vpack.c.bf16 %v118_v49, %v105_v48  ;;  %v183_v26 = vld [vmem:[%s2445_s1 + $0x528] sm:$0xff]  ;;  %v158_v29 = vld [vmem:[%s2445_s1 + $0x460] sm:$0xff] }
  0x3b   :  { %1258 = vmatpush1.bf16.msra.mxu1 %v1257_v56  ;;  %433 = vmatprep.mubr.f32.mxu1 %v1374_v3  ;;  %v120_v56 = vld [vmem:[%s2445_s1 + $0x330] sm:$0xff]  ;;  %v1309_v61 = vpack.c.bf16 %v93_v53, %v80_v52  ;;  %v182_v35 = vld [vmem:[%s2445_s1 + $0x520] sm:$0xff]  ;;  %v209_v39 = vld [vmem:[%s2445_s1 + $0x5f8] sm:$0xff] }
  0x3c   :  { %1260 = vmatprep.subr.bf16.mxu1 %v1259_v59  ;;  %327 = vmatmul.mubr.f32.gmra.mrb[12].mxu0 %v1815_v0  ;;  %v117_v59 = vld [vmem:[%s2445_s1 + $0x318] sm:$0xff]  ;;  %v1311_v1 = vpack.c.bf16 %v120_v56, %v107_v55  ;;  %v184_v42 = vld [vmem:[%s2445_s1 + $0x530] sm:$0xff]  ;;  %v211_v45 = vld [vmem:[%s2445_s1 + $0x608] sm:$0xff] }
  0x3d   :  { %1230 = vmatpush1.bf16.msra.mxu0 %v1229_v63  ;;  %504 = vmatprep.mubr.f32.mxu0 %v1374_v3  ;;  %v144_v63 = vld [vmem:[%s2445_s1 + $0x3f0] sm:$0xff]  ;;  %v1281_v5 = vpack.c.bf16 %v117_v59, %v104_v58  ;;  %v223_v55 = vld [vmem:[%s2445_s1 + $0x668] sm:$0xff] }
  0x3e   :  { %1232 = vmatprep.subr.bf16.mxu0 %v1231_v4  ;;  %434 = vmatmul.mubr.f32.gmra.mrb[12].mxu1 %v1815_v0  ;;  %v119_v4 = vld [vmem:[%s2445_s1 + $0x328] sm:$0xff]  ;;  %v1283_v8 = vpack.c.bf16 %v144_v63, %v131_v62  ;;  %v208_v49 = vld [vmem:[%s2445_s1 + $0x5f0] sm:$0xff]  ;;  %v1375_v62 = vmov 0.0|0.0  }
  0x3f   :  { %1262 = vmatpush1.bf16.msra.mxu1 %v1261_v7  ;;  %611 = vmatprep.mubr.f32.mxu1 %v1374_v3  ;;  %v146_v7 = vld [vmem:[%s2445_s1 + $0x400] sm:$0xff]  ;;  %v1313_v12 = vpack.c.bf16 %v119_v4, %v106_v2  ;;  %v43_v58 = vld [vmem:[%s2445_s1 + $0xc8] sm:$0xff]  ;;  %v56_v63 = vld [vmem:[%s2445_s1 + $0x130] sm:$0xff] }
  0x40   :  { %1264 = vmatprep.subr.bf16.mxu1 %v1263_v11  ;;  %v143_v11 = vld [vmem:[%s2445_s1 + $0x3e8] sm:$0xff]  ;;  %v1315_v15 = vpack.c.bf16 %v146_v7, %v133_v6  ;;  %v82_v4 = vld [vmem:[%s2445_s1 + $0x200] sm:$0xff]  ;;  %v108_v7 = vld [vmem:[%s2445_s1 + $0x2d0] sm:$0xff] }
  0x41   :  { %1234 = vmatpush1.bf16.msra.mxu0 %v1233_v14  ;;  %v170_v14 = vld [vmem:[%s2445_s1 + $0x4c0] sm:$0xff]  ;;  %v1285_v18 = vpack.c.bf16 %v143_v11, %v130_v9 }
  0x42   :  { %1268 = vmatprep.subr.bf16.mxu0 %v1267_v17  ;;  %v145_v17 = vld [vmem:[%s2445_s1 + $0x3f8] sm:$0xff]  ;;  %v1287_v21 = vpack.c.bf16 %v170_v14, %v157_v13  ;;  %v134_v11 = vld [vmem:[%s2445_s1 + $0x3a0] sm:$0xff]  ;;  %v160_v14 = vld [vmem:[%s2445_s1 + $0x470] sm:$0xff] }
  0x43   :  { %1266 = vmatpush1.bf16.msra.mxu1 %v1265_v20  ;;  %v172_v20 = vld [vmem:[%s2445_s1 + $0x4d0] sm:$0xff]  ;;  %v1317_v25 = vpack.c.bf16 %v145_v17, %v132_v16  ;;  %v186_v17 = vld [vmem:[%s2445_s1 + $0x540] sm:$0xff] }
  0x44   :  { %505 = vmatmul.mubr.f32.vlgmr.msra.gmra.mrb[14].mxu0 %v1619_v46  ;;  %1300 = vmatprep.subr.bf16.mxu1 %v1299_v24  ;;  %v169_v24 = vld [vmem:[%s2445_s1 + $0x4b8] sm:$0xff]  ;;  %v1319_v28 = vpack.c.bf16 %v172_v20, %v159_v19  ;;  %v212_v20 = vld [vmem:[%s2445_s1 + $0x610] sm:$0xff] }
  0x45   :  { %1270 = vmatpush1.bf16.msra.mxu0 %v1269_v27  ;;  %510 = vmatprep.mubr.f32.mxu0 %v1374_v3  ;;  %v196_v27 = vld [vmem:[%s2445_s1 + $0x590] sm:$0xff]  ;;  %v1289_v31 = vpack.c.bf16 %v169_v24, %v156_v22 }
  0x46   :  { %612 = vmatmul.mubr.f32.vlgmr.msra.gmra.mrb[14].mxu1 %v1619_v46  ;;  %1272 = vmatprep.subr.bf16.mxu0 %v1271_v30  ;;  %v171_v30 = vld [vmem:[%s2445_s1 + $0x4c8] sm:$0xff]  ;;  %v1291_v34 = vpack.c.bf16 %v196_v27, %v183_v26 }
  0x47   :  { %1302 = vmatpush1.bf16.msra.mxu1 %v1301_v33  ;;  %617 = vmatprep.mubr.f32.mxu1 %v1374_v3  ;;  %v198_v33 = vld [vmem:[%s2445_s1 + $0x5a0] sm:$0xff]  ;;  %v1321_v38 = vpack.c.bf16 %v171_v30, %v158_v29 }
  0x48   :  { %1304 = vmatprep.subr.bf16.mxu1 %v1303_v37  ;;  %511 = vmatmul.mubr.f32.gmra.mrb[16].mxu0 %v1650_v60  ;;  %v195_v37 = vld [vmem:[%s2445_s1 + $0x588] sm:$0xff]  ;;  %v1323_v41 = vpack.c.bf16 %v198_v33, %v185_v32 }
  0x49   :  { %1274 = vmatpush1.bf16.msra.mxu0 %v1273_v40  ;;  %516 = vmatprep.mubr.f32.mxu0 %v1374_v3  ;;  %v222_v40 = vld [vmem:[%s2445_s1 + $0x660] sm:$0xff]  ;;  %v1293_v44 = vpack.c.bf16 %v195_v37, %v182_v35 }
  0x4a   :  { %1276 = vmatprep.subr.bf16.mxu0 %v1275_v43  ;;  %618 = vmatmul.mubr.f32.gmra.mrb[16].mxu1 %v1650_v60  ;;  %v197_v43 = vld [vmem:[%s2445_s1 + $0x598] sm:$0xff]  ;;  %v1295_v48 = vpack.c.bf16 %v222_v40, %v209_v39 }
  0x4b   :  { %1306 = vmatpush1.bf16.msra.mxu1 %v1305_v47  ;;  %623 = vmatprep.mubr.f32.mxu1 %v1374_v3  ;;  %v224_v47 = vld [vmem:[%s2445_s1 + $0x670] sm:$0xff]  ;;  %v1325_v52 = vpack.c.bf16 %v197_v43, %v184_v42 }
  0x4c   :  { %1308 = vmatprep.subr.bf16.mxu1 %v1307_v51  ;;  %517 = vmatmul.mubr.f32.gmra.mrb[18].mxu0 %v1683_v10  ;;  %v221_v51 = vld [vmem:[%s2445_s1 + $0x658] sm:$0xff]  ;;  %v1327_v53 = vpack.c.bf16 %v224_v47, %v211_v45 }
  0x4d   :  { %1278 = vmatpush1.bf16.msra.mxu0 %v1277_v54  ;;  %522 = vmatprep.mubr.f32.mxu0 %v1374_v3  ;;  %v210_v54 = vld [vmem:[%s2445_s1 + $0x600] sm:$0xff]  ;;  %v1297_v56 = vpack.c.bf16 %v221_v51, %v208_v49 }
  0x4e   :  { %1280 = vmatprep.subr.bf16.mxu0 %v1279_v57  ;;  %624 = vmatmul.mubr.f32.gmra.mrb[18].mxu1 %v1683_v10  ;;  %v30_v57 = vld [vmem:[%s2445_s1 + $0x60] sm:$0xff]  ;;  %v1329_v59 = vpack.c.bf16 %v223_v55, %v210_v54 }
  0x4f   :  { %1310 = vmatpush1.bf16.msra.mxu1 %v1309_v61  ;;  %629 = vmatprep.mubr.f32.mxu1 %v1374_v3  ;;  %v1332_v61 = vpack.c.bf16 %v43_v58, %v30_v57 }
  0x50   :  { %1312 = vmatprep.subr.bf16.mxu1 %v1311_v1  ;;  %523 = vmatmul.mubr.f32.gmra.mrb[20].mxu0 %v1716_v23  ;;  %v69_v1 = vld [vmem:[%s2445_s1 + $0x198] sm:$0xff] }
  0x51   :  { %1282 = vmatpush1.bf16.msra.mxu0 %v1281_v5  ;;  %528 = vmatprep.mubr.f32.mxu0 %v1374_v3  ;;  %v1335_v2 = vpack.c.bf16 %v69_v1, %v56_v63  ;;  %v95_v5 = vld [vmem:[%s2445_s1 + $0x268] sm:$0xff] }
  0x52   :  { %1284 = vmatprep.subr.bf16.mxu0 %v1283_v8  ;;  %630 = vmatmul.mubr.f32.gmra.mrb[20].mxu1 %v1716_v23  ;;  %v1338_v6 = vpack.c.bf16 %v95_v5, %v82_v4  ;;  %v121_v8 = vld [vmem:[%s2445_s1 + $0x338] sm:$0xff] }
  0x53   :  { %1314 = vmatpush1.bf16.msra.mxu1 %v1313_v12  ;;  %635 = vmatprep.mubr.f32.mxu1 %v1374_v3  ;;  %v1341_v9 = vpack.c.bf16 %v121_v8, %v108_v7  ;;  %v147_v12 = vld [vmem:[%s2445_s1 + $0x408] sm:$0xff] }
  0x54   :  { %1316 = vmatprep.subr.bf16.mxu1 %v1315_v15  ;;  %529 = vmatmul.mubr.f32.gmra.mrb[22].mxu0 %v1749_v36  ;;  %v1344_v13 = vpack.c.bf16 %v147_v12, %v134_v11  ;;  %v173_v15 = vld [vmem:[%s2445_s1 + $0x4d8] sm:$0xff] }
  0x55   :  { %1286 = vmatpush1.bf16.msra.mxu0 %v1285_v18  ;;  %534 = vmatprep.mubr.f32.mxu0 %v1374_v3  ;;  %v1347_v16 = vpack.c.bf16 %v173_v15, %v160_v14  ;;  %v199_v18 = vld [vmem:[%s2445_s1 + $0x5a8] sm:$0xff] }
  0x56   :  { %1288 = vmatprep.subr.bf16.mxu0 %v1287_v21  ;;  %636 = vmatmul.mubr.f32.gmra.mrb[22].mxu1 %v1749_v36  ;;  %v1350_v19 = vpack.c.bf16 %v199_v18, %v186_v17  ;;  %v225_v21 = vld [vmem:[%s2445_s1 + $0x678] sm:$0xff] }
  0x57   :  { %1318 = vmatpush1.bf16.msra.mxu1 %v1317_v25  ;;  %641 = vmatprep.mubr.f32.mxu1 %v1374_v3  ;;  %v1353_v22 = vpack.c.bf16 %v225_v21, %v212_v20 }
  0x58   :  { %1320 = vmatprep.subr.bf16.mxu1 %v1319_v28  ;;  %535 = vmatmul.mubr.f32.gmra.mrb[24].mxu0 %v1782_v50 }
  0x59   :  { %1290 = vmatpush1.bf16.msra.mxu0 %v1289_v31  ;;  %540 = vmatprep.mubr.f32.mxu0 %v1374_v3 }
  0x5a   :  { %1292 = vmatprep.subr.bf16.mxu0 %v1291_v34  ;;  %642 = vmatmul.mubr.f32.gmra.mrb[24].mxu1 %v1782_v50 }
  0x5b   :  { %1322 = vmatpush1.bf16.msra.mxu1 %v1321_v38  ;;  %647 = vmatprep.mubr.f32.mxu1 %v1374_v3 }
  0x5c   :  { %1324 = vmatprep.subr.bf16.mxu1 %v1323_v41  ;;  %541 = vmatmul.mubr.f32.gmra.mrb[26].mxu0 %v1815_v0 }
  0x5d   :  { %1294 = vmatpush1.bf16.msra.mxu0 %v1293_v44  ;;  %718 = vmatprep.mubr.f32.mxu0 %v1374_v3 }
  0x5e   :  { %1296 = vmatprep.subr.bf16.mxu0 %v1295_v48  ;;  %648 = vmatmul.mubr.f32.gmra.mrb[26].mxu1 %v1815_v0 }
  0x5f   :  { %1326 = vmatpush1.bf16.msra.mxu1 %v1325_v52  ;;  %825 = vmatprep.mubr.f32.mxu1 %v1374_v3 }
  0x60   :  { %1328 = vmatprep.subr.bf16.mxu1 %v1327_v53 }
  0x61   :  { %1298 = vmatpush1.bf16.msra.mxu0 %v1297_v56 }
  0x62   :  { %1331 = vmatprep.subr.bf16.mxu0 %v1375_v62 }
  0x63   :  { %1330 = vmatpush1.bf16.msra.mxu1 %v1329_v59 }
  0x64   :  { %719 = vmatmul.mubr.f32.vlgmr.msra.gmra.mrb[28].mxu0 %v1619_v46  ;;  %1355 = vmatprep.subr.bf16.mxu1 %v1375_v62 }
  0x65   :  { %1333 = vmatpush3.bf16.msra.mxu0 %v1332_v61  ;;  %724 = vmatprep.mubr.f32.mxu0 %v1374_v3 }
  0x66   :  { %826 = vmatmul.mubr.f32.vlgmr.msra.gmra.mrb[28].mxu1 %v1619_v46  ;;  %1334 = vmatprep.subr.bf16.mxu0 %v1375_v62 }
  0x67   :  { %1363 = vmatpush3.bf16.msra.mxu1 %v1332_v61  ;;  %831 = vmatprep.mubr.f32.mxu1 %v1374_v3 }
  0x68   :  { %725 = vmatmul.mubr.f32.gmra.mrb[30].mxu0 %v1650_v60  ;;  %1356 = vmatprep.subr.bf16.mxu1 %v1375_v62 }
  0x69   :  { %1336 = vmatpush3.bf16.msra.mxu0 %v1335_v2  ;;  %730 = vmatprep.mubr.f32.mxu0 %v1374_v3 }
  0x6a   :  { %1337 = vmatprep.subr.bf16.mxu0 %v1375_v62  ;;  %832 = vmatmul.mubr.f32.gmra.mrb[30].mxu1 %v1650_v60 }
  0x6b   :  { %1364 = vmatpush3.bf16.msra.mxu1 %v1335_v2  ;;  %837 = vmatprep.mubr.f32.mxu1 %v1374_v3 }
  0x6c   :  { %731 = vmatmul.mubr.f32.gmra.mrb[32].mxu0 %v1683_v10  ;;  %1357 = vmatprep.subr.bf16.mxu1 %v1375_v62 }
  0x6d   :  { %1339 = vmatpush3.bf16.msra.mxu0 %v1338_v6  ;;  %736 = vmatprep.mubr.f32.mxu0 %v1374_v3 }
  0x6e   :  { %1340 = vmatprep.subr.bf16.mxu0 %v1375_v62  ;;  %838 = vmatmul.mubr.f32.gmra.mrb[32].mxu1 %v1683_v10 }
  0x6f   :  { %1365 = vmatpush3.bf16.msra.mxu1 %v1338_v6  ;;  %843 = vmatprep.mubr.f32.mxu1 %v1374_v3 }
  0x70   :  { %737 = vmatmul.mubr.f32.gmra.mrb[34].mxu0 %v1716_v23  ;;  %1358 = vmatprep.subr.bf16.mxu1 %v1375_v62 }
  0x71   :  { %1342 = vmatpush3.bf16.msra.mxu0 %v1341_v9  ;;  %742 = vmatprep.mubr.f32.mxu0 %v1374_v3 }
  0x72   :  { %1343 = vmatprep.subr.bf16.mxu0 %v1375_v62  ;;  %844 = vmatmul.mubr.f32.gmra.mrb[34].mxu1 %v1716_v23 }
  0x73   :  { %1366 = vmatpush3.bf16.msra.mxu1 %v1341_v9  ;;  %849 = vmatprep.mubr.f32.mxu1 %v1374_v3 }
  0x74   :  { %743 = vmatmul.mubr.f32.gmra.mrb[36].mxu0 %v1749_v36  ;;  %1359 = vmatprep.subr.bf16.mxu1 %v1375_v62 }
  0x75   :  { %1345 = vmatpush3.bf16.msra.mxu0 %v1344_v13  ;;  %748 = vmatprep.mubr.f32.mxu0 %v1374_v3 }
  0x76   :  { %1346 = vmatprep.subr.bf16.mxu0 %v1375_v62  ;;  %850 = vmatmul.mubr.f32.gmra.mrb[36].mxu1 %v1749_v36 }
  0x77   :  { %1367 = vmatpush3.bf16.msra.mxu1 %v1344_v13  ;;  %855 = vmatprep.mubr.f32.mxu1 %v1374_v3 }
  0x78   :  { %749 = vmatmul.mubr.f32.gmra.mrb[38].mxu0 %v1782_v50  ;;  %1360 = vmatprep.subr.bf16.mxu1 %v1375_v62 }
  0x79   :  { %1348 = vmatpush3.bf16.msra.mxu0 %v1347_v16  ;;  %754 = vmatprep.mubr.f32.mxu0 %v1374_v3 }
  0x7a   :  { %1349 = vmatprep.subr.bf16.mxu0 %v1375_v62  ;;  %856 = vmatmul.mubr.f32.gmra.mrb[38].mxu1 %v1782_v50 }
  0x7b   :  { %1368 = vmatpush3.bf16.msra.mxu1 %v1347_v16  ;;  %861 = vmatprep.mubr.f32.mxu1 %v1374_v3 }
  0x7c   :  { %755 = vmatmul.mubr.f32.gmra.mrb[40].mxu0 %v1815_v0  ;;  %1361 = vmatprep.subr.bf16.mxu1 %v1375_v62 }
  0x7d   :  { %1351 = vmatpush3.bf16.msra.mxu0 %v1350_v19  ;;  %1118 = vmatprep.mubr.msk.f32.mxu0 %vm1376_vm0, %v1374_v3 }
  0x7e   :  { %1352 = vmatprep.subr.bf16.mxu0 %v1375_v62  ;;  %862 = vmatmul.mubr.f32.gmra.mrb[40].mxu1 %v1815_v0 }
  0x7f   :  { %1369 = vmatpush3.bf16.msra.mxu1 %v1350_v19  ;;  %1130 = vmatprep.mubr.msk.f32.mxu1 %vm1376_vm0, %v1374_v3 }
  0x80   :  { %1362 = vmatprep.subr.bf16.mxu1 %v1375_v62 }
  0x81   :  { %1354 = vmatpush3.bf16.msra.mxu0 %v1353_v22 }
  0x83   :  { %1370 = vmatpush3.bf16.msra.mxu1 %v1353_v22 }
  0x84   :  { %1119 = vmatmul.mubr.f32.vlgmr.msra.gmra.mrb[42].mxu0 %v1619_v46 }
  0x85   :  { %1121 = vmatprep.mubr.msk.f32.mxu0 %vm1376_vm0, %v1374_v3 }
  0x86   :  { %1131 = vmatmul.mubr.f32.vlgmr.msra.gmra.mrb[42].mxu1 %v1749_v36 }
  0x87   :  { %1133 = vmatprep.mubr.msk.f32.mxu1 %vm1376_vm0, %v1374_v3 }
  0x88   :  { %1122 = vmatmul.mubr.f32.gmra.mrb[44].mxu0 %v1650_v60 }
  0x89   :  { %1124 = vmatprep.mubr.msk.f32.mxu0 %vm1376_vm0, %v1374_v3 }
  0x8a   :  { %1134 = vmatmul.mubr.f32.gmra.mrb[44].mxu1 %v1782_v50 }
  0x8b   :  { %1136 = vmatprep.mubr.msk.f32.mxu1 %vm1376_vm0, %v1374_v3 }
  0x8c   :  { %1125 = vmatmul.mubr.f32.gmra.mrb[46].mxu0 %v1683_v10 }
  0x8d   :  { %1127 = vmatprep.mubr.msk.f32.mxu0 %vm1376_vm0, %v1374_v3 }
  0x8e   :  { %1137 = vmatmul.mubr.f32.gmra.mrb[46].mxu1 %v1815_v0 }
  0x90   :  { %1128 = vmatmul.mubr.f32.gmra.mrb[48].mxu0 %v1716_v23 }
  0xf7   :  { %v292_v46 = vpop.f32.mrb[0].mxu0 }
  0xf8   :  { %968 = vst [vmem:[%s2447_s2] sm:$0xff] %v292_v46  ;;  %v294_v60 = vpop.f32.mrb[1].mxu0 }
  0xf9   :  { %969 = vst [vmem:[%s2447_s2 + $0x8] sm:$0xff] %v294_v60  ;;  %v399_v36 = vpop.f32.mrb[0].mxu1 }
  0xfa   :  { %970 = vst [vmem:[%s2447_s2 + $0x10] sm:$0xff] %v399_v36  ;;  %v401_v3 = vpop.f32.mrb[1].mxu1 }
  0xfb   :  { %971 = vst [vmem:[%s2447_s2 + $0x18] sm:$0xff] %v401_v3  ;;  %v298_v10 = vpop.f32.mrb[2].mxu0 }
  0xfc   :  { %981 = vst [vmem:[%s2447_s2 + $0x68] sm:$0xff] %v298_v10  ;;  %v300_v23 = vpop.f32.mrb[3].mxu0 }
  0xfd   :  { %982 = vst [vmem:[%s2447_s2 + $0x70] sm:$0xff] %v300_v23  ;;  %v405_v50 = vpop.f32.mrb[2].mxu1 }
  0xfe   :  { %983 = vst [vmem:[%s2447_s2 + $0x78] sm:$0xff] %v405_v50  ;;  %v407_v0 = vpop.f32.mrb[3].mxu1 }
  0xff   :  { %v304_v24 = vpop.f32.mrb[4].mxu0  ;;  %984 = vst [vmem:[%s2447_s2 + $0x80] sm:$0xff] %v407_v0 }
 0x100   :  { %994 = vst [vmem:[%s2447_s2 + $0xd0] sm:$0xff] %v304_v24  ;;  %v306_v25 = vpop.f32.mrb[5].mxu0 }
 0x101   :  { %995 = vst [vmem:[%s2447_s2 + $0xd8] sm:$0xff] %v306_v25  ;;  %v411_v26 = vpop.f32.mrb[4].mxu1 }
 0x102   :  { %996 = vst [vmem:[%s2447_s2 + $0xe0] sm:$0xff] %v411_v26  ;;  %v413_v27 = vpop.f32.mrb[5].mxu1 }
 0x103   :  { %v310_v28 = vpop.f32.mrb[6].mxu0  ;;  %997 = vst [vmem:[%s2447_s2 + $0xe8] sm:$0xff] %v413_v27 }
 0x104   :  { %1007 = vst [vmem:[%s2447_s2 + $0x138] sm:$0xff] %v310_v28  ;;  %v312_v29 = vpop.f32.mrb[7].mxu0 }
 0x105   :  { %1008 = vst [vmem:[%s2447_s2 + $0x140] sm:$0xff] %v312_v29  ;;  %v417_v30 = vpop.f32.mrb[6].mxu1 }
 0x106   :  { %1009 = vst [vmem:[%s2447_s2 + $0x148] sm:$0xff] %v417_v30  ;;  %v419_v31 = vpop.f32.mrb[7].mxu1 }
 0x107   :  { %v316_v32 = vpop.f32.mrb[8].mxu0  ;;  %1010 = vst [vmem:[%s2447_s2 + $0x150] sm:$0xff] %v419_v31 }
 0x108   :  { %1020 = vst [vmem:[%s2447_s2 + $0x1a0] sm:$0xff] %v316_v32  ;;  %v318_v33 = vpop.f32.mrb[9].mxu0 }
 0x109   :  { %1021 = vst [vmem:[%s2447_s2 + $0x1a8] sm:$0xff] %v318_v33  ;;  %v423_v34 = vpop.f32.mrb[8].mxu1 }
 0x10a   :  { %1022 = vst [vmem:[%s2447_s2 + $0x1b0] sm:$0xff] %v423_v34  ;;  %v425_v35 = vpop.f32.mrb[9].mxu1 }
 0x10b   :  { %v322_v37 = vpop.f32.mrb[10].mxu0  ;;  %1023 = vst [vmem:[%s2447_s2 + $0x1b8] sm:$0xff] %v425_v35 }
 0x10c   :  { %1033 = vst [vmem:[%s2447_s2 + $0x208] sm:$0xff] %v322_v37  ;;  %v324_v38 = vpop.f32.mrb[11].mxu0 }
 0x10d   :  { %1034 = vst [vmem:[%s2447_s2 + $0x210] sm:$0xff] %v324_v38  ;;  %v429_v39 = vpop.f32.mrb[10].mxu1 }
 0x10e   :  { %1035 = vst [vmem:[%s2447_s2 + $0x218] sm:$0xff] %v429_v39  ;;  %v431_v40 = vpop.f32.mrb[11].mxu1 }
 0x10f   :  { %v328_v41 = vpop.f32.mrb[12].mxu0  ;;  %1036 = vst [vmem:[%s2447_s2 + $0x220] sm:$0xff] %v431_v40 }
 0x110   :  { %1046 = vst [vmem:[%s2447_s2 + $0x270] sm:$0xff] %v328_v41  ;;  %v330_v42 = vpop.f32.mrb[13].mxu0 }
 0x111   :  { %1047 = vst [vmem:[%s2447_s2 + $0x278] sm:$0xff] %v330_v42  ;;  %v435_v43 = vpop.f32.mrb[12].mxu1 }
 0x112   :  { %1048 = vst [vmem:[%s2447_s2 + $0x280] sm:$0xff] %v435_v43  ;;  %v437_v44 = vpop.f32.mrb[13].mxu1 }
 0x113   :  { %1049 = vst [vmem:[%s2447_s2 + $0x288] sm:$0xff] %v437_v44 }
 0x117   :  { %v506_v45 = vpop.f32.mrb[14].mxu0 }
 0x118   :  { %972 = vst [vmem:[%s2447_s2 + $0x20] sm:$0xff] %v506_v45  ;;  %v508_v47 = vpop.f32.mrb[15].mxu0 }
 0x119   :  { %973 = vst [vmem:[%s2447_s2 + $0x28] sm:$0xff] %v508_v47  ;;  %v613_v48 = vpop.f32.mrb[14].mxu1 }
 0x11a   :  { %974 = vst [vmem:[%s2447_s2 + $0x30] sm:$0xff] %v613_v48  ;;  %v615_v49 = vpop.f32.mrb[15].mxu1 }
 0x11b   :  { %975 = vst [vmem:[%s2447_s2 + $0x38] sm:$0xff] %v615_v49  ;;  %v512_v51 = vpop.f32.mrb[16].mxu0 }
 0x11c   :  { %985 = vst [vmem:[%s2447_s2 + $0x88] sm:$0xff] %v512_v51  ;;  %v514_v52 = vpop.f32.mrb[17].mxu0 }
 0x11d   :  { %986 = vst [vmem:[%s2447_s2 + $0x90] sm:$0xff] %v514_v52  ;;  %v619_v53 = vpop.f32.mrb[16].mxu1 }
 0x11e   :  { %987 = vst [vmem:[%s2447_s2 + $0x98] sm:$0xff] %v619_v53  ;;  %v621_v54 = vpop.f32.mrb[17].mxu1 }
 0x11f   :  { %v518_v55 = vpop.f32.mrb[18].mxu0  ;;  %988 = vst [vmem:[%s2447_s2 + $0xa0] sm:$0xff] %v621_v54 }
 0x120   :  { %998 = vst [vmem:[%s2447_s2 + $0xf0] sm:$0xff] %v518_v55  ;;  %v520_v56 = vpop.f32.mrb[19].mxu0 }
 0x121   :  { %999 = vst [vmem:[%s2447_s2 + $0xf8] sm:$0xff] %v520_v56  ;;  %v625_v57 = vpop.f32.mrb[18].mxu1 }
 0x122   :  { %1000 = vst [vmem:[%s2447_s2 + $0x100] sm:$0xff] %v625_v57  ;;  %v627_v58 = vpop.f32.mrb[19].mxu1 }
 0x123   :  { %v524_v59 = vpop.f32.mrb[20].mxu0  ;;  %1001 = vst [vmem:[%s2447_s2 + $0x108] sm:$0xff] %v627_v58 }
 0x124   :  { %1011 = vst [vmem:[%s2447_s2 + $0x158] sm:$0xff] %v524_v59  ;;  %v526_v61 = vpop.f32.mrb[21].mxu0 }
 0x125   :  { %1012 = vst [vmem:[%s2447_s2 + $0x160] sm:$0xff] %v526_v61  ;;  %v631_v62 = vpop.f32.mrb[20].mxu1 }
 0x126   :  { %1013 = vst [vmem:[%s2447_s2 + $0x168] sm:$0xff] %v631_v62  ;;  %v633_v63 = vpop.f32.mrb[21].mxu1 }
 0x127   :  { %v530_v1 = vpop.f32.mrb[22].mxu0  ;;  %1014 = vst [vmem:[%s2447_s2 + $0x170] sm:$0xff] %v633_v63 }
 0x128   :  { %1024 = vst [vmem:[%s2447_s2 + $0x1c0] sm:$0xff] %v530_v1  ;;  %v532_v2 = vpop.f32.mrb[23].mxu0 }
 0x129   :  { %1025 = vst [vmem:[%s2447_s2 + $0x1c8] sm:$0xff] %v532_v2  ;;  %v637_v4 = vpop.f32.mrb[22].mxu1 }
 0x12a   :  { %1026 = vst [vmem:[%s2447_s2 + $0x1d0] sm:$0xff] %v637_v4  ;;  %v639_v5 = vpop.f32.mrb[23].mxu1 }
 0x12b   :  { %v536_v6 = vpop.f32.mrb[24].mxu0  ;;  %1027 = vst [vmem:[%s2447_s2 + $0x1d8] sm:$0xff] %v639_v5 }
 0x12c   :  { %1037 = vst [vmem:[%s2447_s2 + $0x228] sm:$0xff] %v536_v6  ;;  %v538_v7 = vpop.f32.mrb[25].mxu0 }
 0x12d   :  { %1038 = vst [vmem:[%s2447_s2 + $0x230] sm:$0xff] %v538_v7  ;;  %v643_v8 = vpop.f32.mrb[24].mxu1 }
 0x12e   :  { %1039 = vst [vmem:[%s2447_s2 + $0x238] sm:$0xff] %v643_v8  ;;  %v645_v9 = vpop.f32.mrb[25].mxu1 }
 0x12f   :  { %v542_v11 = vpop.f32.mrb[26].mxu0  ;;  %1040 = vst [vmem:[%s2447_s2 + $0x240] sm:$0xff] %v645_v9 }
 0x130   :  { %1050 = vst [vmem:[%s2447_s2 + $0x290] sm:$0xff] %v542_v11  ;;  %v544_v12 = vpop.f32.mrb[27].mxu0 }
 0x131   :  { %1051 = vst [vmem:[%s2447_s2 + $0x298] sm:$0xff] %v544_v12  ;;  %v649_v13 = vpop.f32.mrb[26].mxu1 }
 0x132   :  { %1052 = vst [vmem:[%s2447_s2 + $0x2a0] sm:$0xff] %v649_v13  ;;  %v651_v14 = vpop.f32.mrb[27].mxu1 }
 0x133   :  { %1053 = vst [vmem:[%s2447_s2 + $0x2a8] sm:$0xff] %v651_v14 }
 0x137   :  { %v720_v15 = vpop.f32.mrb[28].mxu0 }
 0x138   :  { %976 = vst [vmem:[%s2447_s2 + $0x40] sm:$0xff] %v720_v15  ;;  %v722_v16 = vpop.f32.mrb[29].mxu0 }
 0x139   :  { %977 = vst [vmem:[%s2447_s2 + $0x48] sm:$0xff] %v722_v16  ;;  %v827_v17 = vpop.f32.mrb[28].mxu1 }
 0x13a   :  { %978 = vst [vmem:[%s2447_s2 + $0x50] sm:$0xff] %v827_v17  ;;  %v829_v18 = vpop.f32.mrb[29].mxu1 }
 0x13b   :  { %979 = vst [vmem:[%s2447_s2 + $0x58] sm:$0xff] %v829_v18  ;;  %v726_v19 = vpop.f32.mrb[30].mxu0 }
 0x13c   :  { %989 = vst [vmem:[%s2447_s2 + $0xa8] sm:$0xff] %v726_v19  ;;  %v728_v20 = vpop.f32.mrb[31].mxu0 }
 0x13d   :  { %990 = vst [vmem:[%s2447_s2 + $0xb0] sm:$0xff] %v728_v20  ;;  %v833_v21 = vpop.f32.mrb[30].mxu1 }
 0x13e   :  { %991 = vst [vmem:[%s2447_s2 + $0xb8] sm:$0xff] %v833_v21  ;;  %v835_v22 = vpop.f32.mrb[31].mxu1 }
 0x13f   :  { %v732_v46 = vpop.f32.mrb[32].mxu0  ;;  %992 = vst [vmem:[%s2447_s2 + $0xc0] sm:$0xff] %v835_v22 }
 0x140   :  { %1002 = vst [vmem:[%s2447_s2 + $0x110] sm:$0xff] %v732_v46  ;;  %v734_v60 = vpop.f32.mrb[33].mxu0 }
 0x141   :  { %1003 = vst [vmem:[%s2447_s2 + $0x118] sm:$0xff] %v734_v60  ;;  %v839_v36 = vpop.f32.mrb[32].mxu1 }
 0x142   :  { %1004 = vst [vmem:[%s2447_s2 + $0x120] sm:$0xff] %v839_v36  ;;  %v841_v3 = vpop.f32.mrb[33].mxu1 }
 0x143   :  { %v738_v10 = vpop.f32.mrb[34].mxu0  ;;  %1005 = vst [vmem:[%s2447_s2 + $0x128] sm:$0xff] %v841_v3 }
 0x144   :  { %1015 = vst [vmem:[%s2447_s2 + $0x178] sm:$0xff] %v738_v10  ;;  %v740_v23 = vpop.f32.mrb[35].mxu0 }
 0x145   :  { %1016 = vst [vmem:[%s2447_s2 + $0x180] sm:$0xff] %v740_v23  ;;  %v845_v50 = vpop.f32.mrb[34].mxu1 }
 0x146   :  { %1017 = vst [vmem:[%s2447_s2 + $0x188] sm:$0xff] %v845_v50  ;;  %v847_v0 = vpop.f32.mrb[35].mxu1 }
 0x147   :  { %v744_v24 = vpop.f32.mrb[36].mxu0  ;;  %1018 = vst [vmem:[%s2447_s2 + $0x190] sm:$0xff] %v847_v0 }
 0x148   :  { %1028 = vst [vmem:[%s2447_s2 + $0x1e0] sm:$0xff] %v744_v24  ;;  %v746_v25 = vpop.f32.mrb[37].mxu0 }
 0x149   :  { %1029 = vst [vmem:[%s2447_s2 + $0x1e8] sm:$0xff] %v746_v25  ;;  %v851_v26 = vpop.f32.mrb[36].mxu1 }
 0x14a   :  { %1030 = vst [vmem:[%s2447_s2 + $0x1f0] sm:$0xff] %v851_v26  ;;  %v853_v27 = vpop.f32.mrb[37].mxu1 }
 0x14b   :  { %v750_v28 = vpop.f32.mrb[38].mxu0  ;;  %1031 = vst [vmem:[%s2447_s2 + $0x1f8] sm:$0xff] %v853_v27 }
 0x14c   :  { %1041 = vst [vmem:[%s2447_s2 + $0x248] sm:$0xff] %v750_v28  ;;  %v752_v29 = vpop.f32.mrb[39].mxu0 }
 0x14d   :  { %1042 = vst [vmem:[%s2447_s2 + $0x250] sm:$0xff] %v752_v29  ;;  %v857_v30 = vpop.f32.mrb[38].mxu1 }
 0x14e   :  { %1043 = vst [vmem:[%s2447_s2 + $0x258] sm:$0xff] %v857_v30  ;;  %v859_v31 = vpop.f32.mrb[39].mxu1 }
 0x14f   :  { %v756_v32 = vpop.f32.mrb[40].mxu0  ;;  %1044 = vst [vmem:[%s2447_s2 + $0x260] sm:$0xff] %v859_v31 }
 0x150   :  { %1054 = vst [vmem:[%s2447_s2 + $0x2b0] sm:$0xff] %v756_v32  ;;  %v758_v33 = vpop.f32.mrb[41].mxu0 }
 0x151   :  { %1055 = vst [vmem:[%s2447_s2 + $0x2b8] sm:$0xff] %v758_v33  ;;  %v863_v34 = vpop.f32.mrb[40].mxu1 }
 0x152   :  { %1056 = vst [vmem:[%s2447_s2 + $0x2c0] sm:$0xff] %v863_v34  ;;  %v865_v35 = vpop.f32.mrb[41].mxu1 }
 0x153   :  { %1057 = vst [vmem:[%s2447_s2 + $0x2c8] sm:$0xff] %v865_v35 }
 0x157   :  { %v934_v37 = vpop.f32.mrb[42].mxu0 }
 0x158   :  { %980 = vst [vmem:[%s2447_s2 + $0x60] sm:$0xff] %v934_v37  ;;  %v1120_v38 = vpop.f32.mrb[43].mxu0 }
 0x159   :  { %v954_v39 = vpop.f32.mrb[42].mxu1 }
 0x15a   :  { %1032 = vst [vmem:[%s2447_s2 + $0x200] sm:$0xff] %v954_v39  ;;  %v1132_v40 = vpop.f32.mrb[43].mxu1 }
 0x15b   :  { %v939_v41 = vpop.f32.mrb[44].mxu0 }
 0x15c   :  { %993 = vst [vmem:[%s2447_s2 + $0xc8] sm:$0xff] %v939_v41  ;;  %v1123_v42 = vpop.f32.mrb[45].mxu0 }
 0x15d   :  { %v959_v43 = vpop.f32.mrb[44].mxu1 }
 0x15e   :  { %1045 = vst [vmem:[%s2447_s2 + $0x268] sm:$0xff] %v959_v43  ;;  %v1135_v44 = vpop.f32.mrb[45].mxu1 }
 0x15f   :  { %v944_v45 = vpop.f32.mrb[46].mxu0 }
 0x160   :  { %1006 = vst [vmem:[%s2447_s2 + $0x130] sm:$0xff] %v944_v45  ;;  %v1126_v47 = vpop.f32.mrb[47].mxu0 }
 0x161   :  { %v964_v48 = vpop.f32.mrb[46].mxu1 }
 0x162   :  { %1058 = vst [vmem:[%s2447_s2 + $0x2d0] sm:$0xff] %v964_v48  ;;  %v1138_v49 = vpop.f32.mrb[47].mxu1 }
 0x163   :  { %v949_v51 = vpop.f32.mrb[48].mxu0 }
 0x164   :  { %1019 = vst [vmem:[%s2447_s2 + $0x198] sm:$0xff] %v949_v51  ;;  %v1129_v52 = vpop.f32.mrb[49].mxu0 }

// kernel: decoder_forward.6
= control target key start
LH: loop header
LB: loop body
LE: loop exit
PB: predicated region body
PF: predicated region fallthrough
CT: control target
= control target key end

     0   :  { %8 = vsyncpa [#allocation3], 0  ;;  %s3705_s0 = inlined_call_operand.vmem [shape: f32[8,1024], index: 0, kind: input, shape index: {}]   ;;  %s3706_s1 = inlined_call_operand.hbm [shape: f32[1024,3200], index: 1, kind: input, shape index: {}]   ;;  %s3707_s2 = inlined_call_operand.vmem [shape: f32[1,3200], index: 2, kind: input, shape index: {}]   ;;  %s3708_s3 = inlined_call_operand.vmem [shape: f32[8,3200], index: 3, kind: output, shape index: {}]  }
   0x1   :  { %10 = vsyncpa [#allocation3 + $0x1], 0  ;;  %s2882_s12 = smov 0   ;;  %s2884_s13 = smov 0  }
   0x2   :  { %s2886_s14 = smov 0   ;;  %s2888_s15 = smov 0  }
   0x3   :  { %s2890_s16 = smov 0   ;;  %s2892_s17 = smov 0  }
   0x4 LB: > { %s1903_s18 = sadd.s32 4294967295, %s2856_s17   ;;  %s25_s19 = sadd.s32 1, %s2852_s16  ;;  %s2856_s17 = sphi %s2892_s17, %s16_s17   ;;  %s2852_s16 = sphi %s2890_s16, %s3716_s16   ;;  %s2848_s15 = sphi %s2888_s15, %s3715_s15   ;;  %s2844_s14 = sphi %s2886_s14, %s3714_s14   ;;  %s2840_s13 = sphi %s2884_s13, %s3713_s13   ;;  %s2836_s12 = sphi %s2882_s12, %s3712_s12  }
   0x5   : > { %p26_p0 = scmp.ge.s32.totalorder %s25_s19, 5  ;;  %s61_s20 = sadd.s32 1, %s2844_s14 }
   0x6   : > { %p68_p1 = scmp.ne.s32.totalorder %s2844_s14, %s2840_s13  ;;  %p69_p2 = scmp.eq.s32.totalorder %s2856_s17, 0 }
   0x7   : > { %s3718_s19 = smov (%p26_p0, %s25_s19), 0  ;;  %p74_p4 = scmp.ne.s32.totalorder %s2840_s13, %s2836_s12 }
   0x8   : > { %p70_p3 = por %p69_p2, %p68_p1  ;;  %s58_s21 = ssub.s32 %s2852_s16, %s3718_s19 }
   0x9   : > { %p75_p5 = scmp.eq.s32.totalorder %s1903_s18, 0  ;;  %p59_p6 = scmp.eq.s32.totalorder %s58_s21, 0 }
   0xa   : > { %p2718_p8 = scmp.lt.s32.totalorder %s2856_s17, 5  ;;  %s160_s24 = sand.u32 1, %s2844_s14  }
   0xb   : > { %p2921_p7 = por %p75_p5, %p74_p4  ;;  %s1913_s25 = smul.u32 640, %s2852_s16 }
   0xc   : > { %s2927_s23 = scalar_select %p59_p6, %s2844_s14, %s61_s20  }
   0xd   : > { %s2710_s26 = smul.u32 5120, %s160_s24  ;;  %s2934_s29 = scalar_lea.hbm %s3706_s1, %s1913_s25 }
   0xe   : > { %p2936_p9 = pnand %p2718_p8, %p70_p3  ;;  %s2943_s6 = scalar_lea.sflag [#allocation3], %s160_s24 }
   0xf   : > { %s164_s4 = scalar_lea.vmem [#allocation2], %s2710_s26  ;;  %s2776_s7 = scalar_lea.hbm %s2934_s29, 81920 }
  0x10   : > { %s171_s5 = sshll.u32 %s164_s4, 4  ;;  %p2777_p11 = scmp.ne.s32.totalorder %s2934_s29, %s2776_s7  ;;  %s2940_s5 = int_to_ptr.vmem [resolvable:$true] %s171_s5 }
  0x11   : > { %p2778_p12 = pneg %p2936_p9  ;;  %s2781_s10 = scalar_lea.hbm %s3706_s1, 409600 }
  0x12   : > { %p2782_p1 = scmp.lt.u32.totalorder %s2934_s29, %s3706_s1  ;;  %p2783_p2 = scmp.lt.u32.totalorder %s2781_s10, %s2776_s7 }
  0x13   : > { %p2779_p13 = pnand %p2778_p12, %p2777_p11  ;;  %p2785_p4 = scmp.lt.u32.totalorder %s2776_s7, %s2934_s29 }
  0x14   : > { %p2784_p3 = por %p2783_p2, %p2782_p1 }
  0x15   : > { %p2780_p0 = pneg %p2779_p13 }
  0x16   : > { %p2786_p5 = por %p2785_p4, %p2784_p3 }
  0x18   : > { %p2787_p6 = pnand %p2786_p5, %p2780_p0 }
  0x1a   : > { %2790 = shalt.err (!%p2787_p6)
}
  0x1b   : > { %s2791_s18 = scalar_lea.vmem %s2940_s5, 81920  ;;  %s2858_s20 = smov [#allocation2]  }
  0x1c   : > { %p2792_p8 = scmp.ne.s32.totalorder %s2940_s5, %s2791_s18  ;;  %s2796_s21 = sshll.u32 %s2858_s20, 4  ;;  %s2797_s21 = int_to_ptr.vmem [resolvable:$false] %s2796_s21 }
  0x1d   : > { %s2798_s24 = scalar_lea.vmem %s2797_s21, 163840  ;;  %p2799_p10 = scmp.lt.s32.totalorder %s2940_s5, %s2797_s21 }
  0x1e   : > { %p2794_p11 = pnand %p2792_p8, %p2778_p12  ;;  %p2800_p1 = scmp.lt.s32.totalorder %s2798_s24, %s2791_s18 }
  0x20   : > { %p2795_p13 = pneg %p2794_p11  ;;  %p2801_p2 = por %p2800_p1, %p2799_p10 }
  0x22   : > { %p2802_p3 = pnand %p2801_p2, %p2795_p13 }
  0x24   : > { %2805 = shalt.err (!%p2802_p3)
}
  0x25   : > { %s2859_s25 = smov 3200   ;;  %s2860_s26 = smov 640  }
  0x26   : > { %s2861_s27 = smov 40   ;;  %p187_p12 = scmp.lt.s32.totalorder %s2856_s17, 6 }
  0x27   : > { %2717 = dma.hbm_to_vmem [thread:$0]  (!%p2936_p9), %s2934_s29, 81920, %s2940_s5, %s2943_s6, %s2859_s25, %s2860_s26, %s2861_s27  }
  0x28   : > { %p3711_p0 = scmp.ge.s32.totalorder %s2856_s17, 1 }
  0x2a   : > { %p188_p4 = pnand %p3711_p0, %p187_p12 }
  0x2b   : > { %s193_s28 = sand.u32 (!%p188_p4), 1, %s2840_s13  }
  0x2c   : > { %191 = sbr.rel (%p188_p4) target bundleno = 598 (0x256), region = 32  ;;  %s194_s7 = scalar_lea.sflag (!%p188_p4), [#allocation3], %s193_s28 }
  0x2d   : > { %s2711_s4 = smul.u32 (!%p188_p4), 5120, %s193_s28 }
  0x2f   : > { %s2975_s8 = scalar_lea.vmem (!%p188_p4), [#allocation2], %s2711_s4 }
  0x33   : > { %2831 = dma.done.wait (%p2921_p7), %s194_s7, 81920  }
  0x34   : > { %2833 = vsyncadd (%p2921_p7), %s194_s7, 4294885376  ;;  %v263_v0 = vld [vmem:[%s2975_s8 + $0x8] sm:$0xff]  ;;  %v268_v1 = vld [vmem:[%s2975_s8 + $0x30] sm:$0xff]  ;;  %s239_s18 = smul.u32 5, %s2848_s15 }
  0x35   : > { %v265_v2 = vld [vmem:[%s2975_s8 + $0x18] sm:$0xff]  ;;  %v2054_v3 = vpack.c.bf16 %v268_v1, %v263_v0  ;;  %v270_v4 = vld [vmem:[%s2975_s8 + $0x40] sm:$0xff]  ;;  %v267_v6 = vld [vmem:[%s2975_s8 + $0x28] sm:$0xff] }
  0x36   : > { %v262_v5 = vld [vmem:[%s2975_s8] sm:$0xff]  ;;  %v2310_v7 = vpack.c.bf16 %v270_v4, %v265_v2  ;;  %v264_v9 = vld [vmem:[%s2975_s8 + $0x10] sm:$0xff]  ;;  %v269_v10 = vld [vmem:[%s2975_s8 + $0x38] sm:$0xff]  ;;  %p240_p7 = scmp.lt.s32.totalorder %s239_s18, 24 }
  0x37   : > { %v2056_v8 = vpack.c.bf16 %v267_v6, %v262_v5  ;;  %v273_v11 = vld [vmem:[%s2975_s8 + $0x58] sm:$0xff]  ;;  %2055 = vmatprep.subr.bf16.mxu0 %v2054_v3  ;;  %v2312_v12 = vpack.c.bf16 %v269_v10, %v264_v9  ;;  %v278_v13 = vld [vmem:[%s2975_s8 + $0x80] sm:$0xff]  ;;  %v275_v14 = vld [vmem:[%s2975_s8 + $0x68] sm:$0xff] }
  0x38   : > { %v280_v15 = vld [vmem:[%s2975_s8 + $0x90] sm:$0xff]  ;;  %2311 = vmatprep.subr.bf16.mxu1 %v2310_v7  ;;  %v2058_v16 = vpack.c.bf16 %v278_v13, %v273_v11  ;;  %v277_v19 = vld [vmem:[%s2975_s8 + $0x78] sm:$0xff]  ;;  %v274_v20 = vld [vmem:[%s2975_s8 + $0x60] sm:$0xff]  ;;  %s3720_s18 = smov (!%p240_p7, %s239_s18), 24 }
  0x39   : > { %2057 = vmatpush1.bf16.msra.mxu0 %v2056_v8  ;;  %v2314_v17 = vpack.c.bf16 %v280_v15, %v275_v14  ;;  %v272_v18 = vld [vmem:[%s2975_s8 + $0x50] sm:$0xff]  ;;  %2313 = vmatpush1.bf16.msra.mxu1 %v2312_v12  ;;  %v279_v22 = vld [vmem:[%s2975_s8 + $0x88] sm:$0xff]  ;;  %v285_v27 = vld [vmem:[%s2975_s8 + $0xb8] sm:$0xff]  ;;  %s242_s21 = scalar_lea.vmem %s3707_s2, %s3720_s18  ;;  %s1910_s24 = sshll.u32 %s3720_s18, 3 }
  0x3a   : > { %v2060_v21 = vpack.c.bf16 %v277_v19, %v272_v18  ;;  %v283_v23 = vld [vmem:[%s2975_s8 + $0xa8] sm:$0xff]  ;;  %v288_v24 = vld [vmem:[%s2975_s8 + $0xd0] sm:$0xff]  ;;  %2059 = vmatprep.subr.bf16.mxu0 %v2058_v16  ;;  %v2316_v25 = vpack.c.bf16 %v279_v22, %v274_v20  ;;  %v290_v28 = vld [vmem:[%s2975_s8 + $0xe0] sm:$0xff]  ;;  %s3680_s26 = scalar_lea.vmem %s3708_s3, %s1910_s24 }
  0x3b   : > { %2315 = vmatprep.subr.bf16.mxu1 %v2314_v17  ;;  %v2062_v26 = vpack.c.bf16 %v288_v24, %v283_v23  ;;  %v282_v29 = vld [vmem:[%s2975_s8 + $0xa0] sm:$0xff]  ;;  %v2318_v30 = vpack.c.bf16 %v290_v28, %v285_v27  ;;  %v287_v31 = vld [vmem:[%s2975_s8 + $0xc8] sm:$0xff]  ;;  %v284_v32 = vld [vmem:[%s2975_s8 + $0xb0] sm:$0xff] }
  0x3c   : > { %v289_v33 = vld [vmem:[%s2975_s8 + $0xd8] sm:$0xff]  ;;  %v2064_v34 = vpack.c.bf16 %v287_v31, %v282_v29  ;;  %v298_v36 = vld [vmem:[%s2975_s8 + $0x120] sm:$0xff]  ;;  %v295_v37 = vld [vmem:[%s2975_s8 + $0x108] sm:$0xff] }
  0x3d   : > { %2061 = vmatpush1.bf16.msra.mxu0 %v2060_v21  ;;  %v293_v35 = vld [vmem:[%s2975_s8 + $0xf8] sm:$0xff]  ;;  %2317 = vmatpush1.bf16.msra.mxu1 %v2316_v25  ;;  %v2320_v38 = vpack.c.bf16 %v289_v33, %v284_v32  ;;  %v300_v40 = vld [vmem:[%s2975_s8 + $0x130] sm:$0xff]  ;;  %v294_v44 = vld [vmem:[%s2975_s8 + $0x100] sm:$0xff] }
  0x3e   : > { %2063 = vmatprep.subr.bf16.mxu0 %v2062_v26  ;;  %v2066_v39 = vpack.c.bf16 %v298_v36, %v293_v35  ;;  %v292_v41 = vld [vmem:[%s2975_s8 + $0xf0] sm:$0xff]  ;;  %v297_v42 = vld [vmem:[%s2975_s8 + $0x118] sm:$0xff]  ;;  %2319 = vmatprep.subr.bf16.mxu1 %v2318_v30  ;;  %v2322_v43 = vpack.c.bf16 %v300_v40, %v295_v37  ;;  %v299_v45 = vld [vmem:[%s2975_s8 + $0x128] sm:$0xff] }
  0x3f   : > { %v303_v46 = vld [vmem:[%s2975_s8 + $0x148] sm:$0xff]  ;;  %v308_v47 = vld [vmem:[%s2975_s8 + $0x170] sm:$0xff]  ;;  %v305_v48 = vld [vmem:[%s2975_s8 + $0x158] sm:$0xff]  ;;  %v2068_v50 = vpack.c.bf16 %v297_v42, %v292_v41  ;;  %v2324_v51 = vpack.c.bf16 %v299_v45, %v294_v44 }
  0x40   : > { %v310_v49 = vld [vmem:[%s2975_s8 + $0x180] sm:$0xff]  ;;  %v2070_v52 = vpack.c.bf16 %v308_v47, %v303_v46  ;;  %v307_v54 = vld [vmem:[%s2975_s8 + $0x168] sm:$0xff]  ;;  %v304_v55 = vld [vmem:[%s2975_s8 + $0x150] sm:$0xff] }
  0x41   : > { %2065 = vmatpush1.bf16.msra.mxu0 %v2064_v34  ;;  %2321 = vmatpush1.bf16.msra.mxu1 %v2320_v38  ;;  %v302_v53 = vld [vmem:[%s2975_s8 + $0x140] sm:$0xff]  ;;  %v2326_v56 = vpack.c.bf16 %v310_v49, %v305_v48  ;;  %v309_v57 = vld [vmem:[%s2975_s8 + $0x178] sm:$0xff]  ;;  %v315_v60 = vld [vmem:[%s2975_s8 + $0x1a8] sm:$0xff] }
  0x42   : > { %2067 = vmatprep.subr.bf16.mxu0 %v2066_v39  ;;  %2323 = vmatprep.subr.bf16.mxu1 %v2322_v43  ;;  %v313_v58 = vld [vmem:[%s2975_s8 + $0x198] sm:$0xff]  ;;  %v318_v59 = vld [vmem:[%s2975_s8 + $0x1c0] sm:$0xff]  ;;  %v320_v61 = vld [vmem:[%s2975_s8 + $0x1d0] sm:$0xff]  ;;  %v2072_v62 = vpack.c.bf16 %v307_v54, %v302_v53  ;;  %v2328_v63 = vpack.c.bf16 %v309_v57, %v304_v55 }
  0x43   : > { %v2074_v0 = vpack.c.bf16 %v318_v59, %v313_v58  ;;  %v312_v1 = vld [vmem:[%s2975_s8 + $0x190] sm:$0xff]  ;;  %v317_v2 = vld [vmem:[%s2975_s8 + $0x1b8] sm:$0xff]  ;;  %v314_v3 = vld [vmem:[%s2975_s8 + $0x1a0] sm:$0xff]  ;;  %v2330_v4 = vpack.c.bf16 %v320_v61, %v315_v60 }
  0x44   : > { %v319_v5 = vld [vmem:[%s2975_s8 + $0x1c8] sm:$0xff]  ;;  %v328_v7 = vld [vmem:[%s2975_s8 + $0x210] sm:$0xff]  ;;  %v325_v8 = vld [vmem:[%s2975_s8 + $0x1f8] sm:$0xff]  ;;  %v2076_v10 = vpack.c.bf16 %v317_v2, %v312_v1 }
  0x45   : > { %2069 = vmatpush1.bf16.msra.mxu0 %v2068_v50  ;;  %2325 = vmatpush1.bf16.msra.mxu1 %v2324_v51  ;;  %v323_v6 = vld [vmem:[%s2975_s8 + $0x1e8] sm:$0xff]  ;;  %v330_v9 = vld [vmem:[%s2975_s8 + $0x220] sm:$0xff]  ;;  %v2332_v11 = vpack.c.bf16 %v319_v5, %v314_v3  ;;  %v324_v15 = vld [vmem:[%s2975_s8 + $0x1f0] sm:$0xff] }
  0x46   : > { %2071 = vmatprep.subr.bf16.mxu0 %v2070_v52  ;;  %2327 = vmatprep.subr.bf16.mxu1 %v2326_v56  ;;  %v2078_v12 = vpack.c.bf16 %v328_v7, %v323_v6  ;;  %v322_v13 = vld [vmem:[%s2975_s8 + $0x1e0] sm:$0xff]  ;;  %v327_v14 = vld [vmem:[%s2975_s8 + $0x208] sm:$0xff]  ;;  %v2334_v16 = vpack.c.bf16 %v330_v9, %v325_v8  ;;  %v329_v17 = vld [vmem:[%s2975_s8 + $0x218] sm:$0xff] }
  0x47   : > { %v333_v18 = vld [vmem:[%s2975_s8 + $0x238] sm:$0xff]  ;;  %v338_v19 = vld [vmem:[%s2975_s8 + $0x260] sm:$0xff]  ;;  %v335_v20 = vld [vmem:[%s2975_s8 + $0x248] sm:$0xff]  ;;  %v2080_v22 = vpack.c.bf16 %v327_v14, %v322_v13  ;;  %v2336_v23 = vpack.c.bf16 %v329_v17, %v324_v15 }
  0x48   : > { %v340_v21 = vld [vmem:[%s2975_s8 + $0x270] sm:$0xff]  ;;  %v2082_v24 = vpack.c.bf16 %v338_v19, %v333_v18  ;;  %v337_v26 = vld [vmem:[%s2975_s8 + $0x258] sm:$0xff]  ;;  %v334_v27 = vld [vmem:[%s2975_s8 + $0x240] sm:$0xff] }
  0x49   : > { %2073 = vmatpush1.bf16.msra.mxu0 %v2072_v62  ;;  %2329 = vmatpush1.bf16.msra.mxu1 %v2328_v63  ;;  %v332_v25 = vld [vmem:[%s2975_s8 + $0x230] sm:$0xff]  ;;  %v2338_v28 = vpack.c.bf16 %v340_v21, %v335_v20  ;;  %v339_v29 = vld [vmem:[%s2975_s8 + $0x268] sm:$0xff]  ;;  %v345_v32 = vld [vmem:[%s2975_s8 + $0x298] sm:$0xff] }
  0x4a   : > { %2075 = vmatprep.subr.bf16.mxu0 %v2074_v0  ;;  %2331 = vmatprep.subr.bf16.mxu1 %v2330_v4  ;;  %v343_v30 = vld [vmem:[%s2975_s8 + $0x288] sm:$0xff]  ;;  %v348_v31 = vld [vmem:[%s2975_s8 + $0x2b0] sm:$0xff]  ;;  %v350_v33 = vld [vmem:[%s2975_s8 + $0x2c0] sm:$0xff]  ;;  %v2084_v34 = vpack.c.bf16 %v337_v26, %v332_v25  ;;  %v2340_v35 = vpack.c.bf16 %v339_v29, %v334_v27 }
  0x4b   : > { %v2086_v36 = vpack.c.bf16 %v348_v31, %v343_v30  ;;  %v342_v37 = vld [vmem:[%s2975_s8 + $0x280] sm:$0xff]  ;;  %v347_v38 = vld [vmem:[%s2975_s8 + $0x2a8] sm:$0xff]  ;;  %v344_v39 = vld [vmem:[%s2975_s8 + $0x290] sm:$0xff]  ;;  %v2342_v40 = vpack.c.bf16 %v350_v33, %v345_v32 }
  0x4c   : > { %v349_v41 = vld [vmem:[%s2975_s8 + $0x2b8] sm:$0xff]  ;;  %v358_v43 = vld [vmem:[%s2975_s8 + $0x300] sm:$0xff]  ;;  %v355_v44 = vld [vmem:[%s2975_s8 + $0x2e8] sm:$0xff]  ;;  %v2088_v46 = vpack.c.bf16 %v347_v38, %v342_v37 }
  0x4d   : > { %2077 = vmatpush1.bf16.msra.mxu0 %v2076_v10  ;;  %2333 = vmatpush1.bf16.msra.mxu1 %v2332_v11  ;;  %v353_v42 = vld [vmem:[%s2975_s8 + $0x2d8] sm:$0xff]  ;;  %v360_v45 = vld [vmem:[%s2975_s8 + $0x310] sm:$0xff]  ;;  %v2344_v47 = vpack.c.bf16 %v349_v41, %v344_v39  ;;  %v354_v51 = vld [vmem:[%s2975_s8 + $0x2e0] sm:$0xff] }
  0x4e   : > { %2079 = vmatprep.subr.bf16.mxu0 %v2078_v12  ;;  %2335 = vmatprep.subr.bf16.mxu1 %v2334_v16  ;;  %v2090_v48 = vpack.c.bf16 %v358_v43, %v353_v42  ;;  %v352_v49 = vld [vmem:[%s2975_s8 + $0x2d0] sm:$0xff]  ;;  %v357_v50 = vld [vmem:[%s2975_s8 + $0x2f8] sm:$0xff]  ;;  %v2346_v52 = vpack.c.bf16 %v360_v45, %v355_v44  ;;  %v359_v53 = vld [vmem:[%s2975_s8 + $0x308] sm:$0xff] }
  0x4f   : > { %v363_v54 = vld [vmem:[%s2975_s8 + $0x328] sm:$0xff]  ;;  %v368_v55 = vld [vmem:[%s2975_s8 + $0x350] sm:$0xff]  ;;  %v365_v56 = vld [vmem:[%s2975_s8 + $0x338] sm:$0xff]  ;;  %v2092_v58 = vpack.c.bf16 %v357_v50, %v352_v49  ;;  %v2348_v59 = vpack.c.bf16 %v359_v53, %v354_v51 }
  0x50   : > { %v370_v57 = vld [vmem:[%s2975_s8 + $0x360] sm:$0xff]  ;;  %v2094_v60 = vpack.c.bf16 %v368_v55, %v363_v54  ;;  %v367_v62 = vld [vmem:[%s2975_s8 + $0x348] sm:$0xff]  ;;  %v364_v63 = vld [vmem:[%s2975_s8 + $0x330] sm:$0xff] }
  0x51   : > { %2081 = vmatpush1.bf16.msra.mxu0 %v2080_v22  ;;  %2337 = vmatpush1.bf16.msra.mxu1 %v2336_v23  ;;  %v362_v61 = vld [vmem:[%s2975_s8 + $0x320] sm:$0xff]  ;;  %v2350_v0 = vpack.c.bf16 %v370_v57, %v365_v56  ;;  %v369_v1 = vld [vmem:[%s2975_s8 + $0x358] sm:$0xff]  ;;  %v375_v4 = vld [vmem:[%s2975_s8 + $0x388] sm:$0xff] }
  0x52   : > { %2083 = vmatprep.subr.bf16.mxu0 %v2082_v24  ;;  %2339 = vmatprep.subr.bf16.mxu1 %v2338_v28  ;;  %v373_v2 = vld [vmem:[%s2975_s8 + $0x378] sm:$0xff]  ;;  %v378_v3 = vld [vmem:[%s2975_s8 + $0x3a0] sm:$0xff]  ;;  %v380_v5 = vld [vmem:[%s2975_s8 + $0x3b0] sm:$0xff]  ;;  %v2096_v6 = vpack.c.bf16 %v367_v62, %v362_v61  ;;  %v2352_v8 = vpack.c.bf16 %v369_v1, %v364_v63 }
  0x53   : > { %v372_v7 = vld [vmem:[%s2975_s8 + $0x370] sm:$0xff]  ;;  %v2098_v9 = vpack.c.bf16 %v378_v3, %v373_v2  ;;  %v377_v10 = vld [vmem:[%s2975_s8 + $0x398] sm:$0xff]  ;;  %v374_v11 = vld [vmem:[%s2975_s8 + $0x380] sm:$0xff]  ;;  %v2354_v13 = vpack.c.bf16 %v380_v5, %v375_v4 }
  0x54   : > { %v379_v12 = vld [vmem:[%s2975_s8 + $0x3a8] sm:$0xff]  ;;  %v388_v15 = vld [vmem:[%s2975_s8 + $0x3f0] sm:$0xff]  ;;  %v385_v17 = vld [vmem:[%s2975_s8 + $0x3d8] sm:$0xff]  ;;  %v2100_v19 = vpack.c.bf16 %v377_v10, %v372_v7 }
  0x55   : > { %2085 = vmatpush1.bf16.msra.mxu0 %v2084_v34  ;;  %2341 = vmatpush1.bf16.msra.mxu1 %v2340_v35  ;;  %v383_v14 = vld [vmem:[%s2975_s8 + $0x3c8] sm:$0xff]  ;;  %v390_v18 = vld [vmem:[%s2975_s8 + $0x400] sm:$0xff]  ;;  %v2356_v20 = vpack.c.bf16 %v379_v12, %v374_v11  ;;  %v384_v24 = vld [vmem:[%s2975_s8 + $0x3d0] sm:$0xff] }
  0x56   : > { %2087 = vmatprep.subr.bf16.mxu0 %v2086_v36  ;;  %2343 = vmatprep.subr.bf16.mxu1 %v2342_v40  ;;  %v255_v16 = vld [vmem:[%s3705_s0 + $0x8] sm:$0xff]  ;;  %v2102_v21 = vpack.c.bf16 %v388_v15, %v383_v14  ;;  %v382_v22 = vld [vmem:[%s2975_s8 + $0x3c0] sm:$0xff]  ;;  %v2358_v25 = vpack.c.bf16 %v390_v18, %v385_v17  ;;  %v389_v26 = vld [vmem:[%s2975_s8 + $0x3f8] sm:$0xff] }
  0x57   : > { %993 = vmatprep.mubr.f32.mxu0 %v255_v16  ;;  %1277 = vmatprep.mubr.f32.mxu1 %v255_v16  ;;  %v387_v23 = vld [vmem:[%s2975_s8 + $0x3e8] sm:$0xff]  ;;  %v393_v27 = vld [vmem:[%s2975_s8 + $0x418] sm:$0xff]  ;;  %v398_v28 = vld [vmem:[%s2975_s8 + $0x440] sm:$0xff]  ;;  %v2360_v32 = vpack.c.bf16 %v389_v26, %v384_v24 }
  0x58   : > { %v395_v29 = vld [vmem:[%s2975_s8 + $0x428] sm:$0xff]  ;;  %v400_v30 = vld [vmem:[%s2975_s8 + $0x450] sm:$0xff]  ;;  %v2104_v31 = vpack.c.bf16 %v387_v23, %v382_v22  ;;  %v2106_v33 = vpack.c.bf16 %v398_v28, %v393_v27  ;;  %v397_v35 = vld [vmem:[%s2975_s8 + $0x438] sm:$0xff] }
  0x59   : > { %2089 = vmatpush1.bf16.msra.mxu0 %v2088_v46  ;;  %2345 = vmatpush1.bf16.msra.mxu1 %v2344_v47  ;;  %v392_v34 = vld [vmem:[%s2975_s8 + $0x410] sm:$0xff]  ;;  %v394_v36 = vld [vmem:[%s2975_s8 + $0x420] sm:$0xff]  ;;  %v2362_v37 = vpack.c.bf16 %v400_v30, %v395_v29  ;;  %v399_v38 = vld [vmem:[%s2975_s8 + $0x448] sm:$0xff] }
  0x5a   : > { %2091 = vmatprep.subr.bf16.mxu0 %v2090_v48  ;;  %2347 = vmatprep.subr.bf16.mxu1 %v2346_v52  ;;  %v403_v39 = vld [vmem:[%s2975_s8 + $0x468] sm:$0xff]  ;;  %v408_v40 = vld [vmem:[%s2975_s8 + $0x490] sm:$0xff]  ;;  %v405_v41 = vld [vmem:[%s2975_s8 + $0x478] sm:$0xff]  ;;  %v2108_v43 = vpack.c.bf16 %v397_v35, %v392_v34  ;;  %v2364_v44 = vpack.c.bf16 %v399_v38, %v394_v36 }
  0x5b   : > { %v410_v42 = vld [vmem:[%s2975_s8 + $0x4a0] sm:$0xff]  ;;  %v2110_v45 = vpack.c.bf16 %v408_v40, %v403_v39  ;;  %v407_v47 = vld [vmem:[%s2975_s8 + $0x488] sm:$0xff]  ;;  %v404_v48 = vld [vmem:[%s2975_s8 + $0x470] sm:$0xff] }
  0x5c   : > { %v402_v46 = vld [vmem:[%s2975_s8 + $0x460] sm:$0xff]  ;;  %v2366_v49 = vpack.c.bf16 %v410_v42, %v405_v41  ;;  %v409_v50 = vld [vmem:[%s2975_s8 + $0x498] sm:$0xff]  ;;  %v415_v53 = vld [vmem:[%s2975_s8 + $0x4c8] sm:$0xff] }
  0x5d   : > { %2093 = vmatpush1.bf16.msra.mxu0 %v2092_v58  ;;  %2349 = vmatpush1.bf16.msra.mxu1 %v2348_v59  ;;  %v413_v51 = vld [vmem:[%s2975_s8 + $0x4b8] sm:$0xff]  ;;  %v418_v52 = vld [vmem:[%s2975_s8 + $0x4e0] sm:$0xff]  ;;  %v420_v54 = vld [vmem:[%s2975_s8 + $0x4f0] sm:$0xff]  ;;  %v2112_v55 = vpack.c.bf16 %v407_v47, %v402_v46  ;;  %v2368_v56 = vpack.c.bf16 %v409_v50, %v404_v48 }
  0x5e   : > { %2095 = vmatprep.subr.bf16.mxu0 %v2094_v60  ;;  %2351 = vmatprep.subr.bf16.mxu1 %v2350_v0  ;;  %v2114_v57 = vpack.c.bf16 %v418_v52, %v413_v51  ;;  %v412_v58 = vld [vmem:[%s2975_s8 + $0x4b0] sm:$0xff]  ;;  %v417_v59 = vld [vmem:[%s2975_s8 + $0x4d8] sm:$0xff]  ;;  %v414_v60 = vld [vmem:[%s2975_s8 + $0x4c0] sm:$0xff]  ;;  %v2370_v61 = vpack.c.bf16 %v420_v54, %v415_v53 }
  0x5f   : > { %v419_v62 = vld [vmem:[%s2975_s8 + $0x4e8] sm:$0xff]  ;;  %v428_v0 = vld [vmem:[%s2975_s8 + $0x530] sm:$0xff]  ;;  %v425_v1 = vld [vmem:[%s2975_s8 + $0x518] sm:$0xff]  ;;  %v2116_v3 = vpack.c.bf16 %v417_v59, %v412_v58 }
  0x60   : > { %v423_v63 = vld [vmem:[%s2975_s8 + $0x508] sm:$0xff]  ;;  %v430_v2 = vld [vmem:[%s2975_s8 + $0x540] sm:$0xff]  ;;  %v2372_v4 = vpack.c.bf16 %v419_v62, %v414_v60  ;;  %v429_v10 = vld [vmem:[%s2975_s8 + $0x538] sm:$0xff] }
  0x61   : > { %2097 = vmatpush1.bf16.msra.mxu0 %v2096_v6  ;;  %2353 = vmatpush1.bf16.msra.mxu1 %v2352_v8  ;;  %v2118_v5 = vpack.c.bf16 %v428_v0, %v423_v63  ;;  %v422_v6 = vld [vmem:[%s2975_s8 + $0x500] sm:$0xff]  ;;  %v427_v7 = vld [vmem:[%s2975_s8 + $0x528] sm:$0xff]  ;;  %v424_v8 = vld [vmem:[%s2975_s8 + $0x510] sm:$0xff] }
  0x62   : > { %2099 = vmatprep.subr.bf16.mxu0 %v2098_v9  ;;  %2355 = vmatprep.subr.bf16.mxu1 %v2354_v13  ;;  %v2374_v9 = vpack.c.bf16 %v430_v2, %v425_v1  ;;  %v433_v11 = vld [vmem:[%s2975_s8 + $0x558] sm:$0xff]  ;;  %v438_v12 = vld [vmem:[%s2975_s8 + $0x580] sm:$0xff]  ;;  %v435_v13 = vld [vmem:[%s2975_s8 + $0x568] sm:$0xff]  ;;  %v2120_v16 = vpack.c.bf16 %v427_v7, %v422_v6  ;;  %v2376_v17 = vpack.c.bf16 %v429_v10, %v424_v8 }
  0x63   : > { %v440_v14 = vld [vmem:[%s2975_s8 + $0x590] sm:$0xff]  ;;  %v254_v15 = vld [vmem:[%s3705_s0] sm:$0xff]  ;;  %v2122_v18 = vpack.c.bf16 %v438_v12, %v433_v11  ;;  %v439_v23 = vld [vmem:[%s2975_s8 + $0x588] sm:$0xff] }
  0x64   : > { %v2378_v22 = vpack.c.bf16 %v440_v14, %v435_v13  ;;  %v443_v24 = vld [vmem:[%s2975_s8 + $0x5a8] sm:$0xff]  ;;  %v445_v26 = vld [vmem:[%s2975_s8 + $0x5b8] sm:$0xff]  ;;  %v450_v27 = vld [vmem:[%s2975_s8 + $0x5e0] sm:$0xff] }
  0x65   : > { %2101 = vmatpush1.bf16.msra.mxu0 %v2100_v19  ;;  %2357 = vmatpush1.bf16.msra.mxu1 %v2356_v20  ;;  %v432_v19 = vld [vmem:[%s2975_s8 + $0x550] sm:$0xff]  ;;  %v437_v20 = vld [vmem:[%s2975_s8 + $0x578] sm:$0xff]  ;;  %v2382_v34 = vpack.c.bf16 %v450_v27, %v445_v26  ;;  %v455_v38 = vld [vmem:[%s2975_s8 + $0x608] sm:$0xff] }
  0x66   : > { %2103 = vmatprep.subr.bf16.mxu0 %v2102_v21  ;;  %2359 = vmatprep.subr.bf16.mxu1 %v2358_v25  ;;  %v434_v21 = vld [vmem:[%s2975_s8 + $0x560] sm:$0xff]  ;;  %v448_v25 = vld [vmem:[%s2975_s8 + $0x5d0] sm:$0xff]  ;;  %v2124_v28 = vpack.c.bf16 %v437_v20, %v432_v19  ;;  %v449_v35 = vld [vmem:[%s2975_s8 + $0x5d8] sm:$0xff] }
  0x67   : > { %v2380_v29 = vpack.c.bf16 %v439_v23, %v434_v21  ;;  %v2126_v30 = vpack.c.bf16 %v448_v25, %v443_v24  ;;  %v453_v36 = vld [vmem:[%s2975_s8 + $0x5f8] sm:$0xff]  ;;  %v460_v39 = vld [vmem:[%s2975_s8 + $0x630] sm:$0xff]  ;;  %v459_v47 = vld [vmem:[%s2975_s8 + $0x628] sm:$0xff] }
  0x68   : > { %v2386_v46 = vpack.c.bf16 %v460_v39, %v455_v38  ;;  %v463_v48 = vld [vmem:[%s2975_s8 + $0x648] sm:$0xff]  ;;  %v465_v50 = vld [vmem:[%s2975_s8 + $0x658] sm:$0xff]  ;;  %v470_v51 = vld [vmem:[%s2975_s8 + $0x680] sm:$0xff] }
  0x69   : > { %2105 = vmatpush1.bf16.msra.mxu0 %v2104_v31  ;;  %2361 = vmatpush1.bf16.msra.mxu1 %v2360_v32  ;;  %v442_v31 = vld [vmem:[%s2975_s8 + $0x5a0] sm:$0xff]  ;;  %v447_v32 = vld [vmem:[%s2975_s8 + $0x5c8] sm:$0xff]  ;;  %v2390_v58 = vpack.c.bf16 %v470_v51, %v465_v50  ;;  %v469_v59 = vld [vmem:[%s2975_s8 + $0x678] sm:$0xff] }
  0x6a   : > { %2107 = vmatprep.subr.bf16.mxu0 %v2106_v33  ;;  %2363 = vmatprep.subr.bf16.mxu1 %v2362_v37  ;;  %v444_v33 = vld [vmem:[%s2975_s8 + $0x5b0] sm:$0xff]  ;;  %v458_v37 = vld [vmem:[%s2975_s8 + $0x620] sm:$0xff]  ;;  %v2128_v40 = vpack.c.bf16 %v447_v32, %v442_v31  ;;  %v473_v60 = vld [vmem:[%s2975_s8 + $0x698] sm:$0xff] }
  0x6b   : > { %v2384_v41 = vpack.c.bf16 %v449_v35, %v444_v33  ;;  %v2130_v42 = vpack.c.bf16 %v458_v37, %v453_v36  ;;  %v475_v62 = vld [vmem:[%s2975_s8 + $0x6a8] sm:$0xff]  ;;  %v480_v63 = vld [vmem:[%s2975_s8 + $0x6d0] sm:$0xff]  ;;  %v485_v10 = vld [vmem:[%s2975_s8 + $0x6f8] sm:$0xff] }
  0x6c   : > { %v2394_v6 = vpack.c.bf16 %v480_v63, %v475_v62  ;;  %v479_v7 = vld [vmem:[%s2975_s8 + $0x6c8] sm:$0xff]  ;;  %v490_v11 = vld [vmem:[%s2975_s8 + $0x720] sm:$0xff]  ;;  %v493_v20 = vld [vmem:[%s2975_s8 + $0x738] sm:$0xff] }
  0x6d   : > { %2109 = vmatpush1.bf16.msra.mxu0 %v2108_v43  ;;  %2365 = vmatpush1.bf16.msra.mxu1 %v2364_v44  ;;  %v452_v43 = vld [vmem:[%s2975_s8 + $0x5f0] sm:$0xff]  ;;  %v457_v44 = vld [vmem:[%s2975_s8 + $0x618] sm:$0xff]  ;;  %v483_v8 = vld [vmem:[%s2975_s8 + $0x6e8] sm:$0xff]  ;;  %v2398_v19 = vpack.c.bf16 %v490_v11, %v485_v10 }
  0x6e   : > { %2111 = vmatprep.subr.bf16.mxu0 %v2110_v45  ;;  %2367 = vmatprep.subr.bf16.mxu1 %v2366_v49  ;;  %v454_v45 = vld [vmem:[%s2975_s8 + $0x600] sm:$0xff]  ;;  %v468_v49 = vld [vmem:[%s2975_s8 + $0x670] sm:$0xff]  ;;  %v2132_v52 = vpack.c.bf16 %v457_v44, %v452_v43  ;;  %v495_v23 = vld [vmem:[%s2975_s8 + $0x748] sm:$0xff] }
  0x6f   : > { %v2388_v53 = vpack.c.bf16 %v459_v47, %v454_v45  ;;  %v2134_v54 = vpack.c.bf16 %v468_v49, %v463_v48  ;;  %v482_v13 = vld [vmem:[%s2975_s8 + $0x6e0] sm:$0xff]  ;;  %v500_v24 = vld [vmem:[%s2975_s8 + $0x770] sm:$0xff]  ;;  %v499_v32 = vld [vmem:[%s2975_s8 + $0x768] sm:$0xff] }
  0x70   : > { %v498_v21 = vld [vmem:[%s2975_s8 + $0x760] sm:$0xff]  ;;  %v2402_v31 = vpack.c.bf16 %v500_v24, %v495_v23  ;;  %v503_v33 = vld [vmem:[%s2975_s8 + $0x788] sm:$0xff]  ;;  %v505_v35 = vld [vmem:[%s2975_s8 + $0x798] sm:$0xff] }
  0x71   : > { %2113 = vmatpush1.bf16.msra.mxu0 %v2112_v55  ;;  %2369 = vmatpush1.bf16.msra.mxu1 %v2368_v56  ;;  %v462_v55 = vld [vmem:[%s2975_s8 + $0x640] sm:$0xff]  ;;  %v467_v56 = vld [vmem:[%s2975_s8 + $0x668] sm:$0xff]  ;;  %v2146_v27 = vpack.c.bf16 %v498_v21, %v493_v20  ;;  %v509_v44 = vld [vmem:[%s2975_s8 + $0x7b8] sm:$0xff] }
  0x72   : > { %2115 = vmatprep.subr.bf16.mxu0 %v2114_v57  ;;  %2371 = vmatprep.subr.bf16.mxu1 %v2370_v61  ;;  %v464_v57 = vld [vmem:[%s2975_s8 + $0x650] sm:$0xff]  ;;  %v478_v61 = vld [vmem:[%s2975_s8 + $0x6c0] sm:$0xff]  ;;  %v2136_v0 = vpack.c.bf16 %v467_v56, %v462_v55  ;;  %v513_v45 = vld [vmem:[%s2975_s8 + $0x7d8] sm:$0xff] }
  0x73   : > { %v2392_v1 = vpack.c.bf16 %v469_v59, %v464_v57  ;;  %v2138_v2 = vpack.c.bf16 %v478_v61, %v473_v60  ;;  %v510_v36 = vld [vmem:[%s2975_s8 + $0x7c0] sm:$0xff]  ;;  %v515_v47 = vld [vmem:[%s2975_s8 + $0x7e8] sm:$0xff]  ;;  %v520_v48 = vld [vmem:[%s2975_s8 + $0x810] sm:$0xff] }
  0x74   : > { %v2406_v43 = vpack.c.bf16 %v510_v36, %v505_v35  ;;  %v2410_v55 = vpack.c.bf16 %v520_v48, %v515_v47  ;;  %v519_v56 = vld [vmem:[%s2975_s8 + $0x808] sm:$0xff]  ;;  %v525_v59 = vld [vmem:[%s2975_s8 + $0x838] sm:$0xff]  ;;  %v530_v60 = vld [vmem:[%s2975_s8 + $0x860] sm:$0xff] }
  0x75   : > { %2117 = vmatpush1.bf16.msra.mxu0 %v2116_v3  ;;  %2373 = vmatpush1.bf16.msra.mxu1 %v2372_v4  ;;  %v472_v3 = vld [vmem:[%s2975_s8 + $0x690] sm:$0xff]  ;;  %v477_v4 = vld [vmem:[%s2975_s8 + $0x6b8] sm:$0xff]  ;;  %v523_v57 = vld [vmem:[%s2975_s8 + $0x828] sm:$0xff] }
  0x76   : > { %2119 = vmatprep.subr.bf16.mxu0 %v2118_v5  ;;  %2375 = vmatprep.subr.bf16.mxu1 %v2374_v9  ;;  %v474_v5 = vld [vmem:[%s2975_s8 + $0x6a0] sm:$0xff]  ;;  %v488_v9 = vld [vmem:[%s2975_s8 + $0x710] sm:$0xff]  ;;  %v2140_v12 = vpack.c.bf16 %v477_v4, %v472_v3  ;;  %v2414_v3 = vpack.c.bf16 %v530_v60, %v525_v59  ;;  %v529_v4 = vld [vmem:[%s2975_s8 + $0x858] sm:$0xff] }
  0x77   : > { %v2396_v14 = vpack.c.bf16 %v479_v7, %v474_v5  ;;  %v533_v5 = vld [vmem:[%s2975_s8 + $0x878] sm:$0xff]  ;;  %v535_v7 = vld [vmem:[%s2975_s8 + $0x888] sm:$0xff]  ;;  %v550_v20 = vld [vmem:[%s2975_s8 + $0x900] sm:$0xff] }
  0x78   : > { %994 = vmatmul.mubr.f32.vlgmr.msra.gmra.mrb[0].mxu0 %v254_v15  ;;  %1278 = vmatmul.mubr.f32.vlgmr.msra.gmra.mrb[0].mxu1 %v254_v15  ;;  %v2142_v15 = vpack.c.bf16 %v488_v9, %v483_v8  ;;  %v540_v8 = vld [vmem:[%s2975_s8 + $0x8b0] sm:$0xff]  ;;  %v542_v24 = vld [vmem:[%s2975_s8 + $0x8c0] sm:$0xff] }
  0x79   : > { %2121 = vmatpush1.bf16.msra.mxu0 %v2120_v16  ;;  %2377 = vmatpush1.bf16.msra.mxu1 %v2376_v17  ;;  %v487_v16 = vld [vmem:[%s2975_s8 + $0x708] sm:$0xff]  ;;  %v484_v17 = vld [vmem:[%s2975_s8 + $0x6f0] sm:$0xff]  ;;  %v562_v48 = vld [vmem:[%s2975_s8 + $0x960] sm:$0xff] }
  0x7a   : > { %2123 = vmatprep.subr.bf16.mxu0 %v2122_v18  ;;  %2379 = vmatprep.subr.bf16.mxu1 %v2378_v22  ;;  %v489_v18 = vld [vmem:[%s2975_s8 + $0x718] sm:$0xff]  ;;  %v2144_v25 = vpack.c.bf16 %v487_v16, %v482_v13  ;;  %v539_v16 = vld [vmem:[%s2975_s8 + $0x8a8] sm:$0xff]  ;;  %v552_v36 = vld [vmem:[%s2975_s8 + $0x910] sm:$0xff] }
  0x7b   : > { %v257_v22 = vld [vmem:[%s3705_s0 + $0x18] sm:$0xff]  ;;  %v2400_v26 = vpack.c.bf16 %v489_v18, %v484_v17  ;;  %v543_v17 = vld [vmem:[%s2975_s8 + $0x8c8] sm:$0xff]  ;;  %v548_v18 = vld [vmem:[%s2975_s8 + $0x8f0] sm:$0xff] }
  0x7c   : > { %1064 = vmatprep.mubr.f32.mxu0 %v257_v22  ;;  %1348 = vmatprep.mubr.f32.mxu1 %v257_v22  ;;  %v537_v13 = vld [vmem:[%s2975_s8 + $0x898] sm:$0xff]  ;;  %v2166_v23 = vpack.c.bf16 %v548_v18, %v543_v17  ;;  %v572_v60 = vld [vmem:[%s2975_s8 + $0x9b0] sm:$0xff] }
  0x7d   : > { %2125 = vmatpush1.bf16.msra.mxu0 %v2124_v28  ;;  %2381 = vmatpush1.bf16.msra.mxu1 %v2380_v29  ;;  %v492_v28 = vld [vmem:[%s2975_s8 + $0x730] sm:$0xff]  ;;  %v497_v29 = vld [vmem:[%s2975_s8 + $0x758] sm:$0xff] }
  0x7e   : > { %2127 = vmatprep.subr.bf16.mxu0 %v2126_v30  ;;  %2383 = vmatprep.subr.bf16.mxu1 %v2382_v34  ;;  %v494_v30 = vld [vmem:[%s2975_s8 + $0x740] sm:$0xff]  ;;  %v508_v34 = vld [vmem:[%s2975_s8 + $0x7b0] sm:$0xff]  ;;  %v2148_v37 = vpack.c.bf16 %v497_v29, %v492_v28  ;;  %v549_v28 = vld [vmem:[%s2975_s8 + $0x8f8] sm:$0xff] }
  0x7f   : > { %v2404_v38 = vpack.c.bf16 %v499_v32, %v494_v30  ;;  %v2150_v39 = vpack.c.bf16 %v508_v34, %v503_v33  ;;  %v553_v29 = vld [vmem:[%s2975_s8 + $0x918] sm:$0xff]  ;;  %v558_v30 = vld [vmem:[%s2975_s8 + $0x940] sm:$0xff]  ;;  %v560_v32 = vld [vmem:[%s2975_s8 + $0x950] sm:$0xff] }
  0x80   : > { %v2170_v35 = vpack.c.bf16 %v558_v30, %v553_v29  ;;  %v256_v17 = vld [vmem:[%s3705_s0 + $0x10] sm:$0xff]  ;;  %v610_v29 = vld [vmem:[%s2975_s8 + $0xae0] sm:$0xff]  ;;  %v259_v30 = vld [vmem:[%s3705_s0 + $0x28] sm:$0xff] }
  0x81   : > { %2129 = vmatpush1.bf16.msra.mxu0 %v2128_v40  ;;  %2385 = vmatpush1.bf16.msra.mxu1 %v2384_v41  ;;  %v502_v40 = vld [vmem:[%s2975_s8 + $0x780] sm:$0xff]  ;;  %v507_v41 = vld [vmem:[%s2975_s8 + $0x7a8] sm:$0xff] }
  0x82   : > { %2131 = vmatprep.subr.bf16.mxu0 %v2130_v42  ;;  %2387 = vmatprep.subr.bf16.mxu1 %v2386_v46  ;;  %v504_v42 = vld [vmem:[%s2975_s8 + $0x790] sm:$0xff]  ;;  %v518_v46 = vld [vmem:[%s2975_s8 + $0x800] sm:$0xff]  ;;  %v2152_v49 = vpack.c.bf16 %v507_v41, %v502_v40  ;;  %v559_v40 = vld [vmem:[%s2975_s8 + $0x948] sm:$0xff] }
  0x83   : > { %v2408_v50 = vpack.c.bf16 %v509_v44, %v504_v42  ;;  %v2154_v51 = vpack.c.bf16 %v518_v46, %v513_v45  ;;  %v563_v41 = vld [vmem:[%s2975_s8 + $0x968] sm:$0xff]  ;;  %v568_v42 = vld [vmem:[%s2975_s8 + $0x990] sm:$0xff]  ;;  %v570_v44 = vld [vmem:[%s2975_s8 + $0x9a0] sm:$0xff] }
  0x84   : > { %v2174_v47 = vpack.c.bf16 %v568_v42, %v563_v41  ;;  %v615_v41 = vld [vmem:[%s2975_s8 + $0xb08] sm:$0xff]  ;;  %v620_v42 = vld [vmem:[%s2975_s8 + $0xb30] sm:$0xff] }
  0x85   : > { %2133 = vmatpush1.bf16.msra.mxu0 %v2132_v52  ;;  %2389 = vmatpush1.bf16.msra.mxu1 %v2388_v53  ;;  %v512_v52 = vld [vmem:[%s2975_s8 + $0x7d0] sm:$0xff]  ;;  %v517_v53 = vld [vmem:[%s2975_s8 + $0x7f8] sm:$0xff] }
  0x86   : > { %2135 = vmatprep.subr.bf16.mxu0 %v2134_v54  ;;  %2391 = vmatprep.subr.bf16.mxu1 %v2390_v58  ;;  %v514_v54 = vld [vmem:[%s2975_s8 + $0x7e0] sm:$0xff]  ;;  %v528_v58 = vld [vmem:[%s2975_s8 + $0x850] sm:$0xff]  ;;  %v2156_v61 = vpack.c.bf16 %v517_v53, %v512_v52  ;;  %v569_v52 = vld [vmem:[%s2975_s8 + $0x998] sm:$0xff] }
  0x87   : > { %v2412_v62 = vpack.c.bf16 %v519_v56, %v514_v54  ;;  %v2158_v63 = vpack.c.bf16 %v528_v58, %v523_v57  ;;  %v573_v53 = vld [vmem:[%s2975_s8 + $0x9b8] sm:$0xff]  ;;  %v578_v54 = vld [vmem:[%s2975_s8 + $0x9e0] sm:$0xff]  ;;  %v580_v56 = vld [vmem:[%s2975_s8 + $0x9f0] sm:$0xff] }
  0x88   : > { %v2178_v59 = vpack.c.bf16 %v578_v54, %v573_v53  ;;  %v625_v53 = vld [vmem:[%s2975_s8 + $0xb58] sm:$0xff]  ;;  %v630_v54 = vld [vmem:[%s2975_s8 + $0xb80] sm:$0xff] }
  0x89   : > { %2137 = vmatpush1.bf16.msra.mxu0 %v2136_v0  ;;  %2393 = vmatpush1.bf16.msra.mxu1 %v2392_v1  ;;  %v522_v0 = vld [vmem:[%s2975_s8 + $0x820] sm:$0xff]  ;;  %v527_v1 = vld [vmem:[%s2975_s8 + $0x848] sm:$0xff] }
  0x8a   : > { %2139 = vmatprep.subr.bf16.mxu0 %v2138_v2  ;;  %2395 = vmatprep.subr.bf16.mxu1 %v2394_v6  ;;  %v524_v2 = vld [vmem:[%s2975_s8 + $0x830] sm:$0xff]  ;;  %v538_v6 = vld [vmem:[%s2975_s8 + $0x8a0] sm:$0xff]  ;;  %v2160_v9 = vpack.c.bf16 %v527_v1, %v522_v0  ;;  %v579_v0 = vld [vmem:[%s2975_s8 + $0x9e8] sm:$0xff] }
  0x8b   : > { %v2416_v10 = vpack.c.bf16 %v529_v4, %v524_v2  ;;  %v2162_v11 = vpack.c.bf16 %v538_v6, %v533_v5  ;;  %v583_v1 = vld [vmem:[%s2975_s8 + $0xa08] sm:$0xff]  ;;  %v588_v2 = vld [vmem:[%s2975_s8 + $0xa30] sm:$0xff]  ;;  %v590_v4 = vld [vmem:[%s2975_s8 + $0xa40] sm:$0xff] }
  0x8d   : > { %2141 = vmatpush1.bf16.msra.mxu0 %v2140_v12  ;;  %2397 = vmatpush1.bf16.msra.mxu1 %v2396_v14  ;;  %v532_v12 = vld [vmem:[%s2975_s8 + $0x870] sm:$0xff]  ;;  %v534_v14 = vld [vmem:[%s2975_s8 + $0x880] sm:$0xff] }
  0x8e   : > { %2143 = vmatprep.subr.bf16.mxu0 %v2142_v15  ;;  %2399 = vmatprep.subr.bf16.mxu1 %v2398_v19  ;;  %v2418_v15 = vpack.c.bf16 %v540_v8, %v535_v7  ;;  %v545_v19 = vld [vmem:[%s2975_s8 + $0x8d8] sm:$0xff]  ;;  %v2164_v21 = vpack.c.bf16 %v537_v13, %v532_v12  ;;  %v2420_v22 = vpack.c.bf16 %v539_v16, %v534_v14  ;;  %v582_v8 = vld [vmem:[%s2975_s8 + $0xa00] sm:$0xff]  ;;  %v600_v16 = vld [vmem:[%s2975_s8 + $0xa90] sm:$0xff] }
  0x8f   : > { %v2182_v7 = vpack.c.bf16 %v588_v2, %v583_v1  ;;  %v589_v12 = vld [vmem:[%s2975_s8 + $0xa38] sm:$0xff]  ;;  %v598_v14 = vld [vmem:[%s2975_s8 + $0xa80] sm:$0xff]  ;;  %v635_v1 = vld [vmem:[%s2975_s8 + $0xba8] sm:$0xff] }
  0x90   : > { %v593_v13 = vld [vmem:[%s2975_s8 + $0xa58] sm:$0xff]  ;;  %v640_v2 = vld [vmem:[%s2975_s8 + $0xbd0] sm:$0xff] }
  0x91   : > { %2145 = vmatpush1.bf16.msra.mxu0 %v2144_v25  ;;  %2401 = vmatpush1.bf16.msra.mxu1 %v2400_v26  ;;  %v547_v25 = vld [vmem:[%s2975_s8 + $0x8e8] sm:$0xff]  ;;  %v544_v26 = vld [vmem:[%s2975_s8 + $0x8d0] sm:$0xff] }
  0x92   : > { %2147 = vmatprep.subr.bf16.mxu0 %v2146_v27  ;;  %2403 = vmatprep.subr.bf16.mxu1 %v2402_v31  ;;  %v2422_v27 = vpack.c.bf16 %v550_v20, %v545_v19  ;;  %v555_v31 = vld [vmem:[%s2975_s8 + $0x928] sm:$0xff]  ;;  %v2168_v33 = vpack.c.bf16 %v547_v25, %v542_v24  ;;  %v2424_v34 = vpack.c.bf16 %v549_v28, %v544_v26  ;;  %v605_v28 = vld [vmem:[%s2975_s8 + $0xab8] sm:$0xff] }
  0x93   : > { %v2186_v20 = vpack.c.bf16 %v598_v14, %v593_v13  ;;  %v599_v25 = vld [vmem:[%s2975_s8 + $0xa88] sm:$0xff]  ;;  %v645_v13 = vld [vmem:[%s2975_s8 + $0xbf8] sm:$0xff]  ;;  %v650_v14 = vld [vmem:[%s2975_s8 + $0xc20] sm:$0xff] }
  0x94   : > { %v603_v26 = vld [vmem:[%s2975_s8 + $0xaa8] sm:$0xff] }
  0x95   : > { %2149 = vmatpush1.bf16.msra.mxu0 %v2148_v37  ;;  %2405 = vmatpush1.bf16.msra.mxu1 %v2404_v38  ;;  %v557_v37 = vld [vmem:[%s2975_s8 + $0x938] sm:$0xff]  ;;  %v554_v38 = vld [vmem:[%s2975_s8 + $0x920] sm:$0xff] }
  0x96   : > { %2151 = vmatprep.subr.bf16.mxu0 %v2150_v39  ;;  %2407 = vmatprep.subr.bf16.mxu1 %v2406_v43  ;;  %v2426_v39 = vpack.c.bf16 %v560_v32, %v555_v31  ;;  %v565_v43 = vld [vmem:[%s2975_s8 + $0x978] sm:$0xff]  ;;  %v2172_v45 = vpack.c.bf16 %v557_v37, %v552_v36  ;;  %v2428_v46 = vpack.c.bf16 %v559_v40, %v554_v38  ;;  %v604_v36 = vld [vmem:[%s2975_s8 + $0xab0] sm:$0xff]  ;;  %v618_v40 = vld [vmem:[%s2975_s8 + $0xb20] sm:$0xff] }
  0x97   : > { %v2446_v37 = vpack.c.bf16 %v610_v29, %v605_v28  ;;  %v609_v38 = vld [vmem:[%s2975_s8 + $0xad8] sm:$0xff] }
  0x99   : > { %2153 = vmatpush1.bf16.msra.mxu0 %v2152_v49  ;;  %2409 = vmatpush1.bf16.msra.mxu1 %v2408_v50  ;;  %v567_v49 = vld [vmem:[%s2975_s8 + $0x988] sm:$0xff]  ;;  %v564_v50 = vld [vmem:[%s2975_s8 + $0x970] sm:$0xff] }
  0x9a   : > { %2155 = vmatprep.subr.bf16.mxu0 %v2154_v51  ;;  %2411 = vmatprep.subr.bf16.mxu1 %v2410_v55  ;;  %v2430_v51 = vpack.c.bf16 %v570_v44, %v565_v43  ;;  %v575_v55 = vld [vmem:[%s2975_s8 + $0x9c8] sm:$0xff]  ;;  %v2176_v57 = vpack.c.bf16 %v567_v49, %v562_v48  ;;  %v2432_v58 = vpack.c.bf16 %v569_v52, %v564_v50  ;;  %v614_v48 = vld [vmem:[%s2975_s8 + $0xb00] sm:$0xff]  ;;  %v628_v52 = vld [vmem:[%s2975_s8 + $0xb70] sm:$0xff] }
  0x9b   : > { %v2448_v44 = vpack.c.bf16 %v609_v38, %v604_v36  ;;  %v2450_v49 = vpack.c.bf16 %v620_v42, %v615_v41  ;;  %v619_v50 = vld [vmem:[%s2975_s8 + $0xb28] sm:$0xff]  ;;  %v668_v36 = vld [vmem:[%s2975_s8 + $0xcb0] sm:$0xff]  ;;  %v670_v38 = vld [vmem:[%s2975_s8 + $0xcc0] sm:$0xff] }
  0x9c   : > { %v662_v42 = vld [vmem:[%s2975_s8 + $0xc80] sm:$0xff] }
  0x9d   : > { %2157 = vmatpush1.bf16.msra.mxu0 %v2156_v61  ;;  %2413 = vmatpush1.bf16.msra.mxu1 %v2412_v62  ;;  %v577_v61 = vld [vmem:[%s2975_s8 + $0x9d8] sm:$0xff]  ;;  %v574_v62 = vld [vmem:[%s2975_s8 + $0x9c0] sm:$0xff] }
  0x9e   : > { %2159 = vmatprep.subr.bf16.mxu0 %v2158_v63  ;;  %2415 = vmatprep.subr.bf16.mxu1 %v2414_v3  ;;  %v2434_v63 = vpack.c.bf16 %v580_v56, %v575_v55  ;;  %v585_v3 = vld [vmem:[%s2975_s8 + $0xa18] sm:$0xff]  ;;  %v2180_v5 = vpack.c.bf16 %v577_v61, %v572_v60  ;;  %v2436_v6 = vpack.c.bf16 %v579_v0, %v574_v62  ;;  %v624_v60 = vld [vmem:[%s2975_s8 + $0xb50] sm:$0xff]  ;;  %v638_v0 = vld [vmem:[%s2975_s8 + $0xbc0] sm:$0xff] }
  0x9f   : > { %v2452_v56 = vpack.c.bf16 %v619_v50, %v614_v48  ;;  %v2454_v61 = vpack.c.bf16 %v630_v54, %v625_v53  ;;  %v629_v62 = vld [vmem:[%s2975_s8 + $0xb78] sm:$0xff]  ;;  %v678_v48 = vld [vmem:[%s2975_s8 + $0xd00] sm:$0xff]  ;;  %v680_v50 = vld [vmem:[%s2975_s8 + $0xd10] sm:$0xff] }
  0xa0   : > { %v672_v54 = vld [vmem:[%s2975_s8 + $0xcd0] sm:$0xff] }
  0xa1   : > { %2161 = vmatpush1.bf16.msra.mxu0 %v2160_v9  ;;  %2417 = vmatpush1.bf16.msra.mxu1 %v2416_v10  ;;  %v587_v9 = vld [vmem:[%s2975_s8 + $0xa28] sm:$0xff]  ;;  %v584_v10 = vld [vmem:[%s2975_s8 + $0xa10] sm:$0xff] }
  0xa2   : > { %2163 = vmatprep.subr.bf16.mxu0 %v2162_v11  ;;  %2419 = vmatprep.subr.bf16.mxu1 %v2418_v15  ;;  %v2438_v11 = vpack.c.bf16 %v590_v4, %v585_v3  ;;  %v595_v15 = vld [vmem:[%s2975_s8 + $0xa68] sm:$0xff]  ;;  %v2184_v18 = vpack.c.bf16 %v587_v9, %v582_v8  ;;  %v2440_v19 = vpack.c.bf16 %v589_v12, %v584_v10  ;;  %v634_v8 = vld [vmem:[%s2975_s8 + $0xba0] sm:$0xff]  ;;  %v648_v12 = vld [vmem:[%s2975_s8 + $0xc10] sm:$0xff] }
  0xa3   : > { %v2442_v24 = vpack.c.bf16 %v600_v16, %v595_v15  ;;  %v2456_v4 = vpack.c.bf16 %v629_v62, %v624_v60  ;;  %v2458_v9 = vpack.c.bf16 %v640_v2, %v635_v1  ;;  %v639_v10 = vld [vmem:[%s2975_s8 + $0xbc8] sm:$0xff]  ;;  %v688_v60 = vld [vmem:[%s2975_s8 + $0xd50] sm:$0xff]  ;;  %v690_v62 = vld [vmem:[%s2975_s8 + $0xd60] sm:$0xff] }
  0xa4   : > { %v2460_v16 = vpack.c.bf16 %v639_v10, %v634_v8  ;;  %v682_v2 = vld [vmem:[%s2975_s8 + $0xd20] sm:$0xff]  ;;  %v700_v10 = vld [vmem:[%s2975_s8 + $0xdb0] sm:$0xff] }
  0xa5   : > { %2165 = vmatpush1.bf16.msra.mxu0 %v2164_v21  ;;  %2421 = vmatpush1.bf16.msra.mxu1 %v2420_v22  ;;  %v592_v21 = vld [vmem:[%s2975_s8 + $0xa50] sm:$0xff]  ;;  %v597_v22 = vld [vmem:[%s2975_s8 + $0xa78] sm:$0xff]  ;;  %v698_v8 = vld [vmem:[%s2975_s8 + $0xda0] sm:$0xff] }
  0xa6   : > { %2167 = vmatprep.subr.bf16.mxu0 %v2166_v23  ;;  %2423 = vmatprep.subr.bf16.mxu1 %v2422_v27  ;;  %v594_v23 = vld [vmem:[%s2975_s8 + $0xa60] sm:$0xff]  ;;  %v608_v27 = vld [vmem:[%s2975_s8 + $0xad0] sm:$0xff]  ;;  %v2188_v31 = vpack.c.bf16 %v597_v22, %v592_v21  ;;  %v2462_v21 = vpack.c.bf16 %v650_v14, %v645_v13  ;;  %v649_v22 = vld [vmem:[%s2975_s8 + $0xc18] sm:$0xff] }
  0xa7   : > { %v2444_v32 = vpack.c.bf16 %v599_v25, %v594_v23  ;;  %v653_v23 = vld [vmem:[%s2975_s8 + $0xc38] sm:$0xff]  ;;  %v655_v25 = vld [vmem:[%s2975_s8 + $0xc48] sm:$0xff]  ;;  %v692_v14 = vld [vmem:[%s2975_s8 + $0xd70] sm:$0xff] }
  0xa9   : > { %2169 = vmatpush1.bf16.msra.mxu0 %v2168_v33  ;;  %2425 = vmatpush1.bf16.msra.mxu1 %v2424_v34  ;;  %v2190_v33 = vpack.c.bf16 %v608_v27, %v603_v26  ;;  %v602_v34 = vld [vmem:[%s2975_s8 + $0xaa0] sm:$0xff]  ;;  %v660_v26 = vld [vmem:[%s2975_s8 + $0xc70] sm:$0xff] }
  0xaa   : > { %2171 = vmatprep.subr.bf16.mxu0 %v2170_v35  ;;  %2427 = vmatprep.subr.bf16.mxu1 %v2426_v39  ;;  %v607_v35 = vld [vmem:[%s2975_s8 + $0xac8] sm:$0xff]  ;;  %v613_v39 = vld [vmem:[%s2975_s8 + $0xaf8] sm:$0xff] }
  0xab   : > { %v2192_v43 = vpack.c.bf16 %v607_v35, %v602_v34  ;;  %v659_v34 = vld [vmem:[%s2975_s8 + $0xc68] sm:$0xff] }
  0xac   : > { %v663_v35 = vld [vmem:[%s2975_s8 + $0xc88] sm:$0xff] }
  0xad   : > { %2173 = vmatpush1.bf16.msra.mxu0 %v2172_v45  ;;  %2429 = vmatpush1.bf16.msra.mxu1 %v2428_v46  ;;  %v2194_v45 = vpack.c.bf16 %v618_v40, %v613_v39  ;;  %v612_v46 = vld [vmem:[%s2975_s8 + $0xaf0] sm:$0xff]  ;;  %v2214_v41 = vpack.c.bf16 %v668_v36, %v663_v35 }
  0xae   : > { %2175 = vmatprep.subr.bf16.mxu0 %v2174_v47  ;;  %2431 = vmatprep.subr.bf16.mxu1 %v2430_v51  ;;  %v617_v47 = vld [vmem:[%s2975_s8 + $0xb18] sm:$0xff]  ;;  %v623_v51 = vld [vmem:[%s2975_s8 + $0xb48] sm:$0xff] }
  0xaf   : > { %v2196_v55 = vpack.c.bf16 %v617_v47, %v612_v46  ;;  %v669_v46 = vld [vmem:[%s2975_s8 + $0xcb8] sm:$0xff] }
  0xb0   : > { %v673_v47 = vld [vmem:[%s2975_s8 + $0xcd8] sm:$0xff] }
  0xb1   : > { %2177 = vmatpush1.bf16.msra.mxu0 %v2176_v57  ;;  %2433 = vmatpush1.bf16.msra.mxu1 %v2432_v58  ;;  %v2198_v57 = vpack.c.bf16 %v628_v52, %v623_v51  ;;  %v622_v58 = vld [vmem:[%s2975_s8 + $0xb40] sm:$0xff]  ;;  %v2218_v53 = vpack.c.bf16 %v678_v48, %v673_v47 }
  0xb2   : > { %2179 = vmatprep.subr.bf16.mxu0 %v2178_v59  ;;  %2435 = vmatprep.subr.bf16.mxu1 %v2434_v63  ;;  %v627_v59 = vld [vmem:[%s2975_s8 + $0xb68] sm:$0xff]  ;;  %v633_v63 = vld [vmem:[%s2975_s8 + $0xb98] sm:$0xff] }
  0xb3   : > { %v2200_v3 = vpack.c.bf16 %v627_v59, %v622_v58  ;;  %v679_v58 = vld [vmem:[%s2975_s8 + $0xd08] sm:$0xff] }
  0xb4   : > { %v683_v59 = vld [vmem:[%s2975_s8 + $0xd28] sm:$0xff] }
  0xb5   : > { %2181 = vmatpush1.bf16.msra.mxu0 %v2180_v5  ;;  %2437 = vmatpush1.bf16.msra.mxu1 %v2436_v6  ;;  %v2202_v5 = vpack.c.bf16 %v638_v0, %v633_v63  ;;  %v632_v6 = vld [vmem:[%s2975_s8 + $0xb90] sm:$0xff]  ;;  %v2222_v1 = vpack.c.bf16 %v688_v60, %v683_v59 }
  0xb6   : > { %2183 = vmatprep.subr.bf16.mxu0 %v2182_v7  ;;  %2439 = vmatprep.subr.bf16.mxu1 %v2438_v11  ;;  %v637_v7 = vld [vmem:[%s2975_s8 + $0xbb8] sm:$0xff]  ;;  %v643_v11 = vld [vmem:[%s2975_s8 + $0xbe8] sm:$0xff] }
  0xb7   : > { %v2204_v15 = vpack.c.bf16 %v637_v7, %v632_v6  ;;  %v689_v6 = vld [vmem:[%s2975_s8 + $0xd58] sm:$0xff] }
  0xb8   : > { %1065 = vmatmul.mubr.f32.vlgmr.msra.gmra.mrb[0].mxu0 %v256_v17  ;;  %1349 = vmatmul.mubr.f32.vlgmr.msra.gmra.mrb[0].mxu1 %v256_v17  ;;  %v2206_v17 = vpack.c.bf16 %v648_v12, %v643_v11  ;;  %v693_v7 = vld [vmem:[%s2975_s8 + $0xd78] sm:$0xff] }
  0xb9   : > { %2185 = vmatpush1.bf16.msra.mxu0 %v2184_v18  ;;  %2441 = vmatpush1.bf16.msra.mxu1 %v2440_v19  ;;  %v642_v18 = vld [vmem:[%s2975_s8 + $0xbe0] sm:$0xff]  ;;  %v647_v19 = vld [vmem:[%s2975_s8 + $0xc08] sm:$0xff]  ;;  %v2226_v13 = vpack.c.bf16 %v698_v8, %v693_v7 }
  0xba   : > { %2187 = vmatprep.subr.bf16.mxu0 %v2186_v20  ;;  %2443 = vmatprep.subr.bf16.mxu1 %v2442_v24  ;;  %v644_v20 = vld [vmem:[%s2975_s8 + $0xbf0] sm:$0xff]  ;;  %v658_v24 = vld [vmem:[%s2975_s8 + $0xc60] sm:$0xff]  ;;  %v2208_v27 = vpack.c.bf16 %v647_v19, %v642_v18  ;;  %v699_v18 = vld [vmem:[%s2975_s8 + $0xda8] sm:$0xff] }
  0xbb   : > { %1135 = vmatprep.mubr.f32.mxu0 %v259_v30  ;;  %1419 = vmatprep.mubr.f32.mxu1 %v259_v30  ;;  %v2464_v28 = vpack.c.bf16 %v649_v22, %v644_v20  ;;  %v2210_v29 = vpack.c.bf16 %v658_v24, %v653_v23  ;;  %v652_v30 = vld [vmem:[%s2975_s8 + $0xc30] sm:$0xff]  ;;  %v703_v19 = vld [vmem:[%s2975_s8 + $0xdc8] sm:$0xff]  ;;  %v710_v22 = vld [vmem:[%s2975_s8 + $0xe00] sm:$0xff] }
  0xbc   : > { %v708_v20 = vld [vmem:[%s2975_s8 + $0xdf0] sm:$0xff] }
  0xbd   : > { %2189 = vmatpush1.bf16.msra.mxu0 %v2188_v31  ;;  %2445 = vmatpush1.bf16.msra.mxu1 %v2444_v32  ;;  %v657_v31 = vld [vmem:[%s2975_s8 + $0xc58] sm:$0xff]  ;;  %v654_v32 = vld [vmem:[%s2975_s8 + $0xc40] sm:$0xff] }
  0xbe   : > { %2191 = vmatprep.subr.bf16.mxu0 %v2190_v33  ;;  %2447 = vmatprep.subr.bf16.mxu1 %v2446_v37  ;;  %v2466_v33 = vpack.c.bf16 %v660_v26, %v655_v25  ;;  %v665_v37 = vld [vmem:[%s2975_s8 + $0xc98] sm:$0xff]  ;;  %v2212_v39 = vpack.c.bf16 %v657_v31, %v652_v30  ;;  %v2468_v40 = vpack.c.bf16 %v659_v34, %v654_v32  ;;  %v702_v26 = vld [vmem:[%s2975_s8 + $0xdc0] sm:$0xff]  ;;  %v720_v34 = vld [vmem:[%s2975_s8 + $0xe50] sm:$0xff] }
  0xbf   : > { %v2230_v25 = vpack.c.bf16 %v708_v20, %v703_v19  ;;  %v709_v30 = vld [vmem:[%s2975_s8 + $0xdf8] sm:$0xff]  ;;  %v718_v32 = vld [vmem:[%s2975_s8 + $0xe40] sm:$0xff] }
  0xc0   : > { %v713_v31 = vld [vmem:[%s2975_s8 + $0xe18] sm:$0xff]  ;;  %v258_v19 = vld [vmem:[%s3705_s0 + $0x20] sm:$0xff] }
  0xc1   : > { %2193 = vmatpush1.bf16.msra.mxu0 %v2192_v43  ;;  %2449 = vmatpush1.bf16.msra.mxu1 %v2448_v44  ;;  %v667_v43 = vld [vmem:[%s2975_s8 + $0xca8] sm:$0xff]  ;;  %v664_v44 = vld [vmem:[%s2975_s8 + $0xc90] sm:$0xff] }
  0xc2   : > { %2195 = vmatprep.subr.bf16.mxu0 %v2194_v45  ;;  %2451 = vmatprep.subr.bf16.mxu1 %v2450_v49  ;;  %v2470_v45 = vpack.c.bf16 %v670_v38, %v665_v37  ;;  %v675_v49 = vld [vmem:[%s2975_s8 + $0xce8] sm:$0xff]  ;;  %v2216_v51 = vpack.c.bf16 %v667_v43, %v662_v42  ;;  %v2472_v52 = vpack.c.bf16 %v669_v46, %v664_v44  ;;  %v712_v38 = vld [vmem:[%s2975_s8 + $0xe10] sm:$0xff]  ;;  %v730_v46 = vld [vmem:[%s2975_s8 + $0xea0] sm:$0xff] }
  0xc3   : > { %v2234_v37 = vpack.c.bf16 %v718_v32, %v713_v31  ;;  %v719_v42 = vld [vmem:[%s2975_s8 + $0xe48] sm:$0xff]  ;;  %v728_v44 = vld [vmem:[%s2975_s8 + $0xe90] sm:$0xff]  ;;  %v770_v31 = vld [vmem:[%s2975_s8 + $0xfe0] sm:$0xff] }
  0xc4   : > { %v723_v43 = vld [vmem:[%s2975_s8 + $0xe68] sm:$0xff]  ;;  %v3406_v32 = vld [vmem:[%s3705_s0 + $0x38] sm:$0xff] }
  0xc5   : > { %2197 = vmatpush1.bf16.msra.mxu0 %v2196_v55  ;;  %2453 = vmatpush1.bf16.msra.mxu1 %v2452_v56  ;;  %v677_v55 = vld [vmem:[%s2975_s8 + $0xcf8] sm:$0xff]  ;;  %v674_v56 = vld [vmem:[%s2975_s8 + $0xce0] sm:$0xff] }
  0xc6   : > { %2199 = vmatprep.subr.bf16.mxu0 %v2198_v57  ;;  %2455 = vmatprep.subr.bf16.mxu1 %v2454_v61  ;;  %v2474_v57 = vpack.c.bf16 %v680_v50, %v675_v49  ;;  %v685_v61 = vld [vmem:[%s2975_s8 + $0xd38] sm:$0xff]  ;;  %v2220_v63 = vpack.c.bf16 %v677_v55, %v672_v54  ;;  %v2476_v0 = vpack.c.bf16 %v679_v58, %v674_v56  ;;  %v722_v50 = vld [vmem:[%s2975_s8 + $0xe60] sm:$0xff]  ;;  %v740_v58 = vld [vmem:[%s2975_s8 + $0xef0] sm:$0xff] }
  0xc7   : > { %v2238_v49 = vpack.c.bf16 %v728_v44, %v723_v43  ;;  %v729_v54 = vld [vmem:[%s2975_s8 + $0xe98] sm:$0xff]  ;;  %v738_v56 = vld [vmem:[%s2975_s8 + $0xee0] sm:$0xff]  ;;  %v775_v43 = vld [vmem:[%s2975_s8 + $0x1008] sm:$0xff] }
  0xc8   : > { %v733_v55 = vld [vmem:[%s2975_s8 + $0xeb8] sm:$0xff]  ;;  %v780_v44 = vld [vmem:[%s2975_s8 + $0x1030] sm:$0xff] }
  0xc9   : > { %2201 = vmatpush1.bf16.msra.mxu0 %v2200_v3  ;;  %2457 = vmatpush1.bf16.msra.mxu1 %v2456_v4  ;;  %v687_v3 = vld [vmem:[%s2975_s8 + $0xd48] sm:$0xff]  ;;  %v684_v4 = vld [vmem:[%s2975_s8 + $0xd30] sm:$0xff] }
  0xca   : > { %2203 = vmatprep.subr.bf16.mxu0 %v2202_v5  ;;  %2459 = vmatprep.subr.bf16.mxu1 %v2458_v9  ;;  %v2478_v5 = vpack.c.bf16 %v690_v62, %v685_v61  ;;  %v695_v9 = vld [vmem:[%s2975_s8 + $0xd88] sm:$0xff]  ;;  %v2224_v11 = vpack.c.bf16 %v687_v3, %v682_v2  ;;  %v2480_v12 = vpack.c.bf16 %v689_v6, %v684_v4  ;;  %v732_v62 = vld [vmem:[%s2975_s8 + $0xeb0] sm:$0xff]  ;;  %v750_v6 = vld [vmem:[%s2975_s8 + $0xf40] sm:$0xff] }
  0xcb   : > { %v2242_v61 = vpack.c.bf16 %v738_v56, %v733_v55  ;;  %v739_v2 = vld [vmem:[%s2975_s8 + $0xee8] sm:$0xff]  ;;  %v748_v4 = vld [vmem:[%s2975_s8 + $0xf30] sm:$0xff]  ;;  %v785_v55 = vld [vmem:[%s2975_s8 + $0x1058] sm:$0xff] }
  0xcc   : > { %v743_v3 = vld [vmem:[%s2975_s8 + $0xf08] sm:$0xff]  ;;  %v790_v56 = vld [vmem:[%s2975_s8 + $0x1080] sm:$0xff] }
  0xcd   : > { %2205 = vmatpush1.bf16.msra.mxu0 %v2204_v15  ;;  %2461 = vmatpush1.bf16.msra.mxu1 %v2460_v16  ;;  %v697_v15 = vld [vmem:[%s2975_s8 + $0xd98] sm:$0xff]  ;;  %v694_v16 = vld [vmem:[%s2975_s8 + $0xd80] sm:$0xff] }
  0xce   : > { %2207 = vmatprep.subr.bf16.mxu0 %v2206_v17  ;;  %2463 = vmatprep.subr.bf16.mxu1 %v2462_v21  ;;  %v2482_v17 = vpack.c.bf16 %v700_v10, %v695_v9  ;;  %v705_v21 = vld [vmem:[%s2975_s8 + $0xdd8] sm:$0xff]  ;;  %v2228_v23 = vpack.c.bf16 %v697_v15, %v692_v14  ;;  %v2484_v24 = vpack.c.bf16 %v699_v18, %v694_v16  ;;  %v742_v10 = vld [vmem:[%s2975_s8 + $0xf00] sm:$0xff]  ;;  %v760_v18 = vld [vmem:[%s2975_s8 + $0xf90] sm:$0xff] }
  0xcf   : > { %v2246_v9 = vpack.c.bf16 %v748_v4, %v743_v3  ;;  %v749_v14 = vld [vmem:[%s2975_s8 + $0xf38] sm:$0xff]  ;;  %v758_v16 = vld [vmem:[%s2975_s8 + $0xf80] sm:$0xff]  ;;  %v795_v3 = vld [vmem:[%s2975_s8 + $0x10a8] sm:$0xff] }
  0xd0   : > { %v753_v15 = vld [vmem:[%s2975_s8 + $0xf58] sm:$0xff]  ;;  %v800_v4 = vld [vmem:[%s2975_s8 + $0x10d0] sm:$0xff] }
  0xd1   : > { %2209 = vmatpush1.bf16.msra.mxu0 %v2208_v27  ;;  %2465 = vmatpush1.bf16.msra.mxu1 %v2464_v28  ;;  %v707_v27 = vld [vmem:[%s2975_s8 + $0xde8] sm:$0xff]  ;;  %v704_v28 = vld [vmem:[%s2975_s8 + $0xdd0] sm:$0xff] }
  0xd2   : > { %2211 = vmatprep.subr.bf16.mxu0 %v2210_v29  ;;  %2467 = vmatprep.subr.bf16.mxu1 %v2466_v33  ;;  %v2486_v29 = vpack.c.bf16 %v710_v22, %v705_v21  ;;  %v715_v33 = vld [vmem:[%s2975_s8 + $0xe28] sm:$0xff]  ;;  %v2232_v35 = vpack.c.bf16 %v707_v27, %v702_v26  ;;  %v2488_v36 = vpack.c.bf16 %v709_v30, %v704_v28  ;;  %v765_v30 = vld [vmem:[%s2975_s8 + $0xfb8] sm:$0xff] }
  0xd3   : > { %v2250_v22 = vpack.c.bf16 %v758_v16, %v753_v15  ;;  %v759_v27 = vld [vmem:[%s2975_s8 + $0xf88] sm:$0xff]  ;;  %v805_v15 = vld [vmem:[%s2975_s8 + $0x10f8] sm:$0xff]  ;;  %v810_v16 = vld [vmem:[%s2975_s8 + $0x1120] sm:$0xff] }
  0xd4   : > { %v763_v28 = vld [vmem:[%s2975_s8 + $0xfa8] sm:$0xff] }
  0xd5   : > { %2213 = vmatpush1.bf16.msra.mxu0 %v2212_v39  ;;  %2469 = vmatpush1.bf16.msra.mxu1 %v2468_v40  ;;  %v717_v39 = vld [vmem:[%s2975_s8 + $0xe38] sm:$0xff]  ;;  %v714_v40 = vld [vmem:[%s2975_s8 + $0xe20] sm:$0xff] }
  0xd6   : > { %2215 = vmatprep.subr.bf16.mxu0 %v2214_v41  ;;  %2471 = vmatprep.subr.bf16.mxu1 %v2470_v45  ;;  %v2490_v41 = vpack.c.bf16 %v720_v34, %v715_v33  ;;  %v725_v45 = vld [vmem:[%s2975_s8 + $0xe78] sm:$0xff]  ;;  %v2236_v47 = vpack.c.bf16 %v717_v39, %v712_v38  ;;  %v2492_v48 = vpack.c.bf16 %v719_v42, %v714_v40  ;;  %v764_v38 = vld [vmem:[%s2975_s8 + $0xfb0] sm:$0xff]  ;;  %v778_v42 = vld [vmem:[%s2975_s8 + $0x1020] sm:$0xff] }
  0xd7   : > { %v2510_v39 = vpack.c.bf16 %v770_v31, %v765_v30  ;;  %v769_v40 = vld [vmem:[%s2975_s8 + $0xfd8] sm:$0xff] }
  0xd9   : > { %2217 = vmatpush1.bf16.msra.mxu0 %v2216_v51  ;;  %2473 = vmatpush1.bf16.msra.mxu1 %v2472_v52  ;;  %v727_v51 = vld [vmem:[%s2975_s8 + $0xe88] sm:$0xff]  ;;  %v724_v52 = vld [vmem:[%s2975_s8 + $0xe70] sm:$0xff] }
  0xda   : > { %2219 = vmatprep.subr.bf16.mxu0 %v2218_v53  ;;  %2475 = vmatprep.subr.bf16.mxu1 %v2474_v57  ;;  %v2494_v53 = vpack.c.bf16 %v730_v46, %v725_v45  ;;  %v735_v57 = vld [vmem:[%s2975_s8 + $0xec8] sm:$0xff]  ;;  %v2240_v59 = vpack.c.bf16 %v727_v51, %v722_v50  ;;  %v2496_v60 = vpack.c.bf16 %v729_v54, %v724_v52  ;;  %v774_v50 = vld [vmem:[%s2975_s8 + $0x1000] sm:$0xff]  ;;  %v788_v54 = vld [vmem:[%s2975_s8 + $0x1070] sm:$0xff] }
  0xdb   : > { %v2512_v46 = vpack.c.bf16 %v769_v40, %v764_v38  ;;  %v2514_v51 = vpack.c.bf16 %v780_v44, %v775_v43  ;;  %v779_v52 = vld [vmem:[%s2975_s8 + $0x1028] sm:$0xff]  ;;  %v825_v40 = vld [vmem:[%s2975_s8 + $0x1198] sm:$0xff] }
  0xdc   : > { %v823_v38 = vld [vmem:[%s2975_s8 + $0x1188] sm:$0xff] }
  0xdd   : > { %2221 = vmatpush1.bf16.msra.mxu0 %v2220_v63  ;;  %2477 = vmatpush1.bf16.msra.mxu1 %v2476_v0  ;;  %v737_v63 = vld [vmem:[%s2975_s8 + $0xed8] sm:$0xff]  ;;  %v734_v0 = vld [vmem:[%s2975_s8 + $0xec0] sm:$0xff] }
  0xde   : > { %2223 = vmatprep.subr.bf16.mxu0 %v2222_v1  ;;  %2479 = vmatprep.subr.bf16.mxu1 %v2478_v5  ;;  %v2498_v1 = vpack.c.bf16 %v740_v58, %v735_v57  ;;  %v745_v5 = vld [vmem:[%s2975_s8 + $0xf18] sm:$0xff]  ;;  %v2244_v7 = vpack.c.bf16 %v737_v63, %v732_v62  ;;  %v2500_v8 = vpack.c.bf16 %v739_v2, %v734_v0  ;;  %v784_v62 = vld [vmem:[%s2975_s8 + $0x1050] sm:$0xff]  ;;  %v798_v2 = vld [vmem:[%s2975_s8 + $0x10c0] sm:$0xff] }
  0xdf   : > { %v2516_v58 = vpack.c.bf16 %v779_v52, %v774_v50  ;;  %v2518_v63 = vpack.c.bf16 %v790_v56, %v785_v55  ;;  %v789_v0 = vld [vmem:[%s2975_s8 + $0x1078] sm:$0xff]  ;;  %v835_v52 = vld [vmem:[%s2975_s8 + $0x11e8] sm:$0xff] }
  0xe0   : > { %v833_v50 = vld [vmem:[%s2975_s8 + $0x11d8] sm:$0xff] }
  0xe1   : > { %2225 = vmatpush1.bf16.msra.mxu0 %v2224_v11  ;;  %2481 = vmatpush1.bf16.msra.mxu1 %v2480_v12  ;;  %v747_v11 = vld [vmem:[%s2975_s8 + $0xf28] sm:$0xff]  ;;  %v744_v12 = vld [vmem:[%s2975_s8 + $0xf10] sm:$0xff] }
  0xe2   : > { %2227 = vmatprep.subr.bf16.mxu0 %v2226_v13  ;;  %2483 = vmatprep.subr.bf16.mxu1 %v2482_v17  ;;  %v2502_v13 = vpack.c.bf16 %v750_v6, %v745_v5  ;;  %v755_v17 = vld [vmem:[%s2975_s8 + $0xf68] sm:$0xff]  ;;  %v2248_v20 = vpack.c.bf16 %v747_v11, %v742_v10  ;;  %v2504_v21 = vpack.c.bf16 %v749_v14, %v744_v12  ;;  %v794_v10 = vld [vmem:[%s2975_s8 + $0x10a0] sm:$0xff]  ;;  %v808_v14 = vld [vmem:[%s2975_s8 + $0x1110] sm:$0xff] }
  0xe3   : > { %v2506_v26 = vpack.c.bf16 %v760_v18, %v755_v17  ;;  %v2520_v6 = vpack.c.bf16 %v789_v0, %v784_v62  ;;  %v2522_v11 = vpack.c.bf16 %v800_v4, %v795_v3  ;;  %v799_v12 = vld [vmem:[%s2975_s8 + $0x10c8] sm:$0xff]  ;;  %v845_v0 = vld [vmem:[%s2975_s8 + $0x1238] sm:$0xff] }
  0xe4   : > { %v2524_v18 = vpack.c.bf16 %v799_v12, %v794_v10  ;;  %v843_v62 = vld [vmem:[%s2975_s8 + $0x1228] sm:$0xff]  ;;  %v853_v10 = vld [vmem:[%s2975_s8 + $0x1278] sm:$0xff] }
  0xe5   : > { %2229 = vmatpush1.bf16.msra.mxu0 %v2228_v23  ;;  %2485 = vmatpush1.bf16.msra.mxu1 %v2484_v24  ;;  %v752_v23 = vld [vmem:[%s2975_s8 + $0xf50] sm:$0xff]  ;;  %v757_v24 = vld [vmem:[%s2975_s8 + $0xf78] sm:$0xff]  ;;  %v855_v12 = vld [vmem:[%s2975_s8 + $0x1288] sm:$0xff] }
  0xe6   : > { %2231 = vmatprep.subr.bf16.mxu0 %v2230_v25  ;;  %2487 = vmatprep.subr.bf16.mxu1 %v2486_v29  ;;  %v754_v25 = vld [vmem:[%s2975_s8 + $0xf60] sm:$0xff]  ;;  %v768_v29 = vld [vmem:[%s2975_s8 + $0xfd0] sm:$0xff]  ;;  %v2252_v33 = vpack.c.bf16 %v757_v24, %v752_v23  ;;  %v2526_v23 = vpack.c.bf16 %v810_v16, %v805_v15  ;;  %v809_v24 = vld [vmem:[%s2975_s8 + $0x1118] sm:$0xff] }
  0xe7   : > { %v2508_v34 = vpack.c.bf16 %v759_v27, %v754_v25  ;;  %v813_v25 = vld [vmem:[%s2975_s8 + $0x1138] sm:$0xff]  ;;  %v815_v27 = vld [vmem:[%s2975_s8 + $0x1148] sm:$0xff] }
  0xe9   : > { %2233 = vmatpush1.bf16.msra.mxu0 %v2232_v35  ;;  %2489 = vmatpush1.bf16.msra.mxu1 %v2488_v36  ;;  %v2254_v35 = vpack.c.bf16 %v768_v29, %v763_v28  ;;  %v762_v36 = vld [vmem:[%s2975_s8 + $0xfa0] sm:$0xff]  ;;  %v820_v28 = vld [vmem:[%s2975_s8 + $0x1170] sm:$0xff] }
  0xea   : > { %2235 = vmatprep.subr.bf16.mxu0 %v2234_v37  ;;  %2491 = vmatprep.subr.bf16.mxu1 %v2490_v41  ;;  %v767_v37 = vld [vmem:[%s2975_s8 + $0xfc8] sm:$0xff]  ;;  %v773_v41 = vld [vmem:[%s2975_s8 + $0xff8] sm:$0xff] }
  0xeb   : > { %v2256_v45 = vpack.c.bf16 %v767_v37, %v762_v36  ;;  %v2530_v36 = vpack.c.bf16 %v820_v28, %v815_v27  ;;  %v819_v37 = vld [vmem:[%s2975_s8 + $0x1168] sm:$0xff] }
  0xed   : > { %2237 = vmatpush1.bf16.msra.mxu0 %v2236_v47  ;;  %2493 = vmatpush1.bf16.msra.mxu1 %v2492_v48  ;;  %v2258_v47 = vpack.c.bf16 %v778_v42, %v773_v41  ;;  %v772_v48 = vld [vmem:[%s2975_s8 + $0xff0] sm:$0xff]  ;;  %v830_v41 = vld [vmem:[%s2975_s8 + $0x11c0] sm:$0xff] }
  0xee   : > { %2239 = vmatprep.subr.bf16.mxu0 %v2238_v49  ;;  %2495 = vmatprep.subr.bf16.mxu1 %v2494_v53  ;;  %v777_v49 = vld [vmem:[%s2975_s8 + $0x1018] sm:$0xff]  ;;  %v783_v53 = vld [vmem:[%s2975_s8 + $0x1048] sm:$0xff] }
  0xef   : > { %v2260_v57 = vpack.c.bf16 %v777_v49, %v772_v48  ;;  %v2534_v48 = vpack.c.bf16 %v830_v41, %v825_v40  ;;  %v829_v49 = vld [vmem:[%s2975_s8 + $0x11b8] sm:$0xff] }
  0xf1   : > { %2241 = vmatpush1.bf16.msra.mxu0 %v2240_v59  ;;  %2497 = vmatpush1.bf16.msra.mxu1 %v2496_v60  ;;  %v2262_v59 = vpack.c.bf16 %v788_v54, %v783_v53  ;;  %v782_v60 = vld [vmem:[%s2975_s8 + $0x1040] sm:$0xff]  ;;  %v840_v53 = vld [vmem:[%s2975_s8 + $0x1210] sm:$0xff] }
  0xf2   : > { %2243 = vmatprep.subr.bf16.mxu0 %v2242_v61  ;;  %2499 = vmatprep.subr.bf16.mxu1 %v2498_v1  ;;  %v787_v61 = vld [vmem:[%s2975_s8 + $0x1068] sm:$0xff]  ;;  %v793_v1 = vld [vmem:[%s2975_s8 + $0x1098] sm:$0xff] }
  0xf3   : > { %v2264_v5 = vpack.c.bf16 %v787_v61, %v782_v60  ;;  %v2538_v60 = vpack.c.bf16 %v840_v53, %v835_v52  ;;  %v839_v61 = vld [vmem:[%s2975_s8 + $0x1208] sm:$0xff] }
  0xf5   : > { %2245 = vmatpush1.bf16.msra.mxu0 %v2244_v7  ;;  %2501 = vmatpush1.bf16.msra.mxu1 %v2500_v8  ;;  %v2266_v7 = vpack.c.bf16 %v798_v2, %v793_v1  ;;  %v792_v8 = vld [vmem:[%s2975_s8 + $0x1090] sm:$0xff]  ;;  %v850_v1 = vld [vmem:[%s2975_s8 + $0x1260] sm:$0xff] }
  0xf6   : > { %2247 = vmatprep.subr.bf16.mxu0 %v2246_v9  ;;  %2503 = vmatprep.subr.bf16.mxu1 %v2502_v13  ;;  %v797_v9 = vld [vmem:[%s2975_s8 + $0x10b8] sm:$0xff]  ;;  %v803_v13 = vld [vmem:[%s2975_s8 + $0x10e8] sm:$0xff] }
  0xf7   : > { %v2268_v17 = vpack.c.bf16 %v797_v9, %v792_v8  ;;  %v2542_v8 = vpack.c.bf16 %v850_v1, %v845_v0  ;;  %v849_v9 = vld [vmem:[%s2975_s8 + $0x1258] sm:$0xff] }
  0xf8   : > { %1136 = vmatmul.mubr.f32.vlgmr.msra.gmra.mrb[0].mxu0 %v258_v19  ;;  %1420 = vmatmul.mubr.f32.vlgmr.msra.gmra.mrb[0].mxu1 %v258_v19  ;;  %v2270_v19 = vpack.c.bf16 %v808_v14, %v803_v13  ;;  %v860_v13 = vld [vmem:[%s2975_s8 + $0x12b0] sm:$0xff] }
  0xf9   : > { %2249 = vmatpush1.bf16.msra.mxu0 %v2248_v20  ;;  %2505 = vmatpush1.bf16.msra.mxu1 %v2504_v21  ;;  %v802_v20 = vld [vmem:[%s2975_s8 + $0x10e0] sm:$0xff]  ;;  %v807_v21 = vld [vmem:[%s2975_s8 + $0x1108] sm:$0xff] }
  0xfa   : > { %2251 = vmatprep.subr.bf16.mxu0 %v2250_v22  ;;  %2507 = vmatprep.subr.bf16.mxu1 %v2506_v26  ;;  %v804_v22 = vld [vmem:[%s2975_s8 + $0x10f0] sm:$0xff]  ;;  %v818_v26 = vld [vmem:[%s2975_s8 + $0x1160] sm:$0xff]  ;;  %v2272_v29 = vpack.c.bf16 %v807_v21, %v802_v20  ;;  %v2546_v20 = vpack.c.bf16 %v860_v13, %v855_v12  ;;  %v859_v21 = vld [vmem:[%s2975_s8 + $0x12a8] sm:$0xff] }
  0xfb   : > { %1206 = vmatprep.mubr.f32.mxu0 %v3406_v32  ;;  %1490 = vmatprep.mubr.f32.mxu1 %v3406_v32  ;;  %v2528_v30 = vpack.c.bf16 %v809_v24, %v804_v22  ;;  %v2274_v31 = vpack.c.bf16 %v818_v26, %v813_v25  ;;  %v863_v22 = vld [vmem:[%s2975_s8 + $0x12c8] sm:$0xff]  ;;  %v865_v24 = vld [vmem:[%s2975_s8 + $0x12d8] sm:$0xff]  ;;  %v870_v25 = vld [vmem:[%s2975_s8 + $0x1300] sm:$0xff] }
  0xfd   : > { %2253 = vmatpush1.bf16.msra.mxu0 %v2252_v33  ;;  %2509 = vmatpush1.bf16.msra.mxu1 %v2508_v34  ;;  %v812_v33 = vld [vmem:[%s2975_s8 + $0x1130] sm:$0xff]  ;;  %v817_v34 = vld [vmem:[%s2975_s8 + $0x1158] sm:$0xff] }
  0xfe   : > { %2255 = vmatprep.subr.bf16.mxu0 %v2254_v35  ;;  %2511 = vmatprep.subr.bf16.mxu1 %v2510_v39  ;;  %v814_v35 = vld [vmem:[%s2975_s8 + $0x1140] sm:$0xff]  ;;  %v828_v39 = vld [vmem:[%s2975_s8 + $0x11b0] sm:$0xff]  ;;  %v2276_v42 = vpack.c.bf16 %v817_v34, %v812_v33  ;;  %v2550_v33 = vpack.c.bf16 %v870_v25, %v865_v24  ;;  %v869_v34 = vld [vmem:[%s2975_s8 + $0x12f8] sm:$0xff] }
  0xff   : > { %v2532_v43 = vpack.c.bf16 %v819_v37, %v814_v35  ;;  %v2278_v44 = vpack.c.bf16 %v828_v39, %v823_v38  ;;  %v873_v35 = vld [vmem:[%s2975_s8 + $0x1318] sm:$0xff]  ;;  %v875_v37 = vld [vmem:[%s2975_s8 + $0x1328] sm:$0xff]  ;;  %v880_v38 = vld [vmem:[%s2975_s8 + $0x1350] sm:$0xff] }
 0x101   : > { %2257 = vmatpush1.bf16.msra.mxu0 %v2256_v45  ;;  %2513 = vmatpush1.bf16.msra.mxu1 %v2512_v46  ;;  %v822_v45 = vld [vmem:[%s2975_s8 + $0x1180] sm:$0xff]  ;;  %v827_v46 = vld [vmem:[%s2975_s8 + $0x11a8] sm:$0xff] }
 0x102   : > { %2259 = vmatprep.subr.bf16.mxu0 %v2258_v47  ;;  %2515 = vmatprep.subr.bf16.mxu1 %v2514_v51  ;;  %v824_v47 = vld [vmem:[%s2975_s8 + $0x1190] sm:$0xff]  ;;  %v838_v51 = vld [vmem:[%s2975_s8 + $0x1200] sm:$0xff]  ;;  %v2280_v54 = vpack.c.bf16 %v827_v46, %v822_v45  ;;  %v2554_v45 = vpack.c.bf16 %v880_v38, %v875_v37  ;;  %v879_v46 = vld [vmem:[%s2975_s8 + $0x1348] sm:$0xff] }
 0x103   : > { %v2536_v55 = vpack.c.bf16 %v829_v49, %v824_v47  ;;  %v2282_v56 = vpack.c.bf16 %v838_v51, %v833_v50  ;;  %v883_v47 = vld [vmem:[%s2975_s8 + $0x1368] sm:$0xff]  ;;  %v885_v49 = vld [vmem:[%s2975_s8 + $0x1378] sm:$0xff]  ;;  %v890_v50 = vld [vmem:[%s2975_s8 + $0x13a0] sm:$0xff] }
 0x105   : > { %2261 = vmatpush1.bf16.msra.mxu0 %v2260_v57  ;;  %2517 = vmatpush1.bf16.msra.mxu1 %v2516_v58  ;;  %v832_v57 = vld [vmem:[%s2975_s8 + $0x11d0] sm:$0xff]  ;;  %v837_v58 = vld [vmem:[%s2975_s8 + $0x11f8] sm:$0xff] }
 0x106   : > { %2263 = vmatprep.subr.bf16.mxu0 %v2262_v59  ;;  %2519 = vmatprep.subr.bf16.mxu1 %v2518_v63  ;;  %v834_v59 = vld [vmem:[%s2975_s8 + $0x11e0] sm:$0xff]  ;;  %v848_v63 = vld [vmem:[%s2975_s8 + $0x1250] sm:$0xff]  ;;  %v2284_v2 = vpack.c.bf16 %v837_v58, %v832_v57  ;;  %v2558_v57 = vpack.c.bf16 %v890_v50, %v885_v49  ;;  %v889_v58 = vld [vmem:[%s2975_s8 + $0x1398] sm:$0xff] }
 0x107   : > { %v2540_v3 = vpack.c.bf16 %v839_v61, %v834_v59  ;;  %v2286_v4 = vpack.c.bf16 %v848_v63, %v843_v62  ;;  %v893_v59 = vld [vmem:[%s2975_s8 + $0x13b8] sm:$0xff]  ;;  %v895_v61 = vld [vmem:[%s2975_s8 + $0x13c8] sm:$0xff]  ;;  %v900_v62 = vld [vmem:[%s2975_s8 + $0x13f0] sm:$0xff] }
 0x108   : > { %v541_v49 = vld [vmem:[%s2975_s8 + $0x8b8] sm:$0xff] }
 0x109   : > { %2265 = vmatpush1.bf16.msra.mxu0 %v2264_v5  ;;  %2521 = vmatpush1.bf16.msra.mxu1 %v2520_v6  ;;  %v842_v5 = vld [vmem:[%s2975_s8 + $0x1220] sm:$0xff]  ;;  %v847_v6 = vld [vmem:[%s2975_s8 + $0x1248] sm:$0xff]  ;;  %v2771_v50 = vld [vmem:[%s3705_s0 + $0x18] sm:$0xff] }
 0x10a   : > { %2267 = vmatprep.subr.bf16.mxu0 %v2266_v7  ;;  %2523 = vmatprep.subr.bf16.mxu1 %v2522_v11  ;;  %v844_v7 = vld [vmem:[%s2975_s8 + $0x1230] sm:$0xff]  ;;  %v858_v11 = vld [vmem:[%s2975_s8 + $0x12a0] sm:$0xff]  ;;  %v2288_v14 = vpack.c.bf16 %v847_v6, %v842_v5  ;;  %v2562_v5 = vpack.c.bf16 %v900_v62, %v895_v61  ;;  %v899_v6 = vld [vmem:[%s2975_s8 + $0x13e8] sm:$0xff] }
 0x10b   : > { %v2544_v15 = vpack.c.bf16 %v849_v9, %v844_v7  ;;  %v2290_v16 = vpack.c.bf16 %v858_v11, %v853_v10  ;;  %v346_v7 = vld [vmem:[%s2975_s8 + $0x2a0] sm:$0xff]  ;;  %v511_v10 = vld [vmem:[%s2975_s8 + $0x7c8] sm:$0xff] }
 0x10c   : > { %v506_v9 = vld [vmem:[%s2975_s8 + $0x7a0] sm:$0xff]  ;;  %v551_v62 = vld [vmem:[%s2975_s8 + $0x908] sm:$0xff] }
 0x10d   : > { %2269 = vmatpush1.bf16.msra.mxu0 %v2268_v17  ;;  %2525 = vmatpush1.bf16.msra.mxu1 %v2524_v18  ;;  %v852_v17 = vld [vmem:[%s2975_s8 + $0x1270] sm:$0xff]  ;;  %v857_v18 = vld [vmem:[%s2975_s8 + $0x1298] sm:$0xff]  ;;  %v546_v61 = vld [vmem:[%s2975_s8 + $0x8e0] sm:$0xff] }
 0x10e   : > { %2271 = vmatprep.subr.bf16.mxu0 %v2270_v19  ;;  %2527 = vmatprep.subr.bf16.mxu1 %v2526_v23  ;;  %v854_v19 = vld [vmem:[%s2975_s8 + $0x1280] sm:$0xff]  ;;  %v868_v23 = vld [vmem:[%s2975_s8 + $0x12f0] sm:$0xff]  ;;  %v2292_v26 = vpack.c.bf16 %v857_v18, %v852_v17  ;;  %v2598_v17 = vpack.c.bf16 %v511_v10, %v506_v9  ;;  %v431_v18 = vld [vmem:[%s2975_s8 + $0x548] sm:$0xff] }
 0x10f   : > { %v2548_v27 = vpack.c.bf16 %v859_v21, %v854_v19  ;;  %v2294_v28 = vpack.c.bf16 %v868_v23, %v863_v22  ;;  %v356_v19 = vld [vmem:[%s2975_s8 + $0x2f0] sm:$0xff]  ;;  %v521_v22 = vld [vmem:[%s2975_s8 + $0x818] sm:$0xff] }
 0x110   : > { %v516_v21 = vld [vmem:[%s2975_s8 + $0x7f0] sm:$0xff]  ;;  %v561_v10 = vld [vmem:[%s2975_s8 + $0x958] sm:$0xff] }
 0x111   : > { %2273 = vmatpush1.bf16.msra.mxu0 %v2272_v29  ;;  %2529 = vmatpush1.bf16.msra.mxu1 %v2528_v30  ;;  %v862_v29 = vld [vmem:[%s2975_s8 + $0x12c0] sm:$0xff]  ;;  %v867_v30 = vld [vmem:[%s2975_s8 + $0x12e8] sm:$0xff]  ;;  %v3533_v23 = vld [vmem:[%s3705_s0 + $0x30] sm:$0xff] }
 0x112   : > { %2275 = vmatprep.subr.bf16.mxu0 %v2274_v31  ;;  %2531 = vmatprep.subr.bf16.mxu1 %v2530_v36  ;;  %v864_v31 = vld [vmem:[%s2975_s8 + $0x12d0] sm:$0xff]  ;;  %v878_v36 = vld [vmem:[%s2975_s8 + $0x1340] sm:$0xff]  ;;  %v2296_v39 = vpack.c.bf16 %v867_v30, %v862_v29  ;;  %v2602_v30 = vpack.c.bf16 %v521_v22, %v516_v21  ;;  %v571_v22 = vld [vmem:[%s2975_s8 + $0x9a8] sm:$0xff] }
 0x113   : > { %v2552_v40 = vpack.c.bf16 %v869_v34, %v864_v31  ;;  %v2298_v41 = vpack.c.bf16 %v878_v36, %v873_v35  ;;  %v436_v29 = vld [vmem:[%s2975_s8 + $0x570] sm:$0xff]  ;;  %v441_v31 = vld [vmem:[%s2975_s8 + $0x598] sm:$0xff]  ;;  %v371_v34 = vld [vmem:[%s2975_s8 + $0x368] sm:$0xff] }
 0x114   : > { %v526_v35 = vld [vmem:[%s2975_s8 + $0x840] sm:$0xff]  ;;  %v531_v36 = vld [vmem:[%s2975_s8 + $0x868] sm:$0xff]  ;;  %v2604_v38 = vpack.c.bf16 %v441_v31, %v436_v29  ;;  %v556_v9 = vld [vmem:[%s2975_s8 + $0x930] sm:$0xff] }
 0x115   : > { %2277 = vmatpush1.bf16.msra.mxu0 %v2276_v42  ;;  %2533 = vmatpush1.bf16.msra.mxu1 %v2532_v43  ;;  %v872_v42 = vld [vmem:[%s2975_s8 + $0x1310] sm:$0xff]  ;;  %v877_v43 = vld [vmem:[%s2975_s8 + $0x1338] sm:$0xff]  ;;  %v566_v21 = vld [vmem:[%s2975_s8 + $0x980] sm:$0xff] }
 0x116   : > { %2279 = vmatprep.subr.bf16.mxu0 %v2278_v44  ;;  %2535 = vmatprep.subr.bf16.mxu1 %v2534_v48  ;;  %v874_v44 = vld [vmem:[%s2975_s8 + $0x1320] sm:$0xff]  ;;  %v888_v48 = vld [vmem:[%s2975_s8 + $0x1390] sm:$0xff]  ;;  %v2300_v51 = vpack.c.bf16 %v877_v43, %v872_v42  ;;  %v2606_v43 = vpack.c.bf16 %v531_v36, %v526_v35  ;;  %v491_v31 = vld [vmem:[%s2975_s8 + $0x728] sm:$0xff] }
 0x117   : > { %v2556_v52 = vpack.c.bf16 %v879_v46, %v874_v44  ;;  %v2302_v53 = vpack.c.bf16 %v888_v48, %v883_v47  ;;  %v446_v42 = vld [vmem:[%s2975_s8 + $0x5c0] sm:$0xff]  ;;  %v451_v44 = vld [vmem:[%s2975_s8 + $0x5e8] sm:$0xff]  ;;  %v381_v46 = vld [vmem:[%s2975_s8 + $0x3b8] sm:$0xff] }
 0x118   : > { %v2770_v47 = vld [vmem:[%s3705_s0 + $0x8] sm:$0xff]  ;;  %v536_v48 = vld [vmem:[%s2975_s8 + $0x890] sm:$0xff]  ;;  %v486_v29 = vld [vmem:[%s2975_s8 + $0x700] sm:$0xff] }
 0x119   : > { %2281 = vmatpush1.bf16.msra.mxu0 %v2280_v54  ;;  %2537 = vmatpush1.bf16.msra.mxu1 %v2536_v55  ;;  %v882_v54 = vld [vmem:[%s2975_s8 + $0x1360] sm:$0xff]  ;;  %v887_v55 = vld [vmem:[%s2975_s8 + $0x1388] sm:$0xff]  ;;  %v576_v35 = vld [vmem:[%s2975_s8 + $0x9d0] sm:$0xff] }
 0x11a   : > { %2283 = vmatprep.subr.bf16.mxu0 %v2282_v56  ;;  %2539 = vmatprep.subr.bf16.mxu1 %v2538_v60  ;;  %v884_v56 = vld [vmem:[%s2975_s8 + $0x1370] sm:$0xff]  ;;  %v898_v60 = vld [vmem:[%s2975_s8 + $0x13e0] sm:$0xff]  ;;  %v2304_v63 = vpack.c.bf16 %v887_v55, %v882_v54  ;;  %v301_v55 = vld [vmem:[%s2975_s8 + $0x138] sm:$0xff] }
 0x11b   : > { %v2560_v0 = vpack.c.bf16 %v889_v58, %v884_v56  ;;  %v2306_v1 = vpack.c.bf16 %v898_v60, %v893_v59  ;;  %v296_v54 = vld [vmem:[%s2975_s8 + $0x110] sm:$0xff]  ;;  %v461_v58 = vld [vmem:[%s2975_s8 + $0x638] sm:$0xff]  ;;  %v386_v59 = vld [vmem:[%s2975_s8 + $0x3e0] sm:$0xff] }
 0x11c   : > { %v456_v56 = vld [vmem:[%s2975_s8 + $0x610] sm:$0xff]  ;;  %v391_v60 = vld [vmem:[%s2975_s8 + $0x408] sm:$0xff]  ;;  %v581_v36 = vld [vmem:[%s2975_s8 + $0x9f8] sm:$0xff] }
 0x11d   : > { %2285 = vmatpush1.bf16.msra.mxu0 %v2284_v2  ;;  %2541 = vmatpush1.bf16.msra.mxu1 %v2540_v3  ;;  %v892_v2 = vld [vmem:[%s2975_s8 + $0x13b0] sm:$0xff]  ;;  %v897_v3 = vld [vmem:[%s2975_s8 + $0x13d8] sm:$0xff] }
 0x11e   : > { %2287 = vmatprep.subr.bf16.mxu0 %v2286_v4  ;;  %2543 = vmatprep.subr.bf16.mxu1 %v2542_v8  ;;  %v894_v4 = vld [vmem:[%s2975_s8 + $0x13c0] sm:$0xff]  ;;  %v351_v8 = vld [vmem:[%s2975_s8 + $0x2c8] sm:$0xff]  ;;  %v2308_v11 = vpack.c.bf16 %v897_v3, %v892_v2 }
 0x11f   : > { %v2564_v12 = vpack.c.bf16 %v899_v6, %v894_v4  ;;  %v2566_v13 = vpack.c.bf16 %v351_v8, %v346_v7  ;;  %v306_v2 = vld [vmem:[%s2975_s8 + $0x160] sm:$0xff]  ;;  %v311_v3 = vld [vmem:[%s2975_s8 + $0x188] sm:$0xff]  ;;  %v396_v7 = vld [vmem:[%s2975_s8 + $0x430] sm:$0xff] }
 0x120   : > { %v466_v4 = vld [vmem:[%s2975_s8 + $0x660] sm:$0xff]  ;;  %v471_v6 = vld [vmem:[%s2975_s8 + $0x688] sm:$0xff]  ;;  %v401_v8 = vld [vmem:[%s2975_s8 + $0x458] sm:$0xff] }
 0x121   : > { %2289 = vmatpush1.bf16.msra.mxu0 %v2288_v14  ;;  %2545 = vmatpush1.bf16.msra.mxu1 %v2544_v15  ;;  %v266_v14 = vld [vmem:[%s2975_s8 + $0x20] sm:$0xff]  ;;  %v271_v15 = vld [vmem:[%s2975_s8 + $0x48] sm:$0xff] }
 0x122   : > { %2291 = vmatprep.subr.bf16.mxu0 %v2290_v16  ;;  %2547 = vmatprep.subr.bf16.mxu1 %v2546_v20  ;;  %v426_v16 = vld [vmem:[%s2975_s8 + $0x520] sm:$0xff]  ;;  %v361_v20 = vld [vmem:[%s2975_s8 + $0x318] sm:$0xff]  ;;  %v2568_v24 = vpack.c.bf16 %v271_v15, %v266_v14  ;;  %v316_v14 = vld [vmem:[%s2975_s8 + $0x1b0] sm:$0xff] }
 0x123   : > { %v2600_v25 = vpack.c.bf16 %v431_v18, %v426_v16  ;;  %v321_v15 = vld [vmem:[%s2975_s8 + $0x1d8] sm:$0xff]  ;;  %v476_v16 = vld [vmem:[%s2975_s8 + $0x6b0] sm:$0xff] }
 0x124   : > { %v481_v18 = vld [vmem:[%s2975_s8 + $0x6d8] sm:$0xff] }
 0x125   : > { %2293 = vmatpush1.bf16.msra.mxu0 %v2292_v26  ;;  %2549 = vmatpush1.bf16.msra.mxu1 %v2548_v27  ;;  %v2570_v26 = vpack.c.bf16 %v361_v20, %v356_v19  ;;  %v276_v27 = vld [vmem:[%s2975_s8 + $0x70] sm:$0xff]  ;;  %v406_v19 = vld [vmem:[%s2975_s8 + $0x480] sm:$0xff]  ;;  %v411_v20 = vld [vmem:[%s2975_s8 + $0x4a8] sm:$0xff] }
 0x126   : > { %2295 = vmatprep.subr.bf16.mxu0 %v2294_v28  ;;  %2551 = vmatprep.subr.bf16.mxu1 %v2550_v33  ;;  %v281_v28 = vld [vmem:[%s2975_s8 + $0x98] sm:$0xff]  ;;  %v366_v33 = vld [vmem:[%s2975_s8 + $0x340] sm:$0xff] }
 0x127   : > { %v2572_v37 = vpack.c.bf16 %v281_v28, %v276_v27  ;;  %v326_v27 = vld [vmem:[%s2975_s8 + $0x200] sm:$0xff]  ;;  %v331_v28 = vld [vmem:[%s2975_s8 + $0x228] sm:$0xff] }
 0x129   : > { %2297 = vmatpush1.bf16.msra.mxu0 %v2296_v39  ;;  %2553 = vmatpush1.bf16.msra.mxu1 %v2552_v40  ;;  %v2574_v39 = vpack.c.bf16 %v371_v34, %v366_v33  ;;  %v286_v40 = vld [vmem:[%s2975_s8 + $0xc0] sm:$0xff]  ;;  %v416_v33 = vld [vmem:[%s2975_s8 + $0x4d0] sm:$0xff]  ;;  %v421_v34 = vld [vmem:[%s2975_s8 + $0x4f8] sm:$0xff] }
 0x12a   : > { %2299 = vmatprep.subr.bf16.mxu0 %v2298_v41  ;;  %2555 = vmatprep.subr.bf16.mxu1 %v2554_v45  ;;  %v291_v41 = vld [vmem:[%s2975_s8 + $0xe8] sm:$0xff]  ;;  %v376_v45 = vld [vmem:[%s2975_s8 + $0x390] sm:$0xff] }
 0x12d   : > { %2301 = vmatpush1.bf16.msra.mxu0 %v2300_v51  ;;  %2557 = vmatpush1.bf16.msra.mxu1 %v2556_v52  ;;  %v2576_v51 = vpack.c.bf16 %v291_v41, %v286_v40  ;;  %v2608_v52 = vpack.c.bf16 %v451_v44, %v446_v42  ;;  %v336_v40 = vld [vmem:[%s2975_s8 + $0x250] sm:$0xff]  ;;  %v341_v41 = vld [vmem:[%s2975_s8 + $0x278] sm:$0xff] }
 0x12e   : > { %2303 = vmatprep.subr.bf16.mxu0 %v2302_v53  ;;  %2559 = vmatprep.subr.bf16.mxu1 %v2558_v57  ;;  %v2578_v53 = vpack.c.bf16 %v381_v46, %v376_v45  ;;  %v2610_v57 = vpack.c.bf16 %v541_v49, %v536_v48  ;;  %v496_v42 = vld [vmem:[%s2975_s8 + $0x750] sm:$0xff]  ;;  %v501_v44 = vld [vmem:[%s2975_s8 + $0x778] sm:$0xff]  ;;  %v666_v45 = vld [vmem:[%s2975_s8 + $0xca0] sm:$0xff]  ;;  %v2596_v49 = vpack.c.bf16 %v341_v41, %v336_v40 }
 0x12f   : > { %v671_v46 = vld [vmem:[%s2975_s8 + $0xcc8] sm:$0xff]  ;;  %v626_v40 = vld [vmem:[%s2975_s8 + $0xb60] sm:$0xff] }
 0x130   : > { %v831_v48 = vld [vmem:[%s2975_s8 + $0x11c8] sm:$0xff] }
 0x131   : > { %2305 = vmatpush1.bf16.msra.mxu0 %v2304_v63  ;;  %2561 = vmatpush1.bf16.msra.mxu1 %v2560_v0  ;;  %v2580_v63 = vpack.c.bf16 %v301_v55, %v296_v54  ;;  %v2612_v0 = vpack.c.bf16 %v461_v58, %v456_v56  ;;  %v746_v54 = vld [vmem:[%s2975_s8 + $0xf20] sm:$0xff]  ;;  %v751_v56 = vld [vmem:[%s2975_s8 + $0xf48] sm:$0xff]  ;;  %v681_v58 = vld [vmem:[%s2975_s8 + $0xd18] sm:$0xff] }
 0x132   : > { %2307 = vmatprep.subr.bf16.mxu0 %v2306_v1  ;;  %2563 = vmatprep.subr.bf16.mxu1 %v2562_v5  ;;  %v2582_v1 = vpack.c.bf16 %v391_v60, %v386_v59  ;;  %v2614_v5 = vpack.c.bf16 %v551_v62, %v546_v61  ;;  %v836_v59 = vld [vmem:[%s2975_s8 + $0x11f0] sm:$0xff]  ;;  %v841_v60 = vld [vmem:[%s2975_s8 + $0x1218] sm:$0xff]  ;;  %v2664_v62 = vpack.c.bf16 %v751_v56, %v746_v54  ;;  %v631_v41 = vld [vmem:[%s2975_s8 + $0xb88] sm:$0xff] }
 0x133   : > { %v796_v54 = vld [vmem:[%s2975_s8 + $0x10b0] sm:$0xff]  ;;  %v801_v56 = vld [vmem:[%s2975_s8 + $0x10d8] sm:$0xff] }
 0x135   : > { %2309 = vmatpush1.bf16.msra.mxu0 %v2308_v11  ;;  %2565 = vmatpush1.bf16.msra.mxu1 %v2564_v12  ;;  %v2584_v11 = vpack.c.bf16 %v311_v3, %v306_v2  ;;  %v2616_v12 = vpack.c.bf16 %v471_v6, %v466_v4  ;;  %v756_v2 = vld [vmem:[%s2975_s8 + $0xf70] sm:$0xff]  ;;  %v2666_v3 = vpack.c.bf16 %v841_v60, %v836_v59  ;;  %v761_v4 = vld [vmem:[%s2975_s8 + $0xf98] sm:$0xff]  ;;  %v691_v6 = vld [vmem:[%s2975_s8 + $0xd68] sm:$0xff] }
 0x136   : > { %2567 = vmatprep.subr.bf16.mxu0 %v2566_v13  ;;  %2599 = vmatprep.subr.bf16.mxu1 %v2598_v17  ;;  %v2586_v13 = vpack.c.bf16 %v401_v8, %v396_v7  ;;  %v2618_v17 = vpack.c.bf16 %v561_v10, %v556_v9  ;;  %v2772_v7 = vld [vmem:[%s3705_s0] sm:$0xff]  ;;  %v851_v9 = vld [vmem:[%s2975_s8 + $0x1268] sm:$0xff]  ;;  %v2773_v10 = vld [vmem:[%s3705_s0 + $0x10] sm:$0xff] }
 0x137   : > { %v846_v8 = vld [vmem:[%s2975_s8 + $0x1240] sm:$0xff]  ;;  %v891_v60 = vld [vmem:[%s2975_s8 + $0x13a8] sm:$0xff] }
 0x138   : > { %1207 = vmatmul.mubr.f32.vlgmr.msra.gmra.mrb[0].mxu0 %v3533_v23  ;;  %1491 = vmatmul.mubr.f32.vlgmr.msra.gmra.mrb[0].mxu1 %v3533_v23  ;;  %v886_v59 = vld [vmem:[%s2975_s8 + $0x1380] sm:$0xff] }
 0x139   : > { %2569 = vmatpush3.bf16.msra.mxu0 %v2568_v24  ;;  %2601 = vmatpush3.bf16.msra.mxu1 %v2600_v25  ;;  %v2588_v24 = vpack.c.bf16 %v321_v15, %v316_v14  ;;  %v2620_v25 = vpack.c.bf16 %v481_v18, %v476_v16  ;;  %v606_v14 = vld [vmem:[%s2975_s8 + $0xac0] sm:$0xff]  ;;  %v611_v15 = vld [vmem:[%s2975_s8 + $0xae8] sm:$0xff] }
 0x13a   : > { %2571 = vmatprep.subr.bf16.mxu0 %v2570_v26  ;;  %2603 = vmatprep.subr.bf16.mxu1 %v2602_v30  ;;  %v2590_v26 = vpack.c.bf16 %v411_v20, %v406_v19  ;;  %v2622_v30 = vpack.c.bf16 %v571_v22, %v566_v21  ;;  %v766_v16 = vld [vmem:[%s2975_s8 + $0xfc0] sm:$0xff]  ;;  %v771_v18 = vld [vmem:[%s2975_s8 + $0xfe8] sm:$0xff]  ;;  %v696_v19 = vld [vmem:[%s2975_s8 + $0xd90] sm:$0xff] }
 0x13b   : > { %1561 = vmatprep.mubr.f32.mxu0 %v2770_v47  ;;  %1631 = vmatprep.mubr.f32.mxu1 %v2771_v50  ;;  %v826_v47 = vld [vmem:[%s2975_s8 + $0x11a0] sm:$0xff]  ;;  %v2628_v50 = vpack.c.bf16 %v501_v44, %v496_v42  ;;  %v701_v20 = vld [vmem:[%s2975_s8 + $0xdb8] sm:$0xff]  ;;  %v2774_v21 = vld [vmem:[%s3705_s0 + $0x28] sm:$0xff] }
 0x13c   : > { %v2662_v55 = vpack.c.bf16 %v831_v48, %v826_v47  ;;  %v856_v22 = vld [vmem:[%s2975_s8 + $0x1290] sm:$0xff]  ;;  %v786_v42 = vld [vmem:[%s2975_s8 + $0x1060] sm:$0xff]  ;;  %v791_v44 = vld [vmem:[%s2975_s8 + $0x1088] sm:$0xff] }
 0x13d   : > { %2573 = vmatpush3.bf16.msra.mxu0 %v2572_v37  ;;  %2605 = vmatpush3.bf16.msra.mxu1 %v2604_v38  ;;  %v2592_v37 = vpack.c.bf16 %v331_v28, %v326_v27  ;;  %v2624_v38 = vpack.c.bf16 %v491_v31, %v486_v29  ;;  %v2642_v27 = vpack.c.bf16 %v701_v20, %v696_v19  ;;  %v616_v28 = vld [vmem:[%s2975_s8 + $0xb10] sm:$0xff]  ;;  %v621_v29 = vld [vmem:[%s2975_s8 + $0xb38] sm:$0xff]  ;;  %v2775_v19 = vld [vmem:[%s3705_s0 + $0x20] sm:$0xff]  ;;  %v904_v20 = vlaneseq }
 0x13e   : > { %2575 = vmatprep.subr.bf16.mxu0 %v2574_v39  ;;  %2607 = vmatprep.subr.bf16.mxu1 %v2606_v43  ;;  %v2594_v39 = vpack.c.bf16 %v421_v34, %v416_v33  ;;  %v2626_v43 = vpack.c.bf16 %v581_v36, %v576_v35  ;;  %v781_v33 = vld [vmem:[%s2975_s8 + $0x1038] sm:$0xff]  ;;  %v706_v34 = vld [vmem:[%s2975_s8 + $0xde0] sm:$0xff]  ;;  %v871_v36 = vld [vmem:[%s2975_s8 + $0x1308] sm:$0xff] }
 0x13f   : > { %v866_v35 = vld [vmem:[%s2975_s8 + $0x12e0] sm:$0xff]  ;;  %v876_v47 = vld [vmem:[%s2975_s8 + $0x1330] sm:$0xff]  ;;  %v881_v48 = vld [vmem:[%s2975_s8 + $0x1358] sm:$0xff] }
 0x141   : > { %2577 = vmatpush3.bf16.msra.mxu0 %v2576_v51  ;;  %2609 = vmatpush3.bf16.msra.mxu1 %v2608_v52  ;;  %v2630_v51 = vpack.c.bf16 %v671_v46, %v666_v45  ;;  %v586_v52 = vld [vmem:[%s2975_s8 + $0xa20] sm:$0xff]  ;;  %v716_v45 = vld [vmem:[%s2975_s8 + $0xe30] sm:$0xff]  ;;  %v721_v46 = vld [vmem:[%s2975_s8 + $0xe58] sm:$0xff] }
 0x142   : > { %2579 = vmatprep.subr.bf16.mxu0 %v2578_v53  ;;  %2611 = vmatprep.subr.bf16.mxu1 %v2610_v57  ;;  %v591_v53 = vld [vmem:[%s2975_s8 + $0xa48] sm:$0xff]  ;;  %v676_v57 = vld [vmem:[%s2975_s8 + $0xcf0] sm:$0xff] }
 0x143   : > { %v2632_v61 = vpack.c.bf16 %v591_v53, %v586_v52  ;;  %v636_v52 = vld [vmem:[%s2975_s8 + $0xbb0] sm:$0xff]  ;;  %v641_v53 = vld [vmem:[%s2975_s8 + $0xbd8] sm:$0xff] }
 0x145   : > { %2581 = vmatpush3.bf16.msra.mxu0 %v2580_v63  ;;  %2613 = vmatpush3.bf16.msra.mxu1 %v2612_v0  ;;  %v2634_v63 = vpack.c.bf16 %v681_v58, %v676_v57  ;;  %v596_v0 = vld [vmem:[%s2975_s8 + $0xa70] sm:$0xff]  ;;  %v726_v57 = vld [vmem:[%s2975_s8 + $0xe80] sm:$0xff]  ;;  %v731_v58 = vld [vmem:[%s2975_s8 + $0xea8] sm:$0xff] }
 0x146   : > { %2583 = vmatprep.subr.bf16.mxu0 %v2582_v1  ;;  %2615 = vmatprep.subr.bf16.mxu1 %v2614_v5  ;;  %v601_v1 = vld [vmem:[%s2975_s8 + $0xa98] sm:$0xff]  ;;  %v686_v5 = vld [vmem:[%s2975_s8 + $0xd40] sm:$0xff] }
 0x149   : > { %2585 = vmatpush3.bf16.msra.mxu0 %v2584_v11  ;;  %2617 = vmatpush3.bf16.msra.mxu1 %v2616_v12  ;;  %v2636_v11 = vpack.c.bf16 %v601_v1, %v596_v0  ;;  %v2668_v12 = vpack.c.bf16 %v761_v4, %v756_v2  ;;  %v646_v0 = vld [vmem:[%s2975_s8 + $0xc00] sm:$0xff]  ;;  %v651_v1 = vld [vmem:[%s2975_s8 + $0xc28] sm:$0xff] }
 0x14a   : > { %2587 = vmatprep.subr.bf16.mxu0 %v2586_v13  ;;  %2619 = vmatprep.subr.bf16.mxu1 %v2618_v17  ;;  %v2638_v13 = vpack.c.bf16 %v691_v6, %v686_v5  ;;  %v2670_v17 = vpack.c.bf16 %v851_v9, %v846_v8  ;;  %v806_v2 = vld [vmem:[%s2975_s8 + $0x1100] sm:$0xff]  ;;  %v811_v4 = vld [vmem:[%s2975_s8 + $0x1128] sm:$0xff]  ;;  %v736_v5 = vld [vmem:[%s2975_s8 + $0xed0] sm:$0xff]  ;;  %v2656_v9 = vpack.c.bf16 %v651_v1, %v646_v0 }
 0x14b   : > { %v741_v6 = vld [vmem:[%s2975_s8 + $0xef8] sm:$0xff] }
 0x14c   : > { %v901_v8 = vld [vmem:[%s2975_s8 + $0x13f8] sm:$0xff] }
 0x14d   : > { %2589 = vmatpush3.bf16.msra.mxu0 %v2588_v24  ;;  %2621 = vmatpush3.bf16.msra.mxu1 %v2620_v25  ;;  %v861_v24 = vld [vmem:[%s2975_s8 + $0x12b8] sm:$0xff]  ;;  %v2640_v25 = vpack.c.bf16 %v611_v15, %v606_v14  ;;  %v816_v15 = vld [vmem:[%s2975_s8 + $0x1150] sm:$0xff] }
 0x14e   : > { %2591 = vmatprep.subr.bf16.mxu0 %v2590_v26  ;;  %2623 = vmatprep.subr.bf16.mxu1 %v2622_v30  ;;  %v2672_v26 = vpack.c.bf16 %v771_v18, %v766_v16  ;;  %v776_v30 = vld [vmem:[%s2975_s8 + $0x1010] sm:$0xff]  ;;  %v2674_v31 = vpack.c.bf16 %v861_v24, %v856_v22  ;;  %v821_v16 = vld [vmem:[%s2975_s8 + $0x1178] sm:$0xff]  ;;  %v902_v24 = vld [vmem:[%s242_s21] sm:$0x1f] }
 0x14f   : > { %v2692_v18 = vpack.c.bf16 %v821_v16, %v816_v15 }
 0x151   : > { %2593 = vmatpush3.bf16.msra.mxu0 %v2592_v37  ;;  %2625 = vmatpush3.bf16.msra.mxu1 %v2624_v38  ;;  %v2644_v37 = vpack.c.bf16 %v621_v29, %v616_v28  ;;  %v2676_v38 = vpack.c.bf16 %v781_v33, %v776_v30 }
 0x152   : > { %2595 = vmatprep.subr.bf16.mxu0 %v2594_v39  ;;  %2627 = vmatprep.subr.bf16.mxu1 %v2626_v43  ;;  %v2678_v43 = vpack.c.bf16 %v871_v36, %v866_v35 }
 0x155   : > { %2597 = vmatpush3.bf16.msra.mxu0 %v2596_v49  ;;  %2629 = vmatpush3.bf16.msra.mxu1 %v2628_v50  ;;  %v2648_v49 = vpack.c.bf16 %v631_v41, %v626_v40  ;;  %v2680_v50 = vpack.c.bf16 %v791_v44, %v786_v42 }
 0x156   : > { %2631 = vmatprep.subr.bf16.mxu0 %v2630_v51  ;;  %2663 = vmatprep.subr.bf16.mxu1 %v2662_v55  ;;  %v2650_v51 = vpack.c.bf16 %v721_v46, %v716_v45  ;;  %v2682_v55 = vpack.c.bf16 %v881_v48, %v876_v47 }
 0x158   : > { %1562 = vmatmul.mubr.f32.vlgmr.msra.gmra.mrb[2].mxu0 %v2772_v7  ;;  %1632 = vmatmul.mubr.f32.vlgmr.msra.gmra.mrb[2].mxu1 %v2773_v10  ;;  %v896_v7 = vld [vmem:[%s2975_s8 + $0x13d0] sm:$0xff]  ;;  %v2688_v10 = vpack.c.bf16 %v811_v4, %v806_v2 }
 0x159   : > { %2633 = vmatpush3.bf16.msra.mxu0 %v2632_v61  ;;  %2665 = vmatpush3.bf16.msra.mxu1 %v2664_v62  ;;  %v2652_v61 = vpack.c.bf16 %v641_v53, %v636_v52  ;;  %v2684_v62 = vpack.c.bf16 %v801_v56, %v796_v54  ;;  %v2690_v14 = vpack.c.bf16 %v901_v8, %v896_v7 }
 0x15a   : > { %2635 = vmatprep.subr.bf16.mxu0 %v2634_v63  ;;  %2667 = vmatprep.subr.bf16.mxu1 %v2666_v3  ;;  %v2654_v63 = vpack.c.bf16 %v731_v58, %v726_v57  ;;  %v2686_v3 = vpack.c.bf16 %v891_v60, %v886_v59 }
 0x15b   : > { %1701 = vmatprep.mubr.f32.mxu0 %v2774_v21  ;;  %1771 = vmatprep.mubr.f32.mxu1 %v3406_v32  ;;  %v711_v32 = vld [vmem:[%s2975_s8 + $0xe08] sm:$0xff]  ;;  %v905_v21 = vshrl.u32 %v904_v20, 7 }
 0x15c   : > { %v2646_v39 = vpack.c.bf16 %v711_v32, %v706_v34 }
 0x15d   : > { %2637 = vmatpush3.bf16.msra.mxu0 %v2636_v11  ;;  %2669 = vmatpush3.bf16.msra.mxu1 %v2668_v12  ;;  %v2658_v11 = vpack.c.bf16 %v741_v6, %v736_v5  ;;  %v656_v12 = vld [vmem:[%s2975_s8 + $0xc50] sm:$0xff]  ;;  %v906_v22 = vsub.s32 0, %v905_v21 }
 0x15e   : > { %2639 = vmatprep.subr.bf16.mxu0 %v2638_v13  ;;  %2671 = vmatprep.subr.bf16.mxu1 %v2670_v17  ;;  %v661_v13 = vld [vmem:[%s2975_s8 + $0xc78] sm:$0xff] }
 0x15f   : > { %v2660_v17 = vpack.c.bf16 %v661_v13, %v656_v12  ;;  %v907_v28 = vrot.slane %v902_v24, %v906_v22 }
 0x161   : > { %2641 = vmatpush3.bf16.msra.mxu0 %v2640_v25  ;;  %2673 = vmatpush3.bf16.msra.mxu1 %v2672_v26  ;;  %v914_v25 = vsub.s32 2, %v905_v21  ;;  %v910_v26 = vsub.s32 1, %v905_v21 }
 0x162   : > { %2643 = vmatprep.subr.bf16.mxu0 %v2642_v27  ;;  %2675 = vmatprep.subr.bf16.mxu1 %v2674_v31  ;;  %v918_v27 = vsub.s32 3, %v905_v21 }
 0x163   : > { %v915_v29 = vrot.slane %v902_v24, %v914_v25  ;;  %v911_v30 = vrot.slane %v902_v24, %v910_v26 }
 0x164   : > { %v919_v31 = vrot.slane %v902_v24, %v918_v27 }
 0x165   : > { %2645 = vmatpush3.bf16.msra.mxu0 %v2644_v37  ;;  %2677 = vmatpush3.bf16.msra.mxu1 %v2676_v38 }
 0x166   : > { %2647 = vmatprep.subr.bf16.mxu0 %v2646_v39  ;;  %2679 = vmatprep.subr.bf16.mxu1 %v2678_v43  ;;  %v922_v43 = vsub.s32 4, %v905_v21 }
 0x168   : > { %v923_v45 = vrot.slane %v902_v24, %v922_v43 }
 0x169   : > { %2649 = vmatpush3.bf16.msra.mxu0 %v2648_v49  ;;  %2681 = vmatpush3.bf16.msra.mxu1 %v2680_v50 }
 0x16a   : > { %2651 = vmatprep.subr.bf16.mxu0 %v2650_v51  ;;  %2683 = vmatprep.subr.bf16.mxu1 %v2682_v55 }
 0x16d   : > { %2653 = vmatpush3.bf16.msra.mxu0 %v2652_v61  ;;  %2685 = vmatpush3.bf16.msra.mxu1 %v2684_v62 }
 0x16e   : > { %2655 = vmatprep.subr.bf16.mxu0 %v2654_v63  ;;  %2687 = vmatprep.subr.bf16.mxu1 %v2686_v3 }
 0x171   : > { %2657 = vmatpush3.bf16.msra.mxu0 %v2656_v9  ;;  %2689 = vmatpush3.bf16.msra.mxu1 %v2688_v10 }
 0x172   : > { %2659 = vmatprep.subr.bf16.mxu0 %v2658_v11  ;;  %2691 = vmatprep.subr.bf16.mxu1 %v2690_v14 }
 0x175   : > { %2661 = vmatpush3.bf16.msra.mxu0 %v2660_v17  ;;  %2693 = vmatpush3.bf16.msra.mxu1 %v2692_v18 }
 0x178   : > { %1702 = vmatmul.mubr.f32.vlgmr.msra.gmra.mrb[4].mxu0 %v2775_v19  ;;  %1772 = vmatmul.mubr.f32.vlgmr.msra.gmra.mrb[4].mxu1 %v3533_v23 }
 0x20b   : > { %v1208_v23 = vpop.f32.mrb[0].mxu0  ;;  %v1492_v34 = vpop.f32.mrb[0].mxu1 }
 0x20c   : > { %v2694_v33 = vadd.f32 %v1208_v23, %v907_v28  ;;  %v1210_v32 = vpop.f32.mrb[1].mxu0  ;;  %v2696_v35 = vadd.f32 %v1492_v34, %v915_v29  ;;  %v1494_v37 = vpop.f32.mrb[1].mxu1 }
 0x20d   : > { %v2695_v36 = vadd.f32 %v1210_v32, %v911_v30  ;;  %v2697_v39 = vadd.f32 %v1494_v37, %v919_v31 }
 0x20e   : > { %v1777_v38 = vmax.f32 %v2694_v33, 0.0  ;;  %v1779_v40 = vmax.f32 %v2696_v35, 0.0 }
 0x20f   : > { %v1778_v41 = vmax.f32 %v2695_v36, 0.0  ;;  %v1780_v42 = vmax.f32 %v2697_v39, 0.0 }
 0x210   : > { %1782 = vst [vmem:[%s3680_s26] sm:$0xff] %v1777_v38  ;;  %1784 = vst [vmem:[%s3680_s26 + $0x10] sm:$0xff] %v1779_v40 }
 0x211   : > { %1783 = vst [vmem:[%s3680_s26 + $0x8] sm:$0xff] %v1778_v41  ;;  %1785 = vst [vmem:[%s3680_s26 + $0x18] sm:$0xff] %v1780_v42 }
 0x22b   : > { %v1946_v44 = vpop.f32.mrb[2].mxu0  ;;  %v1981_v47 = vpop.f32.mrb[2].mxu1 }
 0x22c   : > { %v1947_v46 = vpop.f32.mrb[3].mxu0  ;;  %v1982_v49 = vpop.f32.mrb[3].mxu1 }
 0x22d   : > { %v1948_v48 = vadd.f32 %v1947_v46, %v1946_v44  ;;  %v1983_v50 = vadd.f32 %v1982_v49, %v1981_v47 }
 0x22f   : > { %v1564_v51 = vadd.f32 %v1948_v48, %v923_v45 }
 0x231   : > { %v1634_v52 = vadd.f32 %v1983_v50, %v1564_v51 }
 0x24b   : > { %v2016_v53 = vpop.f32.mrb[4].mxu0  ;;  %v2051_v55 = vpop.f32.mrb[4].mxu1 }
 0x24c   : > { %v2017_v54 = vpop.f32.mrb[5].mxu0  ;;  %v2052_v57 = vpop.f32.mrb[5].mxu1 }
 0x24d   : > { %v2018_v56 = vadd.f32 %v2017_v54, %v2016_v53  ;;  %v2053_v58 = vadd.f32 %v2052_v57, %v2051_v55 }
 0x24f   : > { %v1704_v59 = vadd.f32 %v2018_v56, %v1634_v52 }
 0x251   : > { %v1774_v60 = vadd.f32 %v2053_v58, %v1704_v59 }
 0x253   : > { %v1781_v61 = vmax.f32 %v1774_v60, 0.0 }
 0x255   : > { %1786 = vst [vmem:[%s3680_s26 + $0x20] sm:$0xff] %v1781_v61 }
 0x256 PF: > { %s16_s17 = sadd.s32 1, %s2856_s17   ;;  %s3712_s12 = smov %s2840_s13 }
 0x257   : > { %p13_p9 = scmp.ge.s32.totalorder %s16_s17, 7   ;;  %s3713_s13 = smov %s2844_s14 }
 0x258   : > { %s3714_s14 = smov %s2927_s23  ;;  %s3715_s15 = smov %s2852_s16 }
 0x259   : > { %s3716_s16 = smov %s3718_s19  ;;  %15 = sbr.rel (!%p13_p9) target bundleno = 4 (0x4), region = 78 }
 0x260   :  { %1817 = vsyncpa [#allocation3], 1 }
 0x261   :  { %1819 = vsyncpa [#allocation3 + $0x1], 1 }

// kernel: decoder_forward.8
= control target key start
LH: loop header
LB: loop body
LE: loop exit
PB: predicated region body
PF: predicated region fallthrough
CT: control target
= control target key end

     0   :  { %s1968_s9 = smov 0   ;;  %s1970_s10 = smov 0   ;;  %s2810_s0 = inlined_call_operand.vmem [shape: f32[352,64], index: 0, kind: input, shape index: {}]   ;;  %s2811_s1 = inlined_call_operand.vmem [shape: f32[64,1152], index: 1, kind: input, shape index: {}]   ;;  %s2812_s2 = inlined_call_operand.vmem [shape: f32[352,1152], index: 2, kind: output, shape index: {}]  }
   0x1   :  { %s1972_s11 = smov 0  }
   0x2 LB: > { %s24_s12 = sadd.s32 1, %s1946_s10  ;;  %p1620_p0 = scmp.ge.s32.totalorder %s1950_s11, 1  ;;  %s1950_s11 = sphi %s1972_s11, %s12_s11   ;;  %s1946_s10 = sphi %s1970_s10, %s2815_s10   ;;  %s1942_s9 = sphi %s1968_s9, %s2814_s9  }
   0x3   : > { %p26_p1 = scmp.ge.s32.totalorder %s24_s12, 2  ;;  %p138_p2 = scmp.lt.s32.totalorder %s1950_s11, 3 }
   0x5   : > { %s2817_s12 = smov (%p26_p1, %s24_s12), 0  ;;  %p139_p3 = pnand %p1620_p0, %p138_p2 }
   0x6   : > { %v217_v0 = vld [vmem:[%s2811_s1 + $0x8] sm:$0xff] (!%p139_p3)  ;;  %v226_v1 = vld [vmem:[%s2811_s1 + $0x50] sm:$0xff] (!%p139_p3)  ;;  %v216_v2 = vld [vmem:[%s2811_s1] sm:$0xff] (!%p139_p3)  ;;  %s170_s19 = smul.u32 (!%p139_p3), 22, %s1942_s9  ;;  %v1952_v7 = vmov (!%p139_p3), 0.0   ;;  %vm288_vm0 = vcmask (!%p139_p3), 523264  }
   0x7   : > { %142 = sbr.rel (%p139_p3) target bundleno = 435 (0x1b3), region = 28  ;;  %v1814_v3 = vpack.c.bf16 (!%p139_p3), %v226_v1, %v217_v0  ;;  %v225_v4 = vld [vmem:[%s2811_s1 + $0x48] sm:$0xff] (!%p139_p3)  ;;  %v235_v5 = vld [vmem:[%s2811_s1 + $0x98] sm:$0xff] (!%p139_p3)  ;;  %v244_v6 = vld [vmem:[%s2811_s1 + $0xe0] sm:$0xff] (!%p139_p3)  ;;  %419 = vmatprep.mubr.f32.mxu0 (!%p139_p3), %v1952_v7  ;;  %521 = vmatprep.mubr.f32.mxu1 (!%p139_p3), %v1952_v7 }
   0x8   : > { %v1816_v8 = vpack.c.bf16 (!%p139_p3), %v225_v4, %v216_v2  ;;  %v1818_v9 = vpack.c.bf16 (!%p139_p3), %v244_v6, %v235_v5  ;;  %v234_v10 = vld [vmem:[%s2811_s1 + $0x90] sm:$0xff] (!%p139_p3)  ;;  %v243_v11 = vld [vmem:[%s2811_s1 + $0xd8] sm:$0xff] (!%p139_p3)  ;;  %v253_v12 = vld [vmem:[%s2811_s1 + $0x128] sm:$0xff] (!%p139_p3)  ;;  %p2018_p4 = scmp.lt.s32.totalorder (!%p139_p3), %s170_s19, 43 }
   0x9   : > { %1815 = vmatprep.subr.bf16.mxu0 (!%p139_p3), %v1814_v3  ;;  %1894 = vmatprep.subr.bf16.mxu1 (!%p139_p3), %v1814_v3  ;;  %v262_v13 = vld [vmem:[%s2811_s1 + $0x170] sm:$0xff] (!%p139_p3)  ;;  %v1820_v14 = vpack.c.bf16 (!%p139_p3), %v243_v11, %v234_v10  ;;  %v252_v16 = vld [vmem:[%s2811_s1 + $0x120] sm:$0xff] (!%p139_p3)  ;;  %v261_v17 = vld [vmem:[%s2811_s1 + $0x168] sm:$0xff] (!%p139_p3) }
   0xa   : > { %1817 = vmatpush1.bf16.msra.mxu0 (!%p139_p3), %v1816_v8  ;;  %1898 = vmatpush1.bf16.msra.mxu1 (!%p139_p3), %v1816_v8  ;;  %v1822_v15 = vpack.c.bf16 (!%p139_p3), %v262_v13, %v253_v12  ;;  %v271_v18 = vld [vmem:[%s2811_s1 + $0x1b8] sm:$0xff] (!%p139_p3)  ;;  %v280_v19 = vld [vmem:[%s2811_s1 + $0x200] sm:$0xff] (!%p139_p3)  ;;  %v1824_v20 = vpack.c.bf16 (!%p139_p3), %v261_v17, %v252_v16  ;;  %v270_v22 = vld [vmem:[%s2811_s1 + $0x1b0] sm:$0xff] (!%p139_p3) }
   0xb   : > { %1819 = vmatprep.subr.bf16.mxu0 (!%p139_p3), %v1818_v9  ;;  %1895 = vmatprep.subr.bf16.mxu1 (!%p139_p3), %v1818_v9  ;;  %v1826_v21 = vpack.c.bf16 (!%p139_p3), %v280_v19, %v271_v18  ;;  %v279_v23 = vld [vmem:[%s2811_s1 + $0x1f8] sm:$0xff] (!%p139_p3)  ;;  %v221_v24 = vld [vmem:[%s2811_s1 + $0x28] sm:$0xff] (!%p139_p3)  ;;  %v230_v25 = vld [vmem:[%s2811_s1 + $0x70] sm:$0xff] (!%p139_p3) }
   0xc   : > { %v219_v26 = vld [vmem:[%s2811_s1 + $0x18] sm:$0xff] (!%p139_p3)  ;;  %v228_v27 = vld [vmem:[%s2811_s1 + $0x60] sm:$0xff] (!%p139_p3)  ;;  %v1828_v28 = vpack.c.bf16 (!%p139_p3), %v279_v23, %v270_v22  ;;  %v1846_v29 = vpack.c.bf16 (!%p139_p3), %v230_v25, %v221_v24  ;;  %v229_v31 = vld [vmem:[%s2811_s1 + $0x68] sm:$0xff] (!%p139_p3) }
   0xd   : > { %v220_v30 = vld [vmem:[%s2811_s1 + $0x20] sm:$0xff] (!%p139_p3)  ;;  %v1830_v32 = vpack.c.bf16 (!%p139_p3), %v228_v27, %v219_v26  ;;  %v218_v33 = vld [vmem:[%s2811_s1 + $0x10] sm:$0xff] (!%p139_p3)  ;;  %v227_v34 = vld [vmem:[%s2811_s1 + $0x58] sm:$0xff] (!%p139_p3) }
   0xe   : > { %s2819_s19 = smov (!%p2018_p4, %s170_s19), 43  ;;  %1821 = vmatpush1.bf16.msra.mxu0 %v1820_v14  ;;  %1899 = vmatpush1.bf16.msra.mxu1 %v1820_v14  ;;  %v237_v35 = vld [vmem:[%s2811_s1 + $0xa8] sm:$0xff]  ;;  %v246_v36 = vld [vmem:[%s2811_s1 + $0xf0] sm:$0xff]  ;;  %v239_v37 = vld [vmem:[%s2811_s1 + $0xb8] sm:$0xff]  ;;  %v1848_v40 = vpack.c.bf16 %v229_v31, %v220_v30  ;;  %v1832_v42 = vpack.c.bf16 %v227_v34, %v218_v33 }
   0xf   : > { %1823 = vmatprep.subr.bf16.mxu0 %v1822_v15  ;;  %1896 = vmatprep.subr.bf16.mxu1 %v1822_v15  ;;  %s1621_s25 = sshll.u32 %s2819_s19, 3  ;;  %v248_v38 = vld [vmem:[%s2811_s1 + $0x100] sm:$0xff]  ;;  %v245_v44 = vld [vmem:[%s2811_s1 + $0xe8] sm:$0xff]  ;;  %v1834_v45 = vpack.c.bf16 %v246_v36, %v237_v35  ;;  %v255_v46 = vld [vmem:[%s2811_s1 + $0x138] sm:$0xff]  ;;  %s1902_s22 = smul.u32 72, %s2819_s19 }
  0x10   : > { %s2063_s6 = scalar_lea.vmem %s2810_s0, %s1621_s25  ;;  %v236_v43 = vld [vmem:[%s2811_s1 + $0xa0] sm:$0xff]  ;;  %v1850_v47 = vpack.c.bf16 %v248_v38, %v239_v37  ;;  %v238_v48 = vld [vmem:[%s2811_s1 + $0xb0] sm:$0xff]  ;;  %v247_v49 = vld [vmem:[%s2811_s1 + $0xf8] sm:$0xff] }
  0x11   : > { %v2090_v39 = vld [vmem:[%s2063_s6] sm:$0xff]  ;;  %v2093_v41 = vld [vmem:[%s2063_s6 + $0x88] sm:$0xff]  ;;  %v266_v52 = vld [vmem:[%s2811_s1 + $0x190] sm:$0xff]  ;;  %v1836_v55 = vpack.c.bf16 %v245_v44, %v236_v43  ;;  %v1852_v58 = vpack.c.bf16 %v247_v49, %v238_v48  ;;  %s2601_s25 = scalar_lea.vmem %s2812_s2, %s1902_s22 }
  0x12   : > { %1825 = vmatpush1.bf16.msra.mxu0 %v1824_v20  ;;  %1900 = vmatpush1.bf16.msra.mxu1 %v1824_v20  ;;  %v264_v50 = vld [vmem:[%s2811_s1 + $0x180] sm:$0xff]  ;;  %v257_v51 = vld [vmem:[%s2811_s1 + $0x148] sm:$0xff]  ;;  %v2128_v54 = vld [vmem:[%s2063_s6 + $0x90] sm:$0xff] }
  0x13   : > { %1827 = vmatprep.subr.bf16.mxu0 %v1826_v21  ;;  %1897 = vmatprep.subr.bf16.mxu1 %v1826_v21  ;;  %v2125_v53 = vld [vmem:[%s2063_s6 + $0x8] sm:$0xff]  ;;  %v254_v56 = vld [vmem:[%s2811_s1 + $0x130] sm:$0xff]  ;;  %v263_v57 = vld [vmem:[%s2811_s1 + $0x178] sm:$0xff]  ;;  %v1838_v59 = vpack.c.bf16 %v264_v50, %v255_v46  ;;  %v1854_v61 = vpack.c.bf16 %v266_v52, %v257_v51 }
  0x14   : > { %v273_v60 = vld [vmem:[%s2811_s1 + $0x1c8] sm:$0xff]  ;;  %v256_v62 = vld [vmem:[%s2811_s1 + $0x140] sm:$0xff]  ;;  %v282_v0 = vld [vmem:[%s2811_s1 + $0x210] sm:$0xff]  ;;  %v1840_v5 = vpack.c.bf16 %v263_v57, %v254_v56 }
  0x15   : > { %v265_v63 = vld [vmem:[%s2811_s1 + $0x188] sm:$0xff]  ;;  %v275_v1 = vld [vmem:[%s2811_s1 + $0x1d8] sm:$0xff]  ;;  %v284_v2 = vld [vmem:[%s2811_s1 + $0x220] sm:$0xff]  ;;  %v1842_v10 = vpack.c.bf16 %v282_v0, %v273_v60 }
  0x16   : > { %1829 = vmatpush1.bf16.msra.mxu0 %v1828_v28  ;;  %1901 = vmatpush1.bf16.msra.mxu1 %v1828_v28  ;;  %v2161_v3 = vld [vmem:[%s2063_s6 + $0x10] sm:$0xff]  ;;  %v2165_v4 = vld [vmem:[%s2063_s6 + $0x98] sm:$0xff]  ;;  %v272_v6 = vld [vmem:[%s2811_s1 + $0x1c0] sm:$0xff]  ;;  %v1856_v9 = vpack.c.bf16 %v265_v63, %v256_v62  ;;  %v1858_v12 = vpack.c.bf16 %v284_v2, %v275_v1 }
  0x17   : > { %1847 = vmatprep.subr.bf16.mxu0 %v1846_v29  ;;  %1831 = vmatprep.subr.bf16.mxu1 %v1830_v32  ;;  %v281_v8 = vld [vmem:[%s2811_s1 + $0x208] sm:$0xff]  ;;  %v223_v11 = vld [vmem:[%s2811_s1 + $0x38] sm:$0xff]  ;;  %v274_v13 = vld [vmem:[%s2811_s1 + $0x1d0] sm:$0xff] }
  0x18   : > { %v283_v14 = vld [vmem:[%s2811_s1 + $0x218] sm:$0xff]  ;;  %v232_v15 = vld [vmem:[%s2811_s1 + $0x80] sm:$0xff]  ;;  %v233_v17 = vld [vmem:[%s2811_s1 + $0x88] sm:$0xff]  ;;  %v1844_v20 = vpack.c.bf16 %v281_v8, %v272_v6 }
  0x19   : > { %1623 = vmatmul.mubr.msk.f32.vlgmr.msra.gmra.mrb[0].mxu0 %vm288_vm0, %v2090_v39  ;;  %1640 = vmatmul.mubr.msk.f32.vlgmr.msra.gmra.mrb[0].mxu1 %vm288_vm0, %v2093_v41  ;;  %v224_v16 = vld [vmem:[%s2811_s1 + $0x40] sm:$0xff]  ;;  %v2197_v18 = vld [vmem:[%s2063_s6 + $0x18] sm:$0xff]  ;;  %v1860_v21 = vpack.c.bf16 %v283_v14, %v274_v13  ;;  %v1862_v22 = vpack.c.bf16 %v232_v15, %v223_v11  ;;  %v2215_v25 = vld [vmem:[%s2063_s6 + $0xa8] sm:$0xff] }
  0x1a   : > { %1849 = vmatpush1.bf16.msra.mxu0 %v1848_v40  ;;  %425 = vmatprep.mubr.f32.mxu0 %v1952_v7  ;;  %v2201_v19 = vld [vmem:[%s2063_s6 + $0xa0] sm:$0xff]  ;;  %v2203_v23 = vpack.c.bf16 %v233_v17, %v224_v16  ;;  %v222_v26 = vld [vmem:[%s2811_s1 + $0x30] sm:$0xff]  ;;  %v231_v27 = vld [vmem:[%s2811_s1 + $0x78] sm:$0xff] }
  0x1b   : > { %1833 = vmatpush1.bf16.msra.mxu1 %v1832_v42  ;;  %527 = vmatprep.mubr.f32.mxu1 %v1952_v7  ;;  %v2211_v24 = vld [vmem:[%s2063_s6 + $0x20] sm:$0xff]  ;;  %v241_v28 = vld [vmem:[%s2811_s1 + $0xc8] sm:$0xff]  ;;  %v250_v29 = vld [vmem:[%s2811_s1 + $0x110] sm:$0xff]  ;;  %v1864_v31 = vpack.c.bf16 %v231_v27, %v222_v26 }
  0x1c   : > { %1835 = vmatprep.subr.bf16.mxu1 %v1834_v45  ;;  %1851 = vmatprep.subr.bf16.mxu0 %v1850_v47  ;;  %v2236_v30 = vld [vmem:[%s2063_s6 + $0x28] sm:$0xff]  ;;  %v1866_v32 = vpack.c.bf16 %v250_v29, %v241_v28  ;;  %v240_v33 = vld [vmem:[%s2811_s1 + $0xc0] sm:$0xff]  ;;  %v259_v35 = vld [vmem:[%s2811_s1 + $0x158] sm:$0xff] }
  0x1d   : > { %1624 = vmatmul.mubr.msk.f32.gmra.mrb[2].mxu0 %vm288_vm0, %v2125_v53  ;;  %1641 = vmatmul.mubr.msk.f32.gmra.mrb[2].mxu1 %vm288_vm0, %v2128_v54  ;;  %v249_v34 = vld [vmem:[%s2811_s1 + $0x108] sm:$0xff]  ;;  %v268_v36 = vld [vmem:[%s2811_s1 + $0x1a0] sm:$0xff]  ;;  %v2257_v37 = vld [vmem:[%s2063_s6 + $0x30] sm:$0xff] }
  0x1e   : > { %431 = vmatprep.mubr.f32.mxu0 %v1952_v7  ;;  %533 = vmatprep.mubr.f32.mxu1 %v1952_v7  ;;  %v1868_v38 = vpack.c.bf16 %v249_v34, %v240_v33  ;;  %v1870_v40 = vpack.c.bf16 %v268_v36, %v259_v35  ;;  %v258_v42 = vld [vmem:[%s2811_s1 + $0x150] sm:$0xff]  ;;  %v267_v43 = vld [vmem:[%s2811_s1 + $0x198] sm:$0xff]  ;;  %v277_v44 = vld [vmem:[%s2811_s1 + $0x1e8] sm:$0xff] }
  0x1f   : > { %1837 = vmatpush1.bf16.msra.mxu1 %v1836_v55  ;;  %1853 = vmatpush1.bf16.msra.mxu0 %v1852_v58  ;;  %v286_v45 = vld [vmem:[%s2811_s1 + $0x230] sm:$0xff]  ;;  %v2278_v46 = vld [vmem:[%s2063_s6 + $0x38] sm:$0xff]  ;;  %v1872_v47 = vpack.c.bf16 %v267_v43, %v258_v42  ;;  %v276_v49 = vld [vmem:[%s2811_s1 + $0x1e0] sm:$0xff] }
  0x20   : > { %1839 = vmatprep.subr.bf16.mxu1 %v1838_v59  ;;  %1855 = vmatprep.subr.bf16.mxu0 %v1854_v61  ;;  %v1874_v48 = vpack.c.bf16 %v286_v45, %v277_v44  ;;  %v285_v50 = vld [vmem:[%s2811_s1 + $0x228] sm:$0xff]  ;;  %v2293_v51 = vld [vmem:[%s2063_s6 + $0x40] sm:$0xff]  ;;  %v2311_v56 = vld [vmem:[%s2063_s6 + $0x50] sm:$0xff] }
  0x21   : > { %1625 = vmatmul.mubr.msk.f32.gmra.mrb[4].mxu0 %vm288_vm0, %v2161_v3  ;;  %1642 = vmatmul.mubr.msk.f32.gmra.mrb[4].mxu1 %vm288_vm0, %v2165_v4  ;;  %v1876_v52 = vpack.c.bf16 %v285_v50, %v276_v49  ;;  %v2302_v55 = vld [vmem:[%s2063_s6 + $0x48] sm:$0xff]  ;;  %v2320_v57 = vld [vmem:[%s2063_s6 + $0x58] sm:$0xff]  ;;  %v2329_v58 = vld [vmem:[%s2063_s6 + $0x60] sm:$0xff] }
  0x22   : > { %437 = vmatprep.mubr.f32.mxu0 %v1952_v7  ;;  %539 = vmatprep.mubr.f32.mxu1 %v1952_v7  ;;  %v2338_v59 = vld [vmem:[%s2063_s6 + $0x68] sm:$0xff]  ;;  %v2347_v60 = vld [vmem:[%s2063_s6 + $0x70] sm:$0xff]  ;;  %v2356_v61 = vld [vmem:[%s2063_s6 + $0x78] sm:$0xff] }
  0x23   : > { %1841 = vmatpush1.bf16.msra.mxu1 %v1840_v5  ;;  %1857 = vmatpush1.bf16.msra.mxu0 %v1856_v9  ;;  %v2365_v62 = vld [vmem:[%s2063_s6 + $0x80] sm:$0xff]  ;;  %v242_v63 = vld [vmem:[%s2811_s1 + $0xd0] sm:$0xff]  ;;  %v251_v0 = vld [vmem:[%s2811_s1 + $0x118] sm:$0xff] }
  0x24   : > { %1843 = vmatprep.subr.bf16.mxu1 %v1842_v10  ;;  %1859 = vmatprep.subr.bf16.mxu0 %v1858_v12  ;;  %v1882_v1 = vpack.c.bf16 %v251_v0, %v242_v63  ;;  %v260_v2 = vld [vmem:[%s2811_s1 + $0x160] sm:$0xff]  ;;  %v269_v5 = vld [vmem:[%s2811_s1 + $0x1a8] sm:$0xff]  ;;  %v278_v8 = vld [vmem:[%s2811_s1 + $0x1f0] sm:$0xff] }
  0x25   : > { %1626 = vmatmul.mubr.msk.f32.gmra.mrb[6].mxu0 %vm288_vm0, %v2197_v18  ;;  %1643 = vmatmul.mubr.msk.f32.gmra.mrb[6].mxu1 %vm288_vm0, %v2201_v19  ;;  %v1886_v6 = vpack.c.bf16 %v269_v5, %v260_v2  ;;  %v287_v9 = vld [vmem:[%s2811_s1 + $0x238] sm:$0xff] }
  0x26   : > { %443 = vmatprep.mubr.f32.mxu0 %v1952_v7  ;;  %545 = vmatprep.mubr.f32.mxu1 %v1952_v7  ;;  %v1890_v10 = vpack.c.bf16 %v287_v9, %v278_v8 }
  0x27   : > { %1845 = vmatpush1.bf16.msra.mxu1 %v1844_v20  ;;  %1861 = vmatpush1.bf16.msra.mxu0 %v1860_v21 }
  0x28   : > { %1863 = vmatprep.subr.bf16.mxu1 %v1862_v22  ;;  %1879 = vmatprep.subr.bf16.mxu0 %v2203_v23 }
  0x29   : > { %1627 = vmatmul.mubr.msk.f32.gmra.mrb[8].mxu0 %vm288_vm0, %v2211_v24  ;;  %1644 = vmatmul.mubr.msk.f32.gmra.mrb[8].mxu1 %vm288_vm0, %v2215_v25 }
  0x2a   : > { %449 = vmatprep.mubr.f32.mxu0 %v1952_v7  ;;  %616 = vmatprep.mubr.f32.mxu1 %v1952_v7 }
  0x2d   : > { %1628 = vmatmul.mubr.msk.f32.gmra.mrb[10].mxu0 %vm288_vm0, %v2236_v30  ;;  %1645 = vmatmul.mubr.msk.f32.vlgmr.msra.gmra.mrb[10].mxu1 %vm288_vm0, %v2090_v39 }
  0x2e   : > { %455 = vmatprep.mubr.f32.mxu0 %v1952_v7  ;;  %1865 = vmatpush1.bf16.msra.mxu1 %v1864_v31 }
  0x2f   : > { %622 = vmatprep.mubr.f32.mxu1 %v1952_v7  ;;  %1867 = vmatprep.subr.bf16.mxu1 %v1866_v32 }
  0x31   : > { %1629 = vmatmul.mubr.msk.f32.gmra.mrb[12].mxu0 %vm288_vm0, %v2257_v37  ;;  %1646 = vmatmul.mubr.msk.f32.gmra.mrb[12].mxu1 %vm288_vm0, %v2125_v53 }
  0x32   : > { %461 = vmatprep.mubr.f32.mxu0 %v1952_v7  ;;  %628 = vmatprep.mubr.f32.mxu1 %v1952_v7 }
  0x33   : > { %1869 = vmatpush1.bf16.msra.mxu1 %v1868_v38 }
  0x34   : > { %1871 = vmatprep.subr.bf16.mxu1 %v1870_v40 }
  0x35   : > { %1630 = vmatmul.mubr.msk.f32.gmra.mrb[14].mxu0 %vm288_vm0, %v2278_v46  ;;  %1647 = vmatmul.mubr.msk.f32.gmra.mrb[14].mxu1 %vm288_vm0, %v2161_v3 }
  0x36   : > { %467 = vmatprep.mubr.f32.mxu0 %v1952_v7  ;;  %634 = vmatprep.mubr.f32.mxu1 %v1952_v7 }
  0x37   : > { %1873 = vmatpush1.bf16.msra.mxu1 %v1872_v47 }
  0x38   : > { %1875 = vmatprep.subr.bf16.mxu1 %v1874_v48 }
  0x39   : > { %1631 = vmatmul.mubr.msk.f32.gmra.mrb[16].mxu0 %vm288_vm0, %v2293_v51  ;;  %1648 = vmatmul.mubr.msk.f32.gmra.mrb[16].mxu1 %vm288_vm0, %v2197_v18 }
  0x3a   : > { %473 = vmatprep.mubr.f32.mxu0 %v1952_v7  ;;  %640 = vmatprep.mubr.f32.mxu1 %v1952_v7 }
  0x3b   : > { %1877 = vmatpush1.bf16.msra.mxu1 %v1876_v52 }
  0x3d   : > { %1632 = vmatmul.mubr.msk.f32.gmra.mrb[18].mxu0 %vm288_vm0, %v2302_v55  ;;  %1649 = vmatmul.mubr.msk.f32.gmra.mrb[18].mxu1 %vm288_vm0, %v2211_v24 }
  0x3e   : > { %479 = vmatprep.mubr.f32.mxu0 %v1952_v7  ;;  %646 = vmatprep.mubr.f32.mxu1 %v1952_v7 }
  0x41   : > { %1633 = vmatmul.mubr.msk.f32.gmra.mrb[20].mxu0 %vm288_vm0, %v2311_v56  ;;  %1650 = vmatmul.mubr.msk.f32.gmra.mrb[20].mxu1 %vm288_vm0, %v2236_v30 }
  0x42   : > { %485 = vmatprep.mubr.f32.mxu0 %v1952_v7  ;;  %652 = vmatprep.mubr.f32.mxu1 %v1952_v7 }
  0x45   : > { %1634 = vmatmul.mubr.msk.f32.gmra.mrb[22].mxu0 %vm288_vm0, %v2320_v57  ;;  %1651 = vmatmul.mubr.msk.f32.gmra.mrb[22].mxu1 %vm288_vm0, %v2257_v37 }
  0x46   : > { %491 = vmatprep.mubr.f32.mxu0 %v1952_v7  ;;  %658 = vmatprep.mubr.f32.mxu1 %v1952_v7 }
  0x49   : > { %1635 = vmatmul.mubr.msk.f32.gmra.mrb[24].mxu0 %vm288_vm0, %v2329_v58  ;;  %1652 = vmatmul.mubr.msk.f32.gmra.mrb[24].mxu1 %vm288_vm0, %v2278_v46 }
  0x4a   : > { %497 = vmatprep.mubr.f32.mxu0 %v1952_v7  ;;  %664 = vmatprep.mubr.f32.mxu1 %v1952_v7 }
  0x4d   : > { %1636 = vmatmul.mubr.msk.f32.gmra.mrb[26].mxu0 %vm288_vm0, %v2338_v59  ;;  %1653 = vmatmul.mubr.msk.f32.gmra.mrb[26].mxu1 %vm288_vm0, %v2293_v51 }
  0x4e   : > { %503 = vmatprep.mubr.f32.mxu0 %v1952_v7  ;;  %670 = vmatprep.mubr.f32.mxu1 %v1952_v7 }
  0x51   : > { %1637 = vmatmul.mubr.msk.f32.gmra.mrb[28].mxu0 %vm288_vm0, %v2347_v60  ;;  %1654 = vmatmul.mubr.msk.f32.gmra.mrb[28].mxu1 %vm288_vm0, %v2302_v55 }
  0x52   : > { %509 = vmatprep.mubr.f32.mxu0 %v1952_v7  ;;  %676 = vmatprep.mubr.f32.mxu1 %v1952_v7 }
  0x55   : > { %1638 = vmatmul.mubr.msk.f32.gmra.mrb[30].mxu0 %vm288_vm0, %v2356_v61  ;;  %1655 = vmatmul.mubr.msk.f32.gmra.mrb[30].mxu1 %vm288_vm0, %v2311_v56 }
  0x56   : > { %515 = vmatprep.mubr.f32.mxu0 %v1952_v7  ;;  %682 = vmatprep.mubr.f32.mxu1 %v1952_v7 }
  0x59   : > { %1639 = vmatmul.mubr.msk.f32.gmra.mrb[32].mxu0 %vm288_vm0, %v2365_v62  ;;  %1656 = vmatmul.mubr.msk.f32.gmra.mrb[32].mxu1 %vm288_vm0, %v2320_v57 }
  0x5a   : > { %813 = vmatprep.mubr.f32.mxu0 %v1952_v7  ;;  %688 = vmatprep.mubr.f32.mxu1 %v1952_v7 }
  0x5d   : > { %1667 = vmatmul.mubr.msk.f32.vlgmr.msra.gmra.mrb[34].mxu0 %vm288_vm0, %v2090_v39  ;;  %1657 = vmatmul.mubr.msk.f32.gmra.mrb[34].mxu1 %vm288_vm0, %v2329_v58 }
  0x5e   : > { %1881 = vmatpush3.bf16.msra.mxu0 %v2203_v23  ;;  %819 = vmatprep.mubr.f32.mxu0 %v1952_v7 }
  0x5f   : > { %694 = vmatprep.mubr.f32.mxu1 %v1952_v7  ;;  %1883 = vmatprep.subr.bf16.mxu0 %v1882_v1 }
  0x61   : > { %1668 = vmatmul.mubr.msk.f32.gmra.mrb[36].mxu0 %vm288_vm0, %v2125_v53  ;;  %1658 = vmatmul.mubr.msk.f32.gmra.mrb[36].mxu1 %vm288_vm0, %v2338_v59 }
  0x62   : > { %825 = vmatprep.mubr.f32.mxu0 %v1952_v7  ;;  %700 = vmatprep.mubr.f32.mxu1 %v1952_v7 }
  0x63   : > { %1885 = vmatpush3.bf16.msra.mxu0 %v1882_v1 }
  0x64   : > { %1887 = vmatprep.subr.bf16.mxu0 %v1886_v6 }
  0x65   : > { %1669 = vmatmul.mubr.msk.f32.gmra.mrb[38].mxu0 %vm288_vm0, %v2161_v3  ;;  %1659 = vmatmul.mubr.msk.f32.gmra.mrb[38].mxu1 %vm288_vm0, %v2347_v60 }
  0x66   : > { %831 = vmatprep.mubr.f32.mxu0 %v1952_v7  ;;  %706 = vmatprep.mubr.f32.mxu1 %v1952_v7 }
  0x67   : > { %1889 = vmatpush3.bf16.msra.mxu0 %v1886_v6 }
  0x68   : > { %1891 = vmatprep.subr.bf16.mxu0 %v1890_v10 }
  0x69   : > { %1670 = vmatmul.mubr.msk.f32.gmra.mrb[40].mxu0 %vm288_vm0, %v2197_v18  ;;  %1660 = vmatmul.mubr.msk.f32.gmra.mrb[40].mxu1 %vm288_vm0, %v2356_v61 }
  0x6a   : > { %837 = vmatprep.mubr.f32.mxu0 %v1952_v7  ;;  %712 = vmatprep.mubr.f32.mxu1 %v1952_v7 }
  0x6b   : > { %1893 = vmatpush3.bf16.msra.mxu0 %v1890_v10 }
  0x6d   : > { %1671 = vmatmul.mubr.msk.f32.gmra.mrb[42].mxu0 %vm288_vm0, %v2211_v24  ;;  %1661 = vmatmul.mubr.msk.f32.gmra.mrb[42].mxu1 %vm288_vm0, %v2365_v62 }
  0x6e   : > { %843 = vmatprep.mubr.f32.mxu0 %v1952_v7  ;;  %718 = vmatprep.mubr.f32.mxu1 %v1952_v7 }
  0x71   : > { %1672 = vmatmul.mubr.msk.f32.gmra.mrb[44].mxu0 %vm288_vm0, %v2236_v30  ;;  %1662 = vmatmul.mubr.msk.f32.gmra.mrb[44].mxu1 %vm288_vm0, %v2093_v41 }
  0x72   : > { %849 = vmatprep.mubr.f32.mxu0 %v1952_v7  ;;  %724 = vmatprep.mubr.f32.mxu1 %v1952_v7 }
  0x75   : > { %1673 = vmatmul.mubr.msk.f32.gmra.mrb[46].mxu0 %vm288_vm0, %v2257_v37  ;;  %1663 = vmatmul.mubr.msk.f32.gmra.mrb[46].mxu1 %vm288_vm0, %v2128_v54 }
  0x76   : > { %855 = vmatprep.mubr.f32.mxu0 %v1952_v7  ;;  %730 = vmatprep.mubr.f32.mxu1 %v1952_v7 }
  0x79   : > { %1674 = vmatmul.mubr.msk.f32.gmra.mrb[48].mxu0 %vm288_vm0, %v2278_v46  ;;  %1664 = vmatmul.mubr.msk.f32.gmra.mrb[48].mxu1 %vm288_vm0, %v2165_v4 }
  0x7a   : > { %861 = vmatprep.mubr.f32.mxu0 %v1952_v7  ;;  %736 = vmatprep.mubr.f32.mxu1 %v1952_v7 }
  0x7d   : > { %1675 = vmatmul.mubr.msk.f32.gmra.mrb[50].mxu0 %vm288_vm0, %v2293_v51  ;;  %1665 = vmatmul.mubr.msk.f32.gmra.mrb[50].mxu1 %vm288_vm0, %v2201_v19 }
  0x7e   : > { %867 = vmatprep.mubr.f32.mxu0 %v1952_v7  ;;  %742 = vmatprep.mubr.f32.mxu1 %v1952_v7 }
  0x81   : > { %1676 = vmatmul.mubr.msk.f32.gmra.mrb[52].mxu0 %vm288_vm0, %v2302_v55  ;;  %1666 = vmatmul.mubr.msk.f32.gmra.mrb[52].mxu1 %vm288_vm0, %v2215_v25 }
  0x82   : > { %873 = vmatprep.mubr.f32.mxu0 %v1952_v7  ;;  %1010 = vmatprep.mubr.f32.mxu1 %v1952_v7 }
  0x85   : > { %1677 = vmatmul.mubr.msk.f32.gmra.mrb[54].mxu0 %vm288_vm0, %v2311_v56  ;;  %1689 = vmatmul.mubr.msk.f32.vlgmr.msra.gmra.mrb[54].mxu1 %vm288_vm0, %v2090_v39 }
  0x86   : > { %879 = vmatprep.mubr.f32.mxu0 %v1952_v7  ;;  %1016 = vmatprep.mubr.f32.mxu1 %v1952_v7 }
  0x89   : > { %1678 = vmatmul.mubr.msk.f32.gmra.mrb[56].mxu0 %vm288_vm0, %v2320_v57  ;;  %1690 = vmatmul.mubr.msk.f32.gmra.mrb[56].mxu1 %vm288_vm0, %v2125_v53 }
  0x8a   : > { %885 = vmatprep.mubr.f32.mxu0 %v1952_v7  ;;  %1022 = vmatprep.mubr.f32.mxu1 %v1952_v7 }
  0x8d   : > { %1679 = vmatmul.mubr.msk.f32.gmra.mrb[58].mxu0 %vm288_vm0, %v2329_v58  ;;  %1691 = vmatmul.mubr.msk.f32.gmra.mrb[58].mxu1 %vm288_vm0, %v2161_v3 }
  0x8e   : > { %891 = vmatprep.mubr.f32.mxu0 %v1952_v7  ;;  %1028 = vmatprep.mubr.f32.mxu1 %v1952_v7 }
  0x91   : > { %1680 = vmatmul.mubr.msk.f32.gmra.mrb[60].mxu0 %vm288_vm0, %v2338_v59  ;;  %1692 = vmatmul.mubr.msk.f32.gmra.mrb[60].mxu1 %vm288_vm0, %v2197_v18 }
  0x92   : > { %897 = vmatprep.mubr.f32.mxu0 %v1952_v7  ;;  %1034 = vmatprep.mubr.f32.mxu1 %v1952_v7 }
  0x95   : > { %1681 = vmatmul.mubr.msk.f32.gmra.mrb[62].mxu0 %vm288_vm0, %v2347_v60  ;;  %1693 = vmatmul.mubr.msk.f32.gmra.mrb[62].mxu1 %vm288_vm0, %v2211_v24 }
  0x96   : > { %903 = vmatprep.mubr.f32.mxu0 %v1952_v7  ;;  %1040 = vmatprep.mubr.f32.mxu1 %v1952_v7 }
  0x99   : > { %1682 = vmatmul.mubr.msk.f32.gmra.mrb[64].mxu0 %vm288_vm0, %v2356_v61  ;;  %1694 = vmatmul.mubr.msk.f32.gmra.mrb[64].mxu1 %vm288_vm0, %v2236_v30 }
  0x9a   : > { %909 = vmatprep.mubr.f32.mxu0 %v1952_v7  ;;  %1046 = vmatprep.mubr.f32.mxu1 %v1952_v7 }
  0x9d   : > { %1683 = vmatmul.mubr.msk.f32.gmra.mrb[66].mxu0 %vm288_vm0, %v2365_v62  ;;  %1695 = vmatmul.mubr.msk.f32.gmra.mrb[66].mxu1 %vm288_vm0, %v2257_v37 }
  0x9e   : > { %915 = vmatprep.mubr.f32.mxu0 %v1952_v7  ;;  %1052 = vmatprep.mubr.f32.mxu1 %v1952_v7 }
  0xa1   : > { %1684 = vmatmul.mubr.msk.f32.gmra.mrb[68].mxu0 %vm288_vm0, %v2093_v41  ;;  %1696 = vmatmul.mubr.msk.f32.gmra.mrb[68].mxu1 %vm288_vm0, %v2278_v46 }
  0xa2   : > { %921 = vmatprep.mubr.f32.mxu0 %v1952_v7  ;;  %1058 = vmatprep.mubr.f32.mxu1 %v1952_v7 }
  0xa5   : > { %1685 = vmatmul.mubr.msk.f32.gmra.mrb[70].mxu0 %vm288_vm0, %v2128_v54  ;;  %1697 = vmatmul.mubr.msk.f32.gmra.mrb[70].mxu1 %vm288_vm0, %v2293_v51 }
  0xa6   : > { %927 = vmatprep.mubr.f32.mxu0 %v1952_v7  ;;  %1064 = vmatprep.mubr.f32.mxu1 %v1952_v7 }
  0xa9   : > { %1686 = vmatmul.mubr.msk.f32.gmra.mrb[72].mxu0 %vm288_vm0, %v2165_v4  ;;  %1698 = vmatmul.mubr.msk.f32.gmra.mrb[72].mxu1 %vm288_vm0, %v2302_v55 }
  0xaa   : > { %933 = vmatprep.mubr.f32.mxu0 %v1952_v7  ;;  %1070 = vmatprep.mubr.f32.mxu1 %v1952_v7 }
  0xad   : > { %1687 = vmatmul.mubr.msk.f32.gmra.mrb[74].mxu0 %vm288_vm0, %v2201_v19  ;;  %1699 = vmatmul.mubr.msk.f32.gmra.mrb[74].mxu1 %vm288_vm0, %v2311_v56 }
  0xae   : > { %939 = vmatprep.mubr.f32.mxu0 %v1952_v7  ;;  %1076 = vmatprep.mubr.f32.mxu1 %v1952_v7 }
  0xb1   : > { %1688 = vmatmul.mubr.msk.f32.gmra.mrb[76].mxu0 %vm288_vm0, %v2215_v25  ;;  %1700 = vmatmul.mubr.msk.f32.gmra.mrb[76].mxu1 %vm288_vm0, %v2320_v57 }
  0xb2   : > { %1781 = vmatprep.mubr.msk.f32.mxu0 %vm288_vm0, %v2090_v39  ;;  %1082 = vmatprep.mubr.f32.mxu1 %v1952_v7 }
  0xb5   : > { %1782 = vmatmul.mubr.msk.f32.vlgmr.msra.gmra.mrb[78].mxu0 %vm288_vm0, %v2125_v53  ;;  %1701 = vmatmul.mubr.msk.f32.gmra.mrb[78].mxu1 %vm288_vm0, %v2329_v58 }
  0xb6   : > { %1784 = vmatprep.mubr.msk.f32.mxu0 %vm288_vm0, %v2161_v3  ;;  %1088 = vmatprep.mubr.f32.mxu1 %v1952_v7 }
  0xb9   : > { %1785 = vmatmul.mubr.msk.f32.gmra.mrb[80].mxu0 %vm288_vm0, %v2197_v18  ;;  %1702 = vmatmul.mubr.msk.f32.gmra.mrb[80].mxu1 %vm288_vm0, %v2338_v59 }
  0xba   : > { %1787 = vmatprep.mubr.msk.f32.mxu0 %vm288_vm0, %v2211_v24  ;;  %1094 = vmatprep.mubr.f32.mxu1 %v1952_v7 }
  0xbd   : > { %1788 = vmatmul.mubr.msk.f32.gmra.mrb[82].mxu0 %vm288_vm0, %v2236_v30  ;;  %1703 = vmatmul.mubr.msk.f32.gmra.mrb[82].mxu1 %vm288_vm0, %v2347_v60 }
  0xbe   : > { %1790 = vmatprep.mubr.msk.f32.mxu0 %vm288_vm0, %v2257_v37  ;;  %1100 = vmatprep.mubr.f32.mxu1 %v1952_v7 }
  0xc1   : > { %1791 = vmatmul.mubr.msk.f32.gmra.mrb[84].mxu0 %vm288_vm0, %v2278_v46  ;;  %1704 = vmatmul.mubr.msk.f32.gmra.mrb[84].mxu1 %vm288_vm0, %v2356_v61 }
  0xc2   : > { %1793 = vmatprep.mubr.msk.f32.mxu0 %vm288_vm0, %v2293_v51  ;;  %1106 = vmatprep.mubr.f32.mxu1 %v1952_v7 }
  0xc5   : > { %1794 = vmatmul.mubr.msk.f32.gmra.mrb[86].mxu0 %vm288_vm0, %v2302_v55  ;;  %1705 = vmatmul.mubr.msk.f32.gmra.mrb[86].mxu1 %vm288_vm0, %v2365_v62 }
  0xc6   : > { %1796 = vmatprep.mubr.msk.f32.mxu0 %vm288_vm0, %v2311_v56  ;;  %1112 = vmatprep.mubr.f32.mxu1 %v1952_v7 }
  0xc9   : > { %1797 = vmatmul.mubr.msk.f32.gmra.mrb[88].mxu0 %vm288_vm0, %v2320_v57  ;;  %1706 = vmatmul.mubr.msk.f32.gmra.mrb[88].mxu1 %vm288_vm0, %v2093_v41 }
  0xca   : > { %1799 = vmatprep.mubr.msk.f32.mxu0 %vm288_vm0, %v2329_v58  ;;  %1118 = vmatprep.mubr.f32.mxu1 %v1952_v7 }
  0xcd   : > { %1800 = vmatmul.mubr.msk.f32.gmra.mrb[90].mxu0 %vm288_vm0, %v2338_v59  ;;  %1707 = vmatmul.mubr.msk.f32.gmra.mrb[90].mxu1 %vm288_vm0, %v2128_v54 }
  0xce   : > { %1802 = vmatprep.mubr.msk.f32.mxu0 %vm288_vm0, %v2347_v60  ;;  %1124 = vmatprep.mubr.f32.mxu1 %v1952_v7 }
  0xd1   : > { %1803 = vmatmul.mubr.msk.f32.gmra.mrb[92].mxu0 %vm288_vm0, %v2356_v61  ;;  %1708 = vmatmul.mubr.msk.f32.gmra.mrb[92].mxu1 %vm288_vm0, %v2165_v4 }
  0xd2   : > { %1805 = vmatprep.mubr.msk.f32.mxu0 %vm288_vm0, %v2365_v62  ;;  %1130 = vmatprep.mubr.f32.mxu1 %v1952_v7 }
  0xd5   : > { %1806 = vmatmul.mubr.msk.f32.gmra.mrb[94].mxu0 %vm288_vm0, %v2093_v41  ;;  %1709 = vmatmul.mubr.msk.f32.gmra.mrb[94].mxu1 %vm288_vm0, %v2201_v19 }
  0xd6   : > { %1808 = vmatprep.mubr.msk.f32.mxu0 %vm288_vm0, %v2128_v54  ;;  %1136 = vmatprep.mubr.f32.mxu1 %v1952_v7 }
  0xd9   : > { %1809 = vmatmul.mubr.msk.f32.gmra.mrb[96].mxu0 %vm288_vm0, %v2165_v4  ;;  %1710 = vmatmul.mubr.msk.f32.gmra.mrb[96].mxu1 %vm288_vm0, %v2215_v25 }
  0xda   : > { %1811 = vmatprep.mubr.msk.f32.mxu0 %vm288_vm0, %v2201_v19 }
  0xdd   : > { %1812 = vmatmul.mubr.msk.f32.gmra.mrb[98].mxu0 %vm288_vm0, %v2215_v25 }
  0xec   : > { %v421_v7 = vpop.f32.mrb[0].mxu0  ;;  %v523_v39 = vpop.f32.mrb[0].mxu1 }
  0xed   : > { %1318 = vst [vmem:[%s2601_s25] sm:$0xff] %v421_v7  ;;  %v423_v41 = vpop.f32.mrb[1].mxu0  ;;  %1471 = vst [vmem:[%s2601_s25 + $0x4c8] sm:$0xff] %v523_v39  ;;  %v525_v53 = vpop.f32.mrb[1].mxu1 }
  0xee   : > { %1319 = vst [vmem:[%s2601_s25 + $0x8] sm:$0xff] %v423_v41  ;;  %1472 = vst [vmem:[%s2601_s25 + $0x4d0] sm:$0xff] %v525_v53 }
  0xf0   : > { %v427_v54 = vpop.f32.mrb[2].mxu0  ;;  %v529_v3 = vpop.f32.mrb[2].mxu1 }
  0xf1   : > { %1327 = vst [vmem:[%s2601_s25 + $0x48] sm:$0xff] %v427_v54  ;;  %v429_v4 = vpop.f32.mrb[3].mxu0  ;;  %1480 = vst [vmem:[%s2601_s25 + $0x510] sm:$0xff] %v529_v3  ;;  %v531_v11 = vpop.f32.mrb[3].mxu1 }
  0xf2   : > { %1328 = vst [vmem:[%s2601_s25 + $0x50] sm:$0xff] %v429_v4  ;;  %1481 = vst [vmem:[%s2601_s25 + $0x518] sm:$0xff] %v531_v11 }
  0xf4   : > { %v433_v12 = vpop.f32.mrb[4].mxu0  ;;  %v535_v13 = vpop.f32.mrb[4].mxu1 }
  0xf5   : > { %1336 = vst [vmem:[%s2601_s25 + $0x90] sm:$0xff] %v433_v12  ;;  %v435_v14 = vpop.f32.mrb[5].mxu0  ;;  %1489 = vst [vmem:[%s2601_s25 + $0x558] sm:$0xff] %v535_v13  ;;  %v537_v15 = vpop.f32.mrb[5].mxu1 }
  0xf6   : > { %1337 = vst [vmem:[%s2601_s25 + $0x98] sm:$0xff] %v435_v14  ;;  %1490 = vst [vmem:[%s2601_s25 + $0x560] sm:$0xff] %v537_v15 }
  0xf8   : > { %v439_v16 = vpop.f32.mrb[6].mxu0  ;;  %v541_v17 = vpop.f32.mrb[6].mxu1 }
  0xf9   : > { %1345 = vst [vmem:[%s2601_s25 + $0xd8] sm:$0xff] %v439_v16  ;;  %v441_v18 = vpop.f32.mrb[7].mxu0  ;;  %1498 = vst [vmem:[%s2601_s25 + $0x5a0] sm:$0xff] %v541_v17  ;;  %v543_v19 = vpop.f32.mrb[7].mxu1 }
  0xfa   : > { %1346 = vst [vmem:[%s2601_s25 + $0xe0] sm:$0xff] %v441_v18  ;;  %1499 = vst [vmem:[%s2601_s25 + $0x5a8] sm:$0xff] %v543_v19 }
  0xfc   : > { %v445_v20 = vpop.f32.mrb[8].mxu0  ;;  %v547_v21 = vpop.f32.mrb[8].mxu1 }
  0xfd   : > { %1354 = vst [vmem:[%s2601_s25 + $0x120] sm:$0xff] %v445_v20  ;;  %v447_v22 = vpop.f32.mrb[9].mxu0  ;;  %1507 = vst [vmem:[%s2601_s25 + $0x5e8] sm:$0xff] %v547_v21  ;;  %v549_v23 = vpop.f32.mrb[9].mxu1 }
  0xfe   : > { %1355 = vst [vmem:[%s2601_s25 + $0x128] sm:$0xff] %v447_v22  ;;  %1508 = vst [vmem:[%s2601_s25 + $0x5f0] sm:$0xff] %v549_v23 }
 0x100   : > { %v451_v24 = vpop.f32.mrb[10].mxu0  ;;  %v618_v25 = vpop.f32.mrb[10].mxu1 }
 0x101   : > { %1363 = vst [vmem:[%s2601_s25 + $0x168] sm:$0xff] %v451_v24  ;;  %v453_v26 = vpop.f32.mrb[11].mxu0  ;;  %1320 = vst [vmem:[%s2601_s25 + $0x10] sm:$0xff] %v618_v25  ;;  %v620_v27 = vpop.f32.mrb[11].mxu1 }
 0x102   : > { %1364 = vst [vmem:[%s2601_s25 + $0x170] sm:$0xff] %v453_v26  ;;  %1321 = vst [vmem:[%s2601_s25 + $0x18] sm:$0xff] %v620_v27 }
 0x104   : > { %v457_v28 = vpop.f32.mrb[12].mxu0  ;;  %v624_v29 = vpop.f32.mrb[12].mxu1 }
 0x105   : > { %1372 = vst [vmem:[%s2601_s25 + $0x1b0] sm:$0xff] %v457_v28  ;;  %v459_v30 = vpop.f32.mrb[13].mxu0  ;;  %1329 = vst [vmem:[%s2601_s25 + $0x58] sm:$0xff] %v624_v29  ;;  %v626_v31 = vpop.f32.mrb[13].mxu1 }
 0x106   : > { %1373 = vst [vmem:[%s2601_s25 + $0x1b8] sm:$0xff] %v459_v30  ;;  %1330 = vst [vmem:[%s2601_s25 + $0x60] sm:$0xff] %v626_v31 }
 0x108   : > { %v463_v32 = vpop.f32.mrb[14].mxu0  ;;  %v630_v33 = vpop.f32.mrb[14].mxu1 }
 0x109   : > { %1381 = vst [vmem:[%s2601_s25 + $0x1f8] sm:$0xff] %v463_v32  ;;  %v465_v34 = vpop.f32.mrb[15].mxu0  ;;  %1338 = vst [vmem:[%s2601_s25 + $0xa0] sm:$0xff] %v630_v33  ;;  %v632_v35 = vpop.f32.mrb[15].mxu1 }
 0x10a   : > { %1382 = vst [vmem:[%s2601_s25 + $0x200] sm:$0xff] %v465_v34  ;;  %1339 = vst [vmem:[%s2601_s25 + $0xa8] sm:$0xff] %v632_v35 }
 0x10c   : > { %v469_v36 = vpop.f32.mrb[16].mxu0  ;;  %v636_v37 = vpop.f32.mrb[16].mxu1 }
 0x10d   : > { %1390 = vst [vmem:[%s2601_s25 + $0x240] sm:$0xff] %v469_v36  ;;  %v471_v38 = vpop.f32.mrb[17].mxu0  ;;  %1347 = vst [vmem:[%s2601_s25 + $0xe8] sm:$0xff] %v636_v37  ;;  %v638_v40 = vpop.f32.mrb[17].mxu1 }
 0x10e   : > { %1391 = vst [vmem:[%s2601_s25 + $0x248] sm:$0xff] %v471_v38  ;;  %1348 = vst [vmem:[%s2601_s25 + $0xf0] sm:$0xff] %v638_v40 }
 0x110   : > { %v475_v42 = vpop.f32.mrb[18].mxu0  ;;  %v642_v43 = vpop.f32.mrb[18].mxu1 }
 0x111   : > { %1399 = vst [vmem:[%s2601_s25 + $0x288] sm:$0xff] %v475_v42  ;;  %v477_v44 = vpop.f32.mrb[19].mxu0  ;;  %1356 = vst [vmem:[%s2601_s25 + $0x130] sm:$0xff] %v642_v43  ;;  %v644_v45 = vpop.f32.mrb[19].mxu1 }
 0x112   : > { %1400 = vst [vmem:[%s2601_s25 + $0x290] sm:$0xff] %v477_v44  ;;  %1357 = vst [vmem:[%s2601_s25 + $0x138] sm:$0xff] %v644_v45 }
 0x114   : > { %v481_v46 = vpop.f32.mrb[20].mxu0  ;;  %v648_v47 = vpop.f32.mrb[20].mxu1 }
 0x115   : > { %1408 = vst [vmem:[%s2601_s25 + $0x2d0] sm:$0xff] %v481_v46  ;;  %v483_v48 = vpop.f32.mrb[21].mxu0  ;;  %1365 = vst [vmem:[%s2601_s25 + $0x178] sm:$0xff] %v648_v47  ;;  %v650_v49 = vpop.f32.mrb[21].mxu1 }
 0x116   : > { %1409 = vst [vmem:[%s2601_s25 + $0x2d8] sm:$0xff] %v483_v48  ;;  %1366 = vst [vmem:[%s2601_s25 + $0x180] sm:$0xff] %v650_v49 }
 0x118   : > { %v487_v50 = vpop.f32.mrb[22].mxu0  ;;  %v654_v51 = vpop.f32.mrb[22].mxu1 }
 0x119   : > { %1417 = vst [vmem:[%s2601_s25 + $0x318] sm:$0xff] %v487_v50  ;;  %v489_v52 = vpop.f32.mrb[23].mxu0  ;;  %1374 = vst [vmem:[%s2601_s25 + $0x1c0] sm:$0xff] %v654_v51  ;;  %v656_v55 = vpop.f32.mrb[23].mxu1 }
 0x11a   : > { %1418 = vst [vmem:[%s2601_s25 + $0x320] sm:$0xff] %v489_v52  ;;  %1375 = vst [vmem:[%s2601_s25 + $0x1c8] sm:$0xff] %v656_v55 }
 0x11c   : > { %v493_v56 = vpop.f32.mrb[24].mxu0  ;;  %v660_v57 = vpop.f32.mrb[24].mxu1 }
 0x11d   : > { %1426 = vst [vmem:[%s2601_s25 + $0x360] sm:$0xff] %v493_v56  ;;  %v495_v58 = vpop.f32.mrb[25].mxu0  ;;  %1383 = vst [vmem:[%s2601_s25 + $0x208] sm:$0xff] %v660_v57  ;;  %v662_v59 = vpop.f32.mrb[25].mxu1 }
 0x11e   : > { %1427 = vst [vmem:[%s2601_s25 + $0x368] sm:$0xff] %v495_v58  ;;  %1384 = vst [vmem:[%s2601_s25 + $0x210] sm:$0xff] %v662_v59 }
 0x120   : > { %v499_v60 = vpop.f32.mrb[26].mxu0  ;;  %v666_v61 = vpop.f32.mrb[26].mxu1 }
 0x121   : > { %1435 = vst [vmem:[%s2601_s25 + $0x3a8] sm:$0xff] %v499_v60  ;;  %v501_v62 = vpop.f32.mrb[27].mxu0  ;;  %1392 = vst [vmem:[%s2601_s25 + $0x250] sm:$0xff] %v666_v61  ;;  %v668_v63 = vpop.f32.mrb[27].mxu1 }
 0x122   : > { %1436 = vst [vmem:[%s2601_s25 + $0x3b0] sm:$0xff] %v501_v62  ;;  %1393 = vst [vmem:[%s2601_s25 + $0x258] sm:$0xff] %v668_v63 }
 0x124   : > { %v505_v0 = vpop.f32.mrb[28].mxu0  ;;  %v672_v1 = vpop.f32.mrb[28].mxu1 }
 0x125   : > { %1444 = vst [vmem:[%s2601_s25 + $0x3f0] sm:$0xff] %v505_v0  ;;  %v507_v2 = vpop.f32.mrb[29].mxu0  ;;  %1401 = vst [vmem:[%s2601_s25 + $0x298] sm:$0xff] %v672_v1  ;;  %v674_v5 = vpop.f32.mrb[29].mxu1 }
 0x126   : > { %1445 = vst [vmem:[%s2601_s25 + $0x3f8] sm:$0xff] %v507_v2  ;;  %1402 = vst [vmem:[%s2601_s25 + $0x2a0] sm:$0xff] %v674_v5 }
 0x128   : > { %v511_v6 = vpop.f32.mrb[30].mxu0  ;;  %v678_v8 = vpop.f32.mrb[30].mxu1 }
 0x129   : > { %1453 = vst [vmem:[%s2601_s25 + $0x438] sm:$0xff] %v511_v6  ;;  %v513_v9 = vpop.f32.mrb[31].mxu0  ;;  %1410 = vst [vmem:[%s2601_s25 + $0x2e0] sm:$0xff] %v678_v8  ;;  %v680_v10 = vpop.f32.mrb[31].mxu1 }
 0x12a   : > { %1454 = vst [vmem:[%s2601_s25 + $0x440] sm:$0xff] %v513_v9  ;;  %1411 = vst [vmem:[%s2601_s25 + $0x2e8] sm:$0xff] %v680_v10 }
 0x12c   : > { %v517_v7 = vpop.f32.mrb[32].mxu0  ;;  %v684_v39 = vpop.f32.mrb[32].mxu1 }
 0x12d   : > { %1462 = vst [vmem:[%s2601_s25 + $0x480] sm:$0xff] %v517_v7  ;;  %v519_v41 = vpop.f32.mrb[33].mxu0  ;;  %1419 = vst [vmem:[%s2601_s25 + $0x328] sm:$0xff] %v684_v39  ;;  %v686_v53 = vpop.f32.mrb[33].mxu1 }
 0x12e   : > { %1463 = vst [vmem:[%s2601_s25 + $0x488] sm:$0xff] %v519_v41  ;;  %1420 = vst [vmem:[%s2601_s25 + $0x330] sm:$0xff] %v686_v53 }
 0x130   : > { %v815_v54 = vpop.f32.mrb[34].mxu0  ;;  %v690_v3 = vpop.f32.mrb[34].mxu1 }
 0x131   : > { %1322 = vst [vmem:[%s2601_s25 + $0x20] sm:$0xff] %v815_v54  ;;  %v817_v4 = vpop.f32.mrb[35].mxu0  ;;  %1428 = vst [vmem:[%s2601_s25 + $0x370] sm:$0xff] %v690_v3  ;;  %v692_v11 = vpop.f32.mrb[35].mxu1 }
 0x132   : > { %1323 = vst [vmem:[%s2601_s25 + $0x28] sm:$0xff] %v817_v4  ;;  %1429 = vst [vmem:[%s2601_s25 + $0x378] sm:$0xff] %v692_v11 }
 0x134   : > { %v821_v12 = vpop.f32.mrb[36].mxu0  ;;  %v696_v13 = vpop.f32.mrb[36].mxu1 }
 0x135   : > { %1331 = vst [vmem:[%s2601_s25 + $0x68] sm:$0xff] %v821_v12  ;;  %v823_v14 = vpop.f32.mrb[37].mxu0  ;;  %1437 = vst [vmem:[%s2601_s25 + $0x3b8] sm:$0xff] %v696_v13  ;;  %v698_v15 = vpop.f32.mrb[37].mxu1 }
 0x136   : > { %1332 = vst [vmem:[%s2601_s25 + $0x70] sm:$0xff] %v823_v14  ;;  %1438 = vst [vmem:[%s2601_s25 + $0x3c0] sm:$0xff] %v698_v15 }
 0x138   : > { %v827_v16 = vpop.f32.mrb[38].mxu0  ;;  %v702_v17 = vpop.f32.mrb[38].mxu1 }
 0x139   : > { %1340 = vst [vmem:[%s2601_s25 + $0xb0] sm:$0xff] %v827_v16  ;;  %v829_v18 = vpop.f32.mrb[39].mxu0  ;;  %1446 = vst [vmem:[%s2601_s25 + $0x400] sm:$0xff] %v702_v17  ;;  %v704_v19 = vpop.f32.mrb[39].mxu1 }
 0x13a   : > { %1341 = vst [vmem:[%s2601_s25 + $0xb8] sm:$0xff] %v829_v18  ;;  %1447 = vst [vmem:[%s2601_s25 + $0x408] sm:$0xff] %v704_v19 }
 0x13c   : > { %v833_v20 = vpop.f32.mrb[40].mxu0  ;;  %v708_v21 = vpop.f32.mrb[40].mxu1 }
 0x13d   : > { %1349 = vst [vmem:[%s2601_s25 + $0xf8] sm:$0xff] %v833_v20  ;;  %v835_v22 = vpop.f32.mrb[41].mxu0  ;;  %1455 = vst [vmem:[%s2601_s25 + $0x448] sm:$0xff] %v708_v21  ;;  %v710_v23 = vpop.f32.mrb[41].mxu1 }
 0x13e   : > { %1350 = vst [vmem:[%s2601_s25 + $0x100] sm:$0xff] %v835_v22  ;;  %1456 = vst [vmem:[%s2601_s25 + $0x450] sm:$0xff] %v710_v23 }
 0x140   : > { %v839_v24 = vpop.f32.mrb[42].mxu0  ;;  %v714_v25 = vpop.f32.mrb[42].mxu1 }
 0x141   : > { %1358 = vst [vmem:[%s2601_s25 + $0x140] sm:$0xff] %v839_v24  ;;  %v841_v26 = vpop.f32.mrb[43].mxu0  ;;  %1464 = vst [vmem:[%s2601_s25 + $0x490] sm:$0xff] %v714_v25  ;;  %v716_v27 = vpop.f32.mrb[43].mxu1 }
 0x142   : > { %1359 = vst [vmem:[%s2601_s25 + $0x148] sm:$0xff] %v841_v26  ;;  %1465 = vst [vmem:[%s2601_s25 + $0x498] sm:$0xff] %v716_v27 }
 0x144   : > { %v845_v28 = vpop.f32.mrb[44].mxu0  ;;  %v720_v29 = vpop.f32.mrb[44].mxu1 }
 0x145   : > { %1367 = vst [vmem:[%s2601_s25 + $0x188] sm:$0xff] %v845_v28  ;;  %v847_v30 = vpop.f32.mrb[45].mxu0  ;;  %1473 = vst [vmem:[%s2601_s25 + $0x4d8] sm:$0xff] %v720_v29  ;;  %v722_v31 = vpop.f32.mrb[45].mxu1 }
 0x146   : > { %1368 = vst [vmem:[%s2601_s25 + $0x190] sm:$0xff] %v847_v30  ;;  %1474 = vst [vmem:[%s2601_s25 + $0x4e0] sm:$0xff] %v722_v31 }
 0x148   : > { %v851_v32 = vpop.f32.mrb[46].mxu0  ;;  %v726_v33 = vpop.f32.mrb[46].mxu1 }
 0x149   : > { %1376 = vst [vmem:[%s2601_s25 + $0x1d0] sm:$0xff] %v851_v32  ;;  %v853_v34 = vpop.f32.mrb[47].mxu0  ;;  %1482 = vst [vmem:[%s2601_s25 + $0x520] sm:$0xff] %v726_v33  ;;  %v728_v35 = vpop.f32.mrb[47].mxu1 }
 0x14a   : > { %1377 = vst [vmem:[%s2601_s25 + $0x1d8] sm:$0xff] %v853_v34  ;;  %1483 = vst [vmem:[%s2601_s25 + $0x528] sm:$0xff] %v728_v35 }
 0x14c   : > { %v857_v36 = vpop.f32.mrb[48].mxu0  ;;  %v732_v37 = vpop.f32.mrb[48].mxu1 }
 0x14d   : > { %1385 = vst [vmem:[%s2601_s25 + $0x218] sm:$0xff] %v857_v36  ;;  %v859_v38 = vpop.f32.mrb[49].mxu0  ;;  %1491 = vst [vmem:[%s2601_s25 + $0x568] sm:$0xff] %v732_v37  ;;  %v734_v40 = vpop.f32.mrb[49].mxu1 }
 0x14e   : > { %1386 = vst [vmem:[%s2601_s25 + $0x220] sm:$0xff] %v859_v38  ;;  %1492 = vst [vmem:[%s2601_s25 + $0x570] sm:$0xff] %v734_v40 }
 0x150   : > { %v863_v42 = vpop.f32.mrb[50].mxu0  ;;  %v738_v43 = vpop.f32.mrb[50].mxu1 }
 0x151   : > { %1394 = vst [vmem:[%s2601_s25 + $0x260] sm:$0xff] %v863_v42  ;;  %v865_v44 = vpop.f32.mrb[51].mxu0  ;;  %1500 = vst [vmem:[%s2601_s25 + $0x5b0] sm:$0xff] %v738_v43  ;;  %v740_v45 = vpop.f32.mrb[51].mxu1 }
 0x152   : > { %1395 = vst [vmem:[%s2601_s25 + $0x268] sm:$0xff] %v865_v44  ;;  %1501 = vst [vmem:[%s2601_s25 + $0x5b8] sm:$0xff] %v740_v45 }
 0x154   : > { %v869_v46 = vpop.f32.mrb[52].mxu0  ;;  %v744_v47 = vpop.f32.mrb[52].mxu1 }
 0x155   : > { %1403 = vst [vmem:[%s2601_s25 + $0x2a8] sm:$0xff] %v869_v46  ;;  %v871_v48 = vpop.f32.mrb[53].mxu0  ;;  %1509 = vst [vmem:[%s2601_s25 + $0x5f8] sm:$0xff] %v744_v47  ;;  %v746_v49 = vpop.f32.mrb[53].mxu1 }
 0x156   : > { %1404 = vst [vmem:[%s2601_s25 + $0x2b0] sm:$0xff] %v871_v48  ;;  %1510 = vst [vmem:[%s2601_s25 + $0x600] sm:$0xff] %v746_v49 }
 0x158   : > { %v875_v50 = vpop.f32.mrb[54].mxu0  ;;  %v1012_v51 = vpop.f32.mrb[54].mxu1 }
 0x159   : > { %1412 = vst [vmem:[%s2601_s25 + $0x2f0] sm:$0xff] %v875_v50  ;;  %v877_v52 = vpop.f32.mrb[55].mxu0  ;;  %1324 = vst [vmem:[%s2601_s25 + $0x30] sm:$0xff] %v1012_v51  ;;  %v1014_v55 = vpop.f32.mrb[55].mxu1 }
 0x15a   : > { %1413 = vst [vmem:[%s2601_s25 + $0x2f8] sm:$0xff] %v877_v52  ;;  %1325 = vst [vmem:[%s2601_s25 + $0x38] sm:$0xff] %v1014_v55 }
 0x15c   : > { %v881_v56 = vpop.f32.mrb[56].mxu0  ;;  %v1018_v57 = vpop.f32.mrb[56].mxu1 }
 0x15d   : > { %1421 = vst [vmem:[%s2601_s25 + $0x338] sm:$0xff] %v881_v56  ;;  %v883_v58 = vpop.f32.mrb[57].mxu0  ;;  %1333 = vst [vmem:[%s2601_s25 + $0x78] sm:$0xff] %v1018_v57  ;;  %v1020_v59 = vpop.f32.mrb[57].mxu1 }
 0x15e   : > { %1422 = vst [vmem:[%s2601_s25 + $0x340] sm:$0xff] %v883_v58  ;;  %1334 = vst [vmem:[%s2601_s25 + $0x80] sm:$0xff] %v1020_v59 }
 0x160   : > { %v887_v60 = vpop.f32.mrb[58].mxu0  ;;  %v1024_v61 = vpop.f32.mrb[58].mxu1 }
 0x161   : > { %1430 = vst [vmem:[%s2601_s25 + $0x380] sm:$0xff] %v887_v60  ;;  %v889_v62 = vpop.f32.mrb[59].mxu0  ;;  %1342 = vst [vmem:[%s2601_s25 + $0xc0] sm:$0xff] %v1024_v61  ;;  %v1026_v63 = vpop.f32.mrb[59].mxu1 }
 0x162   : > { %1431 = vst [vmem:[%s2601_s25 + $0x388] sm:$0xff] %v889_v62  ;;  %1343 = vst [vmem:[%s2601_s25 + $0xc8] sm:$0xff] %v1026_v63 }
 0x164   : > { %v893_v0 = vpop.f32.mrb[60].mxu0  ;;  %v1030_v1 = vpop.f32.mrb[60].mxu1 }
 0x165   : > { %1439 = vst [vmem:[%s2601_s25 + $0x3c8] sm:$0xff] %v893_v0  ;;  %v895_v2 = vpop.f32.mrb[61].mxu0  ;;  %1351 = vst [vmem:[%s2601_s25 + $0x108] sm:$0xff] %v1030_v1  ;;  %v1032_v5 = vpop.f32.mrb[61].mxu1 }
 0x166   : > { %1440 = vst [vmem:[%s2601_s25 + $0x3d0] sm:$0xff] %v895_v2  ;;  %1352 = vst [vmem:[%s2601_s25 + $0x110] sm:$0xff] %v1032_v5 }
 0x168   : > { %v899_v6 = vpop.f32.mrb[62].mxu0  ;;  %v1036_v8 = vpop.f32.mrb[62].mxu1 }
 0x169   : > { %1448 = vst [vmem:[%s2601_s25 + $0x410] sm:$0xff] %v899_v6  ;;  %v901_v9 = vpop.f32.mrb[63].mxu0  ;;  %1360 = vst [vmem:[%s2601_s25 + $0x150] sm:$0xff] %v1036_v8  ;;  %v1038_v10 = vpop.f32.mrb[63].mxu1 }
 0x16a   : > { %1449 = vst [vmem:[%s2601_s25 + $0x418] sm:$0xff] %v901_v9  ;;  %1361 = vst [vmem:[%s2601_s25 + $0x158] sm:$0xff] %v1038_v10 }
 0x16c   : > { %v905_v7 = vpop.f32.mrb[64].mxu0  ;;  %v1042_v39 = vpop.f32.mrb[64].mxu1 }
 0x16d   : > { %1457 = vst [vmem:[%s2601_s25 + $0x458] sm:$0xff] %v905_v7  ;;  %v907_v41 = vpop.f32.mrb[65].mxu0  ;;  %1369 = vst [vmem:[%s2601_s25 + $0x198] sm:$0xff] %v1042_v39  ;;  %v1044_v53 = vpop.f32.mrb[65].mxu1 }
 0x16e   : > { %1458 = vst [vmem:[%s2601_s25 + $0x460] sm:$0xff] %v907_v41  ;;  %1370 = vst [vmem:[%s2601_s25 + $0x1a0] sm:$0xff] %v1044_v53 }
 0x170   : > { %v911_v54 = vpop.f32.mrb[66].mxu0  ;;  %v1048_v3 = vpop.f32.mrb[66].mxu1 }
 0x171   : > { %1466 = vst [vmem:[%s2601_s25 + $0x4a0] sm:$0xff] %v911_v54  ;;  %v913_v4 = vpop.f32.mrb[67].mxu0  ;;  %1378 = vst [vmem:[%s2601_s25 + $0x1e0] sm:$0xff] %v1048_v3  ;;  %v1050_v11 = vpop.f32.mrb[67].mxu1 }
 0x172   : > { %1467 = vst [vmem:[%s2601_s25 + $0x4a8] sm:$0xff] %v913_v4  ;;  %1379 = vst [vmem:[%s2601_s25 + $0x1e8] sm:$0xff] %v1050_v11 }
 0x174   : > { %v917_v12 = vpop.f32.mrb[68].mxu0  ;;  %v1054_v13 = vpop.f32.mrb[68].mxu1 }
 0x175   : > { %1475 = vst [vmem:[%s2601_s25 + $0x4e8] sm:$0xff] %v917_v12  ;;  %v919_v14 = vpop.f32.mrb[69].mxu0  ;;  %1387 = vst [vmem:[%s2601_s25 + $0x228] sm:$0xff] %v1054_v13  ;;  %v1056_v15 = vpop.f32.mrb[69].mxu1 }
 0x176   : > { %1476 = vst [vmem:[%s2601_s25 + $0x4f0] sm:$0xff] %v919_v14  ;;  %1388 = vst [vmem:[%s2601_s25 + $0x230] sm:$0xff] %v1056_v15 }
 0x178   : > { %v923_v16 = vpop.f32.mrb[70].mxu0  ;;  %v1060_v17 = vpop.f32.mrb[70].mxu1 }
 0x179   : > { %1484 = vst [vmem:[%s2601_s25 + $0x530] sm:$0xff] %v923_v16  ;;  %v925_v18 = vpop.f32.mrb[71].mxu0  ;;  %1396 = vst [vmem:[%s2601_s25 + $0x270] sm:$0xff] %v1060_v17  ;;  %v1062_v19 = vpop.f32.mrb[71].mxu1 }
 0x17a   : > { %1485 = vst [vmem:[%s2601_s25 + $0x538] sm:$0xff] %v925_v18  ;;  %1397 = vst [vmem:[%s2601_s25 + $0x278] sm:$0xff] %v1062_v19 }
 0x17c   : > { %v929_v20 = vpop.f32.mrb[72].mxu0  ;;  %v1066_v21 = vpop.f32.mrb[72].mxu1 }
 0x17d   : > { %1493 = vst [vmem:[%s2601_s25 + $0x578] sm:$0xff] %v929_v20  ;;  %v931_v22 = vpop.f32.mrb[73].mxu0  ;;  %1405 = vst [vmem:[%s2601_s25 + $0x2b8] sm:$0xff] %v1066_v21  ;;  %v1068_v23 = vpop.f32.mrb[73].mxu1 }
 0x17e   : > { %1494 = vst [vmem:[%s2601_s25 + $0x580] sm:$0xff] %v931_v22  ;;  %1406 = vst [vmem:[%s2601_s25 + $0x2c0] sm:$0xff] %v1068_v23 }
 0x180   : > { %v935_v24 = vpop.f32.mrb[74].mxu0  ;;  %v1072_v25 = vpop.f32.mrb[74].mxu1 }
 0x181   : > { %1502 = vst [vmem:[%s2601_s25 + $0x5c0] sm:$0xff] %v935_v24  ;;  %v937_v26 = vpop.f32.mrb[75].mxu0  ;;  %1414 = vst [vmem:[%s2601_s25 + $0x300] sm:$0xff] %v1072_v25  ;;  %v1074_v27 = vpop.f32.mrb[75].mxu1 }
 0x182   : > { %1503 = vst [vmem:[%s2601_s25 + $0x5c8] sm:$0xff] %v937_v26  ;;  %1415 = vst [vmem:[%s2601_s25 + $0x308] sm:$0xff] %v1074_v27 }
 0x184   : > { %v941_v28 = vpop.f32.mrb[76].mxu0  ;;  %v1078_v29 = vpop.f32.mrb[76].mxu1 }
 0x185   : > { %1511 = vst [vmem:[%s2601_s25 + $0x608] sm:$0xff] %v941_v28  ;;  %v943_v30 = vpop.f32.mrb[77].mxu0  ;;  %1423 = vst [vmem:[%s2601_s25 + $0x348] sm:$0xff] %v1078_v29  ;;  %v1080_v31 = vpop.f32.mrb[77].mxu1 }
 0x186   : > { %1512 = vst [vmem:[%s2601_s25 + $0x610] sm:$0xff] %v943_v30  ;;  %1424 = vst [vmem:[%s2601_s25 + $0x350] sm:$0xff] %v1080_v31 }
 0x188   : > { %v1783_v32 = vpop.f32.mrb[78].mxu0  ;;  %v1084_v33 = vpop.f32.mrb[78].mxu1 }
 0x189   : > { %1335 = vst [vmem:[%s2601_s25 + $0x88] sm:$0xff] %v1783_v32  ;;  %v1209_v34 = vpop.f32.mrb[79].mxu0  ;;  %1432 = vst [vmem:[%s2601_s25 + $0x390] sm:$0xff] %v1084_v33  ;;  %v1086_v35 = vpop.f32.mrb[79].mxu1 }
 0x18a   : > { %1326 = vst [vmem:[%s2601_s25 + $0x40] sm:$0xff] %v1209_v34  ;;  %1433 = vst [vmem:[%s2601_s25 + $0x398] sm:$0xff] %v1086_v35 }
 0x18c   : > { %v1786_v36 = vpop.f32.mrb[80].mxu0  ;;  %v1090_v37 = vpop.f32.mrb[80].mxu1 }
 0x18d   : > { %1353 = vst [vmem:[%s2601_s25 + $0x118] sm:$0xff] %v1786_v36  ;;  %v1219_v38 = vpop.f32.mrb[81].mxu0  ;;  %1441 = vst [vmem:[%s2601_s25 + $0x3d8] sm:$0xff] %v1090_v37  ;;  %v1092_v40 = vpop.f32.mrb[81].mxu1 }
 0x18e   : > { %1344 = vst [vmem:[%s2601_s25 + $0xd0] sm:$0xff] %v1219_v38  ;;  %1442 = vst [vmem:[%s2601_s25 + $0x3e0] sm:$0xff] %v1092_v40 }
 0x190   : > { %v1789_v42 = vpop.f32.mrb[82].mxu0  ;;  %v1096_v43 = vpop.f32.mrb[82].mxu1 }
 0x191   : > { %1371 = vst [vmem:[%s2601_s25 + $0x1a8] sm:$0xff] %v1789_v42  ;;  %v1229_v44 = vpop.f32.mrb[83].mxu0  ;;  %1450 = vst [vmem:[%s2601_s25 + $0x420] sm:$0xff] %v1096_v43  ;;  %v1098_v45 = vpop.f32.mrb[83].mxu1 }
 0x192   : > { %1362 = vst [vmem:[%s2601_s25 + $0x160] sm:$0xff] %v1229_v44  ;;  %1451 = vst [vmem:[%s2601_s25 + $0x428] sm:$0xff] %v1098_v45 }
 0x194   : > { %v1792_v46 = vpop.f32.mrb[84].mxu0  ;;  %v1102_v47 = vpop.f32.mrb[84].mxu1 }
 0x195   : > { %1389 = vst [vmem:[%s2601_s25 + $0x238] sm:$0xff] %v1792_v46  ;;  %v1239_v48 = vpop.f32.mrb[85].mxu0  ;;  %1459 = vst [vmem:[%s2601_s25 + $0x468] sm:$0xff] %v1102_v47  ;;  %v1104_v49 = vpop.f32.mrb[85].mxu1 }
 0x196   : > { %1380 = vst [vmem:[%s2601_s25 + $0x1f0] sm:$0xff] %v1239_v48  ;;  %1460 = vst [vmem:[%s2601_s25 + $0x470] sm:$0xff] %v1104_v49 }
 0x198   : > { %v1795_v50 = vpop.f32.mrb[86].mxu0  ;;  %v1108_v51 = vpop.f32.mrb[86].mxu1 }
 0x199   : > { %1407 = vst [vmem:[%s2601_s25 + $0x2c8] sm:$0xff] %v1795_v50  ;;  %v1249_v52 = vpop.f32.mrb[87].mxu0  ;;  %1468 = vst [vmem:[%s2601_s25 + $0x4b0] sm:$0xff] %v1108_v51  ;;  %v1110_v55 = vpop.f32.mrb[87].mxu1 }
 0x19a   : > { %1398 = vst [vmem:[%s2601_s25 + $0x280] sm:$0xff] %v1249_v52  ;;  %1469 = vst [vmem:[%s2601_s25 + $0x4b8] sm:$0xff] %v1110_v55 }
 0x19c   : > { %v1798_v56 = vpop.f32.mrb[88].mxu0  ;;  %v1114_v57 = vpop.f32.mrb[88].mxu1 }
 0x19d   : > { %1425 = vst [vmem:[%s2601_s25 + $0x358] sm:$0xff] %v1798_v56  ;;  %v1259_v58 = vpop.f32.mrb[89].mxu0  ;;  %1477 = vst [vmem:[%s2601_s25 + $0x4f8] sm:$0xff] %v1114_v57  ;;  %v1116_v59 = vpop.f32.mrb[89].mxu1 }
 0x19e   : > { %1416 = vst [vmem:[%s2601_s25 + $0x310] sm:$0xff] %v1259_v58  ;;  %1478 = vst [vmem:[%s2601_s25 + $0x500] sm:$0xff] %v1116_v59 }
 0x1a0   : > { %v1801_v60 = vpop.f32.mrb[90].mxu0  ;;  %v1120_v61 = vpop.f32.mrb[90].mxu1 }
 0x1a1   : > { %1443 = vst [vmem:[%s2601_s25 + $0x3e8] sm:$0xff] %v1801_v60  ;;  %v1269_v62 = vpop.f32.mrb[91].mxu0  ;;  %1486 = vst [vmem:[%s2601_s25 + $0x540] sm:$0xff] %v1120_v61  ;;  %v1122_v63 = vpop.f32.mrb[91].mxu1 }
 0x1a2   : > { %1434 = vst [vmem:[%s2601_s25 + $0x3a0] sm:$0xff] %v1269_v62  ;;  %1487 = vst [vmem:[%s2601_s25 + $0x548] sm:$0xff] %v1122_v63 }
 0x1a4   : > { %v1804_v0 = vpop.f32.mrb[92].mxu0  ;;  %v1126_v1 = vpop.f32.mrb[92].mxu1 }
 0x1a5   : > { %1461 = vst [vmem:[%s2601_s25 + $0x478] sm:$0xff] %v1804_v0  ;;  %v1279_v2 = vpop.f32.mrb[93].mxu0  ;;  %1495 = vst [vmem:[%s2601_s25 + $0x588] sm:$0xff] %v1126_v1  ;;  %v1128_v5 = vpop.f32.mrb[93].mxu1 }
 0x1a6   : > { %1452 = vst [vmem:[%s2601_s25 + $0x430] sm:$0xff] %v1279_v2  ;;  %1496 = vst [vmem:[%s2601_s25 + $0x590] sm:$0xff] %v1128_v5 }
 0x1a8   : > { %v1807_v6 = vpop.f32.mrb[94].mxu0  ;;  %v1132_v8 = vpop.f32.mrb[94].mxu1 }
 0x1a9   : > { %1479 = vst [vmem:[%s2601_s25 + $0x508] sm:$0xff] %v1807_v6  ;;  %v1289_v9 = vpop.f32.mrb[95].mxu0  ;;  %1504 = vst [vmem:[%s2601_s25 + $0x5d0] sm:$0xff] %v1132_v8  ;;  %v1134_v10 = vpop.f32.mrb[95].mxu1 }
 0x1aa   : > { %1470 = vst [vmem:[%s2601_s25 + $0x4c0] sm:$0xff] %v1289_v9  ;;  %1505 = vst [vmem:[%s2601_s25 + $0x5d8] sm:$0xff] %v1134_v10 }
 0x1ac   : > { %v1810_v7 = vpop.f32.mrb[96].mxu0  ;;  %v1138_v39 = vpop.f32.mrb[96].mxu1 }
 0x1ad   : > { %1497 = vst [vmem:[%s2601_s25 + $0x598] sm:$0xff] %v1810_v7  ;;  %v1299_v41 = vpop.f32.mrb[97].mxu0  ;;  %1513 = vst [vmem:[%s2601_s25 + $0x618] sm:$0xff] %v1138_v39  ;;  %v1140_v53 = vpop.f32.mrb[97].mxu1 }
 0x1ae   : > { %1488 = vst [vmem:[%s2601_s25 + $0x550] sm:$0xff] %v1299_v41  ;;  %1514 = vst [vmem:[%s2601_s25 + $0x620] sm:$0xff] %v1140_v53 }
 0x1b0   : > { %v1813_v54 = vpop.f32.mrb[98].mxu0 }
 0x1b1   : > { %1515 = vst [vmem:[%s2601_s25 + $0x628] sm:$0xff] %v1813_v54  ;;  %v1309_v3 = vpop.f32.mrb[99].mxu0 }
 0x1b2   : > { %1506 = vst [vmem:[%s2601_s25 + $0x5e0] sm:$0xff] %v1309_v3 }
 0x1b3 PF: > { %s12_s11 = sadd.s32 1, %s1950_s11   ;;  %s2814_s9 = smov %s1946_s10 }
 0x1b4   : > { %p9_p5 = scmp.ge.s32.totalorder %s12_s11, 4   ;;  %s2815_s10 = smov %s2817_s12 }
 0x1b6   :  { %11 = sbr.rel (!%p9_p5) target bundleno = 2 (0x2), region = 61 }

// kernel: decoder_forward.9
= control target key start
LH: loop header
LB: loop body
LE: loop exit
PB: predicated region body
PF: predicated region fallthrough
CT: control target
= control target key end

     0   :  { %s2140_s9 = smov 0   ;;  %s2142_s10 = smov 0   ;;  %s2764_s0 = inlined_call_operand.vmem [shape: f32[1808,32], index: 0, kind: input, shape index: {}]   ;;  %s2765_s1 = inlined_call_operand.vmem [shape: f32[32,128], index: 1, kind: input, shape index: {}]   ;;  %s2766_s2 = inlined_call_operand.vmem [shape: f32[1808,128], index: 2, kind: output, shape index: {}]  }
   0x1   :  { %s2144_s11 = smov 0  }
   0x2 LB: > { %s24_s12 = sadd.s32 1, %s2116_s10  ;;  %p1479_p0 = scmp.ge.s32.totalorder %s2120_s11, 1  ;;  %s2120_s11 = sphi %s2144_s11, %s12_s11   ;;  %s2116_s10 = sphi %s2142_s10, %s2768_s10   ;;  %s2112_s9 = sphi %s2140_s9, %s2767_s9  }
   0x3   : > { %p26_p1 = scmp.ge.s32.totalorder %s24_s12, 2  ;;  %p136_p2 = scmp.lt.s32.totalorder %s2120_s11, 3 }
   0x5   : > { %s2770_s12 = smov (%p26_p1, %s24_s12), 0  ;;  %p137_p3 = pnand %p1479_p0, %p136_p2 }
   0x6   : > { %v297_v0 = vld [vmem:[%s2765_s1] sm:$0xff] (!%p137_p3)  ;;  %v298_v1 = vld [vmem:[%s2765_s1 + $0x8] sm:$0xff] (!%p137_p3)  ;;  %v299_v2 = vld [vmem:[%s2765_s1 + $0x10] sm:$0xff] (!%p137_p3)  ;;  %v2122_v3 = vmov (!%p137_p3), 0.0|0.0   ;;  %s165_s21 = smul.u32 (!%p137_p3), 113, %s2112_s9  ;;  %vm2123_vm0 = vmmov (!%p137_p3), 0  }
   0x7   : > { %140 = sbr.rel (%p137_p3) target bundleno = 455 (0x1c7), region = 28  ;;  %2061 = vmatprep.subr.bf16.mxu0 (!%p137_p3), %v2122_v3  ;;  %v2062_v4 = vpack.c.bf16 (!%p137_p3), %v298_v1, %v297_v0  ;;  %2067 = vmatprep.subr.bf16.mxu1 (!%p137_p3), %v2122_v3  ;;  %v300_v5 = vld [vmem:[%s2765_s1 + $0x18] sm:$0xff] (!%p137_p3)  ;;  %v2124_v6 = vmov (!%p137_p3), 0.0   ;;  %vm301_vm1 = vcmask (!%p137_p3), 261120  }
   0x8   : > { %1722 = vmatprep.mubr.msk.f32.mxu0 (!%p137_p3), %vm2123_vm0, %v2124_v6  ;;  %1893 = vmatprep.mubr.msk.f32.mxu1 (!%p137_p3), %vm2123_vm0, %v2124_v6  ;;  %v2065_v7 = vpack.c.bf16 (!%p137_p3), %v300_v5, %v299_v2  ;;  %p166_p4 = scmp.lt.s32.totalorder (!%p137_p3), %s165_s21, 225 }
   0x9   : > { %2063 = vmatpush3.bf16.msra.mxu0 (!%p137_p3), %v2062_v4  ;;  %2069 = vmatpush3.bf16.msra.mxu1 (!%p137_p3), %v2062_v4 }
   0xa   : > { %2064 = vmatprep.subr.bf16.mxu0 (!%p137_p3), %v2122_v3  ;;  %2068 = vmatprep.subr.bf16.mxu1 (!%p137_p3), %v2122_v3 }
   0xd   : > { %2066 = vmatpush3.bf16.msra.mxu0 (!%p137_p3), %v2065_v7  ;;  %2070 = vmatpush3.bf16.msra.mxu1 (!%p137_p3), %v2065_v7 }
   0xe   : > { %s2772_s21 = smov (!%p166_p4, %s165_s21), 225 }
   0xf   : > { %s1480_s22 = sshll.u32 %s2772_s21, 3 }
  0x10   : > { %s2185_s25 = scalar_lea.vmem %s2764_s0, %s1480_s22  ;;  %s2612_s28 = scalar_lea.vmem %s2766_s2, %s1480_s22 }
  0x11   : > { %v184_v8 = vld [vmem:[%s2185_s25] sm:$0xff]  ;;  %v241_v9 = vld [vmem:[%s2185_s25 + $0x1c8] sm:$0xff]  ;;  %v242_v11 = vld [vmem:[%s2185_s25 + $0x1d0] sm:$0xff] }
  0x12   : > { %1723 = vmatmul.mubr.msk.f32.vlgmr.msra.gmra.mrb[0].mxu0 %vm301_vm1, %v184_v8  ;;  %1894 = vmatmul.mubr.msk.f32.vlgmr.msra.gmra.mrb[0].mxu1 %vm301_vm1, %v241_v9  ;;  %v185_v10 = vld [vmem:[%s2185_s25 + $0x8] sm:$0xff]  ;;  %v186_v12 = vld [vmem:[%s2185_s25 + $0x10] sm:$0xff]  ;;  %v243_v13 = vld [vmem:[%s2185_s25 + $0x1d8] sm:$0xff] }
  0x13   : > { %1725 = vmatprep.mubr.msk.f32.mxu0 %vm2123_vm0, %v2124_v6  ;;  %1896 = vmatprep.mubr.msk.f32.mxu1 %vm2123_vm0, %v2124_v6  ;;  %v187_v14 = vld [vmem:[%s2185_s25 + $0x18] sm:$0xff]  ;;  %v244_v15 = vld [vmem:[%s2185_s25 + $0x1e0] sm:$0xff]  ;;  %v245_v17 = vld [vmem:[%s2185_s25 + $0x1e8] sm:$0xff] }
  0x14   : > { %v188_v16 = vld [vmem:[%s2185_s25 + $0x20] sm:$0xff]  ;;  %v189_v18 = vld [vmem:[%s2185_s25 + $0x28] sm:$0xff]  ;;  %v246_v19 = vld [vmem:[%s2185_s25 + $0x1f0] sm:$0xff] }
  0x15   : > { %v190_v20 = vld [vmem:[%s2185_s25 + $0x30] sm:$0xff]  ;;  %v247_v21 = vld [vmem:[%s2185_s25 + $0x1f8] sm:$0xff]  ;;  %v248_v23 = vld [vmem:[%s2185_s25 + $0x200] sm:$0xff] }
  0x16   : > { %1726 = vmatmul.mubr.msk.f32.gmra.mrb[2].mxu0 %vm301_vm1, %v185_v10  ;;  %1897 = vmatmul.mubr.msk.f32.gmra.mrb[2].mxu1 %vm301_vm1, %v242_v11  ;;  %v191_v22 = vld [vmem:[%s2185_s25 + $0x38] sm:$0xff]  ;;  %v192_v24 = vld [vmem:[%s2185_s25 + $0x40] sm:$0xff]  ;;  %v249_v25 = vld [vmem:[%s2185_s25 + $0x208] sm:$0xff] }
  0x17   : > { %1728 = vmatprep.mubr.msk.f32.mxu0 %vm2123_vm0, %v2124_v6  ;;  %1899 = vmatprep.mubr.msk.f32.mxu1 %vm2123_vm0, %v2124_v6  ;;  %v193_v26 = vld [vmem:[%s2185_s25 + $0x48] sm:$0xff]  ;;  %v250_v27 = vld [vmem:[%s2185_s25 + $0x210] sm:$0xff]  ;;  %v251_v29 = vld [vmem:[%s2185_s25 + $0x218] sm:$0xff] }
  0x18   : > { %v194_v28 = vld [vmem:[%s2185_s25 + $0x50] sm:$0xff]  ;;  %v195_v30 = vld [vmem:[%s2185_s25 + $0x58] sm:$0xff]  ;;  %v252_v31 = vld [vmem:[%s2185_s25 + $0x220] sm:$0xff] }
  0x19   : > { %v196_v32 = vld [vmem:[%s2185_s25 + $0x60] sm:$0xff]  ;;  %v253_v33 = vld [vmem:[%s2185_s25 + $0x228] sm:$0xff]  ;;  %v254_v35 = vld [vmem:[%s2185_s25 + $0x230] sm:$0xff] }
  0x1a   : > { %1729 = vmatmul.mubr.msk.f32.gmra.mrb[4].mxu0 %vm301_vm1, %v186_v12  ;;  %1900 = vmatmul.mubr.msk.f32.gmra.mrb[4].mxu1 %vm301_vm1, %v243_v13  ;;  %v197_v34 = vld [vmem:[%s2185_s25 + $0x68] sm:$0xff]  ;;  %v198_v36 = vld [vmem:[%s2185_s25 + $0x70] sm:$0xff]  ;;  %v255_v37 = vld [vmem:[%s2185_s25 + $0x238] sm:$0xff] }
  0x1b   : > { %1731 = vmatprep.mubr.msk.f32.mxu0 %vm2123_vm0, %v2124_v6  ;;  %1902 = vmatprep.mubr.msk.f32.mxu1 %vm2123_vm0, %v2124_v6  ;;  %v199_v38 = vld [vmem:[%s2185_s25 + $0x78] sm:$0xff]  ;;  %v256_v39 = vld [vmem:[%s2185_s25 + $0x240] sm:$0xff]  ;;  %v257_v41 = vld [vmem:[%s2185_s25 + $0x248] sm:$0xff] }
  0x1c   : > { %v200_v40 = vld [vmem:[%s2185_s25 + $0x80] sm:$0xff]  ;;  %v201_v42 = vld [vmem:[%s2185_s25 + $0x88] sm:$0xff]  ;;  %v258_v43 = vld [vmem:[%s2185_s25 + $0x250] sm:$0xff] }
  0x1d   : > { %v202_v44 = vld [vmem:[%s2185_s25 + $0x90] sm:$0xff]  ;;  %v259_v45 = vld [vmem:[%s2185_s25 + $0x258] sm:$0xff]  ;;  %v260_v47 = vld [vmem:[%s2185_s25 + $0x260] sm:$0xff] }
  0x1e   : > { %1732 = vmatmul.mubr.msk.f32.gmra.mrb[6].mxu0 %vm301_vm1, %v187_v14  ;;  %1903 = vmatmul.mubr.msk.f32.gmra.mrb[6].mxu1 %vm301_vm1, %v244_v15  ;;  %v203_v46 = vld [vmem:[%s2185_s25 + $0x98] sm:$0xff]  ;;  %v204_v48 = vld [vmem:[%s2185_s25 + $0xa0] sm:$0xff]  ;;  %v261_v49 = vld [vmem:[%s2185_s25 + $0x268] sm:$0xff] }
  0x1f   : > { %1734 = vmatprep.mubr.msk.f32.mxu0 %vm2123_vm0, %v2124_v6  ;;  %1905 = vmatprep.mubr.msk.f32.mxu1 %vm2123_vm0, %v2124_v6  ;;  %v205_v50 = vld [vmem:[%s2185_s25 + $0xa8] sm:$0xff]  ;;  %v262_v51 = vld [vmem:[%s2185_s25 + $0x270] sm:$0xff]  ;;  %v263_v53 = vld [vmem:[%s2185_s25 + $0x278] sm:$0xff] }
  0x20   : > { %v206_v52 = vld [vmem:[%s2185_s25 + $0xb0] sm:$0xff]  ;;  %v207_v54 = vld [vmem:[%s2185_s25 + $0xb8] sm:$0xff]  ;;  %v264_v55 = vld [vmem:[%s2185_s25 + $0x280] sm:$0xff] }
  0x21   : > { %v208_v56 = vld [vmem:[%s2185_s25 + $0xc0] sm:$0xff]  ;;  %v265_v57 = vld [vmem:[%s2185_s25 + $0x288] sm:$0xff]  ;;  %v266_v59 = vld [vmem:[%s2185_s25 + $0x290] sm:$0xff] }
  0x22   : > { %1735 = vmatmul.mubr.msk.f32.gmra.mrb[8].mxu0 %vm301_vm1, %v188_v16  ;;  %1906 = vmatmul.mubr.msk.f32.gmra.mrb[8].mxu1 %vm301_vm1, %v245_v17  ;;  %v209_v58 = vld [vmem:[%s2185_s25 + $0xc8] sm:$0xff]  ;;  %v210_v60 = vld [vmem:[%s2185_s25 + $0xd0] sm:$0xff]  ;;  %v267_v61 = vld [vmem:[%s2185_s25 + $0x298] sm:$0xff] }
  0x23   : > { %1737 = vmatprep.mubr.msk.f32.mxu0 %vm2123_vm0, %v2124_v6  ;;  %1908 = vmatprep.mubr.msk.f32.mxu1 %vm2123_vm0, %v2124_v6  ;;  %v211_v62 = vld [vmem:[%s2185_s25 + $0xd8] sm:$0xff]  ;;  %v268_v63 = vld [vmem:[%s2185_s25 + $0x2a0] sm:$0xff]  ;;  %v269_v1 = vld [vmem:[%s2185_s25 + $0x2a8] sm:$0xff] }
  0x24   : > { %v212_v0 = vld [vmem:[%s2185_s25 + $0xe0] sm:$0xff]  ;;  %v213_v2 = vld [vmem:[%s2185_s25 + $0xe8] sm:$0xff]  ;;  %v270_v3 = vld [vmem:[%s2185_s25 + $0x2b0] sm:$0xff] }
  0x25   : > { %v214_v4 = vld [vmem:[%s2185_s25 + $0xf0] sm:$0xff]  ;;  %v271_v5 = vld [vmem:[%s2185_s25 + $0x2b8] sm:$0xff]  ;;  %v272_v8 = vld [vmem:[%s2185_s25 + $0x2c0] sm:$0xff] }
  0x26   : > { %1738 = vmatmul.mubr.msk.f32.gmra.mrb[10].mxu0 %vm301_vm1, %v189_v18  ;;  %1909 = vmatmul.mubr.msk.f32.gmra.mrb[10].mxu1 %vm301_vm1, %v246_v19  ;;  %v215_v7 = vld [vmem:[%s2185_s25 + $0xf8] sm:$0xff]  ;;  %v216_v9 = vld [vmem:[%s2185_s25 + $0x100] sm:$0xff]  ;;  %v273_v10 = vld [vmem:[%s2185_s25 + $0x2c8] sm:$0xff] }
  0x27   : > { %1740 = vmatprep.mubr.msk.f32.mxu0 %vm2123_vm0, %v2124_v6  ;;  %1911 = vmatprep.mubr.msk.f32.mxu1 %vm2123_vm0, %v2124_v6  ;;  %v217_v11 = vld [vmem:[%s2185_s25 + $0x108] sm:$0xff]  ;;  %v274_v12 = vld [vmem:[%s2185_s25 + $0x2d0] sm:$0xff]  ;;  %v275_v14 = vld [vmem:[%s2185_s25 + $0x2d8] sm:$0xff] }
  0x28   : > { %v218_v13 = vld [vmem:[%s2185_s25 + $0x110] sm:$0xff]  ;;  %v219_v15 = vld [vmem:[%s2185_s25 + $0x118] sm:$0xff]  ;;  %v276_v16 = vld [vmem:[%s2185_s25 + $0x2e0] sm:$0xff] }
  0x29   : > { %v220_v17 = vld [vmem:[%s2185_s25 + $0x120] sm:$0xff]  ;;  %v277_v18 = vld [vmem:[%s2185_s25 + $0x2e8] sm:$0xff] }
  0x2a   : > { %1741 = vmatmul.mubr.msk.f32.gmra.mrb[12].mxu0 %vm301_vm1, %v190_v20  ;;  %1912 = vmatmul.mubr.msk.f32.gmra.mrb[12].mxu1 %vm301_vm1, %v247_v21  ;;  %v221_v19 = vld [vmem:[%s2185_s25 + $0x128] sm:$0xff]  ;;  %v278_v20 = vld [vmem:[%s2185_s25 + $0x2f0] sm:$0xff] }
  0x2b   : > { %1743 = vmatprep.mubr.msk.f32.mxu0 %vm2123_vm0, %v2124_v6  ;;  %1914 = vmatprep.mubr.msk.f32.mxu1 %vm2123_vm0, %v2124_v6  ;;  %v222_v21 = vld [vmem:[%s2185_s25 + $0x130] sm:$0xff] }
  0x2e   : > { %1744 = vmatmul.mubr.msk.f32.gmra.mrb[14].mxu0 %vm301_vm1, %v191_v22  ;;  %1915 = vmatmul.mubr.msk.f32.gmra.mrb[14].mxu1 %vm301_vm1, %v248_v23  ;;  %v279_v22 = vld [vmem:[%s2185_s25 + $0x2f8] sm:$0xff] }
  0x2f   : > { %1746 = vmatprep.mubr.msk.f32.mxu0 %vm2123_vm0, %v2124_v6  ;;  %1917 = vmatprep.mubr.msk.f32.mxu1 %vm2123_vm0, %v2124_v6  ;;  %v223_v23 = vld [vmem:[%s2185_s25 + $0x138] sm:$0xff] }
  0x32   : > { %1747 = vmatmul.mubr.msk.f32.gmra.mrb[16].mxu0 %vm301_vm1, %v192_v24  ;;  %1918 = vmatmul.mubr.msk.f32.gmra.mrb[16].mxu1 %vm301_vm1, %v249_v25  ;;  %v280_v24 = vld [vmem:[%s2185_s25 + $0x300] sm:$0xff] }
  0x33   : > { %1749 = vmatprep.mubr.msk.f32.mxu0 %vm2123_vm0, %v2124_v6  ;;  %1920 = vmatprep.mubr.msk.f32.mxu1 %vm2123_vm0, %v2124_v6  ;;  %v224_v25 = vld [vmem:[%s2185_s25 + $0x140] sm:$0xff] }
  0x36   : > { %1750 = vmatmul.mubr.msk.f32.gmra.mrb[18].mxu0 %vm301_vm1, %v193_v26  ;;  %1921 = vmatmul.mubr.msk.f32.gmra.mrb[18].mxu1 %vm301_vm1, %v250_v27  ;;  %v281_v26 = vld [vmem:[%s2185_s25 + $0x308] sm:$0xff] }
  0x37   : > { %1752 = vmatprep.mubr.msk.f32.mxu0 %vm2123_vm0, %v2124_v6  ;;  %1923 = vmatprep.mubr.msk.f32.mxu1 %vm2123_vm0, %v2124_v6  ;;  %v225_v27 = vld [vmem:[%s2185_s25 + $0x148] sm:$0xff] }
  0x3a   : > { %1753 = vmatmul.mubr.msk.f32.gmra.mrb[20].mxu0 %vm301_vm1, %v194_v28  ;;  %1924 = vmatmul.mubr.msk.f32.gmra.mrb[20].mxu1 %vm301_vm1, %v251_v29  ;;  %v282_v28 = vld [vmem:[%s2185_s25 + $0x310] sm:$0xff] }
  0x3b   : > { %1755 = vmatprep.mubr.msk.f32.mxu0 %vm2123_vm0, %v2124_v6  ;;  %1926 = vmatprep.mubr.msk.f32.mxu1 %vm2123_vm0, %v2124_v6  ;;  %v226_v29 = vld [vmem:[%s2185_s25 + $0x150] sm:$0xff] }
  0x3e   : > { %1756 = vmatmul.mubr.msk.f32.gmra.mrb[22].mxu0 %vm301_vm1, %v195_v30  ;;  %1927 = vmatmul.mubr.msk.f32.gmra.mrb[22].mxu1 %vm301_vm1, %v252_v31  ;;  %v283_v30 = vld [vmem:[%s2185_s25 + $0x318] sm:$0xff] }
  0x3f   : > { %1758 = vmatprep.mubr.msk.f32.mxu0 %vm2123_vm0, %v2124_v6  ;;  %1929 = vmatprep.mubr.msk.f32.mxu1 %vm2123_vm0, %v2124_v6  ;;  %v227_v31 = vld [vmem:[%s2185_s25 + $0x158] sm:$0xff] }
  0x42   : > { %1759 = vmatmul.mubr.msk.f32.gmra.mrb[24].mxu0 %vm301_vm1, %v196_v32  ;;  %1930 = vmatmul.mubr.msk.f32.gmra.mrb[24].mxu1 %vm301_vm1, %v253_v33  ;;  %v284_v32 = vld [vmem:[%s2185_s25 + $0x320] sm:$0xff] }
  0x43   : > { %1761 = vmatprep.mubr.msk.f32.mxu0 %vm2123_vm0, %v2124_v6  ;;  %1932 = vmatprep.mubr.msk.f32.mxu1 %vm2123_vm0, %v2124_v6  ;;  %v228_v33 = vld [vmem:[%s2185_s25 + $0x160] sm:$0xff] }
  0x46   : > { %1762 = vmatmul.mubr.msk.f32.gmra.mrb[26].mxu0 %vm301_vm1, %v197_v34  ;;  %1933 = vmatmul.mubr.msk.f32.gmra.mrb[26].mxu1 %vm301_vm1, %v254_v35  ;;  %v285_v34 = vld [vmem:[%s2185_s25 + $0x328] sm:$0xff] }
  0x47   : > { %1764 = vmatprep.mubr.msk.f32.mxu0 %vm2123_vm0, %v2124_v6  ;;  %1935 = vmatprep.mubr.msk.f32.mxu1 %vm2123_vm0, %v2124_v6  ;;  %v229_v35 = vld [vmem:[%s2185_s25 + $0x168] sm:$0xff] }
  0x4a   : > { %1765 = vmatmul.mubr.msk.f32.gmra.mrb[28].mxu0 %vm301_vm1, %v198_v36  ;;  %1936 = vmatmul.mubr.msk.f32.gmra.mrb[28].mxu1 %vm301_vm1, %v255_v37  ;;  %v286_v36 = vld [vmem:[%s2185_s25 + $0x330] sm:$0xff] }
  0x4b   : > { %1767 = vmatprep.mubr.msk.f32.mxu0 %vm2123_vm0, %v2124_v6  ;;  %1938 = vmatprep.mubr.msk.f32.mxu1 %vm2123_vm0, %v2124_v6  ;;  %v230_v37 = vld [vmem:[%s2185_s25 + $0x170] sm:$0xff] }
  0x4e   : > { %1768 = vmatmul.mubr.msk.f32.gmra.mrb[30].mxu0 %vm301_vm1, %v199_v38  ;;  %1939 = vmatmul.mubr.msk.f32.gmra.mrb[30].mxu1 %vm301_vm1, %v256_v39  ;;  %v287_v38 = vld [vmem:[%s2185_s25 + $0x338] sm:$0xff] }
  0x4f   : > { %1770 = vmatprep.mubr.msk.f32.mxu0 %vm2123_vm0, %v2124_v6  ;;  %1941 = vmatprep.mubr.msk.f32.mxu1 %vm2123_vm0, %v2124_v6  ;;  %v231_v39 = vld [vmem:[%s2185_s25 + $0x178] sm:$0xff] }
  0x52   : > { %1771 = vmatmul.mubr.msk.f32.gmra.mrb[32].mxu0 %vm301_vm1, %v200_v40  ;;  %1942 = vmatmul.mubr.msk.f32.gmra.mrb[32].mxu1 %vm301_vm1, %v257_v41  ;;  %v288_v40 = vld [vmem:[%s2185_s25 + $0x340] sm:$0xff] }
  0x53   : > { %1773 = vmatprep.mubr.msk.f32.mxu0 %vm2123_vm0, %v2124_v6  ;;  %1944 = vmatprep.mubr.msk.f32.mxu1 %vm2123_vm0, %v2124_v6  ;;  %v232_v41 = vld [vmem:[%s2185_s25 + $0x180] sm:$0xff] }
  0x56   : > { %1774 = vmatmul.mubr.msk.f32.gmra.mrb[34].mxu0 %vm301_vm1, %v201_v42  ;;  %1945 = vmatmul.mubr.msk.f32.gmra.mrb[34].mxu1 %vm301_vm1, %v258_v43  ;;  %v289_v42 = vld [vmem:[%s2185_s25 + $0x348] sm:$0xff] }
  0x57   : > { %1776 = vmatprep.mubr.msk.f32.mxu0 %vm2123_vm0, %v2124_v6  ;;  %1947 = vmatprep.mubr.msk.f32.mxu1 %vm2123_vm0, %v2124_v6  ;;  %v233_v43 = vld [vmem:[%s2185_s25 + $0x188] sm:$0xff] }
  0x5a   : > { %1777 = vmatmul.mubr.msk.f32.gmra.mrb[36].mxu0 %vm301_vm1, %v202_v44  ;;  %1948 = vmatmul.mubr.msk.f32.gmra.mrb[36].mxu1 %vm301_vm1, %v259_v45  ;;  %v290_v44 = vld [vmem:[%s2185_s25 + $0x350] sm:$0xff] }
  0x5b   : > { %1779 = vmatprep.mubr.msk.f32.mxu0 %vm2123_vm0, %v2124_v6  ;;  %1950 = vmatprep.mubr.msk.f32.mxu1 %vm2123_vm0, %v2124_v6  ;;  %v234_v45 = vld [vmem:[%s2185_s25 + $0x190] sm:$0xff] }
  0x5e   : > { %1780 = vmatmul.mubr.msk.f32.gmra.mrb[38].mxu0 %vm301_vm1, %v203_v46  ;;  %1951 = vmatmul.mubr.msk.f32.gmra.mrb[38].mxu1 %vm301_vm1, %v260_v47  ;;  %v291_v46 = vld [vmem:[%s2185_s25 + $0x358] sm:$0xff] }
  0x5f   : > { %1782 = vmatprep.mubr.msk.f32.mxu0 %vm2123_vm0, %v2124_v6  ;;  %1953 = vmatprep.mubr.msk.f32.mxu1 %vm2123_vm0, %v2124_v6  ;;  %v235_v47 = vld [vmem:[%s2185_s25 + $0x198] sm:$0xff] }
  0x62   : > { %1783 = vmatmul.mubr.msk.f32.gmra.mrb[40].mxu0 %vm301_vm1, %v204_v48  ;;  %1954 = vmatmul.mubr.msk.f32.gmra.mrb[40].mxu1 %vm301_vm1, %v261_v49  ;;  %v292_v48 = vld [vmem:[%s2185_s25 + $0x360] sm:$0xff] }
  0x63   : > { %1785 = vmatprep.mubr.msk.f32.mxu0 %vm2123_vm0, %v2124_v6  ;;  %1956 = vmatprep.mubr.msk.f32.mxu1 %vm2123_vm0, %v2124_v6  ;;  %v236_v49 = vld [vmem:[%s2185_s25 + $0x1a0] sm:$0xff] }
  0x66   : > { %1786 = vmatmul.mubr.msk.f32.gmra.mrb[42].mxu0 %vm301_vm1, %v205_v50  ;;  %1957 = vmatmul.mubr.msk.f32.gmra.mrb[42].mxu1 %vm301_vm1, %v262_v51  ;;  %v293_v50 = vld [vmem:[%s2185_s25 + $0x368] sm:$0xff] }
  0x67   : > { %1788 = vmatprep.mubr.msk.f32.mxu0 %vm2123_vm0, %v2124_v6  ;;  %1959 = vmatprep.mubr.msk.f32.mxu1 %vm2123_vm0, %v2124_v6  ;;  %v237_v51 = vld [vmem:[%s2185_s25 + $0x1a8] sm:$0xff] }
  0x6a   : > { %1789 = vmatmul.mubr.msk.f32.gmra.mrb[44].mxu0 %vm301_vm1, %v206_v52  ;;  %1960 = vmatmul.mubr.msk.f32.gmra.mrb[44].mxu1 %vm301_vm1, %v263_v53  ;;  %v294_v52 = vld [vmem:[%s2185_s25 + $0x370] sm:$0xff] }
  0x6b   : > { %1791 = vmatprep.mubr.msk.f32.mxu0 %vm2123_vm0, %v2124_v6  ;;  %1962 = vmatprep.mubr.msk.f32.mxu1 %vm2123_vm0, %v2124_v6 }
  0x6e   : > { %1792 = vmatmul.mubr.msk.f32.gmra.mrb[46].mxu0 %vm301_vm1, %v207_v54  ;;  %1963 = vmatmul.mubr.msk.f32.gmra.mrb[46].mxu1 %vm301_vm1, %v264_v55 }
  0x6f   : > { %1794 = vmatprep.mubr.msk.f32.mxu0 %vm2123_vm0, %v2124_v6  ;;  %1965 = vmatprep.mubr.msk.f32.mxu1 %vm2123_vm0, %v2124_v6 }
  0x72   : > { %1795 = vmatmul.mubr.msk.f32.gmra.mrb[48].mxu0 %vm301_vm1, %v208_v56  ;;  %1966 = vmatmul.mubr.msk.f32.gmra.mrb[48].mxu1 %vm301_vm1, %v265_v57  ;;  %v238_v57 = vld [vmem:[%s2185_s25 + $0x1b0] sm:$0xff] }
  0x73   : > { %1797 = vmatprep.mubr.msk.f32.mxu0 %vm2123_vm0, %v2124_v6  ;;  %1968 = vmatprep.mubr.msk.f32.mxu1 %vm2123_vm0, %v2124_v6 }
  0x76   : > { %1798 = vmatmul.mubr.msk.f32.gmra.mrb[50].mxu0 %vm301_vm1, %v209_v58  ;;  %1969 = vmatmul.mubr.msk.f32.gmra.mrb[50].mxu1 %vm301_vm1, %v266_v59  ;;  %v295_v58 = vld [vmem:[%s2185_s25 + $0x378] sm:$0xff] }
  0x77   : > { %1800 = vmatprep.mubr.msk.f32.mxu0 %vm2123_vm0, %v2124_v6  ;;  %1971 = vmatprep.mubr.msk.f32.mxu1 %vm2123_vm0, %v2124_v6 }
  0x7a   : > { %1801 = vmatmul.mubr.msk.f32.gmra.mrb[52].mxu0 %vm301_vm1, %v210_v60  ;;  %1972 = vmatmul.mubr.msk.f32.gmra.mrb[52].mxu1 %vm301_vm1, %v267_v61 }
  0x7b   : > { %1803 = vmatprep.mubr.msk.f32.mxu0 %vm2123_vm0, %v2124_v6  ;;  %1974 = vmatprep.mubr.msk.f32.mxu1 %vm2123_vm0, %v2124_v6 }
  0x7e   : > { %1804 = vmatmul.mubr.msk.f32.gmra.mrb[54].mxu0 %vm301_vm1, %v211_v62  ;;  %1975 = vmatmul.mubr.msk.f32.gmra.mrb[54].mxu1 %vm301_vm1, %v268_v63  ;;  %v239_v63 = vld [vmem:[%s2185_s25 + $0x1b8] sm:$0xff] }
  0x7f   : > { %1806 = vmatprep.mubr.msk.f32.mxu0 %vm2123_vm0, %v2124_v6  ;;  %1977 = vmatprep.mubr.msk.f32.mxu1 %vm2123_vm0, %v2124_v6 }
  0x82   : > { %1807 = vmatmul.mubr.msk.f32.gmra.mrb[56].mxu0 %vm301_vm1, %v212_v0  ;;  %1978 = vmatmul.mubr.msk.f32.gmra.mrb[56].mxu1 %vm301_vm1, %v269_v1  ;;  %v296_v0 = vld [vmem:[%s2185_s25 + $0x380] sm:$0xff] }
  0x83   : > { %1809 = vmatprep.mubr.msk.f32.mxu0 %vm2123_vm0, %v2124_v6  ;;  %1980 = vmatprep.mubr.msk.f32.mxu1 %vm2123_vm0, %v2124_v6 }
  0x86   : > { %1810 = vmatmul.mubr.msk.f32.gmra.mrb[58].mxu0 %vm301_vm1, %v213_v2  ;;  %1981 = vmatmul.mubr.msk.f32.gmra.mrb[58].mxu1 %vm301_vm1, %v270_v3 }
  0x87   : > { %1812 = vmatprep.mubr.msk.f32.mxu0 %vm2123_vm0, %v2124_v6  ;;  %1983 = vmatprep.mubr.msk.f32.mxu1 %vm2123_vm0, %v2124_v6 }
  0x8a   : > { %1813 = vmatmul.mubr.msk.f32.gmra.mrb[60].mxu0 %vm301_vm1, %v214_v4  ;;  %1984 = vmatmul.mubr.msk.f32.gmra.mrb[60].mxu1 %vm301_vm1, %v271_v5  ;;  %v240_v5 = vld [vmem:[%s2185_s25 + $0x1c0] sm:$0xff] }
  0x8b   : > { %1815 = vmatprep.mubr.msk.f32.mxu0 %vm2123_vm0, %v2124_v6  ;;  %1986 = vmatprep.mubr.msk.f32.mxu1 %vm2123_vm0, %v2124_v6 }
  0x8e   : > { %1816 = vmatmul.mubr.msk.f32.gmra.mrb[62].mxu0 %vm301_vm1, %v215_v7  ;;  %1987 = vmatmul.mubr.msk.f32.gmra.mrb[62].mxu1 %vm301_vm1, %v272_v8 }
  0x8f   : > { %1818 = vmatprep.mubr.msk.f32.mxu0 %vm2123_vm0, %v2124_v6  ;;  %1989 = vmatprep.mubr.msk.f32.mxu1 %vm2123_vm0, %v2124_v6 }
  0x92   : > { %1819 = vmatmul.mubr.msk.f32.gmra.mrb[64].mxu0 %vm301_vm1, %v216_v9  ;;  %1990 = vmatmul.mubr.msk.f32.gmra.mrb[64].mxu1 %vm301_vm1, %v273_v10 }
  0x93   : > { %1821 = vmatprep.mubr.msk.f32.mxu0 %vm2123_vm0, %v2124_v6  ;;  %1992 = vmatprep.mubr.msk.f32.mxu1 %vm2123_vm0, %v2124_v6 }
  0x96   : > { %1822 = vmatmul.mubr.msk.f32.gmra.mrb[66].mxu0 %vm301_vm1, %v217_v11  ;;  %1993 = vmatmul.mubr.msk.f32.gmra.mrb[66].mxu1 %vm301_vm1, %v274_v12 }
  0x97   : > { %1824 = vmatprep.mubr.msk.f32.mxu0 %vm2123_vm0, %v2124_v6  ;;  %1995 = vmatprep.mubr.msk.f32.mxu1 %vm2123_vm0, %v2124_v6 }
  0x9a   : > { %1825 = vmatmul.mubr.msk.f32.gmra.mrb[68].mxu0 %vm301_vm1, %v218_v13  ;;  %1996 = vmatmul.mubr.msk.f32.gmra.mrb[68].mxu1 %vm301_vm1, %v275_v14 }
  0x9b   : > { %1827 = vmatprep.mubr.msk.f32.mxu0 %vm2123_vm0, %v2124_v6  ;;  %1998 = vmatprep.mubr.msk.f32.mxu1 %vm2123_vm0, %v2124_v6 }
  0x9e   : > { %1828 = vmatmul.mubr.msk.f32.gmra.mrb[70].mxu0 %vm301_vm1, %v219_v15  ;;  %1999 = vmatmul.mubr.msk.f32.gmra.mrb[70].mxu1 %vm301_vm1, %v276_v16 }
  0x9f   : > { %1830 = vmatprep.mubr.msk.f32.mxu0 %vm2123_vm0, %v2124_v6  ;;  %2001 = vmatprep.mubr.msk.f32.mxu1 %vm2123_vm0, %v2124_v6 }
  0xa2   : > { %1831 = vmatmul.mubr.msk.f32.gmra.mrb[72].mxu0 %vm301_vm1, %v220_v17  ;;  %2002 = vmatmul.mubr.msk.f32.gmra.mrb[72].mxu1 %vm301_vm1, %v277_v18 }
  0xa3   : > { %1833 = vmatprep.mubr.msk.f32.mxu0 %vm2123_vm0, %v2124_v6  ;;  %2004 = vmatprep.mubr.msk.f32.mxu1 %vm2123_vm0, %v2124_v6 }
  0xa6   : > { %1834 = vmatmul.mubr.msk.f32.gmra.mrb[74].mxu0 %vm301_vm1, %v221_v19  ;;  %2005 = vmatmul.mubr.msk.f32.gmra.mrb[74].mxu1 %vm301_vm1, %v278_v20 }
  0xa7   : > { %1836 = vmatprep.mubr.msk.f32.mxu0 %vm2123_vm0, %v2124_v6  ;;  %2007 = vmatprep.mubr.msk.f32.mxu1 %vm2123_vm0, %v2124_v6 }
  0xaa   : > { %1837 = vmatmul.mubr.msk.f32.gmra.mrb[76].mxu0 %vm301_vm1, %v222_v21  ;;  %2008 = vmatmul.mubr.msk.f32.gmra.mrb[76].mxu1 %vm301_vm1, %v279_v22 }
  0xab   : > { %1839 = vmatprep.mubr.msk.f32.mxu0 %vm2123_vm0, %v2124_v6  ;;  %2010 = vmatprep.mubr.msk.f32.mxu1 %vm2123_vm0, %v2124_v6 }
  0xae   : > { %1840 = vmatmul.mubr.msk.f32.gmra.mrb[78].mxu0 %vm301_vm1, %v223_v23  ;;  %2011 = vmatmul.mubr.msk.f32.gmra.mrb[78].mxu1 %vm301_vm1, %v280_v24 }
  0xaf   : > { %1842 = vmatprep.mubr.msk.f32.mxu0 %vm2123_vm0, %v2124_v6  ;;  %2013 = vmatprep.mubr.msk.f32.mxu1 %vm2123_vm0, %v2124_v6 }
  0xb2   : > { %1843 = vmatmul.mubr.msk.f32.gmra.mrb[80].mxu0 %vm301_vm1, %v224_v25  ;;  %2014 = vmatmul.mubr.msk.f32.gmra.mrb[80].mxu1 %vm301_vm1, %v281_v26 }
  0xb3   : > { %1845 = vmatprep.mubr.msk.f32.mxu0 %vm2123_vm0, %v2124_v6  ;;  %2016 = vmatprep.mubr.msk.f32.mxu1 %vm2123_vm0, %v2124_v6 }
  0xb6   : > { %1846 = vmatmul.mubr.msk.f32.gmra.mrb[82].mxu0 %vm301_vm1, %v225_v27  ;;  %2017 = vmatmul.mubr.msk.f32.gmra.mrb[82].mxu1 %vm301_vm1, %v282_v28 }
  0xb7   : > { %1848 = vmatprep.mubr.msk.f32.mxu0 %vm2123_vm0, %v2124_v6  ;;  %2019 = vmatprep.mubr.msk.f32.mxu1 %vm2123_vm0, %v2124_v6 }
  0xba   : > { %1849 = vmatmul.mubr.msk.f32.gmra.mrb[84].mxu0 %vm301_vm1, %v226_v29  ;;  %2020 = vmatmul.mubr.msk.f32.gmra.mrb[84].mxu1 %vm301_vm1, %v283_v30 }
  0xbb   : > { %1851 = vmatprep.mubr.msk.f32.mxu0 %vm2123_vm0, %v2124_v6  ;;  %2022 = vmatprep.mubr.msk.f32.mxu1 %vm2123_vm0, %v2124_v6 }
  0xbe   : > { %1852 = vmatmul.mubr.msk.f32.gmra.mrb[86].mxu0 %vm301_vm1, %v227_v31  ;;  %2023 = vmatmul.mubr.msk.f32.gmra.mrb[86].mxu1 %vm301_vm1, %v284_v32 }
  0xbf   : > { %1854 = vmatprep.mubr.msk.f32.mxu0 %vm2123_vm0, %v2124_v6  ;;  %2025 = vmatprep.mubr.msk.f32.mxu1 %vm2123_vm0, %v2124_v6 }
  0xc2   : > { %1855 = vmatmul.mubr.msk.f32.gmra.mrb[88].mxu0 %vm301_vm1, %v228_v33  ;;  %2026 = vmatmul.mubr.msk.f32.gmra.mrb[88].mxu1 %vm301_vm1, %v285_v34 }
  0xc3   : > { %1857 = vmatprep.mubr.msk.f32.mxu0 %vm2123_vm0, %v2124_v6  ;;  %2028 = vmatprep.mubr.msk.f32.mxu1 %vm2123_vm0, %v2124_v6 }
  0xc6   : > { %1858 = vmatmul.mubr.msk.f32.gmra.mrb[90].mxu0 %vm301_vm1, %v229_v35  ;;  %2029 = vmatmul.mubr.msk.f32.gmra.mrb[90].mxu1 %vm301_vm1, %v286_v36 }
  0xc7   : > { %1860 = vmatprep.mubr.msk.f32.mxu0 %vm2123_vm0, %v2124_v6  ;;  %2031 = vmatprep.mubr.msk.f32.mxu1 %vm2123_vm0, %v2124_v6 }
  0xca   : > { %1861 = vmatmul.mubr.msk.f32.gmra.mrb[92].mxu0 %vm301_vm1, %v230_v37  ;;  %2032 = vmatmul.mubr.msk.f32.gmra.mrb[92].mxu1 %vm301_vm1, %v287_v38 }
  0xcb   : > { %1863 = vmatprep.mubr.msk.f32.mxu0 %vm2123_vm0, %v2124_v6  ;;  %2034 = vmatprep.mubr.msk.f32.mxu1 %vm2123_vm0, %v2124_v6 }
  0xce   : > { %1864 = vmatmul.mubr.msk.f32.gmra.mrb[94].mxu0 %vm301_vm1, %v231_v39  ;;  %2035 = vmatmul.mubr.msk.f32.gmra.mrb[94].mxu1 %vm301_vm1, %v288_v40 }
  0xcf   : > { %1866 = vmatprep.mubr.msk.f32.mxu0 %vm2123_vm0, %v2124_v6  ;;  %2037 = vmatprep.mubr.msk.f32.mxu1 %vm2123_vm0, %v2124_v6 }
  0xd2   : > { %1867 = vmatmul.mubr.msk.f32.gmra.mrb[96].mxu0 %vm301_vm1, %v232_v41  ;;  %2038 = vmatmul.mubr.msk.f32.gmra.mrb[96].mxu1 %vm301_vm1, %v289_v42 }
  0xd3   : > { %1869 = vmatprep.mubr.msk.f32.mxu0 %vm2123_vm0, %v2124_v6  ;;  %2040 = vmatprep.mubr.msk.f32.mxu1 %vm2123_vm0, %v2124_v6 }
  0xd6   : > { %1870 = vmatmul.mubr.msk.f32.gmra.mrb[98].mxu0 %vm301_vm1, %v233_v43  ;;  %2041 = vmatmul.mubr.msk.f32.gmra.mrb[98].mxu1 %vm301_vm1, %v290_v44 }
  0xd7   : > { %1872 = vmatprep.mubr.msk.f32.mxu0 %vm2123_vm0, %v2124_v6  ;;  %2043 = vmatprep.mubr.msk.f32.mxu1 %vm2123_vm0, %v2124_v6 }
  0xda   : > { %1873 = vmatmul.mubr.msk.f32.gmra.mrb[100].mxu0 %vm301_vm1, %v234_v45  ;;  %2044 = vmatmul.mubr.msk.f32.gmra.mrb[100].mxu1 %vm301_vm1, %v291_v46 }
  0xdb   : > { %1875 = vmatprep.mubr.msk.f32.mxu0 %vm2123_vm0, %v2124_v6  ;;  %2046 = vmatprep.mubr.msk.f32.mxu1 %vm2123_vm0, %v2124_v6 }
  0xde   : > { %1876 = vmatmul.mubr.msk.f32.gmra.mrb[102].mxu0 %vm301_vm1, %v235_v47  ;;  %2047 = vmatmul.mubr.msk.f32.gmra.mrb[102].mxu1 %vm301_vm1, %v292_v48 }
  0xdf   : > { %1878 = vmatprep.mubr.msk.f32.mxu0 %vm2123_vm0, %v2124_v6  ;;  %2049 = vmatprep.mubr.msk.f32.mxu1 %vm2123_vm0, %v2124_v6 }
  0xe2   : > { %1879 = vmatmul.mubr.msk.f32.gmra.mrb[104].mxu0 %vm301_vm1, %v236_v49  ;;  %2050 = vmatmul.mubr.msk.f32.gmra.mrb[104].mxu1 %vm301_vm1, %v293_v50 }
  0xe3   : > { %1881 = vmatprep.mubr.msk.f32.mxu0 %vm2123_vm0, %v2124_v6  ;;  %2052 = vmatprep.mubr.msk.f32.mxu1 %vm2123_vm0, %v2124_v6 }
  0xe5   : > { %v707_v53 = vpop.f32.mrb[0].mxu0  ;;  %v992_v54 = vpop.f32.mrb[0].mxu1 }
  0xe6   : > { %1271 = vst [vmem:[%s2612_s28] sm:$0xff] %v707_v53  ;;  %v1724_v55 = vpop.f32.mrb[1].mxu0  ;;  %1882 = vmatmul.mubr.msk.f32.gmra.mrb[106].mxu0 %vm301_vm1, %v237_v51  ;;  %1328 = vst [vmem:[%s2612_s28 + $0x1c8] sm:$0xff] %v992_v54  ;;  %v1895_v56 = vpop.f32.mrb[1].mxu1  ;;  %2053 = vmatmul.mubr.msk.f32.gmra.mrb[106].mxu1 %vm301_vm1, %v294_v52 }
  0xe7   : > { %1884 = vmatprep.mubr.msk.f32.mxu0 %vm2123_vm0, %v2124_v6  ;;  %2055 = vmatprep.mubr.msk.f32.mxu1 %vm2123_vm0, %v2124_v6 }
  0xe9   : > { %v712_v59 = vpop.f32.mrb[2].mxu0  ;;  %v997_v60 = vpop.f32.mrb[2].mxu1 }
  0xea   : > { %1272 = vst [vmem:[%s2612_s28 + $0x8] sm:$0xff] %v712_v59  ;;  %v1727_v61 = vpop.f32.mrb[3].mxu0  ;;  %1885 = vmatmul.mubr.msk.f32.gmra.mrb[108].mxu0 %vm301_vm1, %v238_v57  ;;  %1329 = vst [vmem:[%s2612_s28 + $0x1d0] sm:$0xff] %v997_v60  ;;  %v1898_v62 = vpop.f32.mrb[3].mxu1  ;;  %2056 = vmatmul.mubr.msk.f32.gmra.mrb[108].mxu1 %vm301_vm1, %v295_v58 }
  0xeb   : > { %1887 = vmatprep.mubr.msk.f32.mxu0 %vm2123_vm0, %v2124_v6  ;;  %2058 = vmatprep.mubr.msk.f32.mxu1 %vm2123_vm0, %v2124_v6 }
  0xed   : > { %v717_v1 = vpop.f32.mrb[4].mxu0  ;;  %v1002_v2 = vpop.f32.mrb[4].mxu1 }
  0xee   : > { %1273 = vst [vmem:[%s2612_s28 + $0x10] sm:$0xff] %v717_v1  ;;  %v1730_v3 = vpop.f32.mrb[5].mxu0  ;;  %1888 = vmatmul.mubr.msk.f32.gmra.mrb[110].mxu0 %vm301_vm1, %v239_v63  ;;  %1330 = vst [vmem:[%s2612_s28 + $0x1d8] sm:$0xff] %v1002_v2  ;;  %v1901_v4 = vpop.f32.mrb[5].mxu1  ;;  %2059 = vmatmul.mubr.msk.f32.gmra.mrb[110].mxu1 %vm301_vm1, %v296_v0 }
  0xef   : > { %1890 = vmatprep.mubr.msk.f32.mxu0 %vm2123_vm0, %v2124_v6 }
  0xf1   : > { %v722_v7 = vpop.f32.mrb[6].mxu0  ;;  %v1007_v8 = vpop.f32.mrb[6].mxu1 }
  0xf2   : > { %1274 = vst [vmem:[%s2612_s28 + $0x18] sm:$0xff] %v722_v7  ;;  %v1733_v9 = vpop.f32.mrb[7].mxu0  ;;  %1891 = vmatmul.mubr.msk.f32.gmra.mrb[112].mxu0 %vm301_vm1, %v240_v5  ;;  %1331 = vst [vmem:[%s2612_s28 + $0x1e0] sm:$0xff] %v1007_v8  ;;  %v1904_v10 = vpop.f32.mrb[7].mxu1 }
  0xf5   : > { %v727_v11 = vpop.f32.mrb[8].mxu0  ;;  %v1012_v12 = vpop.f32.mrb[8].mxu1 }
  0xf6   : > { %1275 = vst [vmem:[%s2612_s28 + $0x20] sm:$0xff] %v727_v11  ;;  %v1736_v13 = vpop.f32.mrb[9].mxu0  ;;  %1332 = vst [vmem:[%s2612_s28 + $0x1e8] sm:$0xff] %v1012_v12  ;;  %v1907_v6 = vpop.f32.mrb[9].mxu1 }
  0xf9   : > { %v732_v14 = vpop.f32.mrb[10].mxu0  ;;  %v1017_v15 = vpop.f32.mrb[10].mxu1 }
  0xfa   : > { %1276 = vst [vmem:[%s2612_s28 + $0x28] sm:$0xff] %v732_v14  ;;  %v1739_v16 = vpop.f32.mrb[11].mxu0  ;;  %1333 = vst [vmem:[%s2612_s28 + $0x1f0] sm:$0xff] %v1017_v15  ;;  %v1910_v17 = vpop.f32.mrb[11].mxu1 }
  0xfd   : > { %v737_v18 = vpop.f32.mrb[12].mxu0  ;;  %v1022_v19 = vpop.f32.mrb[12].mxu1 }
  0xfe   : > { %1277 = vst [vmem:[%s2612_s28 + $0x30] sm:$0xff] %v737_v18  ;;  %v1742_v20 = vpop.f32.mrb[13].mxu0  ;;  %1334 = vst [vmem:[%s2612_s28 + $0x1f8] sm:$0xff] %v1022_v19  ;;  %v1913_v21 = vpop.f32.mrb[13].mxu1 }
 0x101   : > { %v742_v22 = vpop.f32.mrb[14].mxu0  ;;  %v1027_v23 = vpop.f32.mrb[14].mxu1 }
 0x102   : > { %1278 = vst [vmem:[%s2612_s28 + $0x38] sm:$0xff] %v742_v22  ;;  %v1745_v24 = vpop.f32.mrb[15].mxu0  ;;  %1335 = vst [vmem:[%s2612_s28 + $0x200] sm:$0xff] %v1027_v23  ;;  %v1916_v25 = vpop.f32.mrb[15].mxu1 }
 0x105   : > { %v747_v26 = vpop.f32.mrb[16].mxu0  ;;  %v1032_v27 = vpop.f32.mrb[16].mxu1 }
 0x106   : > { %1279 = vst [vmem:[%s2612_s28 + $0x40] sm:$0xff] %v747_v26  ;;  %v1748_v28 = vpop.f32.mrb[17].mxu0  ;;  %1336 = vst [vmem:[%s2612_s28 + $0x208] sm:$0xff] %v1032_v27  ;;  %v1919_v29 = vpop.f32.mrb[17].mxu1 }
 0x109   : > { %v752_v30 = vpop.f32.mrb[18].mxu0  ;;  %v1037_v31 = vpop.f32.mrb[18].mxu1 }
 0x10a   : > { %1280 = vst [vmem:[%s2612_s28 + $0x48] sm:$0xff] %v752_v30  ;;  %v1751_v32 = vpop.f32.mrb[19].mxu0  ;;  %1337 = vst [vmem:[%s2612_s28 + $0x210] sm:$0xff] %v1037_v31  ;;  %v1922_v33 = vpop.f32.mrb[19].mxu1 }
 0x10d   : > { %v757_v34 = vpop.f32.mrb[20].mxu0  ;;  %v1042_v35 = vpop.f32.mrb[20].mxu1 }
 0x10e   : > { %1281 = vst [vmem:[%s2612_s28 + $0x50] sm:$0xff] %v757_v34  ;;  %v1754_v36 = vpop.f32.mrb[21].mxu0  ;;  %1338 = vst [vmem:[%s2612_s28 + $0x218] sm:$0xff] %v1042_v35  ;;  %v1925_v37 = vpop.f32.mrb[21].mxu1 }
 0x111   : > { %v762_v38 = vpop.f32.mrb[22].mxu0  ;;  %v1047_v39 = vpop.f32.mrb[22].mxu1 }
 0x112   : > { %1282 = vst [vmem:[%s2612_s28 + $0x58] sm:$0xff] %v762_v38  ;;  %v1757_v40 = vpop.f32.mrb[23].mxu0  ;;  %1339 = vst [vmem:[%s2612_s28 + $0x220] sm:$0xff] %v1047_v39  ;;  %v1928_v41 = vpop.f32.mrb[23].mxu1 }
 0x115   : > { %v767_v42 = vpop.f32.mrb[24].mxu0  ;;  %v1052_v43 = vpop.f32.mrb[24].mxu1 }
 0x116   : > { %1283 = vst [vmem:[%s2612_s28 + $0x60] sm:$0xff] %v767_v42  ;;  %v1760_v44 = vpop.f32.mrb[25].mxu0  ;;  %1340 = vst [vmem:[%s2612_s28 + $0x228] sm:$0xff] %v1052_v43  ;;  %v1931_v45 = vpop.f32.mrb[25].mxu1 }
 0x119   : > { %v772_v46 = vpop.f32.mrb[26].mxu0  ;;  %v1057_v47 = vpop.f32.mrb[26].mxu1 }
 0x11a   : > { %1284 = vst [vmem:[%s2612_s28 + $0x68] sm:$0xff] %v772_v46  ;;  %v1763_v48 = vpop.f32.mrb[27].mxu0  ;;  %1341 = vst [vmem:[%s2612_s28 + $0x230] sm:$0xff] %v1057_v47  ;;  %v1934_v49 = vpop.f32.mrb[27].mxu1 }
 0x11d   : > { %v777_v50 = vpop.f32.mrb[28].mxu0  ;;  %v1062_v51 = vpop.f32.mrb[28].mxu1 }
 0x11e   : > { %1285 = vst [vmem:[%s2612_s28 + $0x70] sm:$0xff] %v777_v50  ;;  %v1766_v52 = vpop.f32.mrb[29].mxu0  ;;  %1342 = vst [vmem:[%s2612_s28 + $0x238] sm:$0xff] %v1062_v51  ;;  %v1937_v53 = vpop.f32.mrb[29].mxu1 }
 0x121   : > { %v782_v54 = vpop.f32.mrb[30].mxu0  ;;  %v1067_v55 = vpop.f32.mrb[30].mxu1 }
 0x122   : > { %1286 = vst [vmem:[%s2612_s28 + $0x78] sm:$0xff] %v782_v54  ;;  %v1769_v56 = vpop.f32.mrb[31].mxu0  ;;  %1343 = vst [vmem:[%s2612_s28 + $0x240] sm:$0xff] %v1067_v55  ;;  %v1940_v57 = vpop.f32.mrb[31].mxu1 }
 0x125   : > { %v787_v58 = vpop.f32.mrb[32].mxu0  ;;  %v1072_v59 = vpop.f32.mrb[32].mxu1 }
 0x126   : > { %1287 = vst [vmem:[%s2612_s28 + $0x80] sm:$0xff] %v787_v58  ;;  %v1772_v60 = vpop.f32.mrb[33].mxu0  ;;  %1344 = vst [vmem:[%s2612_s28 + $0x248] sm:$0xff] %v1072_v59  ;;  %v1943_v61 = vpop.f32.mrb[33].mxu1 }
 0x129   : > { %v792_v62 = vpop.f32.mrb[34].mxu0  ;;  %v1077_v63 = vpop.f32.mrb[34].mxu1 }
 0x12a   : > { %1288 = vst [vmem:[%s2612_s28 + $0x88] sm:$0xff] %v792_v62  ;;  %v1775_v0 = vpop.f32.mrb[35].mxu0  ;;  %1345 = vst [vmem:[%s2612_s28 + $0x250] sm:$0xff] %v1077_v63  ;;  %v1946_v1 = vpop.f32.mrb[35].mxu1 }
 0x12d   : > { %v797_v2 = vpop.f32.mrb[36].mxu0  ;;  %v1082_v3 = vpop.f32.mrb[36].mxu1 }
 0x12e   : > { %1289 = vst [vmem:[%s2612_s28 + $0x90] sm:$0xff] %v797_v2  ;;  %v1778_v4 = vpop.f32.mrb[37].mxu0  ;;  %1346 = vst [vmem:[%s2612_s28 + $0x258] sm:$0xff] %v1082_v3  ;;  %v1949_v5 = vpop.f32.mrb[37].mxu1 }
 0x131   : > { %v802_v7 = vpop.f32.mrb[38].mxu0  ;;  %v1087_v8 = vpop.f32.mrb[38].mxu1 }
 0x132   : > { %1290 = vst [vmem:[%s2612_s28 + $0x98] sm:$0xff] %v802_v7  ;;  %v1781_v9 = vpop.f32.mrb[39].mxu0  ;;  %1347 = vst [vmem:[%s2612_s28 + $0x260] sm:$0xff] %v1087_v8  ;;  %v1952_v10 = vpop.f32.mrb[39].mxu1 }
 0x135   : > { %v807_v11 = vpop.f32.mrb[40].mxu0  ;;  %v1092_v12 = vpop.f32.mrb[40].mxu1 }
 0x136   : > { %1291 = vst [vmem:[%s2612_s28 + $0xa0] sm:$0xff] %v807_v11  ;;  %v1784_v13 = vpop.f32.mrb[41].mxu0  ;;  %1348 = vst [vmem:[%s2612_s28 + $0x268] sm:$0xff] %v1092_v12  ;;  %v1955_v6 = vpop.f32.mrb[41].mxu1 }
 0x139   : > { %v812_v14 = vpop.f32.mrb[42].mxu0  ;;  %v1097_v15 = vpop.f32.mrb[42].mxu1 }
 0x13a   : > { %1292 = vst [vmem:[%s2612_s28 + $0xa8] sm:$0xff] %v812_v14  ;;  %v1787_v16 = vpop.f32.mrb[43].mxu0  ;;  %1349 = vst [vmem:[%s2612_s28 + $0x270] sm:$0xff] %v1097_v15  ;;  %v1958_v17 = vpop.f32.mrb[43].mxu1 }
 0x13d   : > { %v817_v18 = vpop.f32.mrb[44].mxu0  ;;  %v1102_v19 = vpop.f32.mrb[44].mxu1 }
 0x13e   : > { %1293 = vst [vmem:[%s2612_s28 + $0xb0] sm:$0xff] %v817_v18  ;;  %v1790_v20 = vpop.f32.mrb[45].mxu0  ;;  %1350 = vst [vmem:[%s2612_s28 + $0x278] sm:$0xff] %v1102_v19  ;;  %v1961_v21 = vpop.f32.mrb[45].mxu1 }
 0x141   : > { %v822_v22 = vpop.f32.mrb[46].mxu0  ;;  %v1107_v23 = vpop.f32.mrb[46].mxu1 }
 0x142   : > { %1294 = vst [vmem:[%s2612_s28 + $0xb8] sm:$0xff] %v822_v22  ;;  %v1793_v24 = vpop.f32.mrb[47].mxu0  ;;  %1351 = vst [vmem:[%s2612_s28 + $0x280] sm:$0xff] %v1107_v23  ;;  %v1964_v25 = vpop.f32.mrb[47].mxu1 }
 0x145   : > { %v827_v26 = vpop.f32.mrb[48].mxu0  ;;  %v1112_v27 = vpop.f32.mrb[48].mxu1 }
 0x146   : > { %1295 = vst [vmem:[%s2612_s28 + $0xc0] sm:$0xff] %v827_v26  ;;  %v1796_v28 = vpop.f32.mrb[49].mxu0  ;;  %1352 = vst [vmem:[%s2612_s28 + $0x288] sm:$0xff] %v1112_v27  ;;  %v1967_v29 = vpop.f32.mrb[49].mxu1 }
 0x149   : > { %v832_v30 = vpop.f32.mrb[50].mxu0  ;;  %v1117_v31 = vpop.f32.mrb[50].mxu1 }
 0x14a   : > { %1296 = vst [vmem:[%s2612_s28 + $0xc8] sm:$0xff] %v832_v30  ;;  %v1799_v32 = vpop.f32.mrb[51].mxu0  ;;  %1353 = vst [vmem:[%s2612_s28 + $0x290] sm:$0xff] %v1117_v31  ;;  %v1970_v33 = vpop.f32.mrb[51].mxu1 }
 0x14d   : > { %v837_v34 = vpop.f32.mrb[52].mxu0  ;;  %v1122_v35 = vpop.f32.mrb[52].mxu1 }
 0x14e   : > { %1297 = vst [vmem:[%s2612_s28 + $0xd0] sm:$0xff] %v837_v34  ;;  %v1802_v36 = vpop.f32.mrb[53].mxu0  ;;  %1354 = vst [vmem:[%s2612_s28 + $0x298] sm:$0xff] %v1122_v35  ;;  %v1973_v37 = vpop.f32.mrb[53].mxu1 }
 0x151   : > { %v842_v38 = vpop.f32.mrb[54].mxu0  ;;  %v1127_v39 = vpop.f32.mrb[54].mxu1 }
 0x152   : > { %1298 = vst [vmem:[%s2612_s28 + $0xd8] sm:$0xff] %v842_v38  ;;  %v1805_v40 = vpop.f32.mrb[55].mxu0  ;;  %1355 = vst [vmem:[%s2612_s28 + $0x2a0] sm:$0xff] %v1127_v39  ;;  %v1976_v41 = vpop.f32.mrb[55].mxu1 }
 0x155   : > { %v847_v42 = vpop.f32.mrb[56].mxu0  ;;  %v1132_v43 = vpop.f32.mrb[56].mxu1 }
 0x156   : > { %1299 = vst [vmem:[%s2612_s28 + $0xe0] sm:$0xff] %v847_v42  ;;  %v1808_v44 = vpop.f32.mrb[57].mxu0  ;;  %1356 = vst [vmem:[%s2612_s28 + $0x2a8] sm:$0xff] %v1132_v43  ;;  %v1979_v45 = vpop.f32.mrb[57].mxu1 }
 0x159   : > { %v852_v46 = vpop.f32.mrb[58].mxu0  ;;  %v1137_v47 = vpop.f32.mrb[58].mxu1 }
 0x15a   : > { %1300 = vst [vmem:[%s2612_s28 + $0xe8] sm:$0xff] %v852_v46  ;;  %v1811_v48 = vpop.f32.mrb[59].mxu0  ;;  %1357 = vst [vmem:[%s2612_s28 + $0x2b0] sm:$0xff] %v1137_v47  ;;  %v1982_v49 = vpop.f32.mrb[59].mxu1 }
 0x15d   : > { %v857_v50 = vpop.f32.mrb[60].mxu0  ;;  %v1142_v51 = vpop.f32.mrb[60].mxu1 }
 0x15e   : > { %1301 = vst [vmem:[%s2612_s28 + $0xf0] sm:$0xff] %v857_v50  ;;  %v1814_v52 = vpop.f32.mrb[61].mxu0  ;;  %1358 = vst [vmem:[%s2612_s28 + $0x2b8] sm:$0xff] %v1142_v51  ;;  %v1985_v53 = vpop.f32.mrb[61].mxu1 }
 0x161   : > { %v862_v54 = vpop.f32.mrb[62].mxu0  ;;  %v1147_v55 = vpop.f32.mrb[62].mxu1 }
 0x162   : > { %1302 = vst [vmem:[%s2612_s28 + $0xf8] sm:$0xff] %v862_v54  ;;  %v1817_v56 = vpop.f32.mrb[63].mxu0  ;;  %1359 = vst [vmem:[%s2612_s28 + $0x2c0] sm:$0xff] %v1147_v55  ;;  %v1988_v57 = vpop.f32.mrb[63].mxu1 }
 0x165   : > { %v867_v58 = vpop.f32.mrb[64].mxu0  ;;  %v1152_v59 = vpop.f32.mrb[64].mxu1 }
 0x166   : > { %1303 = vst [vmem:[%s2612_s28 + $0x100] sm:$0xff] %v867_v58  ;;  %v1820_v60 = vpop.f32.mrb[65].mxu0  ;;  %1360 = vst [vmem:[%s2612_s28 + $0x2c8] sm:$0xff] %v1152_v59  ;;  %v1991_v61 = vpop.f32.mrb[65].mxu1 }
 0x169   : > { %v872_v62 = vpop.f32.mrb[66].mxu0  ;;  %v1157_v63 = vpop.f32.mrb[66].mxu1 }
 0x16a   : > { %1304 = vst [vmem:[%s2612_s28 + $0x108] sm:$0xff] %v872_v62  ;;  %v1823_v0 = vpop.f32.mrb[67].mxu0  ;;  %1361 = vst [vmem:[%s2612_s28 + $0x2d0] sm:$0xff] %v1157_v63  ;;  %v1994_v1 = vpop.f32.mrb[67].mxu1 }
 0x16d   : > { %v877_v2 = vpop.f32.mrb[68].mxu0  ;;  %v1162_v3 = vpop.f32.mrb[68].mxu1 }
 0x16e   : > { %1305 = vst [vmem:[%s2612_s28 + $0x110] sm:$0xff] %v877_v2  ;;  %v1826_v4 = vpop.f32.mrb[69].mxu0  ;;  %1362 = vst [vmem:[%s2612_s28 + $0x2d8] sm:$0xff] %v1162_v3  ;;  %v1997_v5 = vpop.f32.mrb[69].mxu1 }
 0x171   : > { %v882_v7 = vpop.f32.mrb[70].mxu0  ;;  %v1167_v8 = vpop.f32.mrb[70].mxu1 }
 0x172   : > { %1306 = vst [vmem:[%s2612_s28 + $0x118] sm:$0xff] %v882_v7  ;;  %v1829_v9 = vpop.f32.mrb[71].mxu0  ;;  %1363 = vst [vmem:[%s2612_s28 + $0x2e0] sm:$0xff] %v1167_v8  ;;  %v2000_v10 = vpop.f32.mrb[71].mxu1 }
 0x175   : > { %v887_v11 = vpop.f32.mrb[72].mxu0  ;;  %v1172_v12 = vpop.f32.mrb[72].mxu1 }
 0x176   : > { %1307 = vst [vmem:[%s2612_s28 + $0x120] sm:$0xff] %v887_v11  ;;  %v1832_v13 = vpop.f32.mrb[73].mxu0  ;;  %1364 = vst [vmem:[%s2612_s28 + $0x2e8] sm:$0xff] %v1172_v12  ;;  %v2003_v6 = vpop.f32.mrb[73].mxu1 }
 0x179   : > { %v892_v14 = vpop.f32.mrb[74].mxu0  ;;  %v1177_v15 = vpop.f32.mrb[74].mxu1 }
 0x17a   : > { %1308 = vst [vmem:[%s2612_s28 + $0x128] sm:$0xff] %v892_v14  ;;  %v1835_v16 = vpop.f32.mrb[75].mxu0  ;;  %1365 = vst [vmem:[%s2612_s28 + $0x2f0] sm:$0xff] %v1177_v15  ;;  %v2006_v17 = vpop.f32.mrb[75].mxu1 }
 0x17d   : > { %v897_v18 = vpop.f32.mrb[76].mxu0  ;;  %v1182_v19 = vpop.f32.mrb[76].mxu1 }
 0x17e   : > { %1309 = vst [vmem:[%s2612_s28 + $0x130] sm:$0xff] %v897_v18  ;;  %v1838_v20 = vpop.f32.mrb[77].mxu0  ;;  %1366 = vst [vmem:[%s2612_s28 + $0x2f8] sm:$0xff] %v1182_v19  ;;  %v2009_v21 = vpop.f32.mrb[77].mxu1 }
 0x181   : > { %v902_v22 = vpop.f32.mrb[78].mxu0  ;;  %v1187_v23 = vpop.f32.mrb[78].mxu1 }
 0x182   : > { %1310 = vst [vmem:[%s2612_s28 + $0x138] sm:$0xff] %v902_v22  ;;  %v1841_v24 = vpop.f32.mrb[79].mxu0  ;;  %1367 = vst [vmem:[%s2612_s28 + $0x300] sm:$0xff] %v1187_v23  ;;  %v2012_v25 = vpop.f32.mrb[79].mxu1 }
 0x185   : > { %v907_v26 = vpop.f32.mrb[80].mxu0  ;;  %v1192_v27 = vpop.f32.mrb[80].mxu1 }
 0x186   : > { %1311 = vst [vmem:[%s2612_s28 + $0x140] sm:$0xff] %v907_v26  ;;  %v1844_v28 = vpop.f32.mrb[81].mxu0  ;;  %1368 = vst [vmem:[%s2612_s28 + $0x308] sm:$0xff] %v1192_v27  ;;  %v2015_v29 = vpop.f32.mrb[81].mxu1 }
 0x189   : > { %v912_v30 = vpop.f32.mrb[82].mxu0  ;;  %v1197_v31 = vpop.f32.mrb[82].mxu1 }
 0x18a   : > { %1312 = vst [vmem:[%s2612_s28 + $0x148] sm:$0xff] %v912_v30  ;;  %v1847_v32 = vpop.f32.mrb[83].mxu0  ;;  %1369 = vst [vmem:[%s2612_s28 + $0x310] sm:$0xff] %v1197_v31  ;;  %v2018_v33 = vpop.f32.mrb[83].mxu1 }
 0x18d   : > { %v917_v34 = vpop.f32.mrb[84].mxu0  ;;  %v1202_v35 = vpop.f32.mrb[84].mxu1 }
 0x18e   : > { %1313 = vst [vmem:[%s2612_s28 + $0x150] sm:$0xff] %v917_v34  ;;  %v1850_v36 = vpop.f32.mrb[85].mxu0  ;;  %1370 = vst [vmem:[%s2612_s28 + $0x318] sm:$0xff] %v1202_v35  ;;  %v2021_v37 = vpop.f32.mrb[85].mxu1 }
 0x191   : > { %v922_v38 = vpop.f32.mrb[86].mxu0  ;;  %v1207_v39 = vpop.f32.mrb[86].mxu1 }
 0x192   : > { %1314 = vst [vmem:[%s2612_s28 + $0x158] sm:$0xff] %v922_v38  ;;  %v1853_v40 = vpop.f32.mrb[87].mxu0  ;;  %1371 = vst [vmem:[%s2612_s28 + $0x320] sm:$0xff] %v1207_v39  ;;  %v2024_v41 = vpop.f32.mrb[87].mxu1 }
 0x195   : > { %v927_v42 = vpop.f32.mrb[88].mxu0  ;;  %v1212_v43 = vpop.f32.mrb[88].mxu1 }
 0x196   : > { %1315 = vst [vmem:[%s2612_s28 + $0x160] sm:$0xff] %v927_v42  ;;  %v1856_v44 = vpop.f32.mrb[89].mxu0  ;;  %1372 = vst [vmem:[%s2612_s28 + $0x328] sm:$0xff] %v1212_v43  ;;  %v2027_v45 = vpop.f32.mrb[89].mxu1 }
 0x199   : > { %v932_v46 = vpop.f32.mrb[90].mxu0  ;;  %v1217_v47 = vpop.f32.mrb[90].mxu1 }
 0x19a   : > { %1316 = vst [vmem:[%s2612_s28 + $0x168] sm:$0xff] %v932_v46  ;;  %v1859_v48 = vpop.f32.mrb[91].mxu0  ;;  %1373 = vst [vmem:[%s2612_s28 + $0x330] sm:$0xff] %v1217_v47  ;;  %v2030_v49 = vpop.f32.mrb[91].mxu1 }
 0x19d   : > { %v937_v50 = vpop.f32.mrb[92].mxu0  ;;  %v1222_v51 = vpop.f32.mrb[92].mxu1 }
 0x19e   : > { %1317 = vst [vmem:[%s2612_s28 + $0x170] sm:$0xff] %v937_v50  ;;  %v1862_v52 = vpop.f32.mrb[93].mxu0  ;;  %1374 = vst [vmem:[%s2612_s28 + $0x338] sm:$0xff] %v1222_v51  ;;  %v2033_v53 = vpop.f32.mrb[93].mxu1 }
 0x1a1   : > { %v942_v54 = vpop.f32.mrb[94].mxu0  ;;  %v1227_v55 = vpop.f32.mrb[94].mxu1 }
 0x1a2   : > { %1318 = vst [vmem:[%s2612_s28 + $0x178] sm:$0xff] %v942_v54  ;;  %v1865_v56 = vpop.f32.mrb[95].mxu0  ;;  %1375 = vst [vmem:[%s2612_s28 + $0x340] sm:$0xff] %v1227_v55  ;;  %v2036_v57 = vpop.f32.mrb[95].mxu1 }
 0x1a5   : > { %v947_v58 = vpop.f32.mrb[96].mxu0  ;;  %v1232_v59 = vpop.f32.mrb[96].mxu1 }
 0x1a6   : > { %1319 = vst [vmem:[%s2612_s28 + $0x180] sm:$0xff] %v947_v58  ;;  %v1868_v60 = vpop.f32.mrb[97].mxu0  ;;  %1376 = vst [vmem:[%s2612_s28 + $0x348] sm:$0xff] %v1232_v59  ;;  %v2039_v61 = vpop.f32.mrb[97].mxu1 }
 0x1a9   : > { %v952_v62 = vpop.f32.mrb[98].mxu0  ;;  %v1237_v63 = vpop.f32.mrb[98].mxu1 }
 0x1aa   : > { %1320 = vst [vmem:[%s2612_s28 + $0x188] sm:$0xff] %v952_v62  ;;  %v1871_v0 = vpop.f32.mrb[99].mxu0  ;;  %1377 = vst [vmem:[%s2612_s28 + $0x350] sm:$0xff] %v1237_v63  ;;  %v2042_v1 = vpop.f32.mrb[99].mxu1 }
 0x1ad   : > { %v957_v2 = vpop.f32.mrb[100].mxu0  ;;  %v1242_v3 = vpop.f32.mrb[100].mxu1 }
 0x1ae   : > { %1321 = vst [vmem:[%s2612_s28 + $0x190] sm:$0xff] %v957_v2  ;;  %v1874_v4 = vpop.f32.mrb[101].mxu0  ;;  %1378 = vst [vmem:[%s2612_s28 + $0x358] sm:$0xff] %v1242_v3  ;;  %v2045_v5 = vpop.f32.mrb[101].mxu1 }
 0x1b1   : > { %v962_v7 = vpop.f32.mrb[102].mxu0  ;;  %v1247_v8 = vpop.f32.mrb[102].mxu1 }
 0x1b2   : > { %1322 = vst [vmem:[%s2612_s28 + $0x198] sm:$0xff] %v962_v7  ;;  %v1877_v9 = vpop.f32.mrb[103].mxu0  ;;  %1379 = vst [vmem:[%s2612_s28 + $0x360] sm:$0xff] %v1247_v8  ;;  %v2048_v10 = vpop.f32.mrb[103].mxu1 }
 0x1b5   : > { %v967_v11 = vpop.f32.mrb[104].mxu0  ;;  %v1252_v12 = vpop.f32.mrb[104].mxu1 }
 0x1b6   : > { %1323 = vst [vmem:[%s2612_s28 + $0x1a0] sm:$0xff] %v967_v11  ;;  %v1880_v13 = vpop.f32.mrb[105].mxu0  ;;  %1380 = vst [vmem:[%s2612_s28 + $0x368] sm:$0xff] %v1252_v12  ;;  %v2051_v6 = vpop.f32.mrb[105].mxu1 }
 0x1b9   : > { %v972_v14 = vpop.f32.mrb[106].mxu0  ;;  %v1257_v15 = vpop.f32.mrb[106].mxu1 }
 0x1ba   : > { %1324 = vst [vmem:[%s2612_s28 + $0x1a8] sm:$0xff] %v972_v14  ;;  %v1883_v16 = vpop.f32.mrb[107].mxu0  ;;  %1381 = vst [vmem:[%s2612_s28 + $0x370] sm:$0xff] %v1257_v15  ;;  %v2054_v17 = vpop.f32.mrb[107].mxu1 }
 0x1bd   : > { %v977_v18 = vpop.f32.mrb[108].mxu0  ;;  %v1262_v19 = vpop.f32.mrb[108].mxu1 }
 0x1be   : > { %1325 = vst [vmem:[%s2612_s28 + $0x1b0] sm:$0xff] %v977_v18  ;;  %v1886_v20 = vpop.f32.mrb[109].mxu0  ;;  %1382 = vst [vmem:[%s2612_s28 + $0x378] sm:$0xff] %v1262_v19  ;;  %v2057_v21 = vpop.f32.mrb[109].mxu1 }
 0x1c1   : > { %v982_v22 = vpop.f32.mrb[110].mxu0  ;;  %v1267_v23 = vpop.f32.mrb[110].mxu1 }
 0x1c2   : > { %1326 = vst [vmem:[%s2612_s28 + $0x1b8] sm:$0xff] %v982_v22  ;;  %v1889_v24 = vpop.f32.mrb[111].mxu0  ;;  %1383 = vst [vmem:[%s2612_s28 + $0x380] sm:$0xff] %v1267_v23  ;;  %v2060_v25 = vpop.f32.mrb[111].mxu1 }
 0x1c5   : > { %v987_v26 = vpop.f32.mrb[112].mxu0 }
 0x1c6   : > { %1327 = vst [vmem:[%s2612_s28 + $0x1c0] sm:$0xff] %v987_v26  ;;  %v1892_v27 = vpop.f32.mrb[113].mxu0 }
 0x1c7 PF: > { %s12_s11 = sadd.s32 1, %s2120_s11   ;;  %s2767_s9 = smov %s2116_s10 }
 0x1c8   : > { %p9_p5 = scmp.ge.s32.totalorder %s12_s11, 4   ;;  %s2768_s10 = smov %s2770_s12 }
 0x1ca   :  { %11 = sbr.rel (!%p9_p5) target bundleno = 2 (0x2), region = 61 }

</bundles_post_ra>
